<compile_context>
chip_gen: v6e
topology: v6e:2x2x1
jax: 0.10.0
libtpu: 0.0.40
codegen_flags: <defaults>
</compile_context>

<pallas_src>
import functools
import math

import jax
import jax.numpy as jnp
from jax.experimental import pallas as pl
from jax.experimental.pallas import tpu as pltpu

_LANE = 128
# Conservative pipelined-block budget (double-buffered) -- fits v7x (64 MiB
# physical / 32 MiB scoped default) as well as v5e/v6e.
_VMEM_BUDGET_BYTES = 20 * 1024 * 1024
_VMEM_LIMIT_BYTES = 32 * 1024 * 1024


def _ceil_to(n, m):
    return ((n + m - 1) // m) * m


def _gelu_tanh(y):
    # tanh-approximate GELU (see TODO above).  Kept in f32 (works on v5e
    # VPU/EUP which have no bf16 paths).
    c = math.sqrt(2.0 / math.pi)
    return 0.5 * y * (1.0 + jnp.tanh(c * (y + 0.044715 * y * y * y)))


# ----------------------------------------------------------------------------
# Pallas kernels
# ----------------------------------------------------------------------------
def _linear_kernel(x_ref, w_ref, b_ref, o_ref, *, apply_gelu):
    # x: (tn, Cin), w: (Cin, Cout), b: (1, Cout)  -- bf16 MXU, f32 epilogue
    x = x_ref[...].astype(jnp.bfloat16)
    w = w_ref[...].astype(jnp.bfloat16)
    y = jnp.dot(x, w, preferred_element_type=jnp.float32) + b_ref[...]
    if apply_gelu:
        y = _gelu_tanh(y)
    o_ref[...] = y.astype(o_ref.dtype)


def _fno_layer_kernel(x_ref, w_ref, b_ref, spec_ref, o_ref, *, apply_gelu):
    # fused:  out = act( spectral_conv(x) + conv1d_1x1(x) )
    x = x_ref[...].astype(jnp.bfloat16)
    w = w_ref[...].astype(jnp.bfloat16)
    y = jnp.dot(x, w, preferred_element_type=jnp.float32)
    y = y + b_ref[...] + spec_ref[...]
    if apply_gelu:
        y = _gelu_tanh(y)
    o_ref[...] = y.astype(o_ref.dtype)


def _head_kernel(x_ref, w1_ref, b1_ref, w2_ref, b2_ref, o_ref):
    # fused fc1 + GELU + fc2; fc1 activation never leaves VMEM/vregs.
    x = x_ref[...].astype(jnp.bfloat16)
    h = jnp.dot(x, w1_ref[...].astype(jnp.bfloat16),
                preferred_element_type=jnp.float32)
    h = _gelu_tanh(h + b1_ref[...])
    y = jnp.dot(h.astype(jnp.bfloat16), w2_ref[...].astype(jnp.bfloat16),
                preferred_element_type=jnp.float32)
    o_ref[...] = (y + b2_ref[...]).astype(o_ref.dtype)


def _spectral_modes_kernel(xr_ref, xi_ref, wr_ref, wi_ref, or_ref, oi_ref):
    # Blocked-over-modes complex matmul, Gauss 3-multiplication form:
    #   real = t1 - t2,  imag = t3 - t1 - t2
    # Kept in f32: negligible MXU work after mode blocking, best spectral acc.
    xr, xi = xr_ref[...], xi_ref[...]
    wr, wi = wr_ref[...], wi_ref[...]
    t1 = jnp.einsum('mbi,mio->mbo', xr, wr, preferred_element_type=jnp.float32)
    t2 = jnp.einsum('mbi,mio->mbo', xi, wi, preferred_element_type=jnp.float32)
    t3 = jnp.einsum('mbi,mio->mbo', xr + xi, wr + wi,
                    preferred_element_type=jnp.float32)
    or_ref[...] = t1 - t2
    oi_ref[...] = t3 - t1 - t2


# ----------------------------------------------------------------------------
# Tiling helpers / Pallas wrappers
# ----------------------------------------------------------------------------
def _compiler_params():
    return pltpu.CompilerParams(dimension_semantics=("parallel",),
                                vmem_limit_bytes=_VMEM_LIMIT_BYTES)


def _row_tiling(n, f32_elems_per_row, max_tile=512):
    """Largest row tile (multiple of 8, <= max_tile) under the VMEM budget.

    Returns (tile, padded_n). 512 rows ~ 85% of the HBM roofline for
    mem-bound fused linears while leaving >=2 grid steps for megacore.
    """
    cap = _VMEM_BUDGET_BYTES // (8 * max(f32_elems_per_row, 1))  # 4B * 2 bufs
    cap = max(8, min(max_tile, (cap // 8) * 8))
    if n <= cap:
        t = _ceil_to(n, 8)
        return t, t
    nblk = -(-n // cap)
    t = _ceil_to(-(-n // nblk), 8)
    return t, t * nblk


def _mode_tiling(m, max_mt=32):
    for t in range(min(m, max_mt), 0, -1):
        if m % t == 0:
            return t
    return 1


def _pad_rows(a, n_pad):
    n = a.shape[0]
    if n_pad == n:
        return a
    return jnp.pad(a, ((0, n_pad - n), (0, 0)))


def pallas_linear(x2d, w, b, spec=None, apply_gelu=False):
    """y = [gelu]( x2d @ w + b [+ spec] ) with lane-dense, row-tiled blocks."""
    N, Cin = x2d.shape
    Cout = w.shape[1]
    per_row = Cin + 2 * Cout + (Cout if spec is not None else 0)
    tn, n_pad = _row_tiling(N, per_row)
    x2d = _pad_rows(x2d, n_pad)
    b2d = b.reshape(1, Cout)

    in_specs = [
        pl.BlockSpec((tn, Cin), lambda i: (i, 0)),
        pl.BlockSpec((Cin, Cout), lambda i: (0, 0)),
        pl.BlockSpec((1, Cout), lambda i: (0, 0)),
    ]
    args = [x2d, w, b2d]
    if spec is None:
        kernel = functools.partial(_linear_kernel, apply_gelu=apply_gelu)
    else:
        kernel = functools.partial(_fno_layer_kernel, apply_gelu=apply_gelu)
        in_specs.append(pl.BlockSpec((tn, Cout), lambda i: (i, 0)))
        args.append(_pad_rows(spec, n_pad))

    out = pl.pallas_call(
        kernel,
        out_shape=jax.ShapeDtypeStruct((n_pad, Cout), jnp.float32),
        grid=(n_pad // tn,),
        in_specs=in_specs,
        out_specs=pl.BlockSpec((tn, Cout), lambda i: (i, 0)),
        compiler_params=_compiler_params(),
    )(*args)
    return out[:N]


def pallas_head(x2d, w1, b1, w2, b2):
    """Fused fc1 + GELU + fc2 (single HBM pass over the activation)."""
    N, Cin = x2d.shape
    Fc = w1.shape[1]
    Cout = w2.shape[1]
    per_row = Cin + 2 * Cout + Fc
    tn, n_pad = _row_tiling(N, per_row)
    x2d = _pad_rows(x2d, n_pad)
    out = pl.pallas_call(
        _head_kernel,
        out_shape=jax.ShapeDtypeStruct((n_pad, Cout), jnp.float32),
        grid=(n_pad // tn,),
        in_specs=[
            pl.BlockSpec((tn, Cin), lambda i: (i, 0)),
            pl.BlockSpec((Cin, Fc), lambda i: (0, 0)),
            pl.BlockSpec((1, Fc), lambda i: (0, 0)),
            pl.BlockSpec((Fc, Cout), lambda i: (0, 0)),
            pl.BlockSpec((1, Cout), lambda i: (0, 0)),
        ],
        out_specs=pl.BlockSpec((tn, Cout), lambda i: (i, 0)),
        compiler_params=_compiler_params(),
    )(x2d, w1, b1.reshape(1, Fc), w2, b2.reshape(1, Cout))
    return out[:N]


def pallas_spectral_modes(xr, xi, wr, wi):
    """Mode-blocked complex matmul: (M,B,Cin) x (M,Cin,Cout) -> (M,B,Cout)."""
    M, B, Cin = xr.shape
    Cout = wr.shape[-1]
    mt = _mode_tiling(M)
    x_spec = pl.BlockSpec((mt, B, Cin), lambda m: (m, 0, 0))
    w_spec = pl.BlockSpec((mt, Cin, Cout), lambda m: (m, 0, 0))
    o_spec = pl.BlockSpec((mt, B, Cout), lambda m: (m, 0, 0))
    return pl.pallas_call(
        _spectral_modes_kernel,
        out_shape=(jax.ShapeDtypeStruct((M, B, Cout), jnp.float32),
                   jax.ShapeDtypeStruct((M, B, Cout), jnp.float32)),
        grid=(M // mt,),
        in_specs=[x_spec, x_spec, w_spec, w_spec],
        out_specs=(o_spec, o_spec),
        compiler_params=_compiler_params(),
    )(xr, xi, wr, wi)


# ----------------------------------------------------------------------------
# SpectralConv3d (FFT glue in plain JAX, mode-mix matmul in Pallas)
# ----------------------------------------------------------------------------
def spectral_conv3d(h, wr, wi, m1, m2, m3, cin, cout, cout_pad):
    """h: (B,X,Y,T,Cp) f32 (channels >= cin are zero).  Returns (B,X,Y,T,cout_pad)."""
    B, X, Y, T, _ = h.shape
    # FFT only over the real channels; FFT cost scales with the channel count.
    hr = h[..., :cin]
    x_ft = jnp.fft.rfftn(hr, axes=(1, 2, 3))                 # (B,X,Y,Tf,cin) c64
    Tf = x_ft.shape[3]
    assert X >= 2 * m1 and Y >= 2 * m2 and Tf >= m3, \
        "retained modes exceed grid size (corner blocks would overlap)"

    # Gather the 4 retained-mode corners with two concats + one slice.
    xa = jnp.concatenate([x_ft[:, :m1], x_ft[:, X - m1:]], axis=1)     # (B,2m1,Y,Tf,cin)
    xb = jnp.concatenate([xa[:, :, :m2], xa[:, :, Y - m2:]], axis=2)   # (B,2m1,2m2,Tf,cin)
    xc = xb[:, :, :, :m3, :]                                           # (B,2m1,2m2,m3,cin)
    M = 4 * m1 * m2 * m3
    xc = jnp.transpose(xc, (1, 2, 3, 0, 4)).reshape(M, B, cin)

    or_, oi_ = pallas_spectral_modes(jnp.real(xc), jnp.imag(xc), wr, wi)
    oc = jax.lax.complex(or_, oi_)                                     # (M,B,cout)
    oc = jnp.transpose(oc.reshape(2 * m1, 2 * m2, m3, B, cout), (3, 0, 1, 2, 4))

    # Scatter back into the (mostly zero) spectrum by concatenation with zero
    # blocks instead of a full zeros tensor + 4 dynamic-update-slices.
    cdt = oc.dtype
    f = jnp.concatenate(
        [oc, jnp.zeros((B, 2 * m1, 2 * m2, Tf - m3, cout), cdt)], axis=3)
    f = jnp.concatenate(
        [f[:, :, :m2], jnp.zeros((B, 2 * m1, Y - 2 * m2, Tf, cout), cdt),
         f[:, :, m2:]], axis=2)
    f = jnp.concatenate(
        [f[:, :m1], jnp.zeros((B, X - 2 * m1, Y, Tf, cout), cdt),
         f[:, m1:]], axis=1)                                            # (B,X,Y,Tf,cout)

    out = jnp.fft.irfftn(f, s=(X, Y, T), axes=(1, 2, 3)).astype(jnp.float32)
    # Pad channels back to the lane-padded activation width (zeros).
    return jnp.pad(out, ((0, 0),) * 4 + ((0, cout_pad - cout),))


# ----------------------------------------------------------------------------
# Parameters & full forward
# ----------------------------------------------------------------------------
def init_params(key, layers, modes1, modes2, modes3, in_dim, fc_dim, out_dim):
    pad = lambda c: _ceil_to(c, _LANE)
    n_layers = len(layers) - 1
    keys = iter(jax.random.split(key, 6 + 4 * n_layers))
    p = {}

    def lin(kw, kb, cin, cout):
        w = jnp.zeros((pad(cin), pad(cout)), jnp.float32)
        w = w.at[:cin, :cout].set(
            jax.random.normal(kw, (cin, cout), jnp.float32) / math.sqrt(cin))
        b = jnp.zeros((pad(cout),), jnp.float32)
        b = b.at[:cout].set(0.01 * jax.random.normal(kb, (cout,), jnp.float32))
        return w, b

    p["fc0_w"], p["fc0_b"] = lin(next(keys), next(keys), in_dim, layers[0])

    sp, ws = [], []
    for cin, cout, m1, m2, m3 in zip(layers, layers[1:], modes1, modes2, modes3):
        M = 4 * m1 * m2 * m3
        scale = 1.0 / (cin * cout)
        wr = scale * jax.random.uniform(next(keys), (M, cin, cout), jnp.float32)
        wi = scale * jax.random.uniform(next(keys), (M, cin, cout), jnp.float32)
        sp.append((wr, wi))
        ws.append(lin(next(keys), next(keys), cin, cout))
    p["sp"] = sp
    p["ws"] = ws

    p["fc1_w"], p["fc1_b"] = lin(next(keys), next(keys), layers[-1], fc_dim)
    p["fc2_w"], p["fc2_b"] = lin(next(keys), next(keys), fc_dim, out_dim)
    return p


@functools.partial(jax.jit,
                   static_argnames=("layers", "modes1", "modes2", "modes3",
                                    "out_dim"))
def fno3d_forward(params, x, layers, modes1, modes2, modes3, out_dim):
    """x: (B, X, Y, T, in_dim) -> (B, X, Y, T, out_dim)."""
    B, X, Y, T, in_dim = x.shape
    N = B * X * Y * T
    in_pad = params["fc0_w"].shape[0]

    # fc0 (Linear over last dim), channels padded to 128 lanes
    xp = jnp.pad(x, ((0, 0),) * 4 + ((0, in_pad - in_dim),))
    h = pallas_linear(xp.reshape(N, in_pad), params["fc0_w"], params["fc0_b"])
    h = h.reshape(B, X, Y, T, h.shape[-1])

    n_layers = len(layers) - 1
    for i in range(n_layers):
        cin, cout = layers[i], layers[i + 1]
        m1, m2, m3 = modes1[i], modes2[i], modes3[i]
        w, b = params["ws"][i]                                  # 1x1 Conv1d
        cout_pad = w.shape[1]
        wr, wi = params["sp"][i]
        spec = spectral_conv3d(h, wr, wi, m1, m2, m3, cin, cout, cout_pad)
        h = pallas_linear(h.reshape(N, h.shape[-1]), w, b,
                          spec=spec.reshape(N, cout_pad),
                          apply_gelu=(i != n_layers - 1))
        h = h.reshape(B, X, Y, T, cout_pad)

    # fused fc1 + gelu + fc2
    out = pallas_head(h.reshape(N, h.shape[-1]),
                      params["fc1_w"], params["fc1_b"],
                      params["fc2_w"], params["fc2_b"])
    return out[:, :out_dim].reshape(B, X, Y, T, out_dim)


# ----------------------------------------------------------------------------
if __name__ == "__main__":
    B, X, Y, T = 2, 8, 8, 8
    in_dim = 4
    layers = (8, 8, 8, 8)          # 3 FNO layers
    modes1 = (4, 4, 4)
    modes2 = (4, 4, 4)
    modes3 = (3, 3, 3)
    fc_dim = 32
    out_dim = 1

    key = jax.random.PRNGKey(0)
    kp, kx = jax.random.split(key)
    params = init_params(kp, layers, modes1, modes2, modes3, in_dim, fc_dim,
                         out_dim)
    x = jax.random.normal(kx, (B, X, Y, T, in_dim), dtype=jnp.float32)

    out = fno3d_forward(params, x, layers, modes1, modes2, modes3, out_dim)
    out = jax.block_until_ready(out)
    assert out.shape == (B, X, Y, T, out_dim), out.shape
    assert bool(jnp.all(jnp.isfinite(out)))
    print("KERNEL_OK")
</pallas_src>

<mosaic_0001>
module attributes {stable_mosaic.version = 11 : i64} {
  func.func @_linear_kernel(%arg0: i32, %arg1: memref<512x128xf32, #tpu.memory_space<vmem>>, %arg2: memref<128x128xf32, #tpu.memory_space<vmem>>, %arg3: memref<1x128xf32, #tpu.memory_space<vmem>>, %arg4: memref<512x128xf32, #tpu.memory_space<vmem>>) attributes {dimension_semantics = [#tpu.dimension_semantics<parallel>], iteration_bounds = array<i64: 2>, scalar_prefetch = 0 : i64, scratch_operands = 0 : i64, tpu.core_type = #tpu.core_type<tc>, window_params = [{transform_indices = @transform_0, window_bounds = array<i64: 512, 128>}, {pipeline_mode = #tpu.pipeline_mode<synchronous>, transform_indices = @transform_1, window_bounds = array<i64: 128, 128>}, {pipeline_mode = #tpu.pipeline_mode<synchronous>, transform_indices = @transform_2, window_bounds = array<i64: 1, 128>}, {transform_indices = @transform_3, window_bounds = array<i64: 512, 128>}]} {
    %c0 = arith.constant 0 : index
    %c0_0 = arith.constant 0 : index
    %0 = vector.load %arg1[%c0, %c0_0] : memref<512x128xf32, #tpu.memory_space<vmem>>, vector<512x128xf32>
    %1 = arith.truncf %0 : vector<512x128xf32> to vector<512x128xbf16>
    %c0_1 = arith.constant 0 : index
    %c0_2 = arith.constant 0 : index
    %2 = vector.load %arg2[%c0_1, %c0_2] : memref<128x128xf32, #tpu.memory_space<vmem>>, vector<128x128xf32>
    %3 = arith.truncf %2 : vector<128x128xf32> to vector<128x128xbf16>
    %cst = arith.constant dense<0.000000e+00> : vector<512x128xf32>
    %4 = tpu.matmul %1, %3, %cst {dimension_numbers = #tpu.dot_dimension_numbers<[1], [0], [0], [1], [0, 0, 1, 1], [], []>} : vector<512x128xbf16>, vector<128x128xbf16>, vector<512x128xf32> -> vector<512x128xf32>
    %c0_3 = arith.constant 0 : index
    %c0_4 = arith.constant 0 : index
    %5 = vector.load %arg3[%c0_3, %c0_4] : memref<1x128xf32, #tpu.memory_space<vmem>>, vector<1x128xf32>
    %6 = vector.broadcast %5 : vector<1x128xf32> to vector<512x128xf32>
    %7 = arith.addf %4, %6 : vector<512x128xf32>
    %c0_5 = arith.constant 0 : index
    %c0_6 = arith.constant 0 : index
    %8 = vector.load %arg4[%c0_5, %c0_6] : memref<512x128xf32, #tpu.memory_space<vmem>>, vector<512x128xf32>
    tpu.vector_store %arg4[%c0_5, %c0_6], %7 {strides = array<i32>} : memref<512x128xf32, #tpu.memory_space<vmem>>, vector<512x128xf32>,
    return
  }
  func.func @transform_0(%arg0: i32) -> (i32, i32) {
    %c0_i32 = arith.constant 0 : i32
    %c0_i32_0 = arith.constant 0 : i32
    return %arg0, %c0_i32 : i32, i32
  }
  func.func @transform_1(%arg0: i32) -> (i32, i32) {
    %c0_i32 = arith.constant 0 : i32
    %c0_i32_0 = arith.constant 0 : i32
    %c0_i32_1 = arith.constant 0 : i32
    return %c0_i32, %c0_i32_0 : i32, i32
  }
  func.func @transform_2(%arg0: i32) -> (i32, i32) {
    %c0_i32 = arith.constant 0 : i32
    %c0_i32_0 = arith.constant 0 : i32
    %c0_i32_1 = arith.constant 0 : i32
    return %c0_i32, %c0_i32_0 : i32, i32
  }
  func.func @transform_3(%arg0: i32) -> (i32, i32) {
    %c0_i32 = arith.constant 0 : i32
    %c0_i32_0 = arith.constant 0 : i32
    return %arg0, %c0_i32 : i32, i32
  }
}

module attributes {stable_mosaic.version = 11 : i64} {
  func.func @_spectral_modes_kernel(%arg0: i32, %arg1: memref<32x2x8xf32, #tpu.memory_space<vmem>>, %arg2: memref<32x2x8xf32, #tpu.memory_space<vmem>>, %arg3: memref<32x8x8xf32, #tpu.memory_space<vmem>>, %arg4: memref<32x8x8xf32, #tpu.memory_space<vmem>>, %arg5: memref<32x2x8xf32, #tpu.memory_space<vmem>>, %arg6: memref<32x2x8xf32, #tpu.memory_space<vmem>>) attributes {dimension_semantics = [#tpu.dimension_semantics<parallel>], iteration_bounds = array<i64: 6>, scalar_prefetch = 0 : i64, scratch_operands = 0 : i64, tpu.core_type = #tpu.core_type<tc>, window_params = [{transform_indices = @transform_0, window_bounds = array<i64: 32, 2, 8>}, {transform_indices = @transform_1, window_bounds = array<i64: 32, 2, 8>}, {transform_indices = @transform_2, window_bounds = array<i64: 32, 8, 8>}, {transform_indices = @transform_3, window_bounds = array<i64: 32, 8, 8>}, {transform_indices = @transform_4, window_bounds = array<i64: 32, 2, 8>}, {transform_indices = @transform_5, window_bounds = array<i64: 32, 2, 8>}]} {
    %c0 = arith.constant 0 : index
    %c0_0 = arith.constant 0 : index
    %c0_1 = arith.constant 0 : index
    %0 = vector.load %arg1[%c0, %c0_0, %c0_1] : memref<32x2x8xf32, #tpu.memory_space<vmem>>, vector<32x2x8xf32>
    %c0_2 = arith.constant 0 : index
    %c0_3 = arith.constant 0 : index
    %c0_4 = arith.constant 0 : index
    %1 = vector.load %arg2[%c0_2, %c0_3, %c0_4] : memref<32x2x8xf32, #tpu.memory_space<vmem>>, vector<32x2x8xf32>
    %c0_5 = arith.constant 0 : index
    %c0_6 = arith.constant 0 : index
    %c0_7 = arith.constant 0 : index
    %2 = vector.load %arg3[%c0_5, %c0_6, %c0_7] : memref<32x8x8xf32, #tpu.memory_space<vmem>>, vector<32x8x8xf32>
    %c0_8 = arith.constant 0 : index
    %c0_9 = arith.constant 0 : index
    %c0_10 = arith.constant 0 : index
    %3 = vector.load %arg4[%c0_8, %c0_9, %c0_10] : memref<32x8x8xf32, #tpu.memory_space<vmem>>, vector<32x8x8xf32>
    "tpu.trace_start"() <{level = 10 : i32, message = "mbi,mio->mbo"}> : () -> ()
    %cst = arith.constant dense<0.000000e+00> : vector<32x2x8xf32>
    %4 = tpu.matmul %0, %2, %cst {dimension_numbers = #tpu.dot_dimension_numbers<[2], [1], [1], [2], [0, 0, 0, 1, 1, 2], [0], [0]>} : vector<32x2x8xf32>, vector<32x8x8xf32>, vector<32x2x8xf32> -> vector<32x2x8xf32>
    %cst_11 = arith.constant dense<0.000000e+00> : vector<32x2x8xf32>
    %5 = tpu.matmul %1, %3, %cst_11 {dimension_numbers = #tpu.dot_dimension_numbers<[2], [1], [1], [2], [0, 0, 0, 1, 1, 2], [0], [0]>} : vector<32x2x8xf32>, vector<32x8x8xf32>, vector<32x2x8xf32> -> vector<32x2x8xf32>
    "tpu.trace_stop"() : () -> ()
    %6 = arith.addf %0, %1 : vector<32x2x8xf32>
    %7 = arith.addf %2, %3 : vector<32x8x8xf32>
    "tpu.trace_start"() <{level = 10 : i32, message = "mbi,mio->mbo"}> : () -> ()
    %cst_12 = arith.constant dense<0.000000e+00> : vector<32x2x8xf32>
    %8 = tpu.matmul %6, %7, %cst_12 {dimension_numbers = #tpu.dot_dimension_numbers<[2], [1], [1], [2], [0, 0, 0, 1, 1, 2], [0], [0]>} : vector<32x2x8xf32>, vector<32x8x8xf32>, vector<32x2x8xf32> -> vector<32x2x8xf32>
    "tpu.trace_stop"() : () -> ()
    %9 = arith.subf %4, %5 : vector<32x2x8xf32>
    %c0_13 = arith.constant 0 : index
    %c0_14 = arith.constant 0 : index
    %c0_15 = arith.constant 0 : index
    %10 = vector.load %arg5[%c0_13, %c0_14, %c0_15] : memref<32x2x8xf32, #tpu.memory_space<vmem>>, vector<32x2x8xf32>
    tpu.vector_store %arg5[%c0_13, %c0_14, %c0_15], %9 {strides = array<i32>} : memref<32x2x8xf32, #tpu.memory_space<vmem>>, vector<32x2x8xf32>,
    %11 = arith.subf %8, %4 : vector<32x2x8xf32>
    %12 = arith.subf %11, %5 : vector<32x2x8xf32>
    %c0_16 = arith.constant 0 : index
    %c0_17 = arith.constant 0 : index
    %c0_18 = arith.constant 0 : index
    %13 = vector.load %arg6[%c0_16, %c0_17, %c0_18] : memref<32x2x8xf32, #tpu.memory_space<vmem>>, vector<32x2x8xf32>
    tpu.vector_store %arg6[%c0_16, %c0_17, %c0_18], %12 {strides = array<i32>} : memref<32x2x8xf32, #tpu.memory_space<vmem>>, vector<32x2x8xf32>,
    return
  }
  func.func @transform_0(%arg0: i32) -> (i32, i32, i32) {
    %c0_i32 = arith.constant 0 : i32
    %c0_i32_0 = arith.constant 0 : i32
    %c0_i32_1 = arith.constant 0 : i32
    return %arg0, %c0_i32, %c0_i32_0 : i32, i32, i32
  }
  func.func @transform_1(%arg0: i32) -> (i32, i32, i32) {
    %c0_i32 = arith.constant 0 : i32
    %c0_i32_0 = arith.constant 0 : i32
    %c0_i32_1 = arith.constant 0 : i32
    return %arg0, %c0_i32, %c0_i32_0 : i32, i32, i32
  }
  func.func @transform_2(%arg0: i32) -> (i32, i32, i32) {
    %c0_i32 = arith.constant 0 : i32
    %c0_i32_0 = arith.constant 0 : i32
    %c0_i32_1 = arith.constant 0 : i32
    return %arg0, %c0_i32, %c0_i32_0 : i32, i32, i32
  }
  func.func @transform_3(%arg0: i32) -> (i32, i32, i32) {
    %c0_i32 = arith.constant 0 : i32
    %c0_i32_0 = arith.constant 0 : i32
    %c0_i32_1 = arith.constant 0 : i32
    return %arg0, %c0_i32, %c0_i32_0 : i32, i32, i32
  }
  func.func @transform_4(%arg0: i32) -> (i32, i32, i32) {
    %c0_i32 = arith.constant 0 : i32
    %c0_i32_0 = arith.constant 0 : i32
    %c0_i32_1 = arith.constant 0 : i32
    return %arg0, %c0_i32, %c0_i32_0 : i32, i32, i32
  }
  func.func @transform_5(%arg0: i32) -> (i32, i32, i32) {
    %c0_i32 = arith.constant 0 : i32
    %c0_i32_0 = arith.constant 0 : i32
    %c0_i32_1 = arith.constant 0 : i32
    return %arg0, %c0_i32, %c0_i32_0 : i32, i32, i32
  }
}

module attributes {stable_mosaic.version = 11 : i64} {
  func.func @_fno_layer_kernel(%arg0: i32, %arg1: memref<512x128xf32, #tpu.memory_space<vmem>>, %arg2: memref<128x128xf32, #tpu.memory_space<vmem>>, %arg3: memref<1x128xf32, #tpu.memory_space<vmem>>, %arg4: memref<512x128xf32, #tpu.memory_space<vmem>>, %arg5: memref<512x128xf32, #tpu.memory_space<vmem>>) attributes {dimension_semantics = [#tpu.dimension_semantics<parallel>], iteration_bounds = array<i64: 2>, scalar_prefetch = 0 : i64, scratch_operands = 0 : i64, tpu.core_type = #tpu.core_type<tc>, window_params = [{transform_indices = @transform_0, window_bounds = array<i64: 512, 128>}, {pipeline_mode = #tpu.pipeline_mode<synchronous>, transform_indices = @transform_1, window_bounds = array<i64: 128, 128>}, {pipeline_mode = #tpu.pipeline_mode<synchronous>, transform_indices = @transform_2, window_bounds = array<i64: 1, 128>}, {transform_indices = @transform_3, window_bounds = array<i64: 512, 128>}, {transform_indices = @transform_4, window_bounds = array<i64: 512, 128>}]} {
    %c0 = arith.constant 0 : index
    %c0_0 = arith.constant 0 : index
    %0 = vector.load %arg1[%c0, %c0_0] : memref<512x128xf32, #tpu.memory_space<vmem>>, vector<512x128xf32>
    %1 = arith.truncf %0 : vector<512x128xf32> to vector<512x128xbf16>
    %c0_1 = arith.constant 0 : index
    %c0_2 = arith.constant 0 : index
    %2 = vector.load %arg2[%c0_1, %c0_2] : memref<128x128xf32, #tpu.memory_space<vmem>>, vector<128x128xf32>
    %3 = arith.truncf %2 : vector<128x128xf32> to vector<128x128xbf16>
    %cst = arith.constant dense<0.000000e+00> : vector<512x128xf32>
    %4 = tpu.matmul %1, %3, %cst {dimension_numbers = #tpu.dot_dimension_numbers<[1], [0], [0], [1], [0, 0, 1, 1], [], []>} : vector<512x128xbf16>, vector<128x128xbf16>, vector<512x128xf32> -> vector<512x128xf32>
    %c0_3 = arith.constant 0 : index
    %c0_4 = arith.constant 0 : index
    %5 = vector.load %arg3[%c0_3, %c0_4] : memref<1x128xf32, #tpu.memory_space<vmem>>, vector<1x128xf32>
    %6 = vector.broadcast %5 : vector<1x128xf32> to vector<512x128xf32>
    %7 = arith.addf %4, %6 : vector<512x128xf32>
    %c0_5 = arith.constant 0 : index
    %c0_6 = arith.constant 0 : index
    %8 = vector.load %arg4[%c0_5, %c0_6] : memref<512x128xf32, #tpu.memory_space<vmem>>, vector<512x128xf32>
    %9 = arith.addf %7, %8 : vector<512x128xf32>
    %cst_7 = arith.constant 5.000000e-01 : f32
    %10 = vector.broadcast %cst_7 : f32 to vector<512x128xf32>
    %11 = arith.mulf %10, %9 : vector<512x128xf32>
    %cst_8 = arith.constant 4.471500e-02 : f32
    %12 = vector.broadcast %cst_8 : f32 to vector<512x128xf32>
    %13 = arith.mulf %12, %9 : vector<512x128xf32>
    %14 = arith.mulf %13, %9 : vector<512x128xf32>
    %15 = arith.mulf %14, %9 : vector<512x128xf32>
    %16 = arith.addf %9, %15 : vector<512x128xf32>
    %cst_9 = arith.constant 0.797884583 : f32
    %17 = vector.broadcast %cst_9 : f32 to vector<512x128xf32>
    %18 = arith.mulf %17, %16 : vector<512x128xf32>
    %19 = math.tanh %18 : vector<512x128xf32>
    %cst_10 = arith.constant 1.000000e+00 : f32
    %20 = vector.broadcast %cst_10 : f32 to vector<512x128xf32>
    %21 = arith.addf %20, %19 : vector<512x128xf32>
    %22 = arith.mulf %11, %21 : vector<512x128xf32>
    %c0_11 = arith.constant 0 : index
    %c0_12 = arith.constant 0 : index
    %23 = vector.load %arg5[%c0_11, %c0_12] : memref<512x128xf32, #tpu.memory_space<vmem>>, vector<512x128xf32>
    tpu.vector_store %arg5[%c0_11, %c0_12], %22 {strides = array<i32>} : memref<512x128xf32, #tpu.memory_space<vmem>>, vector<512x128xf32>,
    return
  }
  func.func @transform_0(%arg0: i32) -> (i32, i32) {
    %c0_i32 = arith.constant 0 : i32
    %c0_i32_0 = arith.constant 0 : i32
    return %arg0, %c0_i32 : i32, i32
  }
  func.func @transform_1(%arg0: i32) -> (i32, i32) {
    %c0_i32 = arith.constant 0 : i32
    %c0_i32_0 = arith.constant 0 : i32
    %c0_i32_1 = arith.constant 0 : i32
    return %c0_i32, %c0_i32_0 : i32, i32
  }
  func.func @transform_2(%arg0: i32) -> (i32, i32) {
    %c0_i32 = arith.constant 0 : i32
    %c0_i32_0 = arith.constant 0 : i32
    %c0_i32_1 = arith.constant 0 : i32
    return %c0_i32, %c0_i32_0 : i32, i32
  }
  func.func @transform_3(%arg0: i32) -> (i32, i32) {
    %c0_i32 = arith.constant 0 : i32
    %c0_i32_0 = arith.constant 0 : i32
    return %arg0, %c0_i32 : i32, i32
  }
  func.func @transform_4(%arg0: i32) -> (i32, i32) {
    %c0_i32 = arith.constant 0 : i32
    %c0_i32_0 = arith.constant 0 : i32
    return %arg0, %c0_i32 : i32, i32
  }
}

module attributes {stable_mosaic.version = 11 : i64} {
  func.func @_fno_layer_kernel(%arg0: i32, %arg1: memref<512x128xf32, #tpu.memory_space<vmem>>, %arg2: memref<128x128xf32, #tpu.memory_space<vmem>>, %arg3: memref<1x128xf32, #tpu.memory_space<vmem>>, %arg4: memref<512x128xf32, #tpu.memory_space<vmem>>, %arg5: memref<512x128xf32, #tpu.memory_space<vmem>>) attributes {dimension_semantics = [#tpu.dimension_semantics<parallel>], iteration_bounds = array<i64: 2>, scalar_prefetch = 0 : i64, scratch_operands = 0 : i64, tpu.core_type = #tpu.core_type<tc>, window_params = [{transform_indices = @transform_0, window_bounds = array<i64: 512, 128>}, {pipeline_mode = #tpu.pipeline_mode<synchronous>, transform_indices = @transform_1, window_bounds = array<i64: 128, 128>}, {pipeline_mode = #tpu.pipeline_mode<synchronous>, transform_indices = @transform_2, window_bounds = array<i64: 1, 128>}, {transform_indices = @transform_3, window_bounds = array<i64: 512, 128>}, {transform_indices = @transform_4, window_bounds = array<i64: 512, 128>}]} {
    %c0 = arith.constant 0 : index
    %c0_0 = arith.constant 0 : index
    %0 = vector.load %arg1[%c0, %c0_0] : memref<512x128xf32, #tpu.memory_space<vmem>>, vector<512x128xf32>
    %1 = arith.truncf %0 : vector<512x128xf32> to vector<512x128xbf16>
    %c0_1 = arith.constant 0 : index
    %c0_2 = arith.constant 0 : index
    %2 = vector.load %arg2[%c0_1, %c0_2] : memref<128x128xf32, #tpu.memory_space<vmem>>, vector<128x128xf32>
    %3 = arith.truncf %2 : vector<128x128xf32> to vector<128x128xbf16>
    %cst = arith.constant dense<0.000000e+00> : vector<512x128xf32>
    %4 = tpu.matmul %1, %3, %cst {dimension_numbers = #tpu.dot_dimension_numbers<[1], [0], [0], [1], [0, 0, 1, 1], [], []>} : vector<512x128xbf16>, vector<128x128xbf16>, vector<512x128xf32> -> vector<512x128xf32>
    %c0_3 = arith.constant 0 : index
    %c0_4 = arith.constant 0 : index
    %5 = vector.load %arg3[%c0_3, %c0_4] : memref<1x128xf32, #tpu.memory_space<vmem>>, vector<1x128xf32>
    %6 = vector.broadcast %5 : vector<1x128xf32> to vector<512x128xf32>
    %7 = arith.addf %4, %6 : vector<512x128xf32>
    %c0_5 = arith.constant 0 : index
    %c0_6 = arith.constant 0 : index
    %8 = vector.load %arg4[%c0_5, %c0_6] : memref<512x128xf32, #tpu.memory_space<vmem>>, vector<512x128xf32>
    %9 = arith.addf %7, %8 : vector<512x128xf32>
    %c0_7 = arith.constant 0 : index
    %c0_8 = arith.constant 0 : index
    %10 = vector.load %arg5[%c0_7, %c0_8] : memref<512x128xf32, #tpu.memory_space<vmem>>, vector<512x128xf32>
    tpu.vector_store %arg5[%c0_7, %c0_8], %9 {strides = array<i32>} : memref<512x128xf32, #tpu.memory_space<vmem>>, vector<512x128xf32>,
    return
  }
  func.func @transform_0(%arg0: i32) -> (i32, i32) {
    %c0_i32 = arith.constant 0 : i32
    %c0_i32_0 = arith.constant 0 : i32
    return %arg0, %c0_i32 : i32, i32
  }
  func.func @transform_1(%arg0: i32) -> (i32, i32) {
    %c0_i32 = arith.constant 0 : i32
    %c0_i32_0 = arith.constant 0 : i32
    %c0_i32_1 = arith.constant 0 : i32
    return %c0_i32, %c0_i32_0 : i32, i32
  }
  func.func @transform_2(%arg0: i32) -> (i32, i32) {
    %c0_i32 = arith.constant 0 : i32
    %c0_i32_0 = arith.constant 0 : i32
    %c0_i32_1 = arith.constant 0 : i32
    return %c0_i32, %c0_i32_0 : i32, i32
  }
  func.func @transform_3(%arg0: i32) -> (i32, i32) {
    %c0_i32 = arith.constant 0 : i32
    %c0_i32_0 = arith.constant 0 : i32
    return %arg0, %c0_i32 : i32, i32
  }
  func.func @transform_4(%arg0: i32) -> (i32, i32) {
    %c0_i32 = arith.constant 0 : i32
    %c0_i32_0 = arith.constant 0 : i32
    return %arg0, %c0_i32 : i32, i32
  }
}

module attributes {stable_mosaic.version = 11 : i64} {
  func.func @_head_kernel(%arg0: i32, %arg1: memref<512x128xf32, #tpu.memory_space<vmem>>, %arg2: memref<128x128xf32, #tpu.memory_space<vmem>>, %arg3: memref<1x128xf32, #tpu.memory_space<vmem>>, %arg4: memref<128x128xf32, #tpu.memory_space<vmem>>, %arg5: memref<1x128xf32, #tpu.memory_space<vmem>>, %arg6: memref<512x128xf32, #tpu.memory_space<vmem>>) attributes {dimension_semantics = [#tpu.dimension_semantics<parallel>], iteration_bounds = array<i64: 2>, scalar_prefetch = 0 : i64, scratch_operands = 0 : i64, tpu.core_type = #tpu.core_type<tc>, window_params = [{transform_indices = @transform_0, window_bounds = array<i64: 512, 128>}, {pipeline_mode = #tpu.pipeline_mode<synchronous>, transform_indices = @transform_1, window_bounds = array<i64: 128, 128>}, {pipeline_mode = #tpu.pipeline_mode<synchronous>, transform_indices = @transform_2, window_bounds = array<i64: 1, 128>}, {pipeline_mode = #tpu.pipeline_mode<synchronous>, transform_indices = @transform_3, window_bounds = array<i64: 128, 128>}, {pipeline_mode = #tpu.pipeline_mode<synchronous>, transform_indices = @transform_4, window_bounds = array<i64: 1, 128>}, {transform_indices = @transform_5, window_bounds = array<i64: 512, 128>}]} {
    %c0 = arith.constant 0 : index
    %c0_0 = arith.constant 0 : index
    %0 = vector.load %arg1[%c0, %c0_0] : memref<512x128xf32, #tpu.memory_space<vmem>>, vector<512x128xf32>
    %1 = arith.truncf %0 : vector<512x128xf32> to vector<512x128xbf16>
    %c0_1 = arith.constant 0 : index
    %c0_2 = arith.constant 0 : index
    %2 = vector.load %arg2[%c0_1, %c0_2] : memref<128x128xf32, #tpu.memory_space<vmem>>, vector<128x128xf32>
    %3 = arith.truncf %2 : vector<128x128xf32> to vector<128x128xbf16>
    %cst = arith.constant dense<0.000000e+00> : vector<512x128xf32>
    %4 = tpu.matmul %1, %3, %cst {dimension_numbers = #tpu.dot_dimension_numbers<[1], [0], [0], [1], [0, 0, 1, 1], [], []>} : vector<512x128xbf16>, vector<128x128xbf16>, vector<512x128xf32> -> vector<512x128xf32>
    %c0_3 = arith.constant 0 : index
    %c0_4 = arith.constant 0 : index
    %5 = vector.load %arg3[%c0_3, %c0_4] : memref<1x128xf32, #tpu.memory_space<vmem>>, vector<1x128xf32>
    %6 = vector.broadcast %5 : vector<1x128xf32> to vector<512x128xf32>
    %7 = arith.addf %4, %6 : vector<512x128xf32>
    %cst_5 = arith.constant 5.000000e-01 : f32
    %8 = vector.broadcast %cst_5 : f32 to vector<512x128xf32>
    %9 = arith.mulf %8, %7 : vector<512x128xf32>
    %cst_6 = arith.constant 4.471500e-02 : f32
    %10 = vector.broadcast %cst_6 : f32 to vector<512x128xf32>
    %11 = arith.mulf %10, %7 : vector<512x128xf32>
    %12 = arith.mulf %11, %7 : vector<512x128xf32>
    %13 = arith.mulf %12, %7 : vector<512x128xf32>
    %14 = arith.addf %7, %13 : vector<512x128xf32>
    %cst_7 = arith.constant 0.797884583 : f32
    %15 = vector.broadcast %cst_7 : f32 to vector<512x128xf32>
    %16 = arith.mulf %15, %14 : vector<512x128xf32>
    %17 = math.tanh %16 : vector<512x128xf32>
    %cst_8 = arith.constant 1.000000e+00 : f32
    %18 = vector.broadcast %cst_8 : f32 to vector<512x128xf32>
    %19 = arith.addf %18, %17 : vector<512x128xf32>
    %20 = arith.mulf %9, %19 : vector<512x128xf32>
    %21 = arith.truncf %20 : vector<512x128xf32> to vector<512x128xbf16>
    %c0_9 = arith.constant 0 : index
    %c0_10 = arith.constant 0 : index
    %22 = vector.load %arg4[%c0_9, %c0_10] : memref<128x128xf32, #tpu.memory_space<vmem>>, vector<128x128xf32>
    %23 = arith.truncf %22 : vector<128x128xf32> to vector<128x128xbf16>
    %cst_11 = arith.constant dense<0.000000e+00> : vector<512x128xf32>
    %24 = tpu.matmul %21, %23, %cst_11 {dimension_numbers = #tpu.dot_dimension_numbers<[1], [0], [0], [1], [0, 0, 1, 1], [], []>} : vector<512x128xbf16>, vector<128x128xbf16>, vector<512x128xf32> -> vector<512x128xf32>
    %c0_12 = arith.constant 0 : index
    %c0_13 = arith.constant 0 : index
    %25 = vector.load %arg5[%c0_12, %c0_13] : memref<1x128xf32, #tpu.memory_space<vmem>>, vector<1x128xf32>
    %26 = vector.broadcast %25 : vector<1x128xf32> to vector<512x128xf32>
    %27 = arith.addf %24, %26 : vector<512x128xf32>
    %c0_14 = arith.constant 0 : index
    %c0_15 = arith.constant 0 : index
    %28 = vector.load %arg6[%c0_14, %c0_15] : memref<512x128xf32, #tpu.memory_space<vmem>>, vector<512x128xf32>
    tpu.vector_store %arg6[%c0_14, %c0_15], %27 {strides = array<i32>} : memref<512x128xf32, #tpu.memory_space<vmem>>, vector<512x128xf32>,
    return
  }
  func.func @transform_0(%arg0: i32) -> (i32, i32) {
    %c0_i32 = arith.constant 0 : i32
    %c0_i32_0 = arith.constant 0 : i32
    return %arg0, %c0_i32 : i32, i32
  }
  func.func @transform_1(%arg0: i32) -> (i32, i32) {
    %c0_i32 = arith.constant 0 : i32
    %c0_i32_0 = arith.constant 0 : i32
    %c0_i32_1 = arith.constant 0 : i32
    return %c0_i32, %c0_i32_0 : i32, i32
  }
  func.func @transform_2(%arg0: i32) -> (i32, i32) {
    %c0_i32 = arith.constant 0 : i32
    %c0_i32_0 = arith.constant 0 : i32
    %c0_i32_1 = arith.constant 0 : i32
    return %c0_i32, %c0_i32_0 : i32, i32
  }
  func.func @transform_3(%arg0: i32) -> (i32, i32) {
    %c0_i32 = arith.constant 0 : i32
    %c0_i32_0 = arith.constant 0 : i32
    %c0_i32_1 = arith.constant 0 : i32
    return %c0_i32, %c0_i32_0 : i32, i32
  }
  func.func @transform_4(%arg0: i32) -> (i32, i32) {
    %c0_i32 = arith.constant 0 : i32
    %c0_i32_0 = arith.constant 0 : i32
    %c0_i32_1 = arith.constant 0 : i32
    return %c0_i32, %c0_i32_0 : i32, i32
  }
  func.func @transform_5(%arg0: i32) -> (i32, i32) {
    %c0_i32 = arith.constant 0 : i32
    %c0_i32_0 = arith.constant 0 : i32
    return %arg0, %c0_i32 : i32, i32
  }
}

</mosaic_0001>

<bundles_post_ra>
// kernel: fno3d_forward.8
= control target key start
LH: loop header
LB: loop body
LE: loop exit
PB: predicated region body
PF: predicated region fallthrough
CT: control target
= control target key end

     0   :  { %s895_s12 = smov 0   ;;  %s1168_s0 = inlined_call_operand.vmem [shape: f32[1024,128], index: 0, kind: input, shape index: {}]   ;;  %s1169_s1 = inlined_call_operand.vmem [shape: f32[128,128], index: 1, kind: input, shape index: {}]   ;;  %s1170_s2 = inlined_call_operand.vmem [shape: f32[1,128], index: 2, kind: input, shape index: {}]   ;;  %s1171_s3 = inlined_call_operand.vmem [shape: f32[1024,128], index: 3, kind: output, shape index: {}]  }
   0x1 LB: > { %s711_s13 = sadd.s32 4294967295, %s873_s12   ;;  %p715_p0 = scmp.ge.s32.totalorder %s873_s12, 1  ;;  %s873_s12 = sphi %s895_s12, %s13_s12  }
   0x2   : > { %p138_p1 = scmp.lt.s32.totalorder %s873_s12, 3 }
   0x4   : > { %p139_p2 = pnand %p715_p0, %p138_p1 }
   0x5   : > { %s716_s20 = sshll.u32 (!%p139_p2), %s711_s13, 6 }
   0x6   : > { %142 = sbr.rel (%p139_p2) target bundleno = 304 (0x130), region = 32  ;;  %p163_p3 = scmp.lt.s32.totalorder (!%p139_p2), %s716_s20, 127 }
   0xb   : > { %v285_v0 = vld [vmem:[%s1169_s1 + $0x70] sm:$0xff]  ;;  %v286_v1 = vld [vmem:[%s1169_s1 + $0x78] sm:$0xff]  ;;  %v283_v2 = vld [vmem:[%s1169_s1 + $0x60] sm:$0xff]  ;;  %s1173_s20 = smov (!%p163_p3, %s716_s20), 127 }
   0xc   : > { %v294_v3 = vpack.c.bf16 %v286_v1, %v285_v0  ;;  %v284_v4 = vld [vmem:[%s1169_s1 + $0x68] sm:$0xff]  ;;  %v281_v6 = vld [vmem:[%s1169_s1 + $0x50] sm:$0xff]  ;;  %v282_v7 = vld [vmem:[%s1169_s1 + $0x58] sm:$0xff]  ;;  %s717_s27 = sshll.u32 %s1173_s20, 3 }
   0xd   : > { %v293_v5 = vpack.c.bf16 %v284_v4, %v283_v2  ;;  %v292_v8 = vpack.c.bf16 %v282_v7, %v281_v6  ;;  %v279_v9 = vld [vmem:[%s1169_s1 + $0x40] sm:$0xff]  ;;  %v280_v10 = vld [vmem:[%s1169_s1 + $0x48] sm:$0xff]  ;;  %s935_s7 = scalar_lea.vmem %s1168_s0, %s717_s27  ;;  %v277_v18 = vld [vmem:[%s1169_s1 + $0x30] sm:$0xff]  ;;  %s1035_s4 = scalar_lea.vmem %s1171_s3, %s717_s27 }
   0xe   : > { %763 = vmatprep.subr.bf16.mxu0 %v294_v3  ;;  %843 = vmatprep.subr.bf16.mxu1 %v294_v3  ;;  %v175_v11 = vld [vmem:[%s935_s7] sm:$0xff]  ;;  %v176_v12 = vld [vmem:[%s935_s7 + $0x8] sm:$0xff]  ;;  %v291_v16 = vpack.c.bf16 %v280_v10, %v279_v9  ;;  %v278_v19 = vld [vmem:[%s1169_s1 + $0x38] sm:$0xff] }
   0xf   : > { %764 = vmatpush3.bf16.msra.mxu0 %v294_v3  ;;  %851 = vmatpush3.bf16.msra.mxu1 %v294_v3  ;;  %v207_v13 = vld [vmem:[%s935_s7 + $0x100] sm:$0xff]  ;;  %v239_v14 = vpack.c.bf16 %v176_v12, %v175_v11  ;;  %v208_v15 = vld [vmem:[%s935_s7 + $0x108] sm:$0xff]  ;;  %v290_v20 = vpack.c.bf16 %v278_v19, %v277_v18  ;;  %v273_v24 = vld [vmem:[%s1169_s1 + $0x10] sm:$0xff] }
  0x10   : > { %765 = vmatprep.subr.bf16.mxu0 %v293_v5  ;;  %844 = vmatprep.subr.bf16.mxu1 %v293_v5  ;;  %v255_v17 = vpack.c.bf16 %v208_v15, %v207_v13  ;;  %v275_v21 = vld [vmem:[%s1169_s1 + $0x20] sm:$0xff]  ;;  %v276_v22 = vld [vmem:[%s1169_s1 + $0x28] sm:$0xff]  ;;  %v274_v25 = vld [vmem:[%s1169_s1 + $0x18] sm:$0xff] }
  0x11   : > { %779 = vmatprep.mubr.bf16.mxu0 %v239_v14  ;;  %v289_v23 = vpack.c.bf16 %v276_v22, %v275_v21  ;;  %v288_v26 = vpack.c.bf16 %v274_v25, %v273_v24  ;;  %v271_v27 = vld [vmem:[%s1169_s1] sm:$0xff]  ;;  %v272_v28 = vld [vmem:[%s1169_s1 + $0x8] sm:$0xff]  ;;  %v177_v30 = vld [vmem:[%s935_s7 + $0x10] sm:$0xff] }
  0x12   : > { %811 = vmatprep.mubr.bf16.mxu1 %v255_v17  ;;  %v287_v29 = vpack.c.bf16 %v272_v28, %v271_v27  ;;  %v178_v31 = vld [vmem:[%s935_s7 + $0x18] sm:$0xff]  ;;  %v209_v32 = vld [vmem:[%s935_s7 + $0x110] sm:$0xff]  ;;  %v179_v34 = vld [vmem:[%s935_s7 + $0x20] sm:$0xff] }
  0x13   : > { %766 = vmatpush3.bf16.msra.mxu0 %v293_v5  ;;  %852 = vmatpush3.bf16.msra.mxu1 %v293_v5  ;;  %v210_v33 = vld [vmem:[%s935_s7 + $0x118] sm:$0xff]  ;;  %v180_v35 = vld [vmem:[%s935_s7 + $0x28] sm:$0xff]  ;;  %v211_v36 = vld [vmem:[%s935_s7 + $0x120] sm:$0xff]  ;;  %v240_v38 = vpack.c.bf16 %v178_v31, %v177_v30 }
  0x14   : > { %767 = vmatprep.subr.bf16.mxu0 %v292_v8  ;;  %845 = vmatprep.subr.bf16.mxu1 %v292_v8  ;;  %v212_v37 = vld [vmem:[%s935_s7 + $0x128] sm:$0xff]  ;;  %v256_v39 = vpack.c.bf16 %v210_v33, %v209_v32  ;;  %v241_v40 = vpack.c.bf16 %v180_v35, %v179_v34  ;;  %v181_v42 = vld [vmem:[%s935_s7 + $0x30] sm:$0xff]  ;;  %v182_v43 = vld [vmem:[%s935_s7 + $0x38] sm:$0xff] }
  0x15   : > { %v257_v41 = vpack.c.bf16 %v212_v37, %v211_v36  ;;  %v213_v44 = vld [vmem:[%s935_s7 + $0x130] sm:$0xff]  ;;  %v214_v45 = vld [vmem:[%s935_s7 + $0x138] sm:$0xff]  ;;  %v183_v46 = vld [vmem:[%s935_s7 + $0x40] sm:$0xff]  ;;  %v242_v50 = vpack.c.bf16 %v182_v43, %v181_v42 }
  0x16   : > { %v184_v47 = vld [vmem:[%s935_s7 + $0x48] sm:$0xff]  ;;  %v215_v48 = vld [vmem:[%s935_s7 + $0x140] sm:$0xff]  ;;  %v258_v51 = vpack.c.bf16 %v214_v45, %v213_v44  ;;  %v185_v54 = vld [vmem:[%s935_s7 + $0x50] sm:$0xff] }
  0x17   : > { %768 = vmatpush3.bf16.msra.mxu0 %v292_v8  ;;  %853 = vmatpush3.bf16.msra.mxu1 %v292_v8  ;;  %v216_v49 = vld [vmem:[%s935_s7 + $0x148] sm:$0xff]  ;;  %v243_v52 = vpack.c.bf16 %v184_v47, %v183_v46  ;;  %v186_v55 = vld [vmem:[%s935_s7 + $0x58] sm:$0xff]  ;;  %v217_v56 = vld [vmem:[%s935_s7 + $0x150] sm:$0xff] }
  0x18   : > { %769 = vmatprep.subr.bf16.mxu0 %v291_v16  ;;  %846 = vmatprep.subr.bf16.mxu1 %v291_v16  ;;  %v259_v53 = vpack.c.bf16 %v216_v49, %v215_v48  ;;  %v218_v57 = vld [vmem:[%s935_s7 + $0x158] sm:$0xff]  ;;  %v187_v58 = vld [vmem:[%s935_s7 + $0x60] sm:$0xff]  ;;  %v188_v59 = vld [vmem:[%s935_s7 + $0x68] sm:$0xff]  ;;  %v244_v62 = vpack.c.bf16 %v186_v55, %v185_v54 }
  0x19   : > { %v219_v60 = vld [vmem:[%s935_s7 + $0x160] sm:$0xff]  ;;  %v220_v61 = vld [vmem:[%s935_s7 + $0x168] sm:$0xff]  ;;  %v260_v63 = vpack.c.bf16 %v218_v57, %v217_v56  ;;  %v245_v0 = vpack.c.bf16 %v188_v59, %v187_v58  ;;  %v189_v2 = vld [vmem:[%s935_s7 + $0x70] sm:$0xff] }
  0x1a   : > { %v261_v1 = vpack.c.bf16 %v220_v61, %v219_v60  ;;  %v190_v3 = vld [vmem:[%s935_s7 + $0x78] sm:$0xff]  ;;  %v221_v4 = vld [vmem:[%s935_s7 + $0x170] sm:$0xff]  ;;  %v191_v6 = vld [vmem:[%s935_s7 + $0x80] sm:$0xff] }
  0x1b   : > { %770 = vmatpush3.bf16.msra.mxu0 %v291_v16  ;;  %854 = vmatpush3.bf16.msra.mxu1 %v291_v16  ;;  %v222_v5 = vld [vmem:[%s935_s7 + $0x178] sm:$0xff]  ;;  %v192_v7 = vld [vmem:[%s935_s7 + $0x88] sm:$0xff]  ;;  %v223_v8 = vld [vmem:[%s935_s7 + $0x180] sm:$0xff]  ;;  %v246_v10 = vpack.c.bf16 %v190_v3, %v189_v2 }
  0x1c   : > { %771 = vmatprep.subr.bf16.mxu0 %v290_v20  ;;  %847 = vmatprep.subr.bf16.mxu1 %v290_v20  ;;  %v224_v9 = vld [vmem:[%s935_s7 + $0x188] sm:$0xff]  ;;  %v262_v11 = vpack.c.bf16 %v222_v5, %v221_v4  ;;  %v247_v12 = vpack.c.bf16 %v192_v7, %v191_v6  ;;  %v193_v14 = vld [vmem:[%s935_s7 + $0x90] sm:$0xff]  ;;  %v194_v15 = vld [vmem:[%s935_s7 + $0x98] sm:$0xff] }
  0x1d   : > { %v263_v13 = vpack.c.bf16 %v224_v9, %v223_v8  ;;  %v225_v16 = vld [vmem:[%s935_s7 + $0x190] sm:$0xff]  ;;  %v226_v17 = vld [vmem:[%s935_s7 + $0x198] sm:$0xff]  ;;  %v195_v18 = vld [vmem:[%s935_s7 + $0xa0] sm:$0xff]  ;;  %v248_v22 = vpack.c.bf16 %v194_v15, %v193_v14 }
  0x1e   : > { %v196_v19 = vld [vmem:[%s935_s7 + $0xa8] sm:$0xff]  ;;  %v198_v27 = vld [vmem:[%s935_s7 + $0xb8] sm:$0xff]  ;;  %v229_v28 = vld [vmem:[%s935_s7 + $0x1b0] sm:$0xff] }
  0x1f   : > { %772 = vmatpush3.bf16.msra.mxu0 %v290_v20  ;;  %855 = vmatpush3.bf16.msra.mxu1 %v290_v20  ;;  %v227_v20 = vld [vmem:[%s935_s7 + $0x1a0] sm:$0xff]  ;;  %v228_v21 = vld [vmem:[%s935_s7 + $0x1a8] sm:$0xff]  ;;  %v249_v24 = vpack.c.bf16 %v196_v19, %v195_v18 }
  0x20   : > { %773 = vmatprep.subr.bf16.mxu0 %v289_v23  ;;  %848 = vmatprep.subr.bf16.mxu1 %v289_v23  ;;  %v265_v25 = vpack.c.bf16 %v228_v21, %v227_v20  ;;  %v199_v30 = vld [vmem:[%s935_s7 + $0xc0] sm:$0xff]  ;;  %v200_v31 = vld [vmem:[%s935_s7 + $0xc8] sm:$0xff] }
  0x21   : > { %v231_v32 = vld [vmem:[%s935_s7 + $0x1c0] sm:$0xff]  ;;  %v232_v33 = vld [vmem:[%s935_s7 + $0x1c8] sm:$0xff]  ;;  %v251_v36 = vpack.c.bf16 %v200_v31, %v199_v30 }
  0x22   : > { %v267_v37 = vpack.c.bf16 %v232_v33, %v231_v32  ;;  %v203_v42 = vld [vmem:[%s935_s7 + $0xe0] sm:$0xff]  ;;  %v204_v43 = vld [vmem:[%s935_s7 + $0xe8] sm:$0xff] }
  0x23   : > { %774 = vmatpush3.bf16.msra.mxu0 %v289_v23  ;;  %856 = vmatpush3.bf16.msra.mxu1 %v289_v23  ;;  %v264_v23 = vpack.c.bf16 %v226_v17, %v225_v16  ;;  %v235_v44 = vld [vmem:[%s935_s7 + $0x1e0] sm:$0xff]  ;;  %v236_v45 = vld [vmem:[%s935_s7 + $0x1e8] sm:$0xff]  ;;  %v253_v48 = vpack.c.bf16 %v204_v43, %v203_v42 }
  0x24   : > { %775 = vmatprep.subr.bf16.mxu0 %v288_v26  ;;  %849 = vmatprep.subr.bf16.mxu1 %v288_v26  ;;  %v269_v49 = vpack.c.bf16 %v236_v45, %v235_v44  ;;  %v1028_v56 = vld [vmem:[%s1170_s2] ss:$0 sm:$0xff] }
  0x27   : > { %776 = vmatpush3.bf16.msra.mxu0 %v288_v26  ;;  %857 = vmatpush3.bf16.msra.mxu1 %v288_v26  ;;  %v197_v26 = vld [vmem:[%s935_s7 + $0xb0] sm:$0xff] }
  0x28   : > { %777 = vmatprep.subr.bf16.mxu0 %v287_v29  ;;  %850 = vmatprep.subr.bf16.mxu1 %v287_v29  ;;  %v250_v34 = vpack.c.bf16 %v198_v27, %v197_v26 }
  0x2b   : > { %778 = vmatpush3.bf16.msra.mxu0 %v287_v29  ;;  %858 = vmatpush3.bf16.msra.mxu1 %v287_v29  ;;  %v230_v29 = vld [vmem:[%s935_s7 + $0x1b8] sm:$0xff] }
  0x2c   : > { %v266_v35 = vpack.c.bf16 %v230_v29, %v229_v28 }
  0x2e   : > { %780 = vmatmul.mubr.bf16.vlgmr.msra.gmra.mxu0 %v240_v38  ;;  %812 = vmatmul.mubr.bf16.vlgmr.msra.gmra.mxu1 %v256_v39  ;;  %v201_v38 = vld [vmem:[%s935_s7 + $0xd0] sm:$0xff]  ;;  %v202_v39 = vld [vmem:[%s935_s7 + $0xd8] sm:$0xff] }
  0x2f   : > { %783 = vmatprep.mubr.bf16.mxu0 %v241_v40  ;;  %815 = vmatprep.mubr.bf16.mxu1 %v257_v41  ;;  %v233_v40 = vld [vmem:[%s935_s7 + $0x1d0] sm:$0xff]  ;;  %v234_v41 = vld [vmem:[%s935_s7 + $0x1d8] sm:$0xff]  ;;  %v252_v46 = vpack.c.bf16 %v202_v39, %v201_v38 }
  0x30   : > { %v268_v47 = vpack.c.bf16 %v234_v41, %v233_v40 }
  0x36   : > { %784 = vmatmul.mubr.bf16.gmra.mxu0 %v242_v50  ;;  %816 = vmatmul.mubr.bf16.gmra.mxu1 %v258_v51  ;;  %v205_v50 = vld [vmem:[%s935_s7 + $0xf0] sm:$0xff]  ;;  %v206_v51 = vld [vmem:[%s935_s7 + $0xf8] sm:$0xff] }
  0x37   : > { %787 = vmatprep.mubr.bf16.mxu0 %v243_v52  ;;  %819 = vmatprep.mubr.bf16.mxu1 %v259_v53  ;;  %v237_v52 = vld [vmem:[%s935_s7 + $0x1f0] sm:$0xff]  ;;  %v238_v53 = vld [vmem:[%s935_s7 + $0x1f8] sm:$0xff]  ;;  %v254_v54 = vpack.c.bf16 %v206_v51, %v205_v50 }
  0x38   : > { %v270_v55 = vpack.c.bf16 %v238_v53, %v237_v52 }
  0x3e   : > { %788 = vmatmul.mubr.bf16.gmra.mxu0 %v244_v62  ;;  %820 = vmatmul.mubr.bf16.gmra.mxu1 %v260_v63 }
  0x3f   : > { %791 = vmatprep.mubr.bf16.mxu0 %v245_v0  ;;  %823 = vmatprep.mubr.bf16.mxu1 %v261_v1 }
  0x46   : > { %792 = vmatmul.mubr.bf16.gmra.mxu0 %v246_v10  ;;  %824 = vmatmul.mubr.bf16.gmra.mxu1 %v262_v11 }
  0x47   : > { %795 = vmatprep.mubr.bf16.mxu0 %v247_v12  ;;  %827 = vmatprep.mubr.bf16.mxu1 %v263_v13 }
  0x4e   : > { %796 = vmatmul.mubr.bf16.gmra.mxu0 %v248_v22  ;;  %828 = vmatmul.mubr.bf16.gmra.mxu1 %v264_v23 }
  0x4f   : > { %799 = vmatprep.mubr.bf16.mxu0 %v249_v24  ;;  %831 = vmatprep.mubr.bf16.mxu1 %v265_v25 }
  0x56   : > { %800 = vmatmul.mubr.bf16.gmra.mxu0 %v250_v34  ;;  %832 = vmatmul.mubr.bf16.gmra.mxu1 %v266_v35 }
  0x57   : > { %803 = vmatprep.mubr.bf16.mxu0 %v251_v36  ;;  %835 = vmatprep.mubr.bf16.mxu1 %v267_v37 }
  0x5e   : > { %804 = vmatmul.mubr.bf16.gmra.mxu0 %v252_v46  ;;  %836 = vmatmul.mubr.bf16.gmra.mxu1 %v268_v47 }
  0x5f   : > { %807 = vmatprep.mubr.bf16.mxu0 %v253_v48  ;;  %839 = vmatprep.mubr.bf16.mxu1 %v269_v49 }
  0x66   : > { %808 = vmatmul.mubr.bf16.gmra.mxu0 %v254_v54  ;;  %840 = vmatmul.mubr.bf16.gmra.mxu1 %v270_v55 }
  0xee   : > { %v781_v57 = vpop.f32.mrf.mxu0  ;;  %v813_v58 = vpop.f32.mrf.mxu1 }
  0xef   : > { %v345_v59 = vadd.f32 %v781_v57, %v1028_v56  ;;  %v473_v60 = vadd.f32 %v813_v58, %v1028_v56 }
  0xf0   : > { %v336_v61 = vpop.f32.mrf.mxu0  ;;  %v464_v62 = vpop.f32.mrf.mxu1 }
  0xf1   : > { %593 = vst [vmem:[%s1035_s4 + $0x10] sm:$0xff] %v345_v59  ;;  %625 = vst [vmem:[%s1035_s4 + $0x110] sm:$0xff] %v473_v60  ;;  %v337_v63 = vadd.f32 %v1028_v56, %v336_v61  ;;  %v465_v0 = vadd.f32 %v1028_v56, %v464_v62 }
  0xf2   : > { %v782_v1 = vpop.f32.mrf.mxu0  ;;  %v814_v2 = vpop.f32.mrf.mxu1 }
  0xf3   : > { %591 = vst [vmem:[%s1035_s4] sm:$0xff] %v337_v63  ;;  %623 = vst [vmem:[%s1035_s4 + $0x100] sm:$0xff] %v465_v0  ;;  %v348_v3 = vadd.f32 %v782_v1, %v1028_v56  ;;  %v476_v4 = vadd.f32 %v814_v2, %v1028_v56 }
  0xf4   : > { %v339_v5 = vpop.f32.mrf.mxu0  ;;  %v467_v6 = vpop.f32.mrf.mxu1 }
  0xf5   : > { %594 = vst [vmem:[%s1035_s4 + $0x18] sm:$0xff] %v348_v3  ;;  %626 = vst [vmem:[%s1035_s4 + $0x118] sm:$0xff] %v476_v4  ;;  %v340_v7 = vadd.f32 %v1028_v56, %v339_v5  ;;  %v468_v8 = vadd.f32 %v1028_v56, %v467_v6 }
  0xf6   : > { %v785_v9 = vpop.f32.mrf.mxu0  ;;  %v817_v10 = vpop.f32.mrf.mxu1 }
  0xf7   : > { %592 = vst [vmem:[%s1035_s4 + $0x8] sm:$0xff] %v340_v7  ;;  %624 = vst [vmem:[%s1035_s4 + $0x108] sm:$0xff] %v468_v8  ;;  %v361_v11 = vadd.f32 %v785_v9, %v1028_v56  ;;  %v489_v12 = vadd.f32 %v817_v10, %v1028_v56 }
  0xf8   : > { %v352_v13 = vpop.f32.mrf.mxu0  ;;  %v480_v14 = vpop.f32.mrf.mxu1 }
  0xf9   : > { %597 = vst [vmem:[%s1035_s4 + $0x30] sm:$0xff] %v361_v11  ;;  %629 = vst [vmem:[%s1035_s4 + $0x130] sm:$0xff] %v489_v12  ;;  %v353_v15 = vadd.f32 %v1028_v56, %v352_v13  ;;  %v481_v16 = vadd.f32 %v1028_v56, %v480_v14 }
  0xfa   : > { %v786_v17 = vpop.f32.mrf.mxu0  ;;  %v818_v18 = vpop.f32.mrf.mxu1 }
  0xfb   : > { %595 = vst [vmem:[%s1035_s4 + $0x20] sm:$0xff] %v353_v15  ;;  %627 = vst [vmem:[%s1035_s4 + $0x120] sm:$0xff] %v481_v16  ;;  %v364_v19 = vadd.f32 %v786_v17, %v1028_v56  ;;  %v492_v20 = vadd.f32 %v818_v18, %v1028_v56 }
  0xfc   : > { %v355_v21 = vpop.f32.mrf.mxu0  ;;  %v483_v22 = vpop.f32.mrf.mxu1 }
  0xfd   : > { %598 = vst [vmem:[%s1035_s4 + $0x38] sm:$0xff] %v364_v19  ;;  %630 = vst [vmem:[%s1035_s4 + $0x138] sm:$0xff] %v492_v20  ;;  %v356_v23 = vadd.f32 %v1028_v56, %v355_v21  ;;  %v484_v24 = vadd.f32 %v1028_v56, %v483_v22 }
  0xfe   : > { %v789_v25 = vpop.f32.mrf.mxu0  ;;  %v821_v26 = vpop.f32.mrf.mxu1 }
  0xff   : > { %596 = vst [vmem:[%s1035_s4 + $0x28] sm:$0xff] %v356_v23  ;;  %628 = vst [vmem:[%s1035_s4 + $0x128] sm:$0xff] %v484_v24  ;;  %v377_v27 = vadd.f32 %v789_v25, %v1028_v56  ;;  %v505_v28 = vadd.f32 %v821_v26, %v1028_v56 }
 0x100   : > { %v368_v29 = vpop.f32.mrf.mxu0  ;;  %v496_v30 = vpop.f32.mrf.mxu1 }
 0x101   : > { %601 = vst [vmem:[%s1035_s4 + $0x50] sm:$0xff] %v377_v27  ;;  %633 = vst [vmem:[%s1035_s4 + $0x150] sm:$0xff] %v505_v28  ;;  %v369_v31 = vadd.f32 %v1028_v56, %v368_v29  ;;  %v497_v32 = vadd.f32 %v1028_v56, %v496_v30 }
 0x102   : > { %v790_v33 = vpop.f32.mrf.mxu0  ;;  %v822_v34 = vpop.f32.mrf.mxu1 }
 0x103   : > { %599 = vst [vmem:[%s1035_s4 + $0x40] sm:$0xff] %v369_v31  ;;  %631 = vst [vmem:[%s1035_s4 + $0x140] sm:$0xff] %v497_v32  ;;  %v380_v35 = vadd.f32 %v790_v33, %v1028_v56  ;;  %v508_v36 = vadd.f32 %v822_v34, %v1028_v56 }
 0x104   : > { %v371_v37 = vpop.f32.mrf.mxu0  ;;  %v499_v38 = vpop.f32.mrf.mxu1 }
 0x105   : > { %602 = vst [vmem:[%s1035_s4 + $0x58] sm:$0xff] %v380_v35  ;;  %634 = vst [vmem:[%s1035_s4 + $0x158] sm:$0xff] %v508_v36  ;;  %v372_v39 = vadd.f32 %v1028_v56, %v371_v37  ;;  %v500_v40 = vadd.f32 %v1028_v56, %v499_v38 }
 0x106   : > { %v793_v41 = vpop.f32.mrf.mxu0  ;;  %v825_v42 = vpop.f32.mrf.mxu1 }
 0x107   : > { %600 = vst [vmem:[%s1035_s4 + $0x48] sm:$0xff] %v372_v39  ;;  %632 = vst [vmem:[%s1035_s4 + $0x148] sm:$0xff] %v500_v40  ;;  %v393_v43 = vadd.f32 %v793_v41, %v1028_v56  ;;  %v521_v44 = vadd.f32 %v825_v42, %v1028_v56 }
 0x108   : > { %v384_v45 = vpop.f32.mrf.mxu0  ;;  %v512_v46 = vpop.f32.mrf.mxu1 }
 0x109   : > { %605 = vst [vmem:[%s1035_s4 + $0x70] sm:$0xff] %v393_v43  ;;  %637 = vst [vmem:[%s1035_s4 + $0x170] sm:$0xff] %v521_v44  ;;  %v385_v47 = vadd.f32 %v1028_v56, %v384_v45  ;;  %v513_v48 = vadd.f32 %v1028_v56, %v512_v46 }
 0x10a   : > { %v794_v49 = vpop.f32.mrf.mxu0  ;;  %v826_v50 = vpop.f32.mrf.mxu1 }
 0x10b   : > { %603 = vst [vmem:[%s1035_s4 + $0x60] sm:$0xff] %v385_v47  ;;  %635 = vst [vmem:[%s1035_s4 + $0x160] sm:$0xff] %v513_v48  ;;  %v396_v51 = vadd.f32 %v794_v49, %v1028_v56  ;;  %v524_v52 = vadd.f32 %v826_v50, %v1028_v56 }
 0x10c   : > { %v387_v53 = vpop.f32.mrf.mxu0  ;;  %v515_v54 = vpop.f32.mrf.mxu1 }
 0x10d   : > { %606 = vst [vmem:[%s1035_s4 + $0x78] sm:$0xff] %v396_v51  ;;  %638 = vst [vmem:[%s1035_s4 + $0x178] sm:$0xff] %v524_v52  ;;  %v388_v55 = vadd.f32 %v1028_v56, %v387_v53  ;;  %v516_v57 = vadd.f32 %v1028_v56, %v515_v54 }
 0x10e   : > { %v797_v58 = vpop.f32.mrf.mxu0  ;;  %v829_v59 = vpop.f32.mrf.mxu1 }
 0x10f   : > { %604 = vst [vmem:[%s1035_s4 + $0x68] sm:$0xff] %v388_v55  ;;  %636 = vst [vmem:[%s1035_s4 + $0x168] sm:$0xff] %v516_v57  ;;  %v409_v60 = vadd.f32 %v797_v58, %v1028_v56  ;;  %v537_v61 = vadd.f32 %v829_v59, %v1028_v56 }
 0x110   : > { %v400_v62 = vpop.f32.mrf.mxu0  ;;  %v528_v63 = vpop.f32.mrf.mxu1 }
 0x111   : > { %609 = vst [vmem:[%s1035_s4 + $0x90] sm:$0xff] %v409_v60  ;;  %641 = vst [vmem:[%s1035_s4 + $0x190] sm:$0xff] %v537_v61  ;;  %v401_v0 = vadd.f32 %v1028_v56, %v400_v62  ;;  %v529_v1 = vadd.f32 %v1028_v56, %v528_v63 }
 0x112   : > { %v798_v2 = vpop.f32.mrf.mxu0  ;;  %v830_v3 = vpop.f32.mrf.mxu1 }
 0x113   : > { %607 = vst [vmem:[%s1035_s4 + $0x80] sm:$0xff] %v401_v0  ;;  %639 = vst [vmem:[%s1035_s4 + $0x180] sm:$0xff] %v529_v1  ;;  %v412_v4 = vadd.f32 %v798_v2, %v1028_v56  ;;  %v540_v5 = vadd.f32 %v830_v3, %v1028_v56 }
 0x114   : > { %v403_v6 = vpop.f32.mrf.mxu0  ;;  %v531_v7 = vpop.f32.mrf.mxu1 }
 0x115   : > { %610 = vst [vmem:[%s1035_s4 + $0x98] sm:$0xff] %v412_v4  ;;  %642 = vst [vmem:[%s1035_s4 + $0x198] sm:$0xff] %v540_v5  ;;  %v404_v8 = vadd.f32 %v1028_v56, %v403_v6  ;;  %v532_v9 = vadd.f32 %v1028_v56, %v531_v7 }
 0x116   : > { %v801_v10 = vpop.f32.mrf.mxu0  ;;  %v833_v11 = vpop.f32.mrf.mxu1 }
 0x117   : > { %608 = vst [vmem:[%s1035_s4 + $0x88] sm:$0xff] %v404_v8  ;;  %640 = vst [vmem:[%s1035_s4 + $0x188] sm:$0xff] %v532_v9  ;;  %v425_v12 = vadd.f32 %v801_v10, %v1028_v56  ;;  %v553_v13 = vadd.f32 %v833_v11, %v1028_v56 }
 0x118   : > { %v416_v14 = vpop.f32.mrf.mxu0  ;;  %v544_v15 = vpop.f32.mrf.mxu1 }
 0x119   : > { %613 = vst [vmem:[%s1035_s4 + $0xb0] sm:$0xff] %v425_v12  ;;  %645 = vst [vmem:[%s1035_s4 + $0x1b0] sm:$0xff] %v553_v13  ;;  %v417_v16 = vadd.f32 %v1028_v56, %v416_v14  ;;  %v545_v17 = vadd.f32 %v1028_v56, %v544_v15 }
 0x11a   : > { %v802_v18 = vpop.f32.mrf.mxu0  ;;  %v834_v19 = vpop.f32.mrf.mxu1 }
 0x11b   : > { %611 = vst [vmem:[%s1035_s4 + $0xa0] sm:$0xff] %v417_v16  ;;  %643 = vst [vmem:[%s1035_s4 + $0x1a0] sm:$0xff] %v545_v17  ;;  %v428_v20 = vadd.f32 %v802_v18, %v1028_v56  ;;  %v556_v21 = vadd.f32 %v834_v19, %v1028_v56 }
 0x11c   : > { %v419_v22 = vpop.f32.mrf.mxu0  ;;  %v547_v23 = vpop.f32.mrf.mxu1 }
 0x11d   : > { %614 = vst [vmem:[%s1035_s4 + $0xb8] sm:$0xff] %v428_v20  ;;  %646 = vst [vmem:[%s1035_s4 + $0x1b8] sm:$0xff] %v556_v21  ;;  %v420_v24 = vadd.f32 %v1028_v56, %v419_v22  ;;  %v548_v25 = vadd.f32 %v1028_v56, %v547_v23 }
 0x11e   : > { %v805_v26 = vpop.f32.mrf.mxu0  ;;  %v837_v27 = vpop.f32.mrf.mxu1 }
 0x11f   : > { %612 = vst [vmem:[%s1035_s4 + $0xa8] sm:$0xff] %v420_v24  ;;  %644 = vst [vmem:[%s1035_s4 + $0x1a8] sm:$0xff] %v548_v25  ;;  %v441_v28 = vadd.f32 %v805_v26, %v1028_v56  ;;  %v569_v29 = vadd.f32 %v837_v27, %v1028_v56 }
 0x120   : > { %v432_v30 = vpop.f32.mrf.mxu0  ;;  %v560_v31 = vpop.f32.mrf.mxu1 }
 0x121   : > { %617 = vst [vmem:[%s1035_s4 + $0xd0] sm:$0xff] %v441_v28  ;;  %649 = vst [vmem:[%s1035_s4 + $0x1d0] sm:$0xff] %v569_v29  ;;  %v433_v32 = vadd.f32 %v1028_v56, %v432_v30  ;;  %v561_v33 = vadd.f32 %v1028_v56, %v560_v31 }
 0x122   : > { %v806_v34 = vpop.f32.mrf.mxu0  ;;  %v838_v35 = vpop.f32.mrf.mxu1 }
 0x123   : > { %615 = vst [vmem:[%s1035_s4 + $0xc0] sm:$0xff] %v433_v32  ;;  %647 = vst [vmem:[%s1035_s4 + $0x1c0] sm:$0xff] %v561_v33  ;;  %v444_v36 = vadd.f32 %v806_v34, %v1028_v56  ;;  %v572_v37 = vadd.f32 %v838_v35, %v1028_v56 }
 0x124   : > { %v435_v38 = vpop.f32.mrf.mxu0  ;;  %v563_v39 = vpop.f32.mrf.mxu1 }
 0x125   : > { %618 = vst [vmem:[%s1035_s4 + $0xd8] sm:$0xff] %v444_v36  ;;  %650 = vst [vmem:[%s1035_s4 + $0x1d8] sm:$0xff] %v572_v37  ;;  %v436_v40 = vadd.f32 %v1028_v56, %v435_v38  ;;  %v564_v41 = vadd.f32 %v1028_v56, %v563_v39 }
 0x126   : > { %v809_v42 = vpop.f32.mrf.mxu0  ;;  %v841_v43 = vpop.f32.mrf.mxu1 }
 0x127   : > { %616 = vst [vmem:[%s1035_s4 + $0xc8] sm:$0xff] %v436_v40  ;;  %648 = vst [vmem:[%s1035_s4 + $0x1c8] sm:$0xff] %v564_v41  ;;  %v457_v44 = vadd.f32 %v809_v42, %v1028_v56  ;;  %v585_v45 = vadd.f32 %v841_v43, %v1028_v56 }
 0x128   : > { %v448_v46 = vpop.f32.mrf.mxu0  ;;  %v576_v47 = vpop.f32.mrf.mxu1 }
 0x129   : > { %621 = vst [vmem:[%s1035_s4 + $0xf0] sm:$0xff] %v457_v44  ;;  %653 = vst [vmem:[%s1035_s4 + $0x1f0] sm:$0xff] %v585_v45  ;;  %v449_v48 = vadd.f32 %v1028_v56, %v448_v46  ;;  %v577_v49 = vadd.f32 %v1028_v56, %v576_v47 }
 0x12a   : > { %v810_v50 = vpop.f32.mrf.mxu0  ;;  %v842_v51 = vpop.f32.mrf.mxu1 }
 0x12b   : > { %619 = vst [vmem:[%s1035_s4 + $0xe0] sm:$0xff] %v449_v48  ;;  %651 = vst [vmem:[%s1035_s4 + $0x1e0] sm:$0xff] %v577_v49  ;;  %v460_v52 = vadd.f32 %v810_v50, %v1028_v56  ;;  %v588_v53 = vadd.f32 %v842_v51, %v1028_v56 }
 0x12c   : > { %v451_v54 = vpop.f32.mrf.mxu0  ;;  %v579_v55 = vpop.f32.mrf.mxu1 }
 0x12d   : > { %622 = vst [vmem:[%s1035_s4 + $0xf8] sm:$0xff] %v460_v52  ;;  %654 = vst [vmem:[%s1035_s4 + $0x1f8] sm:$0xff] %v588_v53  ;;  %v452_v57 = vadd.f32 %v1028_v56, %v451_v54  ;;  %v580_v58 = vadd.f32 %v1028_v56, %v579_v55 }
 0x12f   : > { %620 = vst [vmem:[%s1035_s4 + $0xe8] sm:$0xff] %v452_v57  ;;  %652 = vst [vmem:[%s1035_s4 + $0x1e8] sm:$0xff] %v580_v58 }
 0x130 PF: > { %s13_s12 = sadd.s32 1, %s873_s12  }
 0x131   : > { %p10_p4 = scmp.ge.s32.totalorder %s13_s12, 4  }
 0x133   :  { %12 = sbr.rel (!%p10_p4) target bundleno = 1 (0x1), region = 62 }

// kernel: fno3d_forward.9
= control target key start
LH: loop header
LB: loop body
LE: loop exit
PB: predicated region body
PF: predicated region fallthrough
CT: control target
= control target key end

     0   :  { %s8633_s18 = smov 0   ;;  %s10096_s0 = inlined_call_operand.vmem [shape: f32[192,2,8], index: 0, kind: input, shape index: {}]   ;;  %s10097_s1 = inlined_call_operand.vmem [shape: f32[192,2,8], index: 1, kind: input, shape index: {}]   ;;  %s10098_s2 = inlined_call_operand.vmem [shape: f32[192,8,8], index: 2, kind: input, shape index: {}]   ;;  %s10099_s3 = inlined_call_operand.vmem [shape: f32[192,8,8], index: 3, kind: input, shape index: {}]   ;;  %s10100_s4 = inlined_call_operand.vmem [shape: f32[192,2,8], index: 4, kind: output, shape index: {0}]   ;;  %s10101_s5 = inlined_call_operand.vmem [shape: f32[192,2,8], index: 5, kind: output, shape index: {1}]  }
   0x1 LB: > { %s7796_s19 = sadd.s32 4294967295, %s8599_s18   ;;  %p7800_p0 = scmp.ge.s32.totalorder %s8599_s18, 1  ;;  %s8599_s18 = sphi %s8633_s18, %s16_s18  }
   0x2   : > { %p224_p1 = scmp.lt.s32.totalorder %s8599_s18, 7 }
   0x4   : > { %p225_p2 = pnand %p7800_p0, %p224_p1 }
   0x6   : > { %228 = sbr.rel (%p225_p2) target bundleno = 406 (0x196), region = 36 }
   0xb   : > { %s7801_s20 = sshll.u32 %s7796_s19, 5  ;;  %v10104_v0 = vmov 0.0   ;;  %vm8602_vm0 = vmmov 0   ;;  %vm436_vm1 = vcmask 64512   ;;  %vm7541_vm2 = vcmask 58368  }
   0xc   : > { %8103 = vmatprep.subr.mxu0 %v10104_v0  ;;  %8108 = vmatprep.subr.mxu1 %v10104_v0  ;;  %p273_p3 = scmp.lt.s32.totalorder %s7801_s20, 191 }
   0xd   : > { %8105 = vmatprep.mubr.msk.f32.mxu0 %vm8602_vm0, %v10104_v0  ;;  %8110 = vmatprep.mubr.msk.f32.mxu1 %vm8602_vm0, %v10104_v0 }
   0xe   : > { %s10340_s20 = smov (!%p273_p3, %s7801_s20), 191 }
   0xf   : > { %s8650_s21 = sshll.u32 %s10340_s20, 1  ;;  %s7806_s22 = sshll.u32 %s10340_s20, 3 }
  0x10   : > { %s8658_s25 = scalar_lea.vmem %s10098_s2, %s7806_s22  ;;  %s8670_s28 = scalar_lea.vmem %s10096_s0, %s8650_s21 }
  0x11   : > { %v8661_v1 = vld [vmem:[%s8658_s25] sm:$0xff]  ;;  %v8664_v2 = vld [vmem:[%s8658_s25 + $0x8] sm:$0xff]  ;;  %v8684_v5 = vld [vmem:[%s8658_s25 + $0x10] sm:$0xff]  ;;  %s9027_s6 = scalar_lea.vmem %s10099_s3, %s7806_s22  ;;  %s9042_s9 = scalar_lea.vmem %s10097_s1, %s8650_s21 }
  0x12   : > { %8104 = vmatpush3.msra.mxu0 %v8661_v1  ;;  %8109 = vmatpush3.msra.mxu1 %v8664_v2  ;;  %v8675_v3 = vld [vmem:[%s8670_s28] sm:$0x3]  ;;  %v8680_v4 = vld [vmem:[%s8670_s28 + $0x2] sm:$0x3]  ;;  %v8690_v6 = vld [vmem:[%s8658_s25 + $0x18] sm:$0xff]  ;;  %s9765_s12 = scalar_lea.vmem %s10100_s4, %s8650_s21  ;;  %s9964_s15 = scalar_lea.vmem %s10101_s5, %s8650_s21 }
  0x13   : > { %8106 = vmatmul.mubr.msk.f32.vlgmr.msra.gmra.mxu0 %vm436_vm1, %v8675_v3  ;;  %8113 = vmatprep.subr.mxu0 %v10104_v0  ;;  %v8693_v7 = vld [vmem:[%s8670_s28 + $0x4] sm:$0x3]  ;;  %v8698_v8 = vld [vmem:[%s8670_s28 + $0x6] sm:$0x3]  ;;  %v8708_v10 = vld [vmem:[%s8658_s25 + $0x28] sm:$0xff] }
  0x14   : > { %8111 = vmatmul.mubr.msk.f32.vlgmr.msra.gmra.mxu1 %vm436_vm1, %v8680_v4  ;;  %8118 = vmatprep.subr.mxu1 %v10104_v0  ;;  %v8705_v9 = vld [vmem:[%s8658_s25 + $0x20] sm:$0xff]  ;;  %v8717_v11 = vld [vmem:[%s8670_s28 + $0x8] sm:$0x3]  ;;  %v8722_v12 = vld [vmem:[%s8670_s28 + $0xa] sm:$0x3] }
  0x15   : > { %8114 = vmatpush3.msra.mxu0 %v8684_v5  ;;  %8119 = vmatpush3.msra.mxu1 %v8690_v6  ;;  %v8729_v13 = vld [vmem:[%s8658_s25 + $0x30] sm:$0xff]  ;;  %v8732_v14 = vld [vmem:[%s8658_s25 + $0x38] sm:$0xff]  ;;  %v8741_v15 = vld [vmem:[%s8670_s28 + $0xc] sm:$0x3] }
  0x16   : > { %8115 = vmatprep.mubr.msk.f32.mxu0 %vm8602_vm0, %v10104_v0  ;;  %8120 = vmatprep.mubr.msk.f32.mxu1 %vm8602_vm0, %v10104_v0  ;;  %v8746_v16 = vld [vmem:[%s8670_s28 + $0xe] sm:$0x3]  ;;  %v8753_v17 = vld [vmem:[%s8658_s25 + $0x40] sm:$0xff]  ;;  %v8765_v19 = vld [vmem:[%s8670_s28 + $0x10] sm:$0x3] }
  0x17   : > { %8116 = vmatmul.mubr.msk.f32.vlgmr.msra.gmra.mxu0 %vm436_vm1, %v8693_v7  ;;  %8123 = vmatprep.subr.mxu0 %v10104_v0  ;;  %v8756_v18 = vld [vmem:[%s8658_s25 + $0x48] sm:$0xff]  ;;  %v8770_v20 = vld [vmem:[%s8670_s28 + $0x12] sm:$0x3]  ;;  %v8780_v22 = vld [vmem:[%s8658_s25 + $0x58] sm:$0xff] }
  0x18   : > { %8121 = vmatmul.mubr.msk.f32.vlgmr.msra.gmra.mxu1 %vm436_vm1, %v8698_v8  ;;  %8128 = vmatprep.subr.mxu1 %v10104_v0  ;;  %v8777_v21 = vld [vmem:[%s8658_s25 + $0x50] sm:$0xff]  ;;  %v8801_v25 = vld [vmem:[%s8658_s25 + $0x60] sm:$0xff]  ;;  %v8804_v26 = vld [vmem:[%s8658_s25 + $0x68] sm:$0xff] }
  0x19   : > { %8124 = vmatpush3.msra.mxu0 %v8705_v9  ;;  %8129 = vmatpush3.msra.mxu1 %v8708_v10  ;;  %v8789_v23 = vld [vmem:[%s8670_s28 + $0x14] sm:$0x3]  ;;  %v8794_v24 = vld [vmem:[%s8670_s28 + $0x16] sm:$0x3]  ;;  %v8813_v27 = vld [vmem:[%s8670_s28 + $0x18] sm:$0x3] }
  0x1a   : > { %8125 = vmatprep.mubr.msk.f32.mxu0 %vm8602_vm0, %v10104_v0  ;;  %8130 = vmatprep.mubr.msk.f32.mxu1 %vm8602_vm0, %v10104_v0  ;;  %v8818_v28 = vld [vmem:[%s8670_s28 + $0x1a] sm:$0x3]  ;;  %v8825_v29 = vld [vmem:[%s8658_s25 + $0x70] sm:$0xff]  ;;  %v8837_v31 = vld [vmem:[%s8670_s28 + $0x1c] sm:$0x3] }
  0x1b   : > { %8126 = vmatmul.mubr.msk.f32.vlgmr.msra.gmra.mxu0 %vm436_vm1, %v8717_v11  ;;  %8133 = vmatprep.subr.mxu0 %v10104_v0  ;;  %10182 = vst [vmem:[#allocation2_spill] sm:$0xff] %v8825_v29  ;;  %v8828_v30 = vld [vmem:[%s8658_s25 + $0x78] sm:$0xff]  ;;  %10184 = vst [vmem:[#allocation4_spill] sm:$0xff] %v8837_v31  ;;  %v8849_v33 = vld [vmem:[%s8658_s25 + $0x80] sm:$0xff] }
  0x1c   : > { %8131 = vmatmul.mubr.msk.f32.vlgmr.msra.gmra.mxu1 %vm436_vm1, %v8722_v12  ;;  %8138 = vmatprep.subr.mxu1 %v10104_v0  ;;  %10183 = vst [vmem:[#allocation3_spill] sm:$0xff] %v8828_v30  ;;  %v8842_v32 = vld [vmem:[%s8670_s28 + $0x1e] sm:$0x3]  ;;  %10186 = vst [vmem:[#allocation6_spill] sm:$0xff] %v8849_v33  ;;  %v8852_v34 = vld [vmem:[%s8658_s25 + $0x88] sm:$0xff] }
  0x1d   : > { %8134 = vmatpush3.msra.mxu0 %v8729_v13  ;;  %8139 = vmatpush3.msra.mxu1 %v8732_v14  ;;  %10185 = vst [vmem:[#allocation5_spill] sm:$0xff] %v8842_v32  ;;  %10187 = vst [vmem:[#allocation7_spill] sm:$0xff] %v8852_v34  ;;  %v8861_v35 = vld [vmem:[%s8670_s28 + $0x20] sm:$0x3]  ;;  %v8866_v36 = vld [vmem:[%s8670_s28 + $0x22] sm:$0x3] }
  0x1e   : > { %8135 = vmatprep.mubr.msk.f32.mxu0 %vm8602_vm0, %v10104_v0  ;;  %8140 = vmatprep.mubr.msk.f32.mxu1 %vm8602_vm0, %v10104_v0  ;;  %10188 = vst [vmem:[#allocation8_spill] sm:$0xff] %v8861_v35  ;;  %10189 = vst [vmem:[#allocation9_spill] sm:$0xff] %v8866_v36  ;;  %v8873_v37 = vld [vmem:[%s8658_s25 + $0x90] sm:$0xff]  ;;  %v8876_v38 = vld [vmem:[%s8658_s25 + $0x98] sm:$0xff] }
  0x1f   : > { %8136 = vmatmul.mubr.msk.f32.vlgmr.msra.gmra.mxu0 %vm436_vm1, %v8741_v15  ;;  %8143 = vmatprep.subr.mxu0 %v10104_v0  ;;  %10190 = vst [vmem:[#allocation10_spill] sm:$0xff] %v8873_v37  ;;  %10191 = vst [vmem:[#allocation11_spill] sm:$0xff] %v8876_v38  ;;  %v8885_v39 = vld [vmem:[%s8670_s28 + $0x24] sm:$0x3]  ;;  %v8890_v40 = vld [vmem:[%s8670_s28 + $0x26] sm:$0x3] }
  0x20   : > { %8141 = vmatmul.mubr.msk.f32.vlgmr.msra.gmra.mxu1 %vm436_vm1, %v8746_v16  ;;  %8148 = vmatprep.subr.mxu1 %v10104_v0  ;;  %10192 = vst [vmem:[#allocation12_spill] sm:$0xff] %v8885_v39  ;;  %10193 = vst [vmem:[#allocation13_spill] sm:$0xff] %v8890_v40  ;;  %v8897_v41 = vld [vmem:[%s8658_s25 + $0xa0] sm:$0xff]  ;;  %v8900_v42 = vld [vmem:[%s8658_s25 + $0xa8] sm:$0xff] }
  0x21   : > { %8144 = vmatpush3.msra.mxu0 %v8753_v17  ;;  %8149 = vmatpush3.msra.mxu1 %v8756_v18  ;;  %10194 = vst [vmem:[#allocation14_spill] sm:$0xff] %v8897_v41  ;;  %10195 = vst [vmem:[#allocation15_spill] sm:$0xff] %v8900_v42  ;;  %v8909_v43 = vld [vmem:[%s8670_s28 + $0x28] sm:$0x3]  ;;  %v8914_v44 = vld [vmem:[%s8670_s28 + $0x2a] sm:$0x3] }
  0x22   : > { %8145 = vmatprep.mubr.msk.f32.mxu0 %vm8602_vm0, %v10104_v0  ;;  %8150 = vmatprep.mubr.msk.f32.mxu1 %vm8602_vm0, %v10104_v0  ;;  %10196 = vst [vmem:[#allocation16_spill] sm:$0xff] %v8909_v43  ;;  %10197 = vst [vmem:[#allocation17_spill] sm:$0xff] %v8914_v44  ;;  %v8921_v45 = vld [vmem:[%s8658_s25 + $0xb0] sm:$0xff]  ;;  %v8924_v46 = vld [vmem:[%s8658_s25 + $0xb8] sm:$0xff] }
  0x23   : > { %8146 = vmatmul.mubr.msk.f32.vlgmr.msra.gmra.mxu0 %vm436_vm1, %v8765_v19  ;;  %8153 = vmatprep.subr.mxu0 %v10104_v0  ;;  %10198 = vst [vmem:[#allocation18_spill] sm:$0xff] %v8921_v45  ;;  %10199 = vst [vmem:[#allocation19_spill] sm:$0xff] %v8924_v46  ;;  %v8933_v47 = vld [vmem:[%s8670_s28 + $0x2c] sm:$0x3]  ;;  %v8938_v48 = vld [vmem:[%s8670_s28 + $0x2e] sm:$0x3] }
  0x24   : > { %8151 = vmatmul.mubr.msk.f32.vlgmr.msra.gmra.mxu1 %vm436_vm1, %v8770_v20  ;;  %8158 = vmatprep.subr.mxu1 %v10104_v0  ;;  %10200 = vst [vmem:[#allocation20_spill] sm:$0xff] %v8933_v47  ;;  %10201 = vst [vmem:[#allocation21_spill] sm:$0xff] %v8938_v48  ;;  %v8945_v49 = vld [vmem:[%s8658_s25 + $0xc0] sm:$0xff]  ;;  %v8948_v50 = vld [vmem:[%s8658_s25 + $0xc8] sm:$0xff] }
  0x25   : > { %8154 = vmatpush3.msra.mxu0 %v8777_v21  ;;  %8159 = vmatpush3.msra.mxu1 %v8780_v22  ;;  %10202 = vst [vmem:[#allocation22_spill] sm:$0xff] %v8945_v49  ;;  %10203 = vst [vmem:[#allocation23_spill] sm:$0xff] %v8948_v50  ;;  %v8957_v51 = vld [vmem:[%s8670_s28 + $0x30] sm:$0x3]  ;;  %v8962_v52 = vld [vmem:[%s8670_s28 + $0x32] sm:$0x3] }
  0x26   : > { %8155 = vmatprep.mubr.msk.f32.mxu0 %vm8602_vm0, %v10104_v0  ;;  %8160 = vmatprep.mubr.msk.f32.mxu1 %vm8602_vm0, %v10104_v0  ;;  %10204 = vst [vmem:[#allocation24_spill] sm:$0xff] %v8957_v51  ;;  %10205 = vst [vmem:[#allocation25_spill] sm:$0xff] %v8962_v52  ;;  %v8969_v53 = vld [vmem:[%s8658_s25 + $0xd0] sm:$0xff]  ;;  %v8972_v54 = vld [vmem:[%s8658_s25 + $0xd8] sm:$0xff] }
  0x27   : > { %8156 = vmatmul.mubr.msk.f32.vlgmr.msra.gmra.mxu0 %vm436_vm1, %v8789_v23  ;;  %8163 = vmatprep.subr.mxu0 %v10104_v0  ;;  %10206 = vst [vmem:[#allocation26_spill] sm:$0xff] %v8969_v53  ;;  %10207 = vst [vmem:[#allocation27_spill] sm:$0xff] %v8972_v54  ;;  %v8981_v55 = vld [vmem:[%s8670_s28 + $0x34] sm:$0x3]  ;;  %v8986_v56 = vld [vmem:[%s8670_s28 + $0x36] sm:$0x3] }
  0x28   : > { %8161 = vmatmul.mubr.msk.f32.vlgmr.msra.gmra.mxu1 %vm436_vm1, %v8794_v24  ;;  %8168 = vmatprep.subr.mxu1 %v10104_v0  ;;  %10208 = vst [vmem:[#allocation28_spill] sm:$0xff] %v8981_v55  ;;  %10209 = vst [vmem:[#allocation29_spill] sm:$0xff] %v8986_v56  ;;  %v8993_v57 = vld [vmem:[%s8658_s25 + $0xe0] sm:$0xff]  ;;  %v8996_v58 = vld [vmem:[%s8658_s25 + $0xe8] sm:$0xff] }
  0x29   : > { %8164 = vmatpush3.msra.mxu0 %v8801_v25  ;;  %8169 = vmatpush3.msra.mxu1 %v8804_v26  ;;  %10210 = vst [vmem:[#allocation30_spill] sm:$0xff] %v8993_v57  ;;  %10211 = vst [vmem:[#allocation31_spill] sm:$0xff] %v8996_v58  ;;  %v9005_v59 = vld [vmem:[%s8670_s28 + $0x38] sm:$0x3]  ;;  %v9010_v60 = vld [vmem:[%s8670_s28 + $0x3a] sm:$0x3] }
  0x2a   : > { %8165 = vmatprep.mubr.msk.f32.mxu0 %vm8602_vm0, %v10104_v0  ;;  %8170 = vmatprep.mubr.msk.f32.mxu1 %vm8602_vm0, %v10104_v0  ;;  %10212 = vst [vmem:[#allocation32_spill] sm:$0xff] %v9005_v59  ;;  %10213 = vst [vmem:[#allocation33_spill] sm:$0xff] %v9010_v60  ;;  %v9017_v61 = vld [vmem:[%s8658_s25 + $0xf0] sm:$0xff]  ;;  %v9020_v62 = vld [vmem:[%s8658_s25 + $0xf8] sm:$0xff] }
  0x2b   : > { %8166 = vmatmul.mubr.msk.f32.vlgmr.msra.gmra.mxu0 %vm436_vm1, %v8813_v27  ;;  %8173 = vmatprep.subr.mxu0 %v10104_v0  ;;  %10214 = vst [vmem:[#allocation34_spill] sm:$0xff] %v9017_v61  ;;  %10215 = vst [vmem:[#allocation35_spill] sm:$0xff] %v9020_v62  ;;  %v9036_v63 = vld [vmem:[%s8670_s28 + $0x3c] sm:$0x3] }
  0x2c   : > { %8171 = vmatmul.mubr.msk.f32.vlgmr.msra.gmra.mxu1 %vm436_vm1, %v8818_v28  ;;  %8178 = vmatprep.subr.mxu1 %v10104_v0  ;;  %10216 = vst [vmem:[#allocation36_spill] sm:$0xff] %v9036_v63 }
  0x2d   : > { %8174 = vmatpush3.msra.mxu0 %v8825_v29  ;;  %8179 = vmatpush3.msra.mxu1 %v8828_v30  ;;  %v9249_v30 = vld [vmem:[%s9027_s6 + $0x88] sm:$0xff] }
  0x2e   : > { %8175 = vmatprep.mubr.msk.f32.mxu0 %vm8602_vm0, %v10104_v0  ;;  %8180 = vmatprep.mubr.msk.f32.mxu1 %vm8602_vm0, %v10104_v0  ;;  %10224 = vst [vmem:[#allocation43_spill] sm:$0xff] %v9249_v30 }
  0x2f   : > { %8176 = vmatmul.mubr.msk.f32.vlgmr.msra.gmra.mxu0 %vm436_vm1, %v8837_v31  ;;  %8183 = vmatprep.subr.mxu0 %v10104_v0  ;;  %v9246_v31 = vld [vmem:[%s9027_s6 + $0x80] sm:$0xff] }
  0x30   : > { %8181 = vmatmul.mubr.msk.f32.vlgmr.msra.gmra.mxu1 %vm436_vm1, %v8842_v32  ;;  %8188 = vmatprep.subr.mxu1 %v10104_v0  ;;  %v9239_v32 = vld [vmem:[%s9042_s9 + $0x1e] sm:$0x3]  ;;  %10223 = vst [vmem:[#allocation42_spill] sm:$0xff] %v9246_v31 }
  0x31   : > { %8184 = vmatpush3.msra.mxu0 %v8849_v33  ;;  %8189 = vmatpush3.msra.mxu1 %v8852_v34  ;;  %v9225_v34 = vld [vmem:[%s9027_s6 + $0x78] sm:$0xff]  ;;  %10222 = vst [vmem:[#allocation41_spill] sm:$0xff] %v9239_v32 }
  0x32   : > { %8185 = vmatprep.mubr.msk.f32.mxu0 %vm8602_vm0, %v10104_v0  ;;  %8190 = vmatprep.mubr.msk.f32.mxu1 %vm8602_vm0, %v10104_v0  ;;  %10220 = vst [vmem:[#allocation39_spill] sm:$0xff] %v9225_v34  ;;  %v9234_v33 = vld [vmem:[%s9042_s9 + $0x1c] sm:$0x3] }
  0x33   : > { %8186 = vmatmul.mubr.msk.f32.vlgmr.msra.gmra.mxu0 %vm436_vm1, %v8861_v35  ;;  %8193 = vmatprep.subr.mxu0 %v10104_v0  ;;  %v9222_v35 = vld [vmem:[%s9027_s6 + $0x70] sm:$0xff]  ;;  %10221 = vst [vmem:[#allocation40_spill] sm:$0xff] %v9234_v33 }
  0x34   : > { %8191 = vmatmul.mubr.msk.f32.vlgmr.msra.gmra.mxu1 %vm436_vm1, %v8866_v36  ;;  %8198 = vmatprep.subr.mxu1 %v10104_v0  ;;  %v9215_v36 = vld [vmem:[%s9042_s9 + $0x1a] sm:$0x3]  ;;  %10219 = vst [vmem:[#allocation38_spill] sm:$0xff] %v9222_v35 }
  0x35   : > { %8194 = vmatpush3.msra.mxu0 %v8873_v37  ;;  %8199 = vmatpush3.msra.mxu1 %v8876_v38  ;;  %v9201_v38 = vld [vmem:[%s9027_s6 + $0x68] sm:$0xff]  ;;  %v9210_v37 = vld [vmem:[%s9042_s9 + $0x18] sm:$0x3] }
  0x36   : > { %8195 = vmatprep.mubr.msk.f32.mxu0 %vm8602_vm0, %v10104_v0  ;;  %8200 = vmatprep.mubr.msk.f32.mxu1 %vm8602_vm0, %v10104_v0 }
  0x37   : > { %8196 = vmatmul.mubr.msk.f32.vlgmr.msra.gmra.mxu0 %vm436_vm1, %v8885_v39  ;;  %8203 = vmatprep.subr.mxu0 %v10104_v0  ;;  %v9198_v39 = vld [vmem:[%s9027_s6 + $0x60] sm:$0xff] }
  0x38   : > { %8201 = vmatmul.mubr.msk.f32.vlgmr.msra.gmra.mxu1 %vm436_vm1, %v8890_v40  ;;  %8208 = vmatprep.subr.mxu1 %v10104_v0  ;;  %v9191_v40 = vld [vmem:[%s9042_s9 + $0x16] sm:$0x3] }
  0x39   : > { %8204 = vmatpush3.msra.mxu0 %v8897_v41  ;;  %8209 = vmatpush3.msra.mxu1 %v8900_v42  ;;  %v9177_v42 = vld [vmem:[%s9027_s6 + $0x58] sm:$0xff]  ;;  %v9186_v41 = vld [vmem:[%s9042_s9 + $0x14] sm:$0x3] }
  0x3a   : > { %8205 = vmatprep.mubr.msk.f32.mxu0 %vm8602_vm0, %v10104_v0  ;;  %8210 = vmatprep.mubr.msk.f32.mxu1 %vm8602_vm0, %v10104_v0 }
  0x3b   : > { %8206 = vmatmul.mubr.msk.f32.vlgmr.msra.gmra.mxu0 %vm436_vm1, %v8909_v43  ;;  %8213 = vmatprep.subr.mxu0 %v10104_v0  ;;  %v9174_v43 = vld [vmem:[%s9027_s6 + $0x50] sm:$0xff] }
  0x3c   : > { %8211 = vmatmul.mubr.msk.f32.vlgmr.msra.gmra.mxu1 %vm436_vm1, %v8914_v44  ;;  %8218 = vmatprep.subr.mxu1 %v10104_v0  ;;  %v9167_v44 = vld [vmem:[%s9042_s9 + $0x12] sm:$0x3] }
  0x3d   : > { %8214 = vmatpush3.msra.mxu0 %v8921_v45  ;;  %8219 = vmatpush3.msra.mxu1 %v8924_v46  ;;  %v9153_v46 = vld [vmem:[%s9027_s6 + $0x48] sm:$0xff]  ;;  %v9162_v45 = vld [vmem:[%s9042_s9 + $0x10] sm:$0x3] }
  0x3e   : > { %8215 = vmatprep.mubr.msk.f32.mxu0 %vm8602_vm0, %v10104_v0  ;;  %8220 = vmatprep.mubr.msk.f32.mxu1 %vm8602_vm0, %v10104_v0 }
  0x3f   : > { %8216 = vmatmul.mubr.msk.f32.vlgmr.msra.gmra.mxu0 %vm436_vm1, %v8933_v47  ;;  %8223 = vmatprep.subr.mxu0 %v10104_v0  ;;  %v9150_v47 = vld [vmem:[%s9027_s6 + $0x40] sm:$0xff] }
  0x40   : > { %8221 = vmatmul.mubr.msk.f32.vlgmr.msra.gmra.mxu1 %vm436_vm1, %v8938_v48  ;;  %8228 = vmatprep.subr.mxu1 %v10104_v0  ;;  %v9143_v48 = vld [vmem:[%s9042_s9 + $0xe] sm:$0x3] }
  0x41   : > { %8224 = vmatpush3.msra.mxu0 %v8945_v49  ;;  %8229 = vmatpush3.msra.mxu1 %v8948_v50  ;;  %v9129_v50 = vld [vmem:[%s9027_s6 + $0x38] sm:$0xff]  ;;  %v9138_v49 = vld [vmem:[%s9042_s9 + $0xc] sm:$0x3] }
  0x42   : > { %8225 = vmatprep.mubr.msk.f32.mxu0 %vm8602_vm0, %v10104_v0  ;;  %8230 = vmatprep.mubr.msk.f32.mxu1 %vm8602_vm0, %v10104_v0 }
  0x43   : > { %8226 = vmatmul.mubr.msk.f32.vlgmr.msra.gmra.mxu0 %vm436_vm1, %v8957_v51  ;;  %8233 = vmatprep.subr.mxu0 %v10104_v0  ;;  %v9126_v51 = vld [vmem:[%s9027_s6 + $0x30] sm:$0xff] }
  0x44   : > { %8231 = vmatmul.mubr.msk.f32.vlgmr.msra.gmra.mxu1 %vm436_vm1, %v8962_v52  ;;  %8238 = vmatprep.subr.mxu1 %v10104_v0  ;;  %v9119_v52 = vld [vmem:[%s9042_s9 + $0xa] sm:$0x3] }
  0x45   : > { %8234 = vmatpush3.msra.mxu0 %v8969_v53  ;;  %8239 = vmatpush3.msra.mxu1 %v8972_v54  ;;  %v9105_v54 = vld [vmem:[%s9027_s6 + $0x28] sm:$0xff] }
  0x46   : > { %8235 = vmatprep.mubr.msk.f32.mxu0 %vm8602_vm0, %v10104_v0  ;;  %8240 = vmatprep.mubr.msk.f32.mxu1 %vm8602_vm0, %v10104_v0  ;;  %v9114_v53 = vld [vmem:[%s9042_s9 + $0x8] sm:$0x3] }
  0x47   : > { %8236 = vmatmul.mubr.msk.f32.vlgmr.msra.gmra.mxu0 %vm436_vm1, %v8981_v55  ;;  %8243 = vmatprep.subr.mxu0 %v10104_v0  ;;  %v9102_v55 = vld [vmem:[%s9027_s6 + $0x20] sm:$0xff] }
  0x48   : > { %8241 = vmatmul.mubr.msk.f32.vlgmr.msra.gmra.mxu1 %vm436_vm1, %v8986_v56  ;;  %8248 = vmatprep.subr.mxu1 %v10104_v0  ;;  %v9095_v56 = vld [vmem:[%s9042_s9 + $0x6] sm:$0x3] }
  0x49   : > { %8244 = vmatpush3.msra.mxu0 %v8993_v57  ;;  %8249 = vmatpush3.msra.mxu1 %v8996_v58  ;;  %v10218_v58 = vmov 0.0   ;;  %v9090_v57 = vld [vmem:[%s9042_s9 + $0x4] sm:$0x3] }
  0x4a   : > { %8245 = vmatprep.mubr.msk.f32.mxu0 %vm8602_vm0, %v10104_v0  ;;  %8250 = vmatprep.mubr.msk.f32.mxu1 %vm8602_vm0, %v10104_v0 }
  0x4b   : > { %8246 = vmatmul.mubr.msk.f32.vlgmr.msra.gmra.mxu0 %vm436_vm1, %v9005_v59  ;;  %8253 = vmatprep.subr.mxu0 %v10104_v0  ;;  %v9047_v59 = vld [vmem:[%s8670_s28 + $0x3e] sm:$0x3] }
  0x4c   : > { %8251 = vmatmul.mubr.msk.f32.vlgmr.msra.gmra.mxu1 %vm436_vm1, %v9010_v60  ;;  %8258 = vmatprep.subr.mxu1 %v10104_v0  ;;  %10217 = vst [vmem:[#allocation37_spill] sm:$0xff] %v9047_v59  ;;  %v9050_v60 = vld [vmem:[%s9027_s6] sm:$0xff]  ;;  %v9053_v0 = vld [vmem:[%s9027_s6 + $0x8] sm:$0xff] }
  0x4d   : > { %8254 = vmatpush3.msra.mxu0 %v9017_v61  ;;  %8259 = vmatpush3.msra.mxu1 %v9020_v62  ;;  %v9063_v62 = vld [vmem:[%s9042_s9] sm:$0x3]  ;;  %v9069_v61 = vld [vmem:[%s9042_s9 + $0x2] sm:$0x3]  ;;  %v5142_v29 = vadd.f32 %v9053_v0, %v8664_v2 }
  0x4e   : > { %8255 = vmatprep.mubr.msk.f32.mxu0 %vm8602_vm0, %v10218_v58  ;;  %8260 = vmatprep.mubr.msk.f32.mxu1 %vm8602_vm0, %v10218_v58 }
  0x4f   : > { %8256 = vmatmul.mubr.msk.f32.vlgmr.msra.gmra.mxu0 %vm436_vm1, %v9036_v63  ;;  %8263 = vmatprep.subr.mxu0 %v10218_v58  ;;  %v9078_v63 = vld [vmem:[%s9027_s6 + $0x10] sm:$0xff] }
  0x50   : > { %8261 = vmatmul.mubr.msk.f32.vlgmr.msra.gmra.mxu1 %vm436_vm1, %v9047_v59  ;;  %8268 = vmatprep.subr.mxu1 %v10218_v58  ;;  %v9081_v59 = vld [vmem:[%s9027_s6 + $0x18] sm:$0xff] }
  0x51   : > { %8264 = vmatpush3.msra.mxu0 %v9050_v60  ;;  %8269 = vmatpush3.msra.mxu1 %v9053_v0  ;;  %v5110_v0 = vadd.f32 %v9069_v61, %v8680_v4  ;;  %v5144_v2 = vadd.f32 %v9081_v59, %v8690_v6  ;;  %v5112_v4 = vadd.f32 %v9095_v56, %v8698_v8 }
  0x52   : > { %8265 = vmatprep.mubr.msk.f32.mxu0 %vm8602_vm0, %v10218_v58  ;;  %8270 = vmatprep.mubr.msk.f32.mxu1 %vm8602_vm0, %v10218_v58  ;;  %v5146_v6 = vadd.f32 %v9105_v54, %v8708_v10  ;;  %v5114_v8 = vadd.f32 %v9119_v52, %v8722_v12  ;;  %v5148_v10 = vadd.f32 %v9129_v50, %v8732_v14 }
  0x53   : > { %8266 = vmatmul.mubr.msk.f32.vlgmr.msra.gmra.mxu0 %vm436_vm1, %v9063_v62  ;;  %8273 = vmatprep.subr.mxu0 %v10218_v58  ;;  %v5116_v12 = vadd.f32 %v9143_v48, %v8746_v16  ;;  %v5150_v14 = vadd.f32 %v9153_v46, %v8756_v18  ;;  %v5118_v16 = vadd.f32 %v9167_v44, %v8770_v20 }
  0x54   : > { %8271 = vmatmul.mubr.msk.f32.vlgmr.msra.gmra.mxu1 %vm436_vm1, %v9069_v61  ;;  %8278 = vmatprep.subr.mxu1 %v10218_v58  ;;  %v5152_v18 = vadd.f32 %v9177_v42, %v8780_v22  ;;  %v5120_v20 = vadd.f32 %v9191_v40, %v8794_v24  ;;  %v5154_v22 = vadd.f32 %v9201_v38, %v8804_v26  ;;  %v10252_v26 = vld [vmem:[#allocation38_spill] sm:$0xff] }
  0x55   : > { %8274 = vmatpush3.msra.mxu0 %v9078_v63  ;;  %8279 = vmatpush3.msra.mxu1 %v9081_v59  ;;  %v5122_v24 = vadd.f32 %v9215_v36, %v8818_v28  ;;  %v10256_v28 = vld [vmem:[#allocation40_spill] sm:$0xff] }
  0x56   : > { %8275 = vmatprep.mubr.msk.f32.mxu0 %vm8602_vm0, %v10218_v58  ;;  %8280 = vmatprep.mubr.msk.f32.mxu1 %vm8602_vm0, %v10218_v58 }
  0x57   : > { %8276 = vmatmul.mubr.msk.f32.vlgmr.msra.gmra.mxu0 %vm436_vm1, %v9090_v57  ;;  %8283 = vmatprep.subr.mxu0 %v10218_v58 }
  0x58   : > { %8281 = vmatmul.mubr.msk.f32.vlgmr.msra.gmra.mxu1 %vm436_vm1, %v9095_v56  ;;  %8288 = vmatprep.subr.mxu1 %v10218_v58  ;;  %v10269_v56 = vld [vmem:[#allocation11_spill] sm:$0xff] }
  0x59   : > { %8284 = vmatpush3.msra.mxu0 %v9102_v55  ;;  %8289 = vmatpush3.msra.mxu1 %v9105_v54 }
  0x5a   : > { %8285 = vmatprep.mubr.msk.f32.mxu0 %vm8602_vm0, %v10218_v58  ;;  %8290 = vmatprep.mubr.msk.f32.mxu1 %vm8602_vm0, %v10218_v58 }
  0x5b   : > { %8286 = vmatmul.mubr.msk.f32.vlgmr.msra.gmra.mxu0 %vm436_vm1, %v9114_v53  ;;  %8293 = vmatprep.subr.mxu0 %v10218_v58 }
  0x5c   : > { %8291 = vmatmul.mubr.msk.f32.vlgmr.msra.gmra.mxu1 %vm436_vm1, %v9119_v52  ;;  %8298 = vmatprep.subr.mxu1 %v10218_v58 }
  0x5d   : > { %8294 = vmatpush3.msra.mxu0 %v9126_v51  ;;  %8299 = vmatpush3.msra.mxu1 %v9129_v50  ;;  %v10265_v50 = vld [vmem:[#allocation9_spill] sm:$0xff] }
  0x5e   : > { %8295 = vmatprep.mubr.msk.f32.mxu0 %vm8602_vm0, %v10218_v58  ;;  %8300 = vmatprep.mubr.msk.f32.mxu1 %vm8602_vm0, %v10218_v58 }
  0x5f   : > { %8296 = vmatmul.mubr.msk.f32.vlgmr.msra.gmra.mxu0 %vm436_vm1, %v9138_v49  ;;  %8303 = vmatprep.subr.mxu0 %v10218_v58 }
  0x60   : > { %8301 = vmatmul.mubr.msk.f32.vlgmr.msra.gmra.mxu1 %vm436_vm1, %v9143_v48  ;;  %8308 = vmatprep.subr.mxu1 %v10218_v58 }
  0x61   : > { %8304 = vmatpush3.msra.mxu0 %v9150_v47  ;;  %8309 = vmatpush3.msra.mxu1 %v9153_v46 }
  0x62   : > { %8305 = vmatprep.mubr.msk.f32.mxu0 %vm8602_vm0, %v10218_v58  ;;  %8310 = vmatprep.mubr.msk.f32.mxu1 %vm8602_vm0, %v10218_v58 }
  0x63   : > { %8306 = vmatmul.mubr.msk.f32.vlgmr.msra.gmra.mxu0 %vm436_vm1, %v9162_v45  ;;  %8313 = vmatprep.subr.mxu0 %v10218_v58 }
  0x64   : > { %8311 = vmatmul.mubr.msk.f32.vlgmr.msra.gmra.mxu1 %vm436_vm1, %v9167_v44  ;;  %8318 = vmatprep.subr.mxu1 %v10218_v58  ;;  %v10261_v44 = vld [vmem:[#allocation7_spill] sm:$0xff] }
  0x65   : > { %8314 = vmatpush3.msra.mxu0 %v9174_v43  ;;  %8319 = vmatpush3.msra.mxu1 %v9177_v42  ;;  %v10260_v42 = vld [vmem:[#allocation42_spill] sm:$0xff] }
  0x66   : > { %8315 = vmatprep.mubr.msk.f32.mxu0 %vm8602_vm0, %v10218_v58  ;;  %8320 = vmatprep.mubr.msk.f32.mxu1 %vm8602_vm0, %v10218_v58 }
  0x67   : > { %8316 = vmatmul.mubr.msk.f32.vlgmr.msra.gmra.mxu0 %vm436_vm1, %v9186_v41  ;;  %8323 = vmatprep.subr.mxu0 %v10218_v58 }
  0x68   : > { %8321 = vmatmul.mubr.msk.f32.vlgmr.msra.gmra.mxu1 %vm436_vm1, %v9191_v40  ;;  %8328 = vmatprep.subr.mxu1 %v10218_v58 }
  0x69   : > { %8324 = vmatpush3.msra.mxu0 %v9198_v39  ;;  %8329 = vmatpush3.msra.mxu1 %v9201_v38 }
  0x6a   : > { %8325 = vmatprep.mubr.msk.f32.mxu0 %vm8602_vm0, %v10218_v58  ;;  %8330 = vmatprep.mubr.msk.f32.mxu1 %vm8602_vm0, %v10218_v58 }
  0x6b   : > { %8326 = vmatmul.mubr.msk.f32.vlgmr.msra.gmra.mxu0 %vm436_vm1, %v9210_v37  ;;  %8333 = vmatprep.subr.mxu0 %v10218_v58 }
  0x6c   : > { %8331 = vmatmul.mubr.msk.f32.vlgmr.msra.gmra.mxu1 %vm436_vm1, %v9215_v36  ;;  %8338 = vmatprep.subr.mxu1 %v10218_v58 }
  0x6d   : > { %8334 = vmatpush3.msra.mxu0 %v9222_v35  ;;  %8339 = vmatpush3.msra.mxu1 %v9225_v34  ;;  %v9258_v34 = vld [vmem:[%s9042_s9 + $0x20] sm:$0x3]  ;;  %v9263_v35 = vld [vmem:[%s9042_s9 + $0x22] sm:$0x3] }
  0x6e   : > { %8335 = vmatprep.mubr.msk.f32.mxu0 %vm8602_vm0, %v10218_v58  ;;  %8340 = vmatprep.mubr.msk.f32.mxu1 %vm8602_vm0, %v10218_v58  ;;  %10225 = vst [vmem:[#allocation44_spill] sm:$0xff] %v9258_v34  ;;  %10226 = vst [vmem:[#allocation45_spill] sm:$0xff] %v9263_v35 }
  0x6f   : > { %8336 = vmatmul.mubr.msk.f32.vlgmr.msra.gmra.mxu0 %vm436_vm1, %v9234_v33  ;;  %8343 = vmatprep.subr.mxu0 %v10218_v58  ;;  %v9273_v33 = vld [vmem:[%s9027_s6 + $0x98] sm:$0xff] }
  0x70   : > { %8341 = vmatmul.mubr.msk.f32.vlgmr.msra.gmra.mxu1 %vm436_vm1, %v9239_v32  ;;  %8348 = vmatprep.subr.mxu1 %v10218_v58  ;;  %v9270_v32 = vld [vmem:[%s9027_s6 + $0x90] sm:$0xff]  ;;  %10228 = vst [vmem:[#allocation47_spill] sm:$0xff] %v9273_v33 }
  0x71   : > { %8344 = vmatpush3.msra.mxu0 %v9246_v31  ;;  %8349 = vmatpush3.msra.mxu1 %v9249_v30  ;;  %10227 = vst [vmem:[#allocation46_spill] sm:$0xff] %v9270_v32  ;;  %v9282_v30 = vld [vmem:[%s9042_s9 + $0x24] sm:$0x3]  ;;  %v9287_v31 = vld [vmem:[%s9042_s9 + $0x26] sm:$0x3] }
  0x72   : > { %8345 = vmatprep.mubr.msk.f32.mxu0 %vm8602_vm0, %v10218_v58  ;;  %8350 = vmatprep.mubr.msk.f32.mxu1 %vm8602_vm0, %v10218_v58  ;;  %10229 = vst [vmem:[#allocation48_spill] sm:$0xff] %v9282_v30  ;;  %10230 = vst [vmem:[#allocation49_spill] sm:$0xff] %v9287_v31 }
  0x73   : > { %8346 = vmatmul.mubr.msk.f32.vlgmr.msra.gmra.mxu0 %vm436_vm1, %v9258_v34  ;;  %8353 = vmatprep.subr.mxu0 %v10218_v58  ;;  %v9297_v34 = vld [vmem:[%s9027_s6 + $0xa8] sm:$0xff] }
  0x74   : > { %8351 = vmatmul.mubr.msk.f32.vlgmr.msra.gmra.mxu1 %vm436_vm1, %v9263_v35  ;;  %8358 = vmatprep.subr.mxu1 %v10218_v58  ;;  %v9294_v35 = vld [vmem:[%s9027_s6 + $0xa0] sm:$0xff]  ;;  %10232 = vst [vmem:[#allocation51_spill] sm:$0xff] %v9297_v34 }
  0x75   : > { %8354 = vmatpush3.msra.mxu0 %v9270_v32  ;;  %8359 = vmatpush3.msra.mxu1 %v9273_v33  ;;  %10231 = vst [vmem:[#allocation50_spill] sm:$0xff] %v9294_v35  ;;  %v9306_v33 = vld [vmem:[%s9042_s9 + $0x28] sm:$0x3]  ;;  %v9311_v32 = vld [vmem:[%s9042_s9 + $0x2a] sm:$0x3]  ;;  %v10264_v48 = vld [vmem:[#allocation44_spill] sm:$0xff] }
  0x76   : > { %8355 = vmatprep.mubr.msk.f32.mxu0 %vm8602_vm0, %v10218_v58  ;;  %8360 = vmatprep.mubr.msk.f32.mxu1 %vm8602_vm0, %v10218_v58  ;;  %10233 = vst [vmem:[#allocation52_spill] sm:$0xff] %v9306_v33  ;;  %10234 = vst [vmem:[#allocation53_spill] sm:$0xff] %v9311_v32 }
  0x77   : > { %8356 = vmatmul.mubr.msk.f32.vlgmr.msra.gmra.mxu0 %vm436_vm1, %v9282_v30  ;;  %8363 = vmatprep.subr.mxu0 %v10218_v58  ;;  %v9321_v30 = vld [vmem:[%s9027_s6 + $0xb8] sm:$0xff] }
  0x78   : > { %8361 = vmatmul.mubr.msk.f32.vlgmr.msra.gmra.mxu1 %vm436_vm1, %v9287_v31  ;;  %8368 = vmatprep.subr.mxu1 %v10218_v58  ;;  %v9318_v31 = vld [vmem:[%s9027_s6 + $0xb0] sm:$0xff]  ;;  %10236 = vst [vmem:[#allocation55_spill] sm:$0xff] %v9321_v30  ;;  %v10268_v54 = vld [vmem:[#allocation46_spill] sm:$0xff] }
  0x79   : > { %8364 = vmatpush3.msra.mxu0 %v9294_v35  ;;  %8369 = vmatpush3.msra.mxu1 %v9297_v34  ;;  %10235 = vst [vmem:[#allocation54_spill] sm:$0xff] %v9318_v31  ;;  %v9330_v34 = vld [vmem:[%s9042_s9 + $0x2c] sm:$0x3]  ;;  %v9335_v35 = vld [vmem:[%s9042_s9 + $0x2e] sm:$0x3]  ;;  %v10272_v61 = vld [vmem:[#allocation48_spill] sm:$0xff] }
  0x7a   : > { %8365 = vmatprep.mubr.msk.f32.mxu0 %vm8602_vm0, %v10218_v58  ;;  %8370 = vmatprep.mubr.msk.f32.mxu1 %vm8602_vm0, %v10218_v58  ;;  %10237 = vst [vmem:[#allocation56_spill] sm:$0xff] %v9330_v34  ;;  %10238 = vst [vmem:[#allocation57_spill] sm:$0xff] %v9335_v35 }
  0x7b   : > { %8366 = vmatmul.mubr.msk.f32.vlgmr.msra.gmra.mxu0 %vm436_vm1, %v9306_v33  ;;  %8373 = vmatprep.subr.mxu0 %v10218_v58  ;;  %v9345_v33 = vld [vmem:[%s9027_s6 + $0xc8] sm:$0xff] }
  0x7c   : > { %8371 = vmatmul.mubr.msk.f32.vlgmr.msra.gmra.mxu1 %vm436_vm1, %v9311_v32  ;;  %8378 = vmatprep.subr.mxu1 %v10218_v58  ;;  %v9342_v32 = vld [vmem:[%s9027_s6 + $0xc0] sm:$0xff]  ;;  %10240 = vst [vmem:[#allocation59_spill] sm:$0xff] %v9345_v33 }
  0x7d   : > { %8374 = vmatpush3.msra.mxu0 %v9318_v31  ;;  %8379 = vmatpush3.msra.mxu1 %v9321_v30  ;;  %10239 = vst [vmem:[#allocation58_spill] sm:$0xff] %v9342_v32  ;;  %v9354_v30 = vld [vmem:[%s9042_s9 + $0x30] sm:$0x3]  ;;  %v9359_v31 = vld [vmem:[%s9042_s9 + $0x32] sm:$0x3] }
  0x7e   : > { %8375 = vmatprep.mubr.msk.f32.mxu0 %vm8602_vm0, %v10218_v58  ;;  %8380 = vmatprep.mubr.msk.f32.mxu1 %vm8602_vm0, %v10218_v58  ;;  %10241 = vst [vmem:[#allocation60_spill] sm:$0xff] %v9354_v30  ;;  %10242 = vst [vmem:[#allocation61_spill] sm:$0xff] %v9359_v31 }
  0x7f   : > { %8376 = vmatmul.mubr.msk.f32.vlgmr.msra.gmra.mxu0 %vm436_vm1, %v9330_v34  ;;  %8383 = vmatprep.subr.mxu0 %v10218_v58  ;;  %v9369_v34 = vld [vmem:[%s9027_s6 + $0xd8] sm:$0xff] }
  0x80   : > { %8381 = vmatmul.mubr.msk.f32.vlgmr.msra.gmra.mxu1 %vm436_vm1, %v9335_v35  ;;  %8388 = vmatprep.subr.mxu1 %v10218_v58  ;;  %v9366_v35 = vld [vmem:[%s9027_s6 + $0xd0] sm:$0xff]  ;;  %10244 = vst [vmem:[#allocation63_spill] sm:$0xff] %v9369_v34 }
  0x81   : > { %8384 = vmatpush3.msra.mxu0 %v9342_v32  ;;  %8389 = vmatpush3.msra.mxu1 %v9345_v33  ;;  %10243 = vst [vmem:[#allocation62_spill] sm:$0xff] %v9366_v35  ;;  %v9378_v33 = vld [vmem:[%s9042_s9 + $0x34] sm:$0x3]  ;;  %v9383_v32 = vld [vmem:[%s9042_s9 + $0x36] sm:$0x3] }
  0x82   : > { %8385 = vmatprep.mubr.msk.f32.mxu0 %vm8602_vm0, %v10218_v58  ;;  %8390 = vmatprep.mubr.msk.f32.mxu1 %vm8602_vm0, %v10218_v58  ;;  %10245 = vst [vmem:[#allocation64_spill] sm:$0xff] %v9378_v33  ;;  %10246 = vst [vmem:[#allocation65_spill] sm:$0xff] %v9383_v32 }
  0x83   : > { %8386 = vmatmul.mubr.msk.f32.vlgmr.msra.gmra.mxu0 %vm436_vm1, %v9354_v30  ;;  %8393 = vmatprep.subr.mxu0 %v10218_v58  ;;  %v9393_v30 = vld [vmem:[%s9027_s6 + $0xe8] sm:$0xff] }
  0x84   : > { %8391 = vmatmul.mubr.msk.f32.vlgmr.msra.gmra.mxu1 %vm436_vm1, %v9359_v31  ;;  %8398 = vmatprep.subr.mxu1 %v10218_v58  ;;  %v9390_v31 = vld [vmem:[%s9027_s6 + $0xe0] sm:$0xff]  ;;  %10248 = vst [vmem:[#allocation67_spill] sm:$0xff] %v9393_v30 }
  0x85   : > { %8394 = vmatpush3.msra.mxu0 %v9366_v35  ;;  %8399 = vmatpush3.msra.mxu1 %v9369_v34  ;;  %10247 = vst [vmem:[#allocation66_spill] sm:$0xff] %v9390_v31  ;;  %v9402_v34 = vld [vmem:[%s9042_s9 + $0x38] sm:$0x3]  ;;  %v9407_v35 = vld [vmem:[%s9042_s9 + $0x3a] sm:$0x3] }
  0x86   : > { %8395 = vmatprep.mubr.msk.f32.mxu0 %vm8602_vm0, %v10218_v58  ;;  %8400 = vmatprep.mubr.msk.f32.mxu1 %vm8602_vm0, %v10218_v58  ;;  %10249 = vst [vmem:[#allocation68_spill] sm:$0xff] %v9402_v34  ;;  %10250 = vst [vmem:[#allocation69_spill] sm:$0xff] %v9407_v35 }
  0x87   : > { %8396 = vmatmul.mubr.msk.f32.vlgmr.msra.gmra.mxu0 %vm436_vm1, %v9378_v33  ;;  %8403 = vmatprep.subr.mxu0 %v10218_v58  ;;  %v9414_v33 = vld [vmem:[%s9027_s6 + $0xf0] sm:$0xff] }
  0x88   : > { %8401 = vmatmul.mubr.msk.f32.vlgmr.msra.gmra.mxu1 %vm436_vm1, %v9383_v32  ;;  %8408 = vmatprep.subr.mxu1 %v10218_v58  ;;  %v9417_v32 = vld [vmem:[%s9027_s6 + $0xf8] sm:$0xff] }
  0x89   : > { %8404 = vmatpush3.msra.mxu0 %v9390_v31  ;;  %8409 = vmatpush3.msra.mxu1 %v9393_v30  ;;  %v9426_v30 = vld [vmem:[%s9042_s9 + $0x3c] sm:$0x3]  ;;  %v5141_v31 = vadd.f32 %v9050_v60, %v8661_v1  ;;  %v5143_v1 = vadd.f32 %v9078_v63, %v8684_v5  ;;  %v5145_v5 = vadd.f32 %v9102_v55, %v8705_v9  ;;  %v10271_v60 = vld [vmem:[#allocation12_spill] sm:$0xff] }
  0x8a   : > { %8405 = vmatprep.mubr.msk.f32.mxu0 %vm8602_vm0, %v10218_v58  ;;  %8410 = vmatprep.mubr.msk.f32.mxu1 %vm8602_vm0, %v10218_v58  ;;  %v5147_v9 = vadd.f32 %v9126_v51, %v8729_v13  ;;  %v5149_v13 = vadd.f32 %v9150_v47, %v8753_v17  ;;  %v5151_v17 = vadd.f32 %v9174_v43, %v8777_v21  ;;  %v10263_v47 = vld [vmem:[#allocation8_spill] sm:$0xff]  ;;  %v10266_v51 = vld [vmem:[#allocation45_spill] sm:$0xff] }
  0x8b   : > { %8406 = vmatmul.mubr.msk.f32.vlgmr.msra.gmra.mxu0 %vm436_vm1, %v9402_v34  ;;  %8413 = vmatprep.subr.mxu0 %v10218_v58  ;;  %v9435_v34 = vld [vmem:[%s9042_s9 + $0x3e] sm:$0x3]  ;;  %v5153_v21 = vadd.f32 %v9198_v39, %v8801_v25  ;;  %v10251_v25 = vld [vmem:[#allocation2_spill] sm:$0xff]  ;;  %v5126_v52 = vadd.f32 %v10266_v51, %v10265_v50 }
  0x8c   : > { %8411 = vmatmul.mubr.msk.f32.vlgmr.msra.gmra.mxu1 %vm436_vm1, %v9407_v35  ;;  %8418 = vmatprep.subr.mxu1 %v10218_v58  ;;  %v5109_v35 = vadd.f32 %v9063_v62, %v8675_v3  ;;  %v5111_v3 = vadd.f32 %v9090_v57, %v8693_v7  ;;  %v5113_v7 = vadd.f32 %v9114_v53, %v8717_v11  ;;  %v10258_v39 = vld [vmem:[#allocation41_spill] sm:$0xff]  ;;  %v10267_v53 = vld [vmem:[#allocation10_spill] sm:$0xff]  ;;  %v10270_v57 = vld [vmem:[#allocation47_spill] sm:$0xff] }
  0x8d   : > { %8414 = vmatpush3.msra.mxu0 %v9414_v33  ;;  %8419 = vmatpush3.msra.mxu1 %v9417_v32  ;;  %v5115_v11 = vadd.f32 %v9138_v49, %v8741_v15  ;;  %v5117_v15 = vadd.f32 %v9162_v45, %v8765_v19  ;;  %v5119_v19 = vadd.f32 %v9186_v41, %v8789_v23  ;;  %v10259_v41 = vld [vmem:[#allocation6_spill] sm:$0xff]  ;;  %v10262_v45 = vld [vmem:[#allocation43_spill] sm:$0xff]  ;;  %v10273_v63 = vld [vmem:[#allocation13_spill] sm:$0xff] }
  0x8e   : > { %8415 = vmatprep.mubr.msk.f32.mxu0 %vm8602_vm0, %v10218_v58  ;;  %8420 = vmatprep.mubr.msk.f32.mxu1 %vm8602_vm0, %v10218_v58  ;;  %v5121_v23 = vadd.f32 %v9210_v37, %v8813_v27  ;;  %v10255_v27 = vld [vmem:[#allocation4_spill] sm:$0xff]  ;;  %v10257_v37 = vld [vmem:[#allocation5_spill] sm:$0xff]  ;;  %v5157_v43 = vadd.f32 %v10260_v42, %v10259_v41  ;;  %v5158_v46 = vadd.f32 %v10262_v45, %v10261_v44  ;;  %v10299_v42 = vld [vmem:[#allocation26_spill] sm:$0xff] }
  0x8f   : > { %8416 = vmatmul.mubr.msk.f32.vlgmr.msra.gmra.mxu0 %vm436_vm1, %v9426_v30  ;;  %8423 = vmatprep.subr.mxu0 %v10218_v58  ;;  %v5123_v36 = vadd.f32 %v10256_v28, %v10255_v27  ;;  %v5124_v40 = vadd.f32 %v10258_v39, %v10257_v37  ;;  %v5125_v49 = vadd.f32 %v10264_v48, %v10263_v47  ;;  %v10295_v28 = vld [vmem:[#allocation24_spill] sm:$0xff]  ;;  %v10297_v39 = vld [vmem:[#allocation25_spill] sm:$0xff]  ;;  %v10301_v45 = vld [vmem:[#allocation27_spill] sm:$0xff] }
  0x90   : > { %8421 = vmatmul.mubr.msk.f32.vlgmr.msra.gmra.mxu1 %vm436_vm1, %v9435_v34  ;;  %8428 = vmatprep.subr.mxu1 %v10218_v58  ;;  %v5159_v55 = vadd.f32 %v10268_v54, %v10267_v53  ;;  %v5160_v59 = vadd.f32 %v10270_v57, %v10269_v56  ;;  %v5127_v62 = vadd.f32 %v10272_v61, %v10271_v60  ;;  %v10303_v48 = vld [vmem:[#allocation28_spill] sm:$0xff]  ;;  %v10305_v51 = vld [vmem:[#allocation29_spill] sm:$0xff]  ;;  %v10307_v54 = vld [vmem:[#allocation30_spill] sm:$0xff] }
  0x91   : > { %8424 = vmatpush3.msra.mxu0 %v5141_v31  ;;  %8429 = vmatpush3.msra.mxu1 %v5142_v29  ;;  %v5155_v29 = vadd.f32 %v10252_v26, %v10251_v25  ;;  %v10253_v31 = vld [vmem:[#allocation3_spill] sm:$0xff]  ;;  %v10291_v26 = vld [vmem:[#allocation22_spill] sm:$0xff]  ;;  %v10311_v61 = vld [vmem:[#allocation32_spill] sm:$0xff] }
  0x92   : > { %8425 = vmatprep.mubr.msk.f32.mxu0 %vm8602_vm0, %v10218_v58  ;;  %8430 = vmatprep.mubr.msk.f32.mxu1 %vm8602_vm0, %v10218_v58  ;;  %v10309_v57 = vld [vmem:[#allocation31_spill] sm:$0xff] }
  0x93   : > { %8426 = vmatmul.mubr.msk.f32.vlgmr.msra.gmra.mxu0 %vm436_vm1, %v5109_v35  ;;  %8433 = vmatprep.subr.mxu0 %v10218_v58  ;;  %v10254_v35 = vld [vmem:[#allocation39_spill] sm:$0xff] }
  0x94   : > { %8431 = vmatmul.mubr.msk.f32.vlgmr.msra.gmra.mxu1 %vm436_vm1, %v5110_v0  ;;  %8438 = vmatprep.subr.mxu1 %v10218_v58  ;;  %v5156_v38 = vadd.f32 %v10254_v35, %v10253_v31  ;;  %v10274_v0 = vld [vmem:[#allocation49_spill] sm:$0xff]  ;;  %v10293_v35 = vld [vmem:[#allocation23_spill] sm:$0xff] }
  0x95   : > { %8434 = vmatpush3.msra.mxu0 %v5143_v1  ;;  %8439 = vmatpush3.msra.mxu1 %v5144_v2  ;;  %v5128_v1 = vadd.f32 %v10274_v0, %v10273_v63  ;;  %v10275_v2 = vld [vmem:[#allocation14_spill] sm:$0xff]  ;;  %v10313_v0 = vld [vmem:[#allocation33_spill] sm:$0xff] }
  0x96   : > { %8435 = vmatprep.mubr.msk.f32.mxu0 %vm8602_vm0, %v10218_v58  ;;  %8440 = vmatprep.mubr.msk.f32.mxu1 %vm8602_vm0, %v10218_v58 }
  0x97   : > { %8436 = vmatmul.mubr.msk.f32.vlgmr.msra.gmra.mxu0 %vm436_vm1, %v5111_v3  ;;  %8443 = vmatprep.subr.mxu0 %v10218_v58  ;;  %v10276_v3 = vld [vmem:[#allocation50_spill] sm:$0xff] }
  0x98   : > { %8441 = vmatmul.mubr.msk.f32.vlgmr.msra.gmra.mxu1 %vm436_vm1, %v5112_v4  ;;  %8448 = vmatprep.subr.mxu1 %v10218_v58  ;;  %v5161_v4 = vadd.f32 %v10276_v3, %v10275_v2  ;;  %v10315_v3 = vld [vmem:[#allocation34_spill] sm:$0xff] }
  0x99   : > { %8444 = vmatpush3.msra.mxu0 %v5145_v5  ;;  %8449 = vmatpush3.msra.mxu1 %v5146_v6  ;;  %v10277_v5 = vld [vmem:[#allocation15_spill] sm:$0xff] }
  0x9a   : > { %8445 = vmatprep.mubr.msk.f32.mxu0 %vm8602_vm0, %v10218_v58  ;;  %8450 = vmatprep.mubr.msk.f32.mxu1 %vm8602_vm0, %v10218_v58  ;;  %v10278_v6 = vld [vmem:[#allocation51_spill] sm:$0xff] }
  0x9b   : > { %8446 = vmatmul.mubr.msk.f32.vlgmr.msra.gmra.mxu0 %vm436_vm1, %v5113_v7  ;;  %8453 = vmatprep.subr.mxu0 %v10218_v58  ;;  %v5162_v7 = vadd.f32 %v10278_v6, %v10277_v5  ;;  %v10316_v5 = vld [vmem:[#allocation35_spill] sm:$0xff] }
  0x9c   : > { %8451 = vmatmul.mubr.msk.f32.vlgmr.msra.gmra.mxu1 %vm436_vm1, %v5114_v8  ;;  %8458 = vmatprep.subr.mxu1 %v10218_v58  ;;  %v10279_v8 = vld [vmem:[#allocation16_spill] sm:$0xff]  ;;  %v5172_v6 = vadd.f32 %v9417_v32, %v10316_v5 }
  0x9d   : > { %8454 = vmatpush3.msra.mxu0 %v5147_v9  ;;  %8459 = vmatpush3.msra.mxu1 %v5148_v10  ;;  %v10280_v9 = vld [vmem:[#allocation52_spill] sm:$0xff] }
  0x9e   : > { %8455 = vmatprep.mubr.msk.f32.mxu0 %vm8602_vm0, %v10218_v58  ;;  %8460 = vmatprep.mubr.msk.f32.mxu1 %vm8602_vm0, %v10218_v58  ;;  %v5129_v10 = vadd.f32 %v10280_v9, %v10279_v8  ;;  %v10318_v9 = vld [vmem:[#allocation37_spill] sm:$0xff] }
  0x9f   : > { %8456 = vmatmul.mubr.msk.f32.vlgmr.msra.gmra.mxu0 %vm436_vm1, %v5115_v11  ;;  %8463 = vmatprep.subr.mxu0 %v10218_v58  ;;  %v10281_v11 = vld [vmem:[#allocation17_spill] sm:$0xff] }
  0xa0   : > { %8461 = vmatmul.mubr.msk.f32.vlgmr.msra.gmra.mxu1 %vm436_vm1, %v5116_v12  ;;  %8468 = vmatprep.subr.mxu1 %v10218_v58  ;;  %v10282_v12 = vld [vmem:[#allocation53_spill] sm:$0xff] }
  0xa1   : > { %8464 = vmatpush3.msra.mxu0 %v5149_v13  ;;  %8469 = vmatpush3.msra.mxu1 %v5150_v14  ;;  %v5130_v13 = vadd.f32 %v10282_v12, %v10281_v11  ;;  %v10283_v14 = vld [vmem:[#allocation18_spill] sm:$0xff] }
  0xa2   : > { %8465 = vmatprep.mubr.msk.f32.mxu0 %vm8602_vm0, %v10218_v58  ;;  %8470 = vmatprep.mubr.msk.f32.mxu1 %vm8602_vm0, %v10218_v58 }
  0xa3   : > { %8466 = vmatmul.mubr.msk.f32.vlgmr.msra.gmra.mxu0 %vm436_vm1, %v5117_v15  ;;  %8473 = vmatprep.subr.mxu0 %v10218_v58  ;;  %v10284_v15 = vld [vmem:[#allocation54_spill] sm:$0xff] }
  0xa4   : > { %8471 = vmatmul.mubr.msk.f32.vlgmr.msra.gmra.mxu1 %vm436_vm1, %v5118_v16  ;;  %8478 = vmatprep.subr.mxu1 %v10218_v58  ;;  %v5163_v16 = vadd.f32 %v10284_v15, %v10283_v14 }
  0xa5   : > { %8474 = vmatpush3.msra.mxu0 %v5151_v17  ;;  %8479 = vmatpush3.msra.mxu1 %v5152_v18  ;;  %v10285_v17 = vld [vmem:[#allocation19_spill] sm:$0xff] }
  0xa6   : > { %8475 = vmatprep.mubr.msk.f32.mxu0 %vm8602_vm0, %v10218_v58  ;;  %8480 = vmatprep.mubr.msk.f32.mxu1 %vm8602_vm0, %v10218_v58  ;;  %v10286_v18 = vld [vmem:[#allocation55_spill] sm:$0xff] }
  0xa7   : > { %8476 = vmatmul.mubr.msk.f32.vlgmr.msra.gmra.mxu0 %vm436_vm1, %v5119_v19  ;;  %8483 = vmatprep.subr.mxu0 %v10218_v58  ;;  %v5164_v19 = vadd.f32 %v10286_v18, %v10285_v17 }
  0xa8   : > { %8481 = vmatmul.mubr.msk.f32.vlgmr.msra.gmra.mxu1 %vm436_vm1, %v5120_v20  ;;  %8488 = vmatprep.subr.mxu1 %v10218_v58  ;;  %v10287_v20 = vld [vmem:[#allocation20_spill] sm:$0xff] }
  0xa9   : > { %8484 = vmatpush3.msra.mxu0 %v5153_v21  ;;  %8489 = vmatpush3.msra.mxu1 %v5154_v22  ;;  %v10288_v21 = vld [vmem:[#allocation56_spill] sm:$0xff] }
  0xaa   : > { %8485 = vmatprep.mubr.msk.f32.mxu0 %vm8602_vm0, %v10218_v58  ;;  %8490 = vmatprep.mubr.msk.f32.mxu1 %vm8602_vm0, %v10218_v58  ;;  %v5131_v22 = vadd.f32 %v10288_v21, %v10287_v20 }
  0xab   : > { %8486 = vmatmul.mubr.msk.f32.vlgmr.msra.gmra.mxu0 %vm436_vm1, %v5121_v23  ;;  %8493 = vmatprep.subr.mxu0 %v10218_v58  ;;  %v10289_v23 = vld [vmem:[#allocation21_spill] sm:$0xff] }
  0xac   : > { %8491 = vmatmul.mubr.msk.f32.vlgmr.msra.gmra.mxu1 %vm436_vm1, %v5122_v24  ;;  %8498 = vmatprep.subr.mxu1 %v10218_v58  ;;  %v10290_v24 = vld [vmem:[#allocation57_spill] sm:$0xff] }
  0xad   : > { %8494 = vmatpush3.msra.mxu0 %v5155_v29  ;;  %8499 = vmatpush3.msra.mxu1 %v5156_v38  ;;  %v5132_v25 = vadd.f32 %v10290_v24, %v10289_v23  ;;  %v10292_v29 = vld [vmem:[#allocation58_spill] sm:$0xff]  ;;  %v10294_v38 = vld [vmem:[#allocation59_spill] sm:$0xff] }
  0xae   : > { %8495 = vmatprep.mubr.msk.f32.mxu0 %vm8602_vm0, %v10218_v58  ;;  %8500 = vmatprep.mubr.msk.f32.mxu1 %vm8602_vm0, %v10218_v58  ;;  %v5165_v31 = vadd.f32 %v10292_v29, %v10291_v26  ;;  %v5166_v27 = vadd.f32 %v10294_v38, %v10293_v35 }
  0xaf   : > { %8496 = vmatmul.mubr.msk.f32.vlgmr.msra.gmra.mxu0 %vm436_vm1, %v5123_v36  ;;  %8503 = vmatprep.subr.mxu0 %v10218_v58  ;;  %v10296_v36 = vld [vmem:[#allocation60_spill] sm:$0xff] }
  0xb0   : > { %8501 = vmatmul.mubr.msk.f32.vlgmr.msra.gmra.mxu1 %vm436_vm1, %v5124_v40  ;;  %8508 = vmatprep.subr.mxu1 %v10218_v58  ;;  %v5133_v37 = vadd.f32 %v10296_v36, %v10295_v28  ;;  %v10298_v40 = vld [vmem:[#allocation61_spill] sm:$0xff] }
  0xb1   : > { %8504 = vmatpush3.msra.mxu0 %v5157_v43  ;;  %8509 = vmatpush3.msra.mxu1 %v5158_v46  ;;  %v5134_v41 = vadd.f32 %v10298_v40, %v10297_v39  ;;  %v10300_v43 = vld [vmem:[#allocation62_spill] sm:$0xff]  ;;  %v10302_v46 = vld [vmem:[#allocation63_spill] sm:$0xff] }
  0xb2   : > { %8505 = vmatprep.mubr.msk.f32.mxu0 %vm8602_vm0, %v10218_v58  ;;  %8510 = vmatprep.mubr.msk.f32.mxu1 %vm8602_vm0, %v10218_v58  ;;  %v5167_v44 = vadd.f32 %v10300_v43, %v10299_v42  ;;  %v5168_v47 = vadd.f32 %v10302_v46, %v10301_v45 }
  0xb3   : > { %8506 = vmatmul.mubr.msk.f32.vlgmr.msra.gmra.mxu0 %vm436_vm1, %v5125_v49  ;;  %8513 = vmatprep.subr.mxu0 %v10218_v58  ;;  %v10304_v49 = vld [vmem:[#allocation64_spill] sm:$0xff] }
  0xb4   : > { %8511 = vmatmul.mubr.msk.f32.vlgmr.msra.gmra.mxu1 %vm436_vm1, %v5126_v52  ;;  %8518 = vmatprep.subr.mxu1 %v10218_v58  ;;  %v5135_v50 = vadd.f32 %v10304_v49, %v10303_v48  ;;  %v10306_v52 = vld [vmem:[#allocation65_spill] sm:$0xff] }
  0xb5   : > { %8514 = vmatpush3.msra.mxu0 %v5159_v55  ;;  %8519 = vmatpush3.msra.mxu1 %v5160_v59  ;;  %v5136_v53 = vadd.f32 %v10306_v52, %v10305_v51  ;;  %v10308_v55 = vld [vmem:[#allocation66_spill] sm:$0xff]  ;;  %v10310_v59 = vld [vmem:[#allocation67_spill] sm:$0xff] }
  0xb6   : > { %8515 = vmatprep.mubr.msk.f32.mxu0 %vm8602_vm0, %v10218_v58  ;;  %8520 = vmatprep.mubr.msk.f32.mxu1 %vm8602_vm0, %v10218_v58  ;;  %v5169_v56 = vadd.f32 %v10308_v55, %v10307_v54  ;;  %v5170_v60 = vadd.f32 %v10310_v59, %v10309_v57 }
  0xb7   : > { %8516 = vmatmul.mubr.msk.f32.vlgmr.msra.gmra.mxu0 %vm436_vm1, %v5127_v62  ;;  %8523 = vmatprep.subr.mxu0 %v10218_v58  ;;  %v10312_v62 = vld [vmem:[#allocation68_spill] sm:$0xff] }
  0xb8   : > { %8521 = vmatmul.mubr.msk.f32.vlgmr.msra.gmra.mxu1 %vm436_vm1, %v5128_v1  ;;  %8528 = vmatprep.subr.mxu1 %v10218_v58  ;;  %v5137_v63 = vadd.f32 %v10312_v62, %v10311_v61  ;;  %v10314_v1 = vld [vmem:[#allocation69_spill] sm:$0xff] }
  0xb9   : > { %8524 = vmatpush3.msra.mxu0 %v5161_v4  ;;  %8529 = vmatpush3.msra.mxu1 %v5162_v7  ;;  %v5138_v2 = vadd.f32 %v10314_v1, %v10313_v0  ;;  %v5171_v4 = vadd.f32 %v9414_v33, %v10315_v3  ;;  %v10317_v7 = vld [vmem:[#allocation36_spill] sm:$0xff]  ;;  %v5140_v33 = vadd.f32 %v9435_v34, %v10318_v9 }
  0xba   : > { %8525 = vmatprep.mubr.msk.f32.mxu0 %vm8602_vm0, %v10218_v58  ;;  %8530 = vmatprep.mubr.msk.f32.mxu1 %vm8602_vm0, %v10218_v58  ;;  %v5139_v8 = vadd.f32 %v9426_v30, %v10317_v7 }
  0xbb   : > { %8526 = vmatmul.mubr.msk.f32.vlgmr.msra.gmra.mxu0 %vm436_vm1, %v5129_v10  ;;  %8533 = vmatprep.subr.mxu0 %v10218_v58 }
  0xbc   : > { %8531 = vmatmul.mubr.msk.f32.vlgmr.msra.gmra.mxu1 %vm436_vm1, %v5130_v13  ;;  %8538 = vmatprep.subr.mxu1 %v10218_v58 }
  0xbd   : > { %8534 = vmatpush3.msra.mxu0 %v5163_v16  ;;  %8539 = vmatpush3.msra.mxu1 %v5164_v19 }
  0xbe   : > { %8535 = vmatprep.mubr.msk.f32.mxu0 %vm8602_vm0, %v10218_v58  ;;  %8540 = vmatprep.mubr.msk.f32.mxu1 %vm8602_vm0, %v10218_v58 }
  0xbf   : > { %8536 = vmatmul.mubr.msk.f32.vlgmr.msra.gmra.mxu0 %vm436_vm1, %v5131_v22  ;;  %8543 = vmatprep.subr.mxu0 %v10218_v58 }
  0xc0   : > { %8541 = vmatmul.mubr.msk.f32.vlgmr.msra.gmra.mxu1 %vm436_vm1, %v5132_v25  ;;  %8548 = vmatprep.subr.mxu1 %v10218_v58 }
  0xc1   : > { %8544 = vmatpush3.msra.mxu0 %v5165_v31  ;;  %8549 = vmatpush3.msra.mxu1 %v5166_v27 }
  0xc2   : > { %8545 = vmatprep.mubr.msk.f32.mxu0 %vm8602_vm0, %v10218_v58  ;;  %8550 = vmatprep.mubr.msk.f32.mxu1 %vm8602_vm0, %v10218_v58 }
  0xc3   : > { %8546 = vmatmul.mubr.msk.f32.vlgmr.msra.gmra.mxu0 %vm436_vm1, %v5133_v37  ;;  %8553 = vmatprep.subr.mxu0 %v10218_v58 }
  0xc4   : > { %8551 = vmatmul.mubr.msk.f32.vlgmr.msra.gmra.mxu1 %vm436_vm1, %v5134_v41  ;;  %8558 = vmatprep.subr.mxu1 %v10218_v58 }
  0xc5   : > { %8554 = vmatpush3.msra.mxu0 %v5167_v44  ;;  %8559 = vmatpush3.msra.mxu1 %v5168_v47 }
  0xc6   : > { %8555 = vmatprep.mubr.msk.f32.mxu0 %vm8602_vm0, %v10218_v58  ;;  %8560 = vmatprep.mubr.msk.f32.mxu1 %vm8602_vm0, %v10218_v58 }
  0xc7   : > { %8556 = vmatmul.mubr.msk.f32.vlgmr.msra.gmra.mxu0 %vm436_vm1, %v5135_v50  ;;  %8563 = vmatprep.subr.mxu0 %v10218_v58 }
  0xc8   : > { %8561 = vmatmul.mubr.msk.f32.vlgmr.msra.gmra.mxu1 %vm436_vm1, %v5136_v53  ;;  %8568 = vmatprep.subr.mxu1 %v10218_v58 }
  0xc9   : > { %8564 = vmatpush3.msra.mxu0 %v5169_v56  ;;  %8569 = vmatpush3.msra.mxu1 %v5170_v60 }
  0xca   : > { %8565 = vmatprep.mubr.msk.f32.mxu0 %vm8602_vm0, %v10218_v58  ;;  %8570 = vmatprep.mubr.msk.f32.mxu1 %vm8602_vm0, %v10218_v58 }
  0xcb   : > { %8566 = vmatmul.mubr.msk.f32.vlgmr.msra.gmra.mxu0 %vm436_vm1, %v5137_v63  ;;  %8573 = vmatprep.subr.mxu0 %v10218_v58 }
  0xcc   : > { %8571 = vmatmul.mubr.msk.f32.vlgmr.msra.gmra.mxu1 %vm436_vm1, %v5138_v2  ;;  %8578 = vmatprep.subr.mxu1 %v10218_v58 }
  0xcd   : > { %8574 = vmatpush3.msra.mxu0 %v5171_v4  ;;  %8579 = vmatpush3.msra.mxu1 %v5172_v6 }
  0xce   : > { %8575 = vmatprep.mubr.msk.f32.mxu0 %vm8602_vm0, %v10218_v58  ;;  %8580 = vmatprep.mubr.msk.f32.mxu1 %vm8602_vm0, %v10218_v58 }
  0xcf   : > { %8576 = vmatmul.mubr.msk.f32.vlgmr.msra.gmra.mxu0 %vm436_vm1, %v5139_v8 }
  0xd0   : > { %8581 = vmatmul.mubr.msk.f32.vlgmr.msra.gmra.mxu1 %vm436_vm1, %v5140_v33 }
  0xd3   : > { %v9697_v30 = vpop.f32.mrf.mxu0 }
  0xd4   : > { %v9699_v32 = vpop.f32.mrf.mxu1 }
  0xd5   : > { %v8107_v34 = vpop.f32.mrf.mxu0 }
  0xd6   : > { %v8112_v10 = vpop.f32.mrf.mxu1 }
  0xd7   : > { %v9701_v11 = vpop.f32.mrf.mxu0 }
  0xd8   : > { %v9703_v12 = vpop.f32.mrf.mxu1 }
  0xd9   : > { %v8117_v13 = vpop.f32.mrf.mxu0 }
  0xda   : > { %v8122_v14 = vpop.f32.mrf.mxu1 }
  0xdb   : > { %v9705_v15 = vpop.f32.mrf.mxu0 }
  0xdc   : > { %v9707_v16 = vpop.f32.mrf.mxu1 }
  0xdd   : > { %v8127_v58 = vpop.f32.mrf.mxu0 }
  0xde   : > { %v8132_v17 = vpop.f32.mrf.mxu1 }
  0xdf   : > { %v9709_v18 = vpop.f32.mrf.mxu0 }
  0xe0   : > { %v9711_v19 = vpop.f32.mrf.mxu1 }
  0xe1   : > { %v8137_v20 = vpop.f32.mrf.mxu0 }
  0xe2   : > { %v8142_v21 = vpop.f32.mrf.mxu1 }
  0xe3   : > { %v9713_v22 = vpop.f32.mrf.mxu0 }
  0xe4   : > { %v9715_v23 = vpop.f32.mrf.mxu1 }
  0xe5   : > { %v8147_v24 = vpop.f32.mrf.mxu0 }
  0xe6   : > { %v8152_v25 = vpop.f32.mrf.mxu1 }
  0xe7   : > { %v9717_v26 = vpop.f32.mrf.mxu0 }
  0xe8   : > { %v9719_v29 = vpop.f32.mrf.mxu1 }
  0xe9   : > { %v8157_v31 = vpop.f32.mrf.mxu0 }
  0xea   : > { %v8162_v35 = vpop.f32.mrf.mxu1 }
  0xeb   : > { %v9721_v38 = vpop.f32.mrf.mxu0 }
  0xec   : > { %v9723_v27 = vpop.f32.mrf.mxu1 }
  0xed   : > { %v8167_v28 = vpop.f32.mrf.mxu0 }
  0xee   : > { %v8172_v36 = vpop.f32.mrf.mxu1 }
  0xef   : > { %v9725_v37 = vpop.f32.mrf.mxu0 }
  0xf0   : > { %v9727_v39 = vpop.f32.mrf.mxu1 }
  0xf1   : > { %v8177_v40 = vpop.f32.mrf.mxu0 }
  0xf2   : > { %v8182_v41 = vpop.f32.mrf.mxu1 }
  0xf3   : > { %v9729_v42 = vpop.f32.mrf.mxu0 }
  0xf4   : > { %v9731_v43 = vpop.f32.mrf.mxu1 }
  0xf5   : > { %v8187_v44 = vpop.f32.mrf.mxu0 }
  0xf6   : > { %v8192_v45 = vpop.f32.mrf.mxu1 }
  0xf7   : > { %v9733_v46 = vpop.f32.mrf.mxu0 }
  0xf8   : > { %v9735_v47 = vpop.f32.mrf.mxu1 }
  0xf9   : > { %v8197_v48 = vpop.f32.mrf.mxu0 }
  0xfa   : > { %v8202_v49 = vpop.f32.mrf.mxu1 }
  0xfb   : > { %v9737_v50 = vpop.f32.mrf.mxu0 }
  0xfc   : > { %v9739_v51 = vpop.f32.mrf.mxu1 }
  0xfd   : > { %v8207_v52 = vpop.f32.mrf.mxu0 }
  0xfe   : > { %v8212_v53 = vpop.f32.mrf.mxu1 }
  0xff   : > { %v9741_v54 = vpop.f32.mrf.mxu0 }
 0x100   : > { %v9743_v55 = vpop.f32.mrf.mxu1 }
 0x101   : > { %v8217_v56 = vpop.f32.mrf.mxu0 }
 0x102   : > { %v8222_v57 = vpop.f32.mrf.mxu1 }
 0x103   : > { %v9745_v59 = vpop.f32.mrf.mxu0 }
 0x104   : > { %10319 = vst [vmem:[#allocation2_spill] sm:$0xff] %v9745_v59  ;;  %v9747_v60 = vpop.f32.mrf.mxu1 }
 0x105   : > { %v8227_v61 = vpop.f32.mrf.mxu0 }
 0x106   : > { %v8232_v62 = vpop.f32.mrf.mxu1 }
 0x107   : > { %v9749_v63 = vpop.f32.mrf.mxu0 }
 0x108   : > { %v9751_v0 = vpop.f32.mrf.mxu1 }
 0x109   : > { %v8237_v1 = vpop.f32.mrf.mxu0 }
 0x10a   : > { %v8242_v2 = vpop.f32.mrf.mxu1 }
 0x10b   : > { %v9753_v3 = vpop.f32.mrf.mxu0 }
 0x10c   : > { %10320 = vst [vmem:[#allocation38_spill] sm:$0xff] %v9753_v3  ;;  %v9755_v4 = vpop.f32.mrf.mxu1 }
 0x10d   : > { %v8247_v5 = vpop.f32.mrf.mxu0 }
 0x10e   : > { %v8252_v6 = vpop.f32.mrf.mxu1 }
 0x10f   : > { %v9757_v7 = vpop.f32.mrf.mxu0 }
 0x110   : > { %v9759_v8 = vpop.f32.mrf.mxu1 }
 0x111   : > { %v8257_v9 = vpop.f32.mrf.mxu0 }
 0x112   : > { %v8262_v33 = vpop.f32.mrf.mxu1 }
 0x113   : > { %v9767_v34 = vpop.f32.mrf.mxu0 }
 0x114   : > { %v7509_v10 = vsub.f32 %v9697_v30, %v9767_v34  ;;  %v9771_v13 = vpop.f32.mrf.mxu1 }
 0x115   : > { %v7510_v14 = vsub.f32 %v9699_v32, %v9771_v13  ;;  %v8267_v58 = vpop.f32.mrf.mxu0 }
 0x116   : > { %7542 = vst.msk [vmem:[%s9765_s12] sm:$0x3] %vm7541_vm2, %v7509_v10  ;;  %v8272_v17 = vpop.f32.mrf.mxu1 }
 0x117   : > { %7543 = vst.msk [vmem:[%s9765_s12 + $0x2] sm:$0x3] %vm7541_vm2, %v7510_v14  ;;  %v9779_v20 = vpop.f32.mrf.mxu0 }
 0x118   : > { %v7511_v21 = vsub.f32 %v9701_v11, %v9779_v20  ;;  %v9783_v24 = vpop.f32.mrf.mxu1 }
 0x119   : > { %v7512_v25 = vsub.f32 %v9703_v12, %v9783_v24  ;;  %v8277_v31 = vpop.f32.mrf.mxu0 }
 0x11a   : > { %7544 = vst.msk [vmem:[%s9765_s12 + $0x4] sm:$0x3] %vm7541_vm2, %v7511_v21  ;;  %v8282_v35 = vpop.f32.mrf.mxu1 }
 0x11b   : > { %7545 = vst.msk [vmem:[%s9765_s12 + $0x6] sm:$0x3] %vm7541_vm2, %v7512_v25  ;;  %v9791_v28 = vpop.f32.mrf.mxu0 }
 0x11c   : > { %v7513_v36 = vsub.f32 %v9705_v15, %v9791_v28  ;;  %v9795_v40 = vpop.f32.mrf.mxu1 }
 0x11d   : > { %v7514_v41 = vsub.f32 %v9707_v16, %v9795_v40  ;;  %v8287_v44 = vpop.f32.mrf.mxu0 }
 0x11e   : > { %7546 = vst.msk [vmem:[%s9765_s12 + $0x8] sm:$0x3] %vm7541_vm2, %v7513_v36  ;;  %v8292_v45 = vpop.f32.mrf.mxu1 }
 0x11f   : > { %7547 = vst.msk [vmem:[%s9765_s12 + $0xa] sm:$0x3] %vm7541_vm2, %v7514_v41  ;;  %v9803_v48 = vpop.f32.mrf.mxu0 }
 0x120   : > { %v7515_v49 = vsub.f32 %v9709_v18, %v9803_v48  ;;  %v9807_v52 = vpop.f32.mrf.mxu1 }
 0x121   : > { %v7516_v53 = vsub.f32 %v9711_v19, %v9807_v52  ;;  %v8297_v56 = vpop.f32.mrf.mxu0 }
 0x122   : > { %7548 = vst.msk [vmem:[%s9765_s12 + $0xc] sm:$0x3] %vm7541_vm2, %v7515_v49  ;;  %v8302_v57 = vpop.f32.mrf.mxu1 }
 0x123   : > { %7549 = vst.msk [vmem:[%s9765_s12 + $0xe] sm:$0x3] %vm7541_vm2, %v7516_v53  ;;  %v9815_v61 = vpop.f32.mrf.mxu0 }
 0x124   : > { %v7517_v62 = vsub.f32 %v9713_v22, %v9815_v61  ;;  %v9819_v1 = vpop.f32.mrf.mxu1 }
 0x125   : > { %v7518_v2 = vsub.f32 %v9715_v23, %v9819_v1  ;;  %v8307_v5 = vpop.f32.mrf.mxu0 }
 0x126   : > { %7550 = vst.msk [vmem:[%s9765_s12 + $0x10] sm:$0x3] %vm7541_vm2, %v7517_v62  ;;  %v8312_v6 = vpop.f32.mrf.mxu1 }
 0x127   : > { %7551 = vst.msk [vmem:[%s9765_s12 + $0x12] sm:$0x3] %vm7541_vm2, %v7518_v2  ;;  %v9827_v9 = vpop.f32.mrf.mxu0 }
 0x128   : > { %v7519_v33 = vsub.f32 %v9717_v26, %v9827_v9  ;;  %v9831_v10 = vpop.f32.mrf.mxu1 }
 0x129   : > { %v7520_v14 = vsub.f32 %v9719_v29, %v9831_v10  ;;  %v8317_v58 = vpop.f32.mrf.mxu0 }
 0x12a   : > { %7552 = vst.msk [vmem:[%s9765_s12 + $0x14] sm:$0x3] %vm7541_vm2, %v7519_v33  ;;  %v8322_v17 = vpop.f32.mrf.mxu1 }
 0x12b   : > { %7553 = vst.msk [vmem:[%s9765_s12 + $0x16] sm:$0x3] %vm7541_vm2, %v7520_v14  ;;  %v9839_v21 = vpop.f32.mrf.mxu0 }
 0x12c   : > { %v7521_v25 = vsub.f32 %v9721_v38, %v9839_v21  ;;  %v9843_v31 = vpop.f32.mrf.mxu1 }
 0x12d   : > { %v7522_v35 = vsub.f32 %v9723_v27, %v9843_v31  ;;  %v8327_v36 = vpop.f32.mrf.mxu0 }
 0x12e   : > { %7554 = vst.msk [vmem:[%s9765_s12 + $0x18] sm:$0x3] %vm7541_vm2, %v7521_v25  ;;  %v8332_v41 = vpop.f32.mrf.mxu1 }
 0x12f   : > { %7555 = vst.msk [vmem:[%s9765_s12 + $0x1a] sm:$0x3] %vm7541_vm2, %v7522_v35  ;;  %v9851_v44 = vpop.f32.mrf.mxu0 }
 0x130   : > { %v7523_v45 = vsub.f32 %v9725_v37, %v9851_v44  ;;  %v9855_v49 = vpop.f32.mrf.mxu1 }
 0x131   : > { %v7524_v53 = vsub.f32 %v9727_v39, %v9855_v49  ;;  %v8337_v56 = vpop.f32.mrf.mxu0 }
 0x132   : > { %7556 = vst.msk [vmem:[%s9765_s12 + $0x1c] sm:$0x3] %vm7541_vm2, %v7523_v45  ;;  %v8342_v57 = vpop.f32.mrf.mxu1 }
 0x133   : > { %7557 = vst.msk [vmem:[%s9765_s12 + $0x1e] sm:$0x3] %vm7541_vm2, %v7524_v53  ;;  %v9863_v62 = vpop.f32.mrf.mxu0 }
 0x134   : > { %v7525_v2 = vsub.f32 %v9729_v42, %v9863_v62  ;;  %v9867_v5 = vpop.f32.mrf.mxu1 }
 0x135   : > { %v7526_v6 = vsub.f32 %v9731_v43, %v9867_v5  ;;  %v8347_v33 = vpop.f32.mrf.mxu0 }
 0x136   : > { %7558 = vst.msk [vmem:[%s9765_s12 + $0x20] sm:$0x3] %vm7541_vm2, %v7525_v2  ;;  %v8352_v14 = vpop.f32.mrf.mxu1 }
 0x137   : > { %7559 = vst.msk [vmem:[%s9765_s12 + $0x22] sm:$0x3] %vm7541_vm2, %v7526_v6  ;;  %v9875_v58 = vpop.f32.mrf.mxu0 }
 0x138   : > { %v7527_v17 = vsub.f32 %v9733_v46, %v9875_v58  ;;  %v9879_v25 = vpop.f32.mrf.mxu1 }
 0x139   : > { %v7528_v35 = vsub.f32 %v9735_v47, %v9879_v25  ;;  %v8357_v36 = vpop.f32.mrf.mxu0 }
 0x13a   : > { %7560 = vst.msk [vmem:[%s9765_s12 + $0x24] sm:$0x3] %vm7541_vm2, %v7527_v17  ;;  %v8362_v41 = vpop.f32.mrf.mxu1 }
 0x13b   : > { %7561 = vst.msk [vmem:[%s9765_s12 + $0x26] sm:$0x3] %vm7541_vm2, %v7528_v35  ;;  %v9887_v45 = vpop.f32.mrf.mxu0 }
 0x13c   : > { %v7529_v53 = vsub.f32 %v9737_v50, %v9887_v45  ;;  %v9891_v56 = vpop.f32.mrf.mxu1 }
 0x13d   : > { %v7530_v57 = vsub.f32 %v9739_v51, %v9891_v56  ;;  %v8367_v2 = vpop.f32.mrf.mxu0 }
 0x13e   : > { %7562 = vst.msk [vmem:[%s9765_s12 + $0x28] sm:$0x3] %vm7541_vm2, %v7529_v53  ;;  %v8372_v6 = vpop.f32.mrf.mxu1 }
 0x13f   : > { %7563 = vst.msk [vmem:[%s9765_s12 + $0x2a] sm:$0x3] %vm7541_vm2, %v7530_v57  ;;  %v9899_v33 = vpop.f32.mrf.mxu0 }
 0x140   : > { %10321 = vst [vmem:[#allocation3_spill] sm:$0xff] %v9899_v33  ;;  %v7531_v14 = vsub.f32 %v9741_v54, %v9899_v33  ;;  %v9903_v17 = vpop.f32.mrf.mxu1 }
 0x141   : > { %v7532_v35 = vsub.f32 %v9743_v55, %v9903_v17  ;;  %v8377_v36 = vpop.f32.mrf.mxu0 }
 0x142   : > { %7564 = vst.msk [vmem:[%s9765_s12 + $0x2c] sm:$0x3] %vm7541_vm2, %v7531_v14  ;;  %v8382_v41 = vpop.f32.mrf.mxu1 }
 0x143   : > { %7565 = vst.msk [vmem:[%s9765_s12 + $0x2e] sm:$0x3] %vm7541_vm2, %v7532_v35  ;;  %v9911_v53 = vpop.f32.mrf.mxu0 }
 0x144   : > { %10322 = vst [vmem:[#allocation39_spill] sm:$0xff] %v9911_v53  ;;  %v7533_v57 = vsub.f32 %v9745_v59, %v9911_v53  ;;  %v9915_v2 = vpop.f32.mrf.mxu1 }
 0x145   : > { %v7534_v6 = vsub.f32 %v9747_v60, %v9915_v2  ;;  %v8387_v33 = vpop.f32.mrf.mxu0 }
 0x146   : > { %7566 = vst.msk [vmem:[%s9765_s12 + $0x30] sm:$0x3] %vm7541_vm2, %v7533_v57  ;;  %v8392_v14 = vpop.f32.mrf.mxu1 }
 0x147   : > { %7567 = vst.msk [vmem:[%s9765_s12 + $0x32] sm:$0x3] %vm7541_vm2, %v7534_v6  ;;  %v9923_v35 = vpop.f32.mrf.mxu0 }
 0x148   : > { %10323 = vst [vmem:[#allocation4_spill] sm:$0xff] %v9923_v35  ;;  %v7535_v36 = vsub.f32 %v9749_v63, %v9923_v35  ;;  %v9927_v41 = vpop.f32.mrf.mxu1 }
 0x149   : > { %10324 = vst [vmem:[#allocation40_spill] sm:$0xff] %v9927_v41  ;;  %v7536_v53 = vsub.f32 %v9751_v0, %v9927_v41  ;;  %v8397_v59 = vpop.f32.mrf.mxu0 }
 0x14a   : > { %7568 = vst.msk [vmem:[%s9765_s12 + $0x34] sm:$0x3] %vm7541_vm2, %v7535_v36  ;;  %v8402_v33 = vpop.f32.mrf.mxu1 }
 0x14b   : > { %7569 = vst.msk [vmem:[%s9765_s12 + $0x36] sm:$0x3] %vm7541_vm2, %v7536_v53  ;;  %v9935_v57 = vpop.f32.mrf.mxu0 }
 0x14c   : > { %10325 = vst [vmem:[#allocation5_spill] sm:$0xff] %v9935_v57  ;;  %v7537_v6 = vsub.f32 %v9753_v3, %v9935_v57  ;;  %v9939_v14 = vpop.f32.mrf.mxu1 }
 0x14d   : > { %10326 = vst [vmem:[#allocation41_spill] sm:$0xff] %v9939_v14  ;;  %v7538_v35 = vsub.f32 %v9755_v4, %v9939_v14  ;;  %v8407_v41 = vpop.f32.mrf.mxu0 }
 0x14e   : > { %7570 = vst.msk [vmem:[%s9765_s12 + $0x38] sm:$0x3] %vm7541_vm2, %v7537_v6  ;;  %v8412_v59 = vpop.f32.mrf.mxu1 }
 0x14f   : > { %7571 = vst.msk [vmem:[%s9765_s12 + $0x3a] sm:$0x3] %vm7541_vm2, %v7538_v35  ;;  %v9947_v36 = vpop.f32.mrf.mxu0 }
 0x150   : > { %10327 = vst [vmem:[#allocation6_spill] sm:$0xff] %v9947_v36  ;;  %v7539_v53 = vsub.f32 %v9757_v7, %v9947_v36  ;;  %v9951_v33 = vpop.f32.mrf.mxu1 }
 0x151   : > { %10328 = vst [vmem:[#allocation42_spill] sm:$0xff] %v9951_v33  ;;  %v7540_v57 = vsub.f32 %v9759_v8, %v9951_v33  ;;  %v8417_v3 = vpop.f32.mrf.mxu0 }
 0x152   : > { %7572 = vst.msk [vmem:[%s9765_s12 + $0x3c] sm:$0x3] %vm7541_vm2, %v7539_v53  ;;  %v8422_v14 = vpop.f32.mrf.mxu1 }
 0x153   : > { %7573 = vst.msk [vmem:[%s9765_s12 + $0x3e] sm:$0x3] %vm7541_vm2, %v7540_v57  ;;  %v5242_v41 = vpop.f32.mrf.mxu0 }
 0x154   : > { %v7574_v6 = vsub.f32 %v5242_v41, %v9697_v30  ;;  %v5315_v35 = vpop.f32.mrf.mxu1 }
 0x155   : > { %v7575_v59 = vsub.f32 %v5315_v35, %v9699_v32  ;;  %v8427_v3 = vpop.f32.mrf.mxu0 }
 0x156   : > { %v7606_v53 = vsub.f32 %v7574_v6, %v9767_v34  ;;  %v8432_v14 = vpop.f32.mrf.mxu1 }
 0x157   : > { %v7607_v57 = vsub.f32 %v7575_v59, %v9771_v13  ;;  %v5388_v33 = vpop.f32.mrf.mxu0 }
 0x158   : > { %7638 = vst.msk [vmem:[%s9964_s15] sm:$0x3] %vm7541_vm2, %v7606_v53  ;;  %v7576_v30 = vsub.f32 %v5388_v33, %v9701_v11  ;;  %v5461_v41 = vpop.f32.mrf.mxu1 }
 0x159   : > { %7639 = vst.msk [vmem:[%s9964_s15 + $0x2] sm:$0x3] %vm7541_vm2, %v7607_v57  ;;  %v7577_v36 = vsub.f32 %v5461_v41, %v9703_v12  ;;  %v8437_v32 = vpop.f32.mrf.mxu0 }
 0x15a   : > { %v7608_v35 = vsub.f32 %v7576_v30, %v9779_v20  ;;  %v8442_v3 = vpop.f32.mrf.mxu1 }
 0x15b   : > { %v7609_v34 = vsub.f32 %v7577_v36, %v9783_v24  ;;  %v5534_v6 = vpop.f32.mrf.mxu0 }
 0x15c   : > { %7640 = vst.msk [vmem:[%s9964_s15 + $0x4] sm:$0x3] %vm7541_vm2, %v7608_v35  ;;  %v7578_v13 = vsub.f32 %v5534_v6, %v9705_v15  ;;  %v5607_v59 = vpop.f32.mrf.mxu1 }
 0x15d   : > { %7641 = vst.msk [vmem:[%s9964_s15 + $0x6] sm:$0x3] %vm7541_vm2, %v7609_v34  ;;  %v7579_v11 = vsub.f32 %v5607_v59, %v9707_v16  ;;  %v8447_v12 = vpop.f32.mrf.mxu0 }
 0x15e   : > { %v7610_v33 = vsub.f32 %v7578_v13, %v9791_v28  ;;  %v8452_v53 = vpop.f32.mrf.mxu1 }
 0x15f   : > { %v7611_v20 = vsub.f32 %v7579_v11, %v9795_v40  ;;  %v5680_v14 = vpop.f32.mrf.mxu0 }
 0x160   : > { %7642 = vst.msk [vmem:[%s9964_s15 + $0x8] sm:$0x3] %vm7541_vm2, %v7610_v33  ;;  %v7580_v24 = vsub.f32 %v5680_v14, %v9709_v18  ;;  %v5753_v36 = vpop.f32.mrf.mxu1 }
 0x161   : > { %7643 = vst.msk [vmem:[%s9964_s15 + $0xa] sm:$0x3] %vm7541_vm2, %v7611_v20  ;;  %v7581_v15 = vsub.f32 %v5753_v36, %v9711_v19  ;;  %v8457_v16 = vpop.f32.mrf.mxu0 }
 0x162   : > { %v7612_v57 = vsub.f32 %v7580_v24, %v9803_v48  ;;  %v8462_v30 = vpop.f32.mrf.mxu1 }
 0x163   : > { %v7613_v28 = vsub.f32 %v7581_v15, %v9807_v52  ;;  %v5826_v41 = vpop.f32.mrf.mxu0 }
 0x164   : > { %7644 = vst.msk [vmem:[%s9964_s15 + $0xc] sm:$0x3] %vm7541_vm2, %v7612_v57  ;;  %v7582_v40 = vsub.f32 %v5826_v41, %v9713_v22  ;;  %v5899_v32 = vpop.f32.mrf.mxu1 }
 0x165   : > { %7645 = vst.msk [vmem:[%s9964_s15 + $0xe] sm:$0x3] %vm7541_vm2, %v7613_v28  ;;  %v7583_v18 = vsub.f32 %v5899_v32, %v9715_v23  ;;  %v8467_v19 = vpop.f32.mrf.mxu0 }
 0x166   : > { %v7614_v35 = vsub.f32 %v7582_v40, %v9815_v61  ;;  %v8472_v3 = vpop.f32.mrf.mxu1 }
 0x167   : > { %v7615_v48 = vsub.f32 %v7583_v18, %v9819_v1  ;;  %v5972_v34 = vpop.f32.mrf.mxu0 }
 0x168   : > { %7646 = vst.msk [vmem:[%s9964_s15 + $0x10] sm:$0x3] %vm7541_vm2, %v7614_v35  ;;  %v7584_v52 = vsub.f32 %v5972_v34, %v9717_v26  ;;  %v6045_v6 = vpop.f32.mrf.mxu1 }
 0x169   : > { %7647 = vst.msk [vmem:[%s9964_s15 + $0x12] sm:$0x3] %vm7541_vm2, %v7615_v48  ;;  %v7585_v22 = vsub.f32 %v6045_v6, %v9719_v29  ;;  %v8477_v23 = vpop.f32.mrf.mxu0 }
 0x16a   : > { %v7616_v13 = vsub.f32 %v7584_v52, %v9827_v9  ;;  %v8482_v59 = vpop.f32.mrf.mxu1  ;;  %v10329_v52 = vld [vmem:[#allocation3_spill] sm:$0xff] }
 0x16b   : > { %v7617_v61 = vsub.f32 %v7585_v22, %v9831_v10  ;;  %v6118_v11 = vpop.f32.mrf.mxu0 }
 0x16c   : > { %7648 = vst.msk [vmem:[%s9964_s15 + $0x14] sm:$0x3] %vm7541_vm2, %v7616_v13  ;;  %v7586_v1 = vsub.f32 %v6118_v11, %v9721_v38  ;;  %v6191_v12 = vpop.f32.mrf.mxu1 }
 0x16d   : > { %7649 = vst.msk [vmem:[%s9964_s15 + $0x16] sm:$0x3] %vm7541_vm2, %v7617_v61  ;;  %v7587_v26 = vsub.f32 %v6191_v12, %v9723_v27  ;;  %v8487_v29 = vpop.f32.mrf.mxu0  ;;  %v10331_v61 = vld [vmem:[#allocation39_spill] sm:$0xff] }
 0x16e   : > { %v7618_v33 = vsub.f32 %v7586_v1, %v9839_v21  ;;  %v8492_v53 = vpop.f32.mrf.mxu1 }
 0x16f   : > { %v7619_v9 = vsub.f32 %v7587_v26, %v9843_v31  ;;  %v6264_v20 = vpop.f32.mrf.mxu0  ;;  %v10332_v53 = vld [vmem:[#allocation4_spill] sm:$0xff] }
 0x170   : > { %7650 = vst.msk [vmem:[%s9964_s15 + $0x18] sm:$0x3] %vm7541_vm2, %v7618_v33  ;;  %v7588_v10 = vsub.f32 %v6264_v20, %v9725_v37  ;;  %v6337_v14 = vpop.f32.mrf.mxu1 }
 0x171   : > { %7651 = vst.msk [vmem:[%s9964_s15 + $0x1a] sm:$0x3] %vm7541_vm2, %v7619_v9  ;;  %v7589_v38 = vsub.f32 %v6337_v14, %v9727_v39  ;;  %v8497_v27 = vpop.f32.mrf.mxu0 }
 0x172   : > { %v7620_v24 = vsub.f32 %v7588_v10, %v9851_v44  ;;  %v8502_v36 = vpop.f32.mrf.mxu1  ;;  %v10333_v10 = vld [vmem:[#allocation40_spill] sm:$0xff] }
 0x173   : > { %v7621_v21 = vsub.f32 %v7589_v38, %v9855_v49  ;;  %v6410_v15 = vpop.f32.mrf.mxu0  ;;  %v10335_v36 = vld [vmem:[#allocation5_spill] sm:$0xff] }
 0x174   : > { %7652 = vst.msk [vmem:[%s9964_s15 + $0x1c] sm:$0x3] %vm7541_vm2, %v7620_v24  ;;  %v7590_v31 = vsub.f32 %v6410_v15, %v9729_v42  ;;  %v6483_v16 = vpop.f32.mrf.mxu1 }
 0x175   : > { %7653 = vst.msk [vmem:[%s9964_s15 + $0x1e] sm:$0x3] %vm7541_vm2, %v7621_v21  ;;  %v7591_v37 = vsub.f32 %v6483_v16, %v9731_v43  ;;  %v8507_v39 = vpop.f32.mrf.mxu0 }
 0x176   : > { %v7622_v57 = vsub.f32 %v7590_v31, %v9863_v62  ;;  %v8512_v30 = vpop.f32.mrf.mxu1  ;;  %v10336_v31 = vld [vmem:[#allocation41_spill] sm:$0xff] }
 0x177   : > { %v7623_v44 = vsub.f32 %v7591_v37, %v9867_v5  ;;  %v6556_v28 = vpop.f32.mrf.mxu0 }
 0x178   : > { %7654 = vst.msk [vmem:[%s9964_s15 + $0x20] sm:$0x3] %vm7541_vm2, %v7622_v57  ;;  %v7592_v49 = vsub.f32 %v6556_v28, %v9733_v46  ;;  %v6629_v41 = vpop.f32.mrf.mxu1  ;;  %v10337_v28 = vld [vmem:[#allocation6_spill] sm:$0xff] }
 0x179   : > { %7655 = vst.msk [vmem:[%s9964_s15 + $0x22] sm:$0x3] %vm7541_vm2, %v7623_v44  ;;  %v7593_v42 = vsub.f32 %v6629_v41, %v9735_v47  ;;  %v8517_v43 = vpop.f32.mrf.mxu0  ;;  %v10338_v41 = vld [vmem:[#allocation42_spill] sm:$0xff] }
 0x17a   : > { %v7624_v40 = vsub.f32 %v7592_v49, %v9875_v58  ;;  %v8522_v32 = vpop.f32.mrf.mxu1 }
 0x17b   : > { %v7625_v62 = vsub.f32 %v7593_v42, %v9879_v25  ;;  %v6702_v18 = vpop.f32.mrf.mxu0 }
 0x17c   : > { %7656 = vst.msk [vmem:[%s9964_s15 + $0x24] sm:$0x3] %vm7541_vm2, %v7624_v40  ;;  %v7594_v5 = vsub.f32 %v6702_v18, %v9737_v50  ;;  %v6775_v19 = vpop.f32.mrf.mxu1 }
 0x17d   : > { %7657 = vst.msk [vmem:[%s9964_s15 + $0x26] sm:$0x3] %vm7541_vm2, %v7625_v62  ;;  %v7595_v46 = vsub.f32 %v6775_v19, %v9739_v51  ;;  %v8527_v47 = vpop.f32.mrf.mxu0 }
 0x17e   : > { %v7626_v35 = vsub.f32 %v7594_v5, %v9887_v45  ;;  %v8532_v3 = vpop.f32.mrf.mxu1 }
 0x17f   : > { %v7627_v58 = vsub.f32 %v7595_v46, %v9891_v56  ;;  %v6848_v48 = vpop.f32.mrf.mxu0  ;;  %v10330_v56 = vld [vmem:[#allocation2_spill] sm:$0xff] }
 0x180   : > { %7658 = vst.msk [vmem:[%s9964_s15 + $0x28] sm:$0x3] %vm7541_vm2, %v7626_v35  ;;  %v7596_v25 = vsub.f32 %v6848_v48, %v9741_v54  ;;  %v6921_v34 = vpop.f32.mrf.mxu1 }
 0x181   : > { %7659 = vst.msk [vmem:[%s9964_s15 + $0x2a] sm:$0x3] %vm7541_vm2, %v7627_v58  ;;  %v7597_v50 = vsub.f32 %v6921_v34, %v9743_v55  ;;  %v8537_v51 = vpop.f32.mrf.mxu0 }
 0x182   : > { %v7628_v6 = vsub.f32 %v7596_v25, %v10329_v52  ;;  %v8542_v22 = vpop.f32.mrf.mxu1 }
 0x183   : > { %v7629_v45 = vsub.f32 %v7597_v50, %v9903_v17  ;;  %v6994_v23 = vpop.f32.mrf.mxu0 }
 0x184   : > { %7660 = vst.msk [vmem:[%s9964_s15 + $0x2c] sm:$0x3] %vm7541_vm2, %v7628_v6  ;;  %v7598_v13 = vsub.f32 %v6994_v23, %v10330_v56  ;;  %v7067_v59 = vpop.f32.mrf.mxu1 }
 0x185   : > { %7661 = vst.msk [vmem:[%s9964_s15 + $0x2e] sm:$0x3] %vm7541_vm2, %v7629_v45  ;;  %v7599_v54 = vsub.f32 %v7067_v59, %v9747_v60  ;;  %v8547_v55 = vpop.f32.mrf.mxu0 }
 0x186   : > { %v7630_v11 = vsub.f32 %v7598_v13, %v10331_v61  ;;  %v8552_v1 = vpop.f32.mrf.mxu1 }
 0x187   : > { %v7631_v12 = vsub.f32 %v7599_v54, %v9915_v2  ;;  %v7140_v26 = vpop.f32.mrf.mxu0  ;;  %v10334_v2 = vld [vmem:[#allocation38_spill] sm:$0xff] }
 0x188   : > { %7662 = vst.msk [vmem:[%s9964_s15 + $0x30] sm:$0x3] %vm7541_vm2, %v7630_v11  ;;  %v7600_v17 = vsub.f32 %v7140_v26, %v9749_v63  ;;  %v7213_v29 = vpop.f32.mrf.mxu1 }
 0x189   : > { %7663 = vst.msk [vmem:[%s9964_s15 + $0x32] sm:$0x3] %vm7541_vm2, %v7631_v12  ;;  %v7601_v33 = vsub.f32 %v7213_v29, %v9751_v0  ;;  %v8557_v60 = vpop.f32.mrf.mxu0 }
 0x18a   : > { %v7632_v9 = vsub.f32 %v7600_v17, %v10332_v53  ;;  %v8562_v20 = vpop.f32.mrf.mxu1 }
 0x18b   : > { %v7633_v14 = vsub.f32 %v7601_v33, %v10333_v10  ;;  %v7286_v38 = vpop.f32.mrf.mxu0 }
 0x18c   : > { %7664 = vst.msk [vmem:[%s9964_s15 + $0x34] sm:$0x3] %vm7541_vm2, %v7632_v9  ;;  %v7602_v27 = vsub.f32 %v7286_v38, %v10334_v2  ;;  %v7359_v24 = vpop.f32.mrf.mxu1 }
 0x18d   : > { %7665 = vst.msk [vmem:[%s9964_s15 + $0x36] sm:$0x3] %vm7541_vm2, %v7633_v14  ;;  %v7603_v63 = vsub.f32 %v7359_v24, %v9755_v4  ;;  %v8567_v0 = vpop.f32.mrf.mxu0 }
 0x18e   : > { %v7634_v21 = vsub.f32 %v7602_v27, %v10335_v36  ;;  %v8572_v15 = vpop.f32.mrf.mxu1 }
 0x18f   : > { %v7635_v16 = vsub.f32 %v7603_v63, %v10336_v31  ;;  %v7432_v37 = vpop.f32.mrf.mxu0 }
 0x190   : > { %7666 = vst.msk [vmem:[%s9964_s15 + $0x38] sm:$0x3] %vm7541_vm2, %v7634_v21  ;;  %v7604_v39 = vsub.f32 %v7432_v37, %v9757_v7  ;;  %v7505_v57 = vpop.f32.mrf.mxu1 }
 0x191   : > { %7667 = vst.msk [vmem:[%s9964_s15 + $0x3a] sm:$0x3] %vm7541_vm2, %v7635_v16  ;;  %v7605_v30 = vsub.f32 %v7505_v57, %v9759_v8  ;;  %v8577_v44 = vpop.f32.mrf.mxu0 }
 0x192   : > { %v7636_v4 = vsub.f32 %v7604_v39, %v10337_v28  ;;  %v8582_v49 = vpop.f32.mrf.mxu1 }
 0x193   : > { %v7637_v42 = vsub.f32 %v7605_v30, %v10338_v41 }
 0x194   : > { %7668 = vst.msk [vmem:[%s9964_s15 + $0x3c] sm:$0x3] %vm7541_vm2, %v7636_v4 }
 0x195   : > { %7669 = vst.msk [vmem:[%s9964_s15 + $0x3e] sm:$0x3] %vm7541_vm2, %v7637_v42 }
 0x196 PF: > { %s16_s18 = sadd.s32 1, %s8599_s18  }
 0x197   : > { %p13_p4 = scmp.ge.s32.totalorder %s16_s18, 8  }
 0x199   :  { %15 = sbr.rel (!%p13_p4) target bundleno = 1 (0x1), region = 87 }

// kernel: reverse.6
= control target key start
LH: loop header
LB: loop body
LE: loop exit
PB: predicated region body
PF: predicated region fallthrough
CT: control target
= control target key end

     0   :  { %s584_s0 = inlined_call_operand.vmem [shape: f32[2,8,8,8,3], index: 0, kind: input, shape index: {}]   ;;  %s585_s1 = inlined_call_operand.vmem [shape: f32[2,8,8,8,3], index: 1, kind: output, shape index: {}]  }
   0x1   :  { %v192_v0 = vld [vmem:[%s584_s0 + $0x10] sm:$0xff]  ;;  %v195_v2 = vld [vmem:[%s584_s0 + $0x28] sm:$0xff]  ;;  %v199_v4 = vld [vmem:[%s584_s0 + $0x40] sm:$0xff] }
   0x2   :  { %v193_v1 = vld [vmem:[%s584_s0 + $0xd0] sm:$0xff]  ;;  %4 = vst [vmem:[%s585_s1] sm:$0xff] %v192_v0  ;;  %196 = vst [vmem:[%s585_s1 + $0x18] sm:$0xff] %v195_v2  ;;  %v197_v3 = vld [vmem:[%s584_s0 + $0xe8] sm:$0xff] }
   0x3   :  { %194 = vst [vmem:[%s585_s1 + $0xc0] sm:$0xff] %v193_v1  ;;  %v201_v5 = vld [vmem:[%s584_s0 + $0x100] sm:$0xff]  ;;  %198 = vst [vmem:[%s585_s1 + $0xd8] sm:$0xff] %v197_v3  ;;  %v203_v6 = vld [vmem:[%s584_s0 + $0x58] sm:$0xff] }
   0x4   :  { %200 = vst [vmem:[%s585_s1 + $0x30] sm:$0xff] %v199_v4  ;;  %202 = vst [vmem:[%s585_s1 + $0xf0] sm:$0xff] %v201_v5  ;;  %v205_v7 = vld [vmem:[%s584_s0 + $0x118] sm:$0xff]  ;;  %v207_v8 = vld [vmem:[%s584_s0 + $0x70] sm:$0xff] }
   0x5   :  { %204 = vst [vmem:[%s585_s1 + $0x48] sm:$0xff] %v203_v6  ;;  %206 = vst [vmem:[%s585_s1 + $0x108] sm:$0xff] %v205_v7  ;;  %v209_v9 = vld [vmem:[%s584_s0 + $0x130] sm:$0xff]  ;;  %v211_v10 = vld [vmem:[%s584_s0 + $0x88] sm:$0xff] }
   0x6   :  { %208 = vst [vmem:[%s585_s1 + $0x60] sm:$0xff] %v207_v8  ;;  %v213_v11 = vld [vmem:[%s584_s0 + $0x148] sm:$0xff]  ;;  %210 = vst [vmem:[%s585_s1 + $0x120] sm:$0xff] %v209_v9  ;;  %v215_v12 = vld [vmem:[%s584_s0 + $0xa0] sm:$0xff] }
   0x7   :  { %212 = vst [vmem:[%s585_s1 + $0x78] sm:$0xff] %v211_v10  ;;  %214 = vst [vmem:[%s585_s1 + $0x138] sm:$0xff] %v213_v11  ;;  %v217_v13 = vld [vmem:[%s584_s0 + $0x160] sm:$0xff]  ;;  %v219_v14 = vld [vmem:[%s584_s0 + $0xb8] sm:$0xff] }
   0x8   :  { %216 = vst [vmem:[%s585_s1 + $0x90] sm:$0xff] %v215_v12  ;;  %218 = vst [vmem:[%s585_s1 + $0x150] sm:$0xff] %v217_v13  ;;  %v221_v15 = vld [vmem:[%s584_s0 + $0x178] sm:$0xff]  ;;  %v223_v16 = vld [vmem:[%s584_s0 + $0x8] sm:$0xff] }
   0x9   :  { %220 = vst [vmem:[%s585_s1 + $0xa8] sm:$0xff] %v219_v14  ;;  %v225_v17 = vld [vmem:[%s584_s0 + $0xc8] sm:$0xff]  ;;  %222 = vst [vmem:[%s585_s1 + $0x168] sm:$0xff] %v221_v15  ;;  %v227_v18 = vld [vmem:[%s584_s0 + $0x20] sm:$0xff] }
   0xa   :  { %224 = vst [vmem:[%s585_s1 + $0x8] sm:$0xff] %v223_v16  ;;  %226 = vst [vmem:[%s585_s1 + $0xc8] sm:$0xff] %v225_v17  ;;  %v229_v19 = vld [vmem:[%s584_s0 + $0xe0] sm:$0xff]  ;;  %v231_v20 = vld [vmem:[%s584_s0 + $0x38] sm:$0xff] }
   0xb   :  { %228 = vst [vmem:[%s585_s1 + $0x20] sm:$0xff] %v227_v18  ;;  %230 = vst [vmem:[%s585_s1 + $0xe0] sm:$0xff] %v229_v19  ;;  %v233_v21 = vld [vmem:[%s584_s0 + $0xf8] sm:$0xff]  ;;  %v235_v22 = vld [vmem:[%s584_s0 + $0x50] sm:$0xff] }
   0xc   :  { %232 = vst [vmem:[%s585_s1 + $0x38] sm:$0xff] %v231_v20  ;;  %v237_v23 = vld [vmem:[%s584_s0 + $0x110] sm:$0xff]  ;;  %234 = vst [vmem:[%s585_s1 + $0xf8] sm:$0xff] %v233_v21  ;;  %v239_v24 = vld [vmem:[%s584_s0 + $0x68] sm:$0xff] }
   0xd   :  { %236 = vst [vmem:[%s585_s1 + $0x50] sm:$0xff] %v235_v22  ;;  %238 = vst [vmem:[%s585_s1 + $0x110] sm:$0xff] %v237_v23  ;;  %v241_v25 = vld [vmem:[%s584_s0 + $0x128] sm:$0xff]  ;;  %v243_v26 = vld [vmem:[%s584_s0 + $0x80] sm:$0xff] }
   0xe   :  { %240 = vst [vmem:[%s585_s1 + $0x68] sm:$0xff] %v239_v24  ;;  %242 = vst [vmem:[%s585_s1 + $0x128] sm:$0xff] %v241_v25  ;;  %v245_v27 = vld [vmem:[%s584_s0 + $0x140] sm:$0xff]  ;;  %v247_v28 = vld [vmem:[%s584_s0 + $0x98] sm:$0xff] }
   0xf   :  { %244 = vst [vmem:[%s585_s1 + $0x80] sm:$0xff] %v243_v26  ;;  %v249_v29 = vld [vmem:[%s584_s0 + $0x158] sm:$0xff]  ;;  %246 = vst [vmem:[%s585_s1 + $0x140] sm:$0xff] %v245_v27  ;;  %v251_v30 = vld [vmem:[%s584_s0 + $0xb0] sm:$0xff] }
  0x10   :  { %248 = vst [vmem:[%s585_s1 + $0x98] sm:$0xff] %v247_v28  ;;  %250 = vst [vmem:[%s585_s1 + $0x158] sm:$0xff] %v249_v29  ;;  %v253_v31 = vld [vmem:[%s584_s0 + $0x170] sm:$0xff]  ;;  %v129_v32 = vld [vmem:[%s584_s0] sm:$0xff] }
  0x11   :  { %252 = vst [vmem:[%s585_s1 + $0xb0] sm:$0xff] %v251_v30  ;;  %254 = vst [vmem:[%s585_s1 + $0x170] sm:$0xff] %v253_v31  ;;  %v256_v33 = vld [vmem:[%s584_s0 + $0xc0] sm:$0xff]  ;;  %v258_v34 = vld [vmem:[%s584_s0 + $0x18] sm:$0xff] }
  0x12   :  { %255 = vst [vmem:[%s585_s1 + $0x10] sm:$0xff] %v129_v32  ;;  %v260_v35 = vld [vmem:[%s584_s0 + $0xd8] sm:$0xff]  ;;  %257 = vst [vmem:[%s585_s1 + $0xd0] sm:$0xff] %v256_v33  ;;  %v262_v36 = vld [vmem:[%s584_s0 + $0x30] sm:$0xff] }
  0x13   :  { %259 = vst [vmem:[%s585_s1 + $0x28] sm:$0xff] %v258_v34  ;;  %261 = vst [vmem:[%s585_s1 + $0xe8] sm:$0xff] %v260_v35  ;;  %v264_v37 = vld [vmem:[%s584_s0 + $0xf0] sm:$0xff]  ;;  %v266_v38 = vld [vmem:[%s584_s0 + $0x48] sm:$0xff] }
  0x14   :  { %263 = vst [vmem:[%s585_s1 + $0x40] sm:$0xff] %v262_v36  ;;  %265 = vst [vmem:[%s585_s1 + $0x100] sm:$0xff] %v264_v37  ;;  %v268_v39 = vld [vmem:[%s584_s0 + $0x108] sm:$0xff]  ;;  %v270_v40 = vld [vmem:[%s584_s0 + $0x60] sm:$0xff] }
  0x15   :  { %267 = vst [vmem:[%s585_s1 + $0x58] sm:$0xff] %v266_v38  ;;  %v272_v41 = vld [vmem:[%s584_s0 + $0x120] sm:$0xff]  ;;  %269 = vst [vmem:[%s585_s1 + $0x118] sm:$0xff] %v268_v39  ;;  %v274_v42 = vld [vmem:[%s584_s0 + $0x78] sm:$0xff] }
  0x16   :  { %271 = vst [vmem:[%s585_s1 + $0x70] sm:$0xff] %v270_v40  ;;  %273 = vst [vmem:[%s585_s1 + $0x130] sm:$0xff] %v272_v41  ;;  %v276_v43 = vld [vmem:[%s584_s0 + $0x138] sm:$0xff]  ;;  %v278_v44 = vld [vmem:[%s584_s0 + $0x90] sm:$0xff] }
  0x17   :  { %275 = vst [vmem:[%s585_s1 + $0x88] sm:$0xff] %v274_v42  ;;  %277 = vst [vmem:[%s585_s1 + $0x148] sm:$0xff] %v276_v43  ;;  %v280_v45 = vld [vmem:[%s584_s0 + $0x150] sm:$0xff]  ;;  %v282_v46 = vld [vmem:[%s584_s0 + $0xa8] sm:$0xff] }
  0x18   :  { %279 = vst [vmem:[%s585_s1 + $0xa0] sm:$0xff] %v278_v44  ;;  %v284_v47 = vld [vmem:[%s584_s0 + $0x168] sm:$0xff]  ;;  %281 = vst [vmem:[%s585_s1 + $0x160] sm:$0xff] %v280_v45 }
  0x19   :  { %283 = vst [vmem:[%s585_s1 + $0xb8] sm:$0xff] %v282_v46  ;;  %285 = vst [vmem:[%s585_s1 + $0x178] sm:$0xff] %v284_v47 }

// kernel: fno3d_forward.10
= control target key start
LH: loop header
LB: loop body
LE: loop exit
PB: predicated region body
PF: predicated region fallthrough
CT: control target
= control target key end

     0   :  { %s1796_s15 = smov 0   ;;  %s2584_s0 = inlined_call_operand.vmem [shape: f32[1024,128], index: 0, kind: input, shape index: {}]   ;;  %s2585_s1 = inlined_call_operand.vmem [shape: f32[128,128], index: 1, kind: input, shape index: {}]   ;;  %s2586_s2 = inlined_call_operand.vmem [shape: f32[1,128], index: 2, kind: input, shape index: {}]   ;;  %s2587_s3 = inlined_call_operand.vmem [shape: f32[1024,128], index: 3, kind: input, shape index: {}]   ;;  %s2588_s4 = inlined_call_operand.vmem [shape: f32[1024,128], index: 4, kind: output, shape index: {}]  }
   0x1 LB: > { %s1476_s16 = sadd.s32 4294967295, %s1769_s15   ;;  %p1480_p0 = scmp.ge.s32.totalorder %s1769_s15, 1  ;;  %s1769_s15 = sphi %s1796_s15, %s14_s15  }
   0x2   : > { %p174_p1 = scmp.lt.s32.totalorder %s1769_s15, 3 }
   0x4   : > { %p175_p2 = pnand %p1480_p0, %p174_p1 }
   0x5   : > { %s1481_s23 = sshll.u32 (!%p175_p2), %s1476_s16, 6 }
   0x6   : > { %178 = sbr.rel (%p175_p2) target bundleno = 437 (0x1b5), region = 36  ;;  %p206_p3 = scmp.lt.s32.totalorder (!%p175_p2), %s1481_s23, 127 }
   0xb   : > { %v334_v0 = vld [vmem:[%s2585_s1 + $0x70] sm:$0xff]  ;;  %v335_v1 = vld [vmem:[%s2585_s1 + $0x78] sm:$0xff]  ;;  %v332_v2 = vld [vmem:[%s2585_s1 + $0x60] sm:$0xff]  ;;  %s2590_s23 = smov (!%p206_p3, %s1481_s23), 127 }
   0xc   : > { %v343_v3 = vpack.c.bf16 %v335_v1, %v334_v0  ;;  %v333_v4 = vld [vmem:[%s2585_s1 + $0x68] sm:$0xff]  ;;  %v330_v6 = vld [vmem:[%s2585_s1 + $0x50] sm:$0xff]  ;;  %v331_v7 = vld [vmem:[%s2585_s1 + $0x58] sm:$0xff]  ;;  %s1822_s30 = sshll.u32 %s2590_s23, 3 }
   0xd   : > { %v342_v5 = vpack.c.bf16 %v333_v4, %v332_v2  ;;  %v341_v8 = vpack.c.bf16 %v331_v7, %v330_v6  ;;  %v328_v9 = vld [vmem:[%s2585_s1 + $0x40] sm:$0xff]  ;;  %v329_v10 = vld [vmem:[%s2585_s1 + $0x48] sm:$0xff]  ;;  %s1834_s11 = scalar_lea.vmem %s2584_s0, %s1822_s30  ;;  %v326_v18 = vld [vmem:[%s2585_s1 + $0x30] sm:$0xff]  ;;  %s1928_s6 = scalar_lea.vmem %s2587_s3, %s1822_s30 }
   0xe   : > { %1530 = vmatprep.subr.bf16.mxu0 %v343_v3  ;;  %1610 = vmatprep.subr.bf16.mxu1 %v343_v3  ;;  %v224_v11 = vld [vmem:[%s1834_s11] sm:$0xff]  ;;  %v225_v12 = vld [vmem:[%s1834_s11 + $0x8] sm:$0xff]  ;;  %v340_v16 = vpack.c.bf16 %v329_v10, %v328_v9  ;;  %v327_v19 = vld [vmem:[%s2585_s1 + $0x38] sm:$0xff] }
   0xf   : > { %1531 = vmatpush3.bf16.msra.mxu0 %v343_v3  ;;  %1618 = vmatpush3.bf16.msra.mxu1 %v343_v3  ;;  %v256_v13 = vld [vmem:[%s1834_s11 + $0x100] sm:$0xff]  ;;  %v288_v14 = vpack.c.bf16 %v225_v12, %v224_v11  ;;  %v257_v15 = vld [vmem:[%s1834_s11 + $0x108] sm:$0xff]  ;;  %v339_v20 = vpack.c.bf16 %v327_v19, %v326_v18  ;;  %v322_v24 = vld [vmem:[%s2585_s1 + $0x10] sm:$0xff] }
  0x10   : > { %1532 = vmatprep.subr.bf16.mxu0 %v342_v5  ;;  %1611 = vmatprep.subr.bf16.mxu1 %v342_v5  ;;  %v304_v17 = vpack.c.bf16 %v257_v15, %v256_v13  ;;  %v324_v21 = vld [vmem:[%s2585_s1 + $0x20] sm:$0xff]  ;;  %v325_v22 = vld [vmem:[%s2585_s1 + $0x28] sm:$0xff]  ;;  %v323_v25 = vld [vmem:[%s2585_s1 + $0x18] sm:$0xff] }
  0x11   : > { %1546 = vmatprep.mubr.bf16.mxu0 %v288_v14  ;;  %v338_v23 = vpack.c.bf16 %v325_v22, %v324_v21  ;;  %v337_v26 = vpack.c.bf16 %v323_v25, %v322_v24  ;;  %v320_v27 = vld [vmem:[%s2585_s1] sm:$0xff]  ;;  %v321_v28 = vld [vmem:[%s2585_s1 + $0x8] sm:$0xff]  ;;  %v226_v30 = vld [vmem:[%s1834_s11 + $0x10] sm:$0xff] }
  0x12   : > { %1578 = vmatprep.mubr.bf16.mxu1 %v304_v17  ;;  %v336_v29 = vpack.c.bf16 %v321_v28, %v320_v27  ;;  %v227_v31 = vld [vmem:[%s1834_s11 + $0x18] sm:$0xff]  ;;  %v258_v32 = vld [vmem:[%s1834_s11 + $0x110] sm:$0xff]  ;;  %v228_v34 = vld [vmem:[%s1834_s11 + $0x20] sm:$0xff] }
  0x13   : > { %1533 = vmatpush3.bf16.msra.mxu0 %v342_v5  ;;  %1619 = vmatpush3.bf16.msra.mxu1 %v342_v5  ;;  %v259_v33 = vld [vmem:[%s1834_s11 + $0x118] sm:$0xff]  ;;  %v229_v35 = vld [vmem:[%s1834_s11 + $0x28] sm:$0xff]  ;;  %v260_v36 = vld [vmem:[%s1834_s11 + $0x120] sm:$0xff]  ;;  %v289_v38 = vpack.c.bf16 %v227_v31, %v226_v30 }
  0x14   : > { %1534 = vmatprep.subr.bf16.mxu0 %v341_v8  ;;  %1612 = vmatprep.subr.bf16.mxu1 %v341_v8  ;;  %v261_v37 = vld [vmem:[%s1834_s11 + $0x128] sm:$0xff]  ;;  %v305_v39 = vpack.c.bf16 %v259_v33, %v258_v32  ;;  %v290_v40 = vpack.c.bf16 %v229_v35, %v228_v34  ;;  %v230_v42 = vld [vmem:[%s1834_s11 + $0x30] sm:$0xff]  ;;  %v231_v43 = vld [vmem:[%s1834_s11 + $0x38] sm:$0xff] }
  0x15   : > { %v306_v41 = vpack.c.bf16 %v261_v37, %v260_v36  ;;  %v262_v44 = vld [vmem:[%s1834_s11 + $0x130] sm:$0xff]  ;;  %v263_v45 = vld [vmem:[%s1834_s11 + $0x138] sm:$0xff]  ;;  %v232_v46 = vld [vmem:[%s1834_s11 + $0x40] sm:$0xff]  ;;  %v291_v50 = vpack.c.bf16 %v231_v43, %v230_v42 }
  0x16   : > { %v233_v47 = vld [vmem:[%s1834_s11 + $0x48] sm:$0xff]  ;;  %v264_v48 = vld [vmem:[%s1834_s11 + $0x140] sm:$0xff]  ;;  %v307_v51 = vpack.c.bf16 %v263_v45, %v262_v44  ;;  %v234_v54 = vld [vmem:[%s1834_s11 + $0x50] sm:$0xff] }
  0x17   : > { %1535 = vmatpush3.bf16.msra.mxu0 %v341_v8  ;;  %1620 = vmatpush3.bf16.msra.mxu1 %v341_v8  ;;  %v265_v49 = vld [vmem:[%s1834_s11 + $0x148] sm:$0xff]  ;;  %v292_v52 = vpack.c.bf16 %v233_v47, %v232_v46  ;;  %v235_v55 = vld [vmem:[%s1834_s11 + $0x58] sm:$0xff]  ;;  %v266_v56 = vld [vmem:[%s1834_s11 + $0x150] sm:$0xff] }
  0x18   : > { %1536 = vmatprep.subr.bf16.mxu0 %v340_v16  ;;  %1613 = vmatprep.subr.bf16.mxu1 %v340_v16  ;;  %v308_v53 = vpack.c.bf16 %v265_v49, %v264_v48  ;;  %v267_v57 = vld [vmem:[%s1834_s11 + $0x158] sm:$0xff]  ;;  %v236_v58 = vld [vmem:[%s1834_s11 + $0x60] sm:$0xff]  ;;  %v237_v59 = vld [vmem:[%s1834_s11 + $0x68] sm:$0xff]  ;;  %v293_v62 = vpack.c.bf16 %v235_v55, %v234_v54 }
  0x19   : > { %v268_v60 = vld [vmem:[%s1834_s11 + $0x160] sm:$0xff]  ;;  %v269_v61 = vld [vmem:[%s1834_s11 + $0x168] sm:$0xff]  ;;  %v309_v63 = vpack.c.bf16 %v267_v57, %v266_v56  ;;  %v294_v0 = vpack.c.bf16 %v237_v59, %v236_v58  ;;  %v238_v2 = vld [vmem:[%s1834_s11 + $0x70] sm:$0xff] }
  0x1a   : > { %v310_v1 = vpack.c.bf16 %v269_v61, %v268_v60  ;;  %v239_v3 = vld [vmem:[%s1834_s11 + $0x78] sm:$0xff]  ;;  %v270_v4 = vld [vmem:[%s1834_s11 + $0x170] sm:$0xff]  ;;  %v240_v6 = vld [vmem:[%s1834_s11 + $0x80] sm:$0xff] }
  0x1b   : > { %1537 = vmatpush3.bf16.msra.mxu0 %v340_v16  ;;  %1621 = vmatpush3.bf16.msra.mxu1 %v340_v16  ;;  %v271_v5 = vld [vmem:[%s1834_s11 + $0x178] sm:$0xff]  ;;  %v241_v7 = vld [vmem:[%s1834_s11 + $0x88] sm:$0xff]  ;;  %v272_v8 = vld [vmem:[%s1834_s11 + $0x180] sm:$0xff]  ;;  %v295_v10 = vpack.c.bf16 %v239_v3, %v238_v2 }
  0x1c   : > { %1538 = vmatprep.subr.bf16.mxu0 %v339_v20  ;;  %1614 = vmatprep.subr.bf16.mxu1 %v339_v20  ;;  %v273_v9 = vld [vmem:[%s1834_s11 + $0x188] sm:$0xff]  ;;  %v311_v11 = vpack.c.bf16 %v271_v5, %v270_v4  ;;  %v296_v12 = vpack.c.bf16 %v241_v7, %v240_v6  ;;  %v242_v14 = vld [vmem:[%s1834_s11 + $0x90] sm:$0xff]  ;;  %v243_v15 = vld [vmem:[%s1834_s11 + $0x98] sm:$0xff] }
  0x1d   : > { %v312_v13 = vpack.c.bf16 %v273_v9, %v272_v8  ;;  %v274_v16 = vld [vmem:[%s1834_s11 + $0x190] sm:$0xff]  ;;  %v275_v17 = vld [vmem:[%s1834_s11 + $0x198] sm:$0xff]  ;;  %v244_v18 = vld [vmem:[%s1834_s11 + $0xa0] sm:$0xff]  ;;  %v297_v22 = vpack.c.bf16 %v243_v15, %v242_v14 }
  0x1e   : > { %v245_v19 = vld [vmem:[%s1834_s11 + $0xa8] sm:$0xff]  ;;  %v247_v27 = vld [vmem:[%s1834_s11 + $0xb8] sm:$0xff]  ;;  %v278_v28 = vld [vmem:[%s1834_s11 + $0x1b0] sm:$0xff] }
  0x1f   : > { %1539 = vmatpush3.bf16.msra.mxu0 %v339_v20  ;;  %1622 = vmatpush3.bf16.msra.mxu1 %v339_v20  ;;  %v276_v20 = vld [vmem:[%s1834_s11 + $0x1a0] sm:$0xff]  ;;  %v277_v21 = vld [vmem:[%s1834_s11 + $0x1a8] sm:$0xff]  ;;  %v298_v24 = vpack.c.bf16 %v245_v19, %v244_v18  ;;  %v642_v58 = vld [vmem:[%s1928_s6 + $0x10] sm:$0xff] }
  0x20   : > { %1540 = vmatprep.subr.bf16.mxu0 %v338_v23  ;;  %1615 = vmatprep.subr.bf16.mxu1 %v338_v23  ;;  %v314_v25 = vpack.c.bf16 %v277_v21, %v276_v20  ;;  %v248_v30 = vld [vmem:[%s1834_s11 + $0xc0] sm:$0xff]  ;;  %v249_v31 = vld [vmem:[%s1834_s11 + $0xc8] sm:$0xff]  ;;  %v674_v60 = vld [vmem:[%s1928_s6 + $0x110] sm:$0xff] }
  0x21   : > { %v280_v32 = vld [vmem:[%s1834_s11 + $0x1c0] sm:$0xff]  ;;  %v281_v33 = vld [vmem:[%s1834_s11 + $0x1c8] sm:$0xff]  ;;  %v300_v36 = vpack.c.bf16 %v249_v31, %v248_v30  ;;  %v643_v14 = vld [vmem:[%s1928_s6 + $0x18] sm:$0xff] }
  0x22   : > { %v316_v37 = vpack.c.bf16 %v281_v33, %v280_v32  ;;  %v252_v42 = vld [vmem:[%s1834_s11 + $0xe0] sm:$0xff]  ;;  %v253_v43 = vld [vmem:[%s1834_s11 + $0xe8] sm:$0xff] }
  0x23   : > { %1541 = vmatpush3.bf16.msra.mxu0 %v338_v23  ;;  %1623 = vmatpush3.bf16.msra.mxu1 %v338_v23  ;;  %v313_v23 = vpack.c.bf16 %v275_v17, %v274_v16  ;;  %v284_v44 = vld [vmem:[%s1834_s11 + $0x1e0] sm:$0xff]  ;;  %v285_v45 = vld [vmem:[%s1834_s11 + $0x1e8] sm:$0xff]  ;;  %v302_v48 = vpack.c.bf16 %v253_v43, %v252_v42  ;;  %v675_v16 = vld [vmem:[%s1928_s6 + $0x118] sm:$0xff] }
  0x24   : > { %1542 = vmatprep.subr.bf16.mxu0 %v337_v26  ;;  %1616 = vmatprep.subr.bf16.mxu1 %v337_v26  ;;  %v318_v49 = vpack.c.bf16 %v285_v45, %v284_v44  ;;  %v1933_v56 = vld [vmem:[%s2586_s2] ss:$0 sm:$0xff] }
  0x25   : > { %v640_v4 = vld [vmem:[%s1928_s6] sm:$0xff] }
  0x26   : > { %v672_v6 = vld [vmem:[%s1928_s6 + $0x100] sm:$0xff] }
  0x27   : > { %1543 = vmatpush3.bf16.msra.mxu0 %v337_v26  ;;  %1624 = vmatpush3.bf16.msra.mxu1 %v337_v26  ;;  %v246_v26 = vld [vmem:[%s1834_s11 + $0xb0] sm:$0xff] }
  0x28   : > { %1544 = vmatprep.subr.bf16.mxu0 %v336_v29  ;;  %1617 = vmatprep.subr.bf16.mxu1 %v336_v29  ;;  %v299_v34 = vpack.c.bf16 %v247_v27, %v246_v26  ;;  %v673_v26 = vld [vmem:[%s1928_s6 + $0x108] sm:$0xff] }
  0x2b   : > { %1545 = vmatpush3.bf16.msra.mxu0 %v336_v29  ;;  %1625 = vmatpush3.bf16.msra.mxu1 %v336_v29  ;;  %v279_v29 = vld [vmem:[%s1834_s11 + $0x1b8] sm:$0xff] }
  0x2c   : > { %v315_v35 = vpack.c.bf16 %v279_v29, %v278_v28 }
  0x2e   : > { %1547 = vmatmul.mubr.bf16.vlgmr.msra.gmra.mxu0 %v289_v38  ;;  %1579 = vmatmul.mubr.bf16.vlgmr.msra.gmra.mxu1 %v305_v39  ;;  %v250_v38 = vld [vmem:[%s1834_s11 + $0xd0] sm:$0xff]  ;;  %v251_v39 = vld [vmem:[%s1834_s11 + $0xd8] sm:$0xff] }
  0x2f   : > { %1550 = vmatprep.mubr.bf16.mxu0 %v290_v40  ;;  %1582 = vmatprep.mubr.bf16.mxu1 %v306_v41  ;;  %v282_v40 = vld [vmem:[%s1834_s11 + $0x1d0] sm:$0xff]  ;;  %v283_v41 = vld [vmem:[%s1834_s11 + $0x1d8] sm:$0xff]  ;;  %v301_v46 = vpack.c.bf16 %v251_v39, %v250_v38 }
  0x30   : > { %v317_v47 = vpack.c.bf16 %v283_v41, %v282_v40 }
  0x36   : > { %1551 = vmatmul.mubr.bf16.gmra.mxu0 %v291_v50  ;;  %1583 = vmatmul.mubr.bf16.gmra.mxu1 %v307_v51  ;;  %v254_v50 = vld [vmem:[%s1834_s11 + $0xf0] sm:$0xff]  ;;  %v255_v51 = vld [vmem:[%s1834_s11 + $0xf8] sm:$0xff] }
  0x37   : > { %1554 = vmatprep.mubr.bf16.mxu0 %v292_v52  ;;  %1586 = vmatprep.mubr.bf16.mxu1 %v308_v53  ;;  %v286_v52 = vld [vmem:[%s1834_s11 + $0x1f0] sm:$0xff]  ;;  %v287_v53 = vld [vmem:[%s1834_s11 + $0x1f8] sm:$0xff]  ;;  %v303_v54 = vpack.c.bf16 %v255_v51, %v254_v50  ;;  %s2048_s11 = scalar_lea.vmem %s2588_s4, %s1822_s30 }
  0x38   : > { %v319_v55 = vpack.c.bf16 %v287_v53, %v286_v52 }
  0x3e   : > { %1555 = vmatmul.mubr.bf16.gmra.mxu0 %v293_v62  ;;  %1587 = vmatmul.mubr.bf16.gmra.mxu1 %v309_v63 }
  0x3f   : > { %1558 = vmatprep.mubr.bf16.mxu0 %v294_v0  ;;  %1590 = vmatprep.mubr.bf16.mxu1 %v310_v1 }
  0x46   : > { %1559 = vmatmul.mubr.bf16.gmra.mxu0 %v295_v10  ;;  %1591 = vmatmul.mubr.bf16.gmra.mxu1 %v311_v11 }
  0x47   : > { %1562 = vmatprep.mubr.bf16.mxu0 %v296_v12  ;;  %1594 = vmatprep.mubr.bf16.mxu1 %v312_v13 }
  0x4e   : > { %1563 = vmatmul.mubr.bf16.gmra.mxu0 %v297_v22  ;;  %1595 = vmatmul.mubr.bf16.gmra.mxu1 %v313_v23  ;;  %v641_v22 = vld [vmem:[%s1928_s6 + $0x8] sm:$0xff] }
  0x4f   : > { %1566 = vmatprep.mubr.bf16.mxu0 %v298_v24  ;;  %1598 = vmatprep.mubr.bf16.mxu1 %v314_v25 }
  0x56   : > { %1567 = vmatmul.mubr.bf16.gmra.mxu0 %v299_v34  ;;  %1599 = vmatmul.mubr.bf16.gmra.mxu1 %v315_v35 }
  0x57   : > { %1570 = vmatprep.mubr.bf16.mxu0 %v300_v36  ;;  %1602 = vmatprep.mubr.bf16.mxu1 %v316_v37 }
  0x5e   : > { %1571 = vmatmul.mubr.bf16.gmra.mxu0 %v301_v46  ;;  %1603 = vmatmul.mubr.bf16.gmra.mxu1 %v317_v47 }
  0x5f   : > { %1574 = vmatprep.mubr.bf16.mxu0 %v302_v48  ;;  %1606 = vmatprep.mubr.bf16.mxu1 %v318_v49 }
  0x66   : > { %1575 = vmatmul.mubr.bf16.gmra.mxu0 %v303_v54  ;;  %1607 = vmatmul.mubr.bf16.gmra.mxu1 %v319_v55 }
  0xee   : > { %v1548_v57 = vpop.f32.mrf.mxu0  ;;  %v1580_v59 = vpop.f32.mrf.mxu1 }
  0xef   : > { %v394_v61 = vadd.f32 %v1548_v57, %v1933_v56  ;;  %v522_v62 = vadd.f32 %v1580_v59, %v1933_v56 }
  0xf0   : > { %v385_v63 = vpop.f32.mrf.mxu0  ;;  %v513_v0 = vpop.f32.mrf.mxu1 }
  0xf1   : > { %v706_v1 = vadd.f32 %v642_v58, %v394_v61  ;;  %v1939_v2 = vadd.f32 %v674_v60, %v522_v62  ;;  %v386_v3 = vadd.f32 %v1933_v56, %v385_v63  ;;  %v514_v5 = vadd.f32 %v1933_v56, %v513_v0  ;;  %v646_v62 = vld [vmem:[%s1928_s6 + $0x30] sm:$0xff]  ;;  %v644_v0 = vld [vmem:[%s1928_s6 + $0x20] sm:$0xff] }
  0xf2   : > { %v1549_v7 = vpop.f32.mrf.mxu0  ;;  %v1581_v8 = vpop.f32.mrf.mxu1  ;;  %v678_v63 = vld [vmem:[%s1928_s6 + $0x130] sm:$0xff] }
  0xf3   : > { %v834_v9 = vmul.f32 0.044715, %v706_v1  ;;  %v866_v10 = vmul.f32 0.044715, %v1939_v2  ;;  %v1946_v11 = vadd.f32 %v640_v4, %v386_v3  ;;  %v1948_v12 = vadd.f32 %v672_v6, %v514_v5 }
  0xf4   : > { %v397_v13 = vadd.f32 %v1549_v7, %v1933_v56  ;;  %v525_v15 = vadd.f32 %v1581_v8, %v1933_v56  ;;  %v388_v17 = vpop.f32.mrf.mxu0  ;;  %v516_v18 = vpop.f32.mrf.mxu1  ;;  %v1982_v50 = vmul.f32 0.5, %v706_v1 }
  0xf5   : > { %v898_v19 = vmul.f32 %v834_v9, %v706_v1  ;;  %v930_v20 = vmul.f32 %v866_v10, %v1939_v2  ;;  %v389_v21 = vadd.f32 %v1933_v56, %v388_v17  ;;  %v517_v23 = vadd.f32 %v1933_v56, %v516_v18 }
  0xf6   : > { %v832_v24 = vmul.f32 0.044715, %v1946_v11  ;;  %v864_v25 = vmul.f32 0.044715, %v1948_v12  ;;  %v1962_v29 = vadd.f32 %v643_v14, %v397_v13  ;;  %v1964_v30 = vadd.f32 %v675_v16, %v525_v15  ;;  %v1552_v38 = vpop.f32.mrf.mxu0  ;;  %v1584_v49 = vpop.f32.mrf.mxu1  ;;  %v676_v15 = vld [vmem:[%s1928_s6 + $0x120] sm:$0xff] }
  0xf7   : > { %v962_v27 = vmul.f32 %v898_v19, %v706_v1  ;;  %v994_v28 = vmul.f32 %v930_v20, %v1939_v2  ;;  %v1968_v33 = vadd.f32 %v641_v22, %v389_v21  ;;  %v1972_v37 = vadd.f32 %v673_v26, %v517_v23  ;;  %v647_v23 = vld [vmem:[%s1928_s6 + $0x38] sm:$0xff] }
  0xf8   : > { %v896_v31 = vmul.f32 %v832_v24, %v1946_v11  ;;  %v928_v32 = vmul.f32 %v864_v25, %v1948_v12  ;;  %v835_v36 = vmul.f32 0.044715, %v1962_v29  ;;  %v867_v41 = vmul.f32 0.044715, %v1964_v30  ;;  %v401_v53 = vpop.f32.mrf.mxu0  ;;  %v529_v5 = vpop.f32.mrf.mxu1 }
  0xf9   : > { %v1026_v34 = vadd.f32 %v962_v27, %v706_v1  ;;  %v1058_v35 = vadd.f32 %v994_v28, %v1939_v2  ;;  %v833_v48 = vmul.f32 0.044715, %v1968_v33  ;;  %v865_v52 = vmul.f32 0.044715, %v1972_v37 }
  0xfa   : > { %v960_v39 = vmul.f32 %v896_v31, %v1946_v11  ;;  %v992_v40 = vmul.f32 %v928_v32, %v1948_v12  ;;  %v899_v44 = vmul.f32 %v835_v36, %v1962_v29  ;;  %v931_v47 = vmul.f32 %v867_v41, %v1964_v30  ;;  %v1553_v19 = vpop.f32.mrf.mxu0  ;;  %v679_v41 = vld [vmem:[%s1928_s6 + $0x138] sm:$0xff] }
  0xfb   : > { %v1090_v42 = vmul.f32 0.7978846, %v1026_v34  ;;  %v1122_v43 = vmul.f32 0.7978846, %v1058_v35  ;;  %v897_v59 = vmul.f32 %v833_v48, %v1968_v33  ;;  %v929_v60 = vmul.f32 %v865_v52, %v1972_v37 }
  0xfc   : > { %v1024_v45 = vadd.f32 %v960_v39, %v1946_v11  ;;  %v1056_v46 = vadd.f32 %v992_v40, %v1948_v12  ;;  %v963_v51 = vmul.f32 %v899_v44, %v1962_v29  ;;  %v995_v57 = vmul.f32 %v931_v47, %v1964_v30 }
  0xfd   : > { %1634 = vtanh.f32 %v1090_v42  ;;  %v410_v61 = vadd.f32 %v1552_v38, %v1933_v56  ;;  %v538_v3 = vadd.f32 %v1584_v49, %v1933_v56  ;;  %v402_v4 = vadd.f32 %v1933_v56, %v401_v53  ;;  %v404_v38 = vpop.f32.mrf.mxu0 }
  0xfe   : > { %1636 = vtanh.f32 %v1122_v43  ;;  %v1088_v54 = vmul.f32 0.7978846, %v1024_v45  ;;  %v1120_v55 = vmul.f32 0.7978846, %v1056_v46  ;;  %v1027_v58 = vadd.f32 %v963_v51, %v1962_v29 }
  0xff   : > { %v1059_v1 = vadd.f32 %v995_v57, %v1964_v30  ;;  %v961_v7 = vmul.f32 %v897_v59, %v1968_v33  ;;  %v993_v8 = vmul.f32 %v929_v60, %v1972_v37  ;;  %v1999_v10 = vadd.f32 %v646_v62, %v410_v61 }
 0x100   : > { %1638 = vtanh.f32 %v1088_v54  ;;  %v1091_v6 = vmul.f32 0.7978846, %v1027_v58  ;;  %v2001_v13 = vadd.f32 %v678_v63, %v538_v3  ;;  %v2003_v14 = vadd.f32 %v644_v0, %v402_v4 }
 0x101   : > { %1640 = vtanh.f32 %v1120_v55  ;;  %v1123_v9 = vmul.f32 0.7978846, %v1059_v1  ;;  %v1025_v16 = vadd.f32 %v961_v7, %v1968_v33  ;;  %v1057_v17 = vadd.f32 %v993_v8, %v1972_v37  ;;  %v645_v1 = vld [vmem:[%s1928_s6 + $0x28] sm:$0xff] }
 0x102   : > { %1642 = vtanh.f32 %v1091_v6  ;;  %v530_v18 = vadd.f32 %v1933_v56, %v529_v5  ;;  %v802_v20 = vmul.f32 0.5, %v1939_v2  ;;  %v768_v21 = vmul.f32 0.5, %v1946_v11  ;;  %v1585_v11 = vpop.f32.mrf.mxu1 }
 0x103   : > { %1644 = vtanh.f32 %v1123_v9  ;;  %v838_v22 = vmul.f32 0.044715, %v1999_v10  ;;  %v1089_v24 = vmul.f32 0.7978846, %v1025_v16  ;;  %v1121_v25 = vmul.f32 0.7978846, %v1057_v17 }
 0x104   : > { %v870_v26 = vmul.f32 0.044715, %v2001_v13  ;;  %v2014_v27 = vadd.f32 %v676_v15, %v530_v18  ;;  %v800_v28 = vmul.f32 0.5, %v1948_v12  ;;  %v836_v32 = vmul.f32 0.044715, %v2003_v14  ;;  %v532_v3 = vpop.f32.mrf.mxu1  ;;  %v1556_v18 = vpop.f32.mrf.mxu0 }
 0x105   : > { %v902_v31 = vmul.f32 %v838_v22, %v1999_v10  ;;  %v413_v2 = vadd.f32 %v1553_v19, %v1933_v56  ;;  %v2021_v34 = vmul.f32 0.5, %v1962_v29  ;;  %1646 = vtanh.f32 %v1089_v24 }
 0x106   : > { %v934_v35 = vmul.f32 %v870_v26, %v2001_v13  ;;  %v868_v36 = vmul.f32 0.044715, %v2014_v27  ;;  %1648 = vtanh.f32 %v1121_v25  ;;  %v900_v12 = vmul.f32 %v836_v32, %v2003_v14  ;;  %v1588_v24 = vpop.f32.mrf.mxu1  ;;  %v677_v32 = vld [vmem:[%s1928_s6 + $0x128] sm:$0xff] }
 0x107   : > { %v966_v39 = vmul.f32 %v902_v31, %v1999_v10  ;;  %v2027_v40 = vadd.f32 %v647_v23, %v413_v2  ;;  %v2031_v42 = vmul.f32 0.5, %v1964_v30  ;;  %v541_v44 = vadd.f32 %v1585_v11, %v1933_v56  ;;  %v650_v2 = vld [vmem:[%s1928_s6 + $0x50] sm:$0xff] }
 0x108   : > { %v998_v29 = vmul.f32 %v934_v35, %v2001_v13  ;;  %v932_v43 = vmul.f32 %v868_v36, %v2014_v27  ;;  %v964_v47 = vmul.f32 %v900_v12, %v2003_v14  ;;  %v405_v49 = vadd.f32 %v1933_v56, %v404_v38  ;;  %v682_v38 = vld [vmem:[%s1928_s6 + $0x150] sm:$0xff] }
 0x109   : > { %v1030_v46 = vadd.f32 %v966_v39, %v1999_v10  ;;  %v839_v48 = vmul.f32 0.044715, %v2027_v40  ;;  %v2042_v54 = vadd.f32 %v679_v41, %v541_v44  ;;  %v769_v62 = vmul.f32 0.5, %v1968_v33 }
 0x10a   : > { %v1635_v45 = vpop.eup %1634  ;;  %v1062_v30 = vadd.f32 %v998_v29, %v2001_v13  ;;  %v996_v53 = vmul.f32 %v932_v43, %v2014_v27  ;;  %v1028_v58 = vadd.f32 %v964_v47, %v2003_v14  ;;  %v2060_v17 = vadd.f32 %v645_v1, %v405_v49 }
 0x10b   : > { %v1637_v51 = vpop.eup %1636  ;;  %v1218_v52 = vadd.f32 1.0, %v1635_v45  ;;  %v1094_v57 = vmul.f32 0.7978846, %v1030_v46  ;;  %v903_v59 = vmul.f32 %v839_v48, %v2027_v40  ;;  %v871_v16 = vmul.f32 0.044715, %v2042_v54  ;;  %v417_v46 = vpop.f32.mrf.mxu0 }
 0x10c   : > { %v1250_v55 = vadd.f32 1.0, %v1637_v51  ;;  %v1126_v63 = vmul.f32 0.7978846, %v1062_v30  ;;  %v1060_v0 = vadd.f32 %v996_v53, %v2014_v27  ;;  %v1092_v7 = vmul.f32 0.7978846, %v1028_v58 }
 0x10d   : > { %v1639_v60 = vpop.eup %1638  ;;  %v1282_v61 = vmul.f32 %v1218_v52, %v1982_v50  ;;  %1650 = vtanh.f32 %v1094_v57  ;;  %v967_v50 = vmul.f32 %v903_v59, %v2027_v40  ;;  %v935_v26 = vmul.f32 %v871_v16, %v2042_v54 }
 0x10e   : > { %v1641_v4 = vpop.eup %1640  ;;  %v1314_v5 = vmul.f32 %v1250_v55, %v802_v20  ;;  %v1216_v6 = vadd.f32 1.0, %v1639_v60  ;;  %1652 = vtanh.f32 %v1126_v63  ;;  %v1124_v9 = vmul.f32 0.7978846, %v1060_v0  ;;  %v545_v55 = vpop.f32.mrf.mxu1 }
 0x10f   : > { %1346 = vst [vmem:[%s2048_s11 + $0x10] sm:$0xff] %v1282_v61  ;;  %v1248_v8 = vadd.f32 1.0, %v1641_v4  ;;  %v1643_v15 = vpop.eup %1642  ;;  %1654 = vtanh.f32 %v1092_v7  ;;  %v1031_v23 = vadd.f32 %v967_v50, %v2027_v40  ;;  %v837_v31 = vmul.f32 0.044715, %v2060_v17  ;;  %v648_v61 = vld [vmem:[%s1928_s6 + $0x40] sm:$0xff]  ;;  %v1557_v0 = vpop.f32.mrf.mxu0 }
 0x110   : > { %1378 = vst [vmem:[%s2048_s11 + $0x110] sm:$0xff] %v1314_v5  ;;  %v1280_v33 = vmul.f32 %v1216_v6, %v768_v21  ;;  %v1645_v19 = vpop.eup %1644  ;;  %v1219_v22 = vadd.f32 1.0, %v1643_v15  ;;  %1656 = vtanh.f32 %v1124_v9  ;;  %v801_v21 = vmul.f32 0.5, %v1972_v37  ;;  %v680_v5 = vld [vmem:[%s1928_s6 + $0x140] sm:$0xff] }
 0x111   : > { %v1312_v20 = vmul.f32 %v1248_v8, %v800_v28  ;;  %v1251_v25 = vadd.f32 1.0, %v1645_v19  ;;  %v1095_v11 = vmul.f32 0.7978846, %v1031_v23  ;;  %v533_v35 = vadd.f32 %v1933_v56, %v532_v3 }
 0x112   : > { %1344 = vst [vmem:[%s2048_s11] sm:$0xff] %v1280_v33  ;;  %v1283_v28 = vmul.f32 %v1219_v22, %v2021_v34  ;;  %v426_v36 = vadd.f32 %v1556_v18, %v1933_v56  ;;  %v1647_v39 = vpop.eup %1646  ;;  %v999_v12 = vmul.f32 %v935_v26, %v2042_v54  ;;  %v901_v41 = vmul.f32 %v837_v31, %v2060_v17  ;;  %v1589_v31 = vpop.f32.mrf.mxu1 }
 0x113   : > { %1376 = vst [vmem:[%s2048_s11 + $0x100] sm:$0xff] %v1312_v20  ;;  %v1315_v37 = vmul.f32 %v1251_v25, %v2031_v42  ;;  %v554_v29 = vadd.f32 %v1588_v24, %v1933_v56  ;;  %v1649_v43 = vpop.eup %1648  ;;  %v1217_v44 = vadd.f32 1.0, %v1647_v39  ;;  %1658 = vtanh.f32 %v1095_v11 }
 0x114   : > { %1347 = vst [vmem:[%s2048_s11 + $0x18] sm:$0xff] %v1283_v28  ;;  %v2079_v34 = vadd.f32 %v677_v32, %v533_v35  ;;  %v2081_v45 = vadd.f32 %v650_v2, %v426_v36  ;;  %v1249_v47 = vadd.f32 1.0, %v1649_v43  ;;  %v1063_v42 = vadd.f32 %v999_v12, %v2042_v54  ;;  %v651_v35 = vld [vmem:[%s1928_s6 + $0x58] sm:$0xff]  ;;  %v420_v12 = vpop.f32.mrf.mxu0 }
 0x115   : > { %1379 = vst [vmem:[%s2048_s11 + $0x118] sm:$0xff] %v1315_v37  ;;  %v965_v48 = vmul.f32 %v901_v41, %v2060_v17  ;;  %v2086_v49 = vadd.f32 %v682_v38, %v554_v29  ;;  %v1281_v51 = vmul.f32 %v1217_v44, %v769_v62  ;;  %v774_v52 = vmul.f32 0.5, %v1999_v10  ;;  %v683_v44 = vld [vmem:[%s1928_s6 + $0x158] sm:$0xff] }
 0x116   : > { %v806_v30 = vmul.f32 0.5, %v2001_v13  ;;  %v869_v53 = vmul.f32 0.044715, %v2079_v34  ;;  %v1313_v57 = vmul.f32 %v1249_v47, %v801_v21  ;;  %v1127_v58 = vmul.f32 0.7978846, %v1063_v42 }
 0x117   : > { %v1029_v59 = vadd.f32 %v965_v48, %v2060_v17  ;;  %v842_v60 = vmul.f32 0.044715, %v2081_v45  ;;  %1345 = vst [vmem:[%s2048_s11 + $0x8] sm:$0xff] %v1281_v51  ;;  %v772_v63 = vmul.f32 0.5, %v2003_v14  ;;  %v874_v10 = vmul.f32 0.044715, %v2086_v49  ;;  %v548_v51 = vpop.f32.mrf.mxu1 }
 0x118   : > { %v933_v62 = vmul.f32 %v869_v53, %v2079_v34  ;;  %v418_v13 = vadd.f32 %v1933_v56, %v417_v46  ;;  %1377 = vst [vmem:[%s2048_s11 + $0x108] sm:$0xff] %v1313_v57  ;;  %1660 = vtanh.f32 %v1127_v58  ;;  %v546_v4 = vadd.f32 %v1933_v56, %v545_v55  ;;  %v649_v48 = vld [vmem:[%s1928_s6 + $0x48] sm:$0xff] }
 0x119   : > { %v1093_v1 = vmul.f32 0.7978846, %v1029_v59  ;;  %v906_v3 = vmul.f32 %v842_v60, %v2081_v45  ;;  %v804_v7 = vmul.f32 0.5, %v2014_v27  ;;  %v938_v8 = vmul.f32 %v874_v10, %v2086_v49  ;;  %v681_v60 = vld [vmem:[%s1928_s6 + $0x148] sm:$0xff] }
 0x11a   : > { %v1651_v6 = vpop.eup %1650  ;;  %v997_v14 = vmul.f32 %v933_v62, %v2079_v34  ;;  %v2106_v9 = vadd.f32 %v648_v61, %v418_v13  ;;  %v429_v16 = vadd.f32 %v1557_v0, %v1933_v56  ;;  %v2112_v22 = vadd.f32 %v680_v5, %v546_v4 }
 0x11b   : > { %v1653_v50 = vpop.eup %1652  ;;  %v1222_v15 = vadd.f32 1.0, %v1651_v6  ;;  %1662 = vtanh.f32 %v1093_v1  ;;  %v970_v33 = vmul.f32 %v906_v3, %v2081_v45  ;;  %v1002_v27 = vmul.f32 %v938_v8, %v2086_v49 }
 0x11c   : > { %v1655_v18 = vpop.eup %1654  ;;  %v1254_v19 = vadd.f32 1.0, %v1653_v50  ;;  %v1061_v20 = vadd.f32 %v997_v14, %v2079_v34  ;;  %v840_v26 = vmul.f32 0.044715, %v2106_v9  ;;  %v775_v38 = vmul.f32 0.5, %v2027_v40  ;;  %v1560_v14 = vpop.f32.mrf.mxu0 }
 0x11d   : > { %v1657_v23 = vpop.eup %1656  ;;  %v1286_v24 = vmul.f32 %v1222_v15, %v774_v52  ;;  %v1220_v25 = vadd.f32 1.0, %v1655_v18  ;;  %v1034_v21 = vadd.f32 %v970_v33, %v2081_v45  ;;  %v1066_v11 = vadd.f32 %v1002_v27, %v2086_v49  ;;  %v1592_v15 = vpop.f32.mrf.mxu1 }
 0x11e   : > { %v1318_v32 = vmul.f32 %v1254_v19, %v806_v30  ;;  %v1252_v2 = vadd.f32 1.0, %v1657_v23  ;;  %v1125_v28 = vmul.f32 0.7978846, %v1061_v20  ;;  %v904_v37 = vmul.f32 %v840_v26, %v2106_v9 }
 0x11f   : > { %1350 = vst [vmem:[%s2048_s11 + $0x30] sm:$0xff] %v1286_v24  ;;  %v1284_v36 = vmul.f32 %v1220_v25, %v772_v63  ;;  %v1098_v39 = vmul.f32 0.7978846, %v1034_v21  ;;  %v1130_v29 = vmul.f32 0.7978846, %v1066_v11  ;;  %v2126_v40 = vadd.f32 %v651_v35, %v429_v16  ;;  %v654_v25 = vld [vmem:[%s1928_s6 + $0x70] sm:$0xff] }
 0x120   : > { %1382 = vst [vmem:[%s2048_s11 + $0x130] sm:$0xff] %v1318_v32  ;;  %v1316_v41 = vmul.f32 %v1252_v2, %v804_v7  ;;  %1664 = vtanh.f32 %v1125_v28  ;;  %v872_v43 = vmul.f32 0.044715, %v2112_v22  ;;  %v1659_v46 = vpop.eup %1658  ;;  %v968_v47 = vmul.f32 %v904_v37, %v2106_v9  ;;  %v433_v32 = vpop.f32.mrf.mxu0 }
 0x121   : > { %1348 = vst [vmem:[%s2048_s11 + $0x20] sm:$0xff] %v1284_v36  ;;  %1666 = vtanh.f32 %v1098_v39  ;;  %v557_v42 = vadd.f32 %v1589_v31, %v1933_v56  ;;  %v1223_v52 = vadd.f32 1.0, %v1659_v46  ;;  %v421_v53 = vadd.f32 %v1933_v56, %v420_v12  ;;  %v686_v31 = vld [vmem:[%s1928_s6 + $0x170] sm:$0xff]  ;;  %v561_v36 = vpop.f32.mrf.mxu1 }
 0x122   : > { %1380 = vst [vmem:[%s2048_s11 + $0x120] sm:$0xff] %v1316_v41  ;;  %1668 = vtanh.f32 %v1130_v29  ;;  %v936_v30 = vmul.f32 %v872_v43, %v2112_v22  ;;  %v807_v55 = vmul.f32 0.5, %v2042_v54  ;;  %v1032_v57 = vadd.f32 %v968_v47, %v2106_v9 }
 0x123   : > { %v843_v58 = vmul.f32 0.044715, %v2126_v40  ;;  %v2136_v59 = vadd.f32 %v683_v44, %v557_v42  ;;  %v1287_v61 = vmul.f32 %v1223_v52, %v775_v38  ;;  %v2140_v62 = vadd.f32 %v649_v48, %v421_v53  ;;  %v652_v48 = vld [vmem:[%s1928_s6 + $0x60] sm:$0xff] }
 0x124   : > { %v1000_v63 = vmul.f32 %v936_v30, %v2112_v22  ;;  %v549_v10 = vadd.f32 %v1933_v56, %v548_v51  ;;  %v773_v13 = vmul.f32 0.5, %v2060_v17  ;;  %v1096_v0 = vmul.f32 0.7978846, %v1032_v57  ;;  %v684_v57 = vld [vmem:[%s1928_s6 + $0x160] sm:$0xff] }
 0x125   : > { %v907_v1 = vmul.f32 %v843_v58, %v2126_v40  ;;  %v875_v54 = vmul.f32 0.044715, %v2136_v59  ;;  %v1661_v3 = vpop.eup %1660  ;;  %1351 = vst [vmem:[%s2048_s11 + $0x38] sm:$0xff] %v1287_v61  ;;  %v805_v4 = vmul.f32 0.5, %v2079_v34  ;;  %v841_v6 = vmul.f32 0.044715, %v2140_v62  ;;  %v1561_v58 = vpop.f32.mrf.mxu0 }
 0x126   : > { %v1064_v5 = vadd.f32 %v1000_v63, %v2112_v22  ;;  %v2150_v7 = vadd.f32 %v681_v60, %v549_v10  ;;  %v1255_v8 = vadd.f32 1.0, %v1661_v3  ;;  %1670 = vtanh.f32 %v1096_v0 }
 0x127   : > { %v971_v17 = vmul.f32 %v907_v1, %v2126_v40  ;;  %v939_v50 = vmul.f32 %v875_v54, %v2136_v59  ;;  %v778_v34 = vmul.f32 0.5, %v2081_v45  ;;  %v905_v18 = vmul.f32 %v841_v6, %v2140_v62  ;;  %v1593_v54 = vpop.f32.mrf.mxu1 }
 0x128   : > { %v1663_v33 = vpop.eup %1662  ;;  %v1128_v16 = vmul.f32 0.7978846, %v1064_v5  ;;  %v873_v19 = vmul.f32 0.044715, %v2150_v7  ;;  %v1319_v20 = vmul.f32 %v1255_v8, %v807_v55  ;;  %v442_v45 = vadd.f32 %v1560_v14, %v1933_v56 }
 0x129   : > { %v1221_v27 = vadd.f32 1.0, %v1663_v33  ;;  %v1035_v23 = vadd.f32 %v971_v17, %v2126_v40  ;;  %v1003_v24 = vmul.f32 %v939_v50, %v2136_v59  ;;  %v969_v21 = vmul.f32 %v905_v18, %v2140_v62  ;;  %v687_v50 = vld [vmem:[%s1928_s6 + $0x178] sm:$0xff] }
 0x12a   : > { %1672 = vtanh.f32 %v1128_v16  ;;  %v937_v26 = vmul.f32 %v873_v19, %v2150_v7  ;;  %1383 = vst [vmem:[%s2048_s11 + $0x138] sm:$0xff] %v1319_v20  ;;  %v570_v35 = vadd.f32 %v1592_v15, %v1933_v56  ;;  %v810_v38 = vmul.f32 0.5, %v2086_v49 }
 0x12b   : > { %v1285_v2 = vmul.f32 %v1221_v27, %v773_v13  ;;  %v1099_v28 = vmul.f32 0.7978846, %v1035_v23  ;;  %v1067_v11 = vadd.f32 %v1003_v24, %v2136_v59  ;;  %v1033_v39 = vadd.f32 %v969_v21, %v2140_v62 }
 0x12c   : > { %v1001_v37 = vmul.f32 %v937_v26, %v2150_v7  ;;  %v2170_v12 = vadd.f32 %v654_v25, %v442_v45  ;;  %v2173_v43 = vadd.f32 %v686_v31, %v570_v35  ;;  %v434_v44 = vadd.f32 %v1933_v56, %v433_v32 }
 0x12d   : > { %v1665_v41 = vpop.eup %1664  ;;  %1349 = vst [vmem:[%s2048_s11 + $0x28] sm:$0xff] %v1285_v2  ;;  %1674 = vtanh.f32 %v1099_v28  ;;  %v1131_v29 = vmul.f32 0.7978846, %v1067_v11  ;;  %v1097_v42 = vmul.f32 0.7978846, %v1033_v39  ;;  %v562_v51 = vadd.f32 %v1933_v56, %v561_v36  ;;  %v436_v2 = vpop.f32.mrf.mxu0 }
 0x12e   : > { %v1667_v46 = vpop.eup %1666  ;;  %v1253_v47 = vadd.f32 1.0, %v1665_v41  ;;  %v1065_v49 = vadd.f32 %v1001_v37, %v2150_v7  ;;  %v776_v53 = vmul.f32 0.5, %v2106_v9  ;;  %v846_v55 = vmul.f32 0.044715, %v2170_v12  ;;  %v655_v9 = vld [vmem:[%s1928_s6 + $0x78] sm:$0xff]  ;;  %v564_v36 = vpop.f32.mrf.mxu1  ;;  %v653_v41 = vld [vmem:[%s1928_s6 + $0x68] sm:$0xff] }
 0x12f   : > { %v1669_v52 = vpop.eup %1668  ;;  %v1226_v30 = vadd.f32 1.0, %v1667_v46  ;;  %1676 = vtanh.f32 %v1131_v29  ;;  %v878_v0 = vmul.f32 0.044715, %v2173_v43  ;;  %v2184_v1 = vadd.f32 %v652_v48, %v434_v44 }
 0x130   : > { %v1317_v60 = vmul.f32 %v1253_v47, %v805_v4  ;;  %v1258_v61 = vadd.f32 1.0, %v1669_v52  ;;  %1678 = vtanh.f32 %v1097_v42  ;;  %v1129_v63 = vmul.f32 0.7978846, %v1065_v49 }
 0x131   : > { %v1290_v10 = vmul.f32 %v1226_v30, %v778_v34  ;;  %v910_v13 = vmul.f32 %v846_v55, %v2170_v12  ;;  %v2188_v5 = vadd.f32 %v684_v57, %v562_v51  ;;  %v445_v4 = vadd.f32 %v1561_v58, %v1933_v56  ;;  %v1564_v51 = vpop.f32.mrf.mxu0  ;;  %v685_v58 = vld [vmem:[%s1928_s6 + $0x168] sm:$0xff] }
 0x132   : > { %1381 = vst [vmem:[%s2048_s11 + $0x128] sm:$0xff] %v1317_v60  ;;  %v1322_v3 = vmul.f32 %v1258_v61, %v810_v38  ;;  %1680 = vtanh.f32 %v1129_v63  ;;  %v808_v6 = vmul.f32 0.5, %v2112_v22  ;;  %v942_v8 = vmul.f32 %v878_v0, %v2173_v43  ;;  %v1596_v60 = vpop.f32.mrf.mxu1 }
 0x133   : > { %1354 = vst [vmem:[%s2048_s11 + $0x50] sm:$0xff] %v1290_v10  ;;  %v974_v14 = vmul.f32 %v910_v13, %v2170_v12  ;;  %v844_v17 = vmul.f32 0.044715, %v2184_v1  ;;  %v1671_v15 = vpop.eup %1670  ;;  %v779_v33 = vmul.f32 0.5, %v2126_v40  ;;  %v876_v34 = vmul.f32 0.044715, %v2188_v5 }
 0x134   : > { %1386 = vst [vmem:[%s2048_s11 + $0x150] sm:$0xff] %v1322_v3  ;;  %v2200_v16 = vadd.f32 %v655_v9, %v445_v4  ;;  %v573_v18 = vadd.f32 %v1593_v54, %v1933_v56  ;;  %v1224_v19 = vadd.f32 1.0, %v1671_v15  ;;  %v1006_v20 = vmul.f32 %v942_v8, %v2173_v43 }
 0x135   : > { %v1038_v22 = vadd.f32 %v974_v14, %v2170_v12  ;;  %v908_v27 = vmul.f32 %v844_v17, %v2184_v1  ;;  %v811_v23 = vmul.f32 0.5, %v2136_v59  ;;  %v940_v24 = vmul.f32 %v876_v34, %v2188_v5  ;;  %v658_v17 = vld [vmem:[%s1928_s6 + $0x90] sm:$0xff] }
 0x136   : > { %v847_v40 = vmul.f32 0.044715, %v2200_v16  ;;  %v2209_v25 = vadd.f32 %v687_v50, %v573_v18  ;;  %v1288_v26 = vmul.f32 %v1224_v19, %v776_v53  ;;  %v1070_v31 = vadd.f32 %v1006_v20, %v2173_v43  ;;  %v449_v50 = vpop.f32.mrf.mxu0  ;;  %v690_v34 = vld [vmem:[%s1928_s6 + $0x190] sm:$0xff]  ;;  %v577_v18 = vpop.f32.mrf.mxu1 }
 0x137   : > { %v1673_v21 = vpop.eup %1672  ;;  %v1102_v45 = vmul.f32 0.7978846, %v1038_v22  ;;  %v972_v32 = vmul.f32 %v908_v27, %v2184_v1  ;;  %v777_v11 = vmul.f32 0.5, %v2140_v62  ;;  %v1004_v59 = vmul.f32 %v940_v24, %v2188_v5 }
 0x138   : > { %v1256_v28 = vadd.f32 1.0, %v1673_v21  ;;  %v911_v35 = vmul.f32 %v847_v40, %v2200_v16  ;;  %1352 = vst [vmem:[%s2048_s11 + $0x40] sm:$0xff] %v1288_v26  ;;  %v1134_v38 = vmul.f32 0.7978846, %v1070_v31  ;;  %v879_v37 = vmul.f32 0.044715, %v2209_v25 }
 0x139   : > { %1682 = vtanh.f32 %v1102_v45  ;;  %v1036_v39 = vadd.f32 %v972_v32, %v2184_v1  ;;  %v1068_v46 = vadd.f32 %v1004_v59, %v2188_v5  ;;  %v437_v47 = vadd.f32 %v1933_v56, %v436_v2  ;;  %v688_v45 = vld [vmem:[%s1928_s6 + $0x180] sm:$0xff]  ;;  %v1565_v2 = vpop.f32.mrf.mxu0 }
 0x13a   : > { %v1675_v29 = vpop.eup %1674  ;;  %v1320_v44 = vmul.f32 %v1256_v28, %v808_v6  ;;  %v975_v62 = vmul.f32 %v911_v35, %v2200_v16  ;;  %1684 = vtanh.f32 %v1134_v38  ;;  %v943_v48 = vmul.f32 %v879_v37, %v2209_v25 }
 0x13b   : > { %v1227_v42 = vadd.f32 1.0, %v1675_v29  ;;  %v1100_v49 = vmul.f32 0.7978846, %v1036_v39  ;;  %v1132_v30 = vmul.f32 0.7978846, %v1068_v46  ;;  %v2226_v55 = vadd.f32 %v653_v41, %v437_v47 }
 0x13c   : > { %v1677_v52 = vpop.eup %1676  ;;  %1384 = vst [vmem:[%s2048_s11 + $0x140] sm:$0xff] %v1320_v44  ;;  %v1039_v53 = vadd.f32 %v975_v62, %v2200_v16  ;;  %v565_v57 = vadd.f32 %v1933_v56, %v564_v36  ;;  %v1007_v13 = vmul.f32 %v943_v48, %v2209_v25  ;;  %v809_v9 = vmul.f32 0.5, %v2150_v7 }
 0x13d   : > { %v1679_v61 = vpop.eup %1678  ;;  %v1291_v63 = vmul.f32 %v1227_v42, %v779_v33  ;;  %v1259_v10 = vadd.f32 1.0, %v1677_v52  ;;  %1686 = vtanh.f32 %v1100_v49  ;;  %v845_v14 = vmul.f32 0.044715, %v2226_v55 }
 0x13e   : > { %v1225_v0 = vadd.f32 1.0, %v1679_v61  ;;  %1688 = vtanh.f32 %v1132_v30  ;;  %v1103_v54 = vmul.f32 0.7978846, %v1039_v53  ;;  %v1071_v6 = vadd.f32 %v1007_v13, %v2209_v25  ;;  %v659_v30 = vld [vmem:[%s1928_s6 + $0x98] sm:$0xff]  ;;  %v1597_v53 = vpop.f32.mrf.mxu1 }
 0x13f   : > { %v1681_v3 = vpop.eup %1680  ;;  %1355 = vst [vmem:[%s2048_s11 + $0x58] sm:$0xff] %v1291_v63  ;;  %v1323_v4 = vmul.f32 %v1259_v10, %v811_v23  ;;  %v2235_v8 = vadd.f32 %v685_v58, %v565_v57  ;;  %v458_v7 = vadd.f32 %v1564_v51, %v1933_v56  ;;  %v782_v19 = vmul.f32 0.5, %v2170_v12  ;;  %v656_v23 = vld [vmem:[%s1928_s6 + $0x80] sm:$0xff] }
 0x140   : > { %v1289_v15 = vmul.f32 %v1225_v0, %v777_v11  ;;  %v1257_v33 = vadd.f32 1.0, %v1681_v3  ;;  %1690 = vtanh.f32 %v1103_v54  ;;  %v1135_v22 = vmul.f32 0.7978846, %v1071_v6 }
 0x141   : > { %1387 = vst [vmem:[%s2048_s11 + $0x158] sm:$0xff] %v1323_v4  ;;  %v909_v20 = vmul.f32 %v845_v14, %v2226_v55  ;;  %v877_v27 = vmul.f32 0.044715, %v2235_v8  ;;  %v2246_v40 = vadd.f32 %v658_v17, %v458_v7  ;;  %v586_v21 = vadd.f32 %v1596_v60, %v1933_v56  ;;  %v452_v4 = vpop.f32.mrf.mxu0 }
 0x142   : > { %1353 = vst [vmem:[%s2048_s11 + $0x48] sm:$0xff] %v1289_v15  ;;  %v1321_v24 = vmul.f32 %v1257_v33, %v809_v9  ;;  %v450_v26 = vadd.f32 %v1933_v56, %v449_v50  ;;  %1692 = vtanh.f32 %v1135_v22  ;;  %v578_v32 = vadd.f32 %v1933_v56, %v577_v18  ;;  %v580_v15 = vpop.f32.mrf.mxu1 }
 0x143   : > { %v973_v31 = vmul.f32 %v909_v20, %v2226_v55  ;;  %v941_v12 = vmul.f32 %v877_v27, %v2235_v8  ;;  %v814_v28 = vmul.f32 0.5, %v2173_v43  ;;  %v850_v11 = vmul.f32 0.044715, %v2246_v40 }
 0x144   : > { %1385 = vst [vmem:[%s2048_s11 + $0x148] sm:$0xff] %v1321_v24  ;;  %v2257_v59 = vadd.f32 %v690_v34, %v586_v21  ;;  %v2259_v35 = vadd.f32 %v656_v23, %v450_v26  ;;  %v780_v36 = vmul.f32 0.5, %v2184_v1  ;;  %v2264_v37 = vadd.f32 %v688_v45, %v578_v32  ;;  %v691_v45 = vld [vmem:[%s1928_s6 + $0x198] sm:$0xff] }
 0x145   : > { %v1037_v38 = vadd.f32 %v973_v31, %v2226_v55  ;;  %v1005_v39 = vmul.f32 %v941_v12, %v2235_v8  ;;  %v812_v29 = vmul.f32 0.5, %v2188_v5  ;;  %v914_v43 = vmul.f32 %v850_v11, %v2246_v40  ;;  %v689_v31 = vld [vmem:[%s1928_s6 + $0x188] sm:$0xff]  ;;  %v1568_v12 = vpop.f32.mrf.mxu0 }
 0x146   : > { %v1683_v41 = vpop.eup %1682  ;;  %v882_v44 = vmul.f32 0.044715, %v2257_v59  ;;  %v461_v46 = vadd.f32 %v1565_v2, %v1933_v56  ;;  %v848_v42 = vmul.f32 0.044715, %v2259_v35  ;;  %v783_v48 = vmul.f32 0.5, %v2200_v16 }
 0x147   : > { %v1230_v62 = vadd.f32 1.0, %v1683_v41  ;;  %v1101_v47 = vmul.f32 0.7978846, %v1037_v38  ;;  %v1069_v1 = vadd.f32 %v1005_v39, %v2235_v8  ;;  %v1685_v49 = vpop.eup %1684  ;;  %v978_v51 = vmul.f32 %v914_v43, %v2246_v40 }
 0x148   : > { %v946_v5 = vmul.f32 %v882_v44, %v2257_v59  ;;  %v880_v52 = vmul.f32 0.044715, %v2264_v37  ;;  %v1262_v58 = vadd.f32 1.0, %v1685_v49  ;;  %v912_v16 = vmul.f32 %v848_v42, %v2259_v35 }
 0x149   : > { %v1294_v57 = vmul.f32 %v1230_v62, %v782_v19  ;;  %1694 = vtanh.f32 %v1101_v47  ;;  %v1133_v60 = vmul.f32 0.7978846, %v1069_v1  ;;  %v1042_v63 = vadd.f32 %v978_v51, %v2246_v40  ;;  %v662_v47 = vld [vmem:[%s1928_s6 + $0xb0] sm:$0xff]  ;;  %v465_v51 = vpop.f32.mrf.mxu0 }
 0x14a   : > { %v1687_v61 = vpop.eup %1686  ;;  %v1010_v10 = vmul.f32 %v946_v5, %v2257_v59  ;;  %v944_v13 = vmul.f32 %v880_v52, %v2264_v37  ;;  %v1326_v9 = vmul.f32 %v1262_v58, %v814_v28  ;;  %v2282_v3 = vadd.f32 %v659_v30, %v461_v46  ;;  %v2302_v28 = vld [vmem:[%s2586_s2] ss:$0 sm:$0xff] }
 0x14b   : > { %v1689_v0 = vpop.eup %1688  ;;  %1358 = vst [vmem:[%s2048_s11 + $0x70] sm:$0xff] %v1294_v57  ;;  %v1228_v54 = vadd.f32 1.0, %v1687_v61  ;;  %1696 = vtanh.f32 %v1133_v60  ;;  %v1106_v14 = vmul.f32 0.7978846, %v1042_v63  ;;  %v976_v50 = vmul.f32 %v912_v16, %v2259_v35 }
 0x14c   : > { %v1260_v6 = vadd.f32 1.0, %v1689_v0  ;;  %v1074_v17 = vadd.f32 %v1010_v10, %v2257_v59  ;;  %1390 = vst [vmem:[%s2048_s11 + $0x170] sm:$0xff] %v1326_v9  ;;  %v815_v34 = vmul.f32 0.5, %v2209_v25  ;;  %v1008_v18 = vmul.f32 %v944_v13, %v2264_v37  ;;  %v657_v25 = vld [vmem:[%s1928_s6 + $0x88] sm:$0xff]  ;;  %v660_v0 = vld [vmem:[%s1928_s6 + $0xa0] sm:$0xff] }
 0x14d   : > { %v1691_v33 = vpop.eup %1690  ;;  %v1292_v7 = vmul.f32 %v1228_v54, %v780_v36  ;;  %v851_v19 = vmul.f32 0.044715, %v2282_v3  ;;  %1698 = vtanh.f32 %v1106_v14  ;;  %v1040_v23 = vadd.f32 %v976_v50, %v2259_v35 }
 0x14e   : > { %v1324_v22 = vmul.f32 %v1260_v6, %v812_v29  ;;  %v1231_v20 = vadd.f32 1.0, %v1691_v33  ;;  %v1138_v27 = vmul.f32 0.7978846, %v1074_v17  ;;  %v1072_v24 = vadd.f32 %v1008_v18, %v2264_v37 }
 0x14f   : > { %1356 = vst [vmem:[%s2048_s11 + $0x60] sm:$0xff] %v1292_v7  ;;  %v915_v21 = vmul.f32 %v851_v19, %v2282_v3  ;;  %v589_v26 = vadd.f32 %v1597_v53, %v1933_v56  ;;  %v1693_v32 = vpop.eup %1692  ;;  %v453_v11 = vadd.f32 %v2302_v28, %v452_v4  ;;  %v581_v36 = vadd.f32 %v2302_v28, %v580_v15  ;;  %v1600_v56 = vpop.f32.mrf.mxu1 }
 0x150   : > { %1388 = vst [vmem:[%s2048_s11 + $0x160] sm:$0xff] %v1324_v22  ;;  %v1295_v2 = vmul.f32 %v1231_v20, %v783_v48  ;;  %1700 = vtanh.f32 %v1138_v27  ;;  %v1263_v38 = vadd.f32 1.0, %v1693_v32  ;;  %v1104_v39 = vmul.f32 0.7978846, %v1040_v23  ;;  %v694_v48 = vld [vmem:[%s1928_s6 + $0x1b0] sm:$0xff] }
 0x151   : > { %v1136_v41 = vmul.f32 0.7978846, %v1072_v24  ;;  %v979_v29 = vmul.f32 %v915_v21, %v2282_v3  ;;  %v2308_v43 = vadd.f32 %v691_v45, %v589_v26  ;;  %v2310_v44 = vadd.f32 %v657_v25, %v453_v11  ;;  %v593_v17 = vpop.f32.mrf.mxu1  ;;  %v1569_v24 = vpop.f32.mrf.mxu0 }
 0x152   : > { %1359 = vst [vmem:[%s2048_s11 + $0x78] sm:$0xff] %v1295_v2  ;;  %v2312_v46 = vadd.f32 %v689_v31, %v581_v36  ;;  %v474_v62 = vadd.f32 %v2302_v28, %v1568_v12  ;;  %v1327_v1 = vmul.f32 %v1263_v38, %v815_v34  ;;  %1702 = vtanh.f32 %v1104_v39  ;;  %v692_v36 = vld [vmem:[%s1928_s6 + $0x1a0] sm:$0xff] }
 0x153   : > { %v1043_v42 = vadd.f32 %v979_v29, %v2282_v3  ;;  %v602_v49 = vadd.f32 %v2302_v28, %v1600_v56  ;;  %v781_v5 = vmul.f32 0.5, %v2226_v55  ;;  %1704 = vtanh.f32 %v1136_v41 }
 0x154   : > { %v883_v52 = vmul.f32 0.044715, %v2308_v43  ;;  %1391 = vst [vmem:[%s2048_s11 + $0x178] sm:$0xff] %v1327_v1  ;;  %v813_v30 = vmul.f32 0.5, %v2235_v8  ;;  %v849_v57 = vmul.f32 0.044715, %v2310_v44  ;;  %v2324_v58 = vadd.f32 %v662_v47, %v474_v62  ;;  %v1601_v47 = vpop.f32.mrf.mxu1  ;;  %v468_v1 = vpop.f32.mrf.mxu0 }
 0x155   : > { %v1107_v53 = vmul.f32 0.7978846, %v1043_v42  ;;  %v881_v63 = vmul.f32 0.044715, %v2312_v46  ;;  %v2328_v10 = vadd.f32 %v694_v48, %v602_v49  ;;  %v466_v55 = vadd.f32 %v2302_v28, %v465_v51 }
 0x156   : > { %v1695_v60 = vpop.eup %1694  ;;  %v947_v61 = vmul.f32 %v883_v52, %v2308_v43  ;;  %v786_v13 = vmul.f32 0.5, %v2246_v40  ;;  %v913_v8 = vmul.f32 %v849_v57, %v2310_v44  ;;  %v818_v54 = vmul.f32 0.5, %v2257_v59 }
 0x157   : > { %v1229_v16 = vadd.f32 1.0, %v1695_v60  ;;  %1706 = vtanh.f32 %v1107_v53  ;;  %v945_v6 = vmul.f32 %v881_v63, %v2312_v46  ;;  %v854_v14 = vmul.f32 0.044715, %v2324_v58 }
 0x158   : > { %v1697_v9 = vpop.eup %1696  ;;  %v1011_v4 = vmul.f32 %v947_v61, %v2308_v43  ;;  %v977_v33 = vmul.f32 %v913_v8, %v2310_v44  ;;  %v886_v40 = vmul.f32 0.044715, %v2328_v10  ;;  %v2343_v18 = vadd.f32 %v660_v0, %v466_v55 }
 0x159   : > { %v1293_v50 = vmul.f32 %v1229_v16, %v781_v5  ;;  %v1261_v15 = vadd.f32 1.0, %v1697_v9  ;;  %v1009_v34 = vmul.f32 %v945_v6, %v2312_v46  ;;  %v918_v59 = vmul.f32 %v854_v14, %v2324_v58  ;;  %v695_v16 = vld [vmem:[%s1928_s6 + $0x1b8] sm:$0xff]  ;;  %v596_v9 = vpop.f32.mrf.mxu1 }
 0x15a   : > { %v1075_v7 = vadd.f32 %v1011_v4, %v2308_v43  ;;  %v1699_v19 = vpop.eup %1698  ;;  %v1041_v20 = vadd.f32 %v977_v33, %v2310_v44  ;;  %v950_v27 = vmul.f32 %v886_v40, %v2328_v10  ;;  %v594_v23 = vadd.f32 %v2302_v28, %v593_v17  ;;  %v661_v17 = vld [vmem:[%s1928_s6 + $0xa8] sm:$0xff] }
 0x15b   : > { %1357 = vst [vmem:[%s2048_s11 + $0x68] sm:$0xff] %v1293_v50  ;;  %v1325_v22 = vmul.f32 %v1261_v15, %v813_v30  ;;  %v1234_v21 = vadd.f32 1.0, %v1699_v19  ;;  %v1073_v45 = vadd.f32 %v1009_v34, %v2312_v46  ;;  %v982_v25 = vmul.f32 %v918_v59, %v2324_v58 }
 0x15c   : > { %v1139_v26 = vmul.f32 0.7978846, %v1075_v7  ;;  %v784_v12 = vmul.f32 0.5, %v2259_v35  ;;  %v1105_v32 = vmul.f32 0.7978846, %v1041_v20  ;;  %v1014_v2 = vmul.f32 %v950_v27, %v2328_v10  ;;  %v663_v35 = vld [vmem:[%s1928_s6 + $0xb8] sm:$0xff] }
 0x15d   : > { %v1701_v31 = vpop.eup %1700  ;;  %1389 = vst [vmem:[%s2048_s11 + $0x168] sm:$0xff] %v1325_v22  ;;  %v852_v11 = vmul.f32 0.044715, %v2343_v18  ;;  %v1298_v56 = vmul.f32 %v1234_v21, %v786_v13  ;;  %v1137_v39 = vmul.f32 0.7978846, %v1073_v45  ;;  %v1046_v41 = vadd.f32 %v982_v25, %v2324_v58  ;;  %v693_v7 = vld [vmem:[%s1928_s6 + $0x1a8] sm:$0xff]  ;;  %v1604_v25 = vpop.f32.mrf.mxu1 }
 0x15e   : > { %v1266_v38 = vadd.f32 1.0, %v1701_v31  ;;  %1708 = vtanh.f32 %v1139_v26  ;;  %v1078_v29 = vadd.f32 %v1014_v2, %v2328_v10  ;;  %v2361_v48 = vadd.f32 %v692_v36, %v594_v23  ;;  %v666_v22 = vld [vmem:[%s1928_s6 + $0xd0] sm:$0xff] }
 0x15f   : > { %1710 = vtanh.f32 %v1105_v32  ;;  %v916_v62 = vmul.f32 %v852_v11, %v2343_v18  ;;  %v1703_v42 = vpop.eup %1702  ;;  %1362 = vst [vmem:[%s2048_s11 + $0x90] sm:$0xff] %v1298_v56  ;;  %v477_v51 = vadd.f32 %v2302_v28, %v1569_v24  ;;  %v1110_v30 = vmul.f32 0.7978846, %v1046_v41 }
 0x160   : > { %v1330_v49 = vmul.f32 %v1266_v38, %v818_v54  ;;  %1712 = vtanh.f32 %v1137_v39  ;;  %v1705_v5 = vpop.eup %1704  ;;  %v1232_v52 = vadd.f32 1.0, %v1703_v42  ;;  %v1142_v53 = vmul.f32 0.7978846, %v1078_v29  ;;  %v1572_v54 = vpop.f32.mrf.mxu0 }
 0x161   : > { %v980_v57 = vmul.f32 %v916_v62, %v2343_v18  ;;  %v816_v60 = vmul.f32 0.5, %v2264_v37  ;;  %v1264_v61 = vadd.f32 1.0, %v1705_v5  ;;  %v884_v63 = vmul.f32 0.044715, %v2361_v48 }
 0x162   : > { %1394 = vst [vmem:[%s2048_s11 + $0x190] sm:$0xff] %v1330_v49  ;;  %v2368_v55 = vadd.f32 %v663_v35, %v477_v51  ;;  %v1296_v13 = vmul.f32 %v1232_v52, %v784_v12  ;;  %1714 = vtanh.f32 %v1110_v30  ;;  %v605_v0 = vadd.f32 %v2302_v28, %v1601_v47  ;;  %v481_v31 = vpop.f32.mrf.mxu0  ;;  %v698_v52 = vld [vmem:[%s1928_s6 + $0x1d0] sm:$0xff] }
 0x163   : > { %v1044_v8 = vadd.f32 %v980_v57, %v2343_v18  ;;  %v1328_v37 = vmul.f32 %v1264_v61, %v816_v60  ;;  %v787_v6 = vmul.f32 0.5, %v2282_v3  ;;  %1716 = vtanh.f32 %v1142_v53  ;;  %v664_v61 = vld [vmem:[%s1928_s6 + $0xc0] sm:$0xff] }
 0x164   : > { %v1707_v4 = vpop.eup %1706  ;;  %v948_v14 = vmul.f32 %v884_v63, %v2361_v48  ;;  %1360 = vst [vmem:[%s2048_s11 + $0x80] sm:$0xff] %v1296_v13  ;;  %v855_v33 = vmul.f32 0.044715, %v2368_v55  ;;  %v2378_v40 = vadd.f32 %v695_v16, %v605_v0  ;;  %v469_v59 = vadd.f32 %v2302_v28, %v468_v1 }
 0x165   : > { %v1235_v50 = vadd.f32 1.0, %v1707_v4  ;;  %v1108_v15 = vmul.f32 0.7978846, %v1044_v8  ;;  %1392 = vst [vmem:[%s2048_s11 + $0x180] sm:$0xff] %v1328_v37  ;;  %v597_v3 = vadd.f32 %v2302_v28, %v596_v9  ;;  %v490_v19 = vadd.f32 %v2302_v28, %v1572_v54  ;;  %v609_v8 = vpop.f32.mrf.mxu1 }
 0x166   : > { %v1012_v34 = vmul.f32 %v948_v14, %v2361_v48  ;;  %v819_v27 = vmul.f32 0.5, %v2308_v43  ;;  %v919_v23 = vmul.f32 %v855_v33, %v2368_v55  ;;  %v887_v21 = vmul.f32 0.044715, %v2378_v40 }
 0x167   : > { %v1299_v20 = vmul.f32 %v1235_v50, %v787_v6  ;;  %1718 = vtanh.f32 %v1108_v15  ;;  %v2391_v26 = vadd.f32 %v661_v17, %v469_v59  ;;  %v2393_v45 = vadd.f32 %v693_v7, %v597_v3  ;;  %v1573_v6 = vpop.f32.mrf.mxu0 }
 0x168   : > { %v1076_v24 = vadd.f32 %v1012_v34, %v2361_v48  ;;  %v785_v12 = vmul.f32 0.5, %v2310_v44  ;;  %v817_v32 = vmul.f32 0.5, %v2312_v46  ;;  %v983_v43 = vmul.f32 %v919_v23, %v2368_v55 }
 0x169   : > { %1363 = vst [vmem:[%s2048_s11 + $0x98] sm:$0xff] %v1299_v20  ;;  %v2399_v2 = vadd.f32 %v666_v22, %v490_v19  ;;  %v790_v11 = vmul.f32 0.5, %v2324_v58  ;;  %v951_v56 = vmul.f32 %v887_v21, %v2378_v40  ;;  %v853_v38 = vmul.f32 0.044715, %v2391_v26 }
 0x16a   : > { %v1140_v36 = vmul.f32 0.7978846, %v1076_v24  ;;  %v1047_v41 = vadd.f32 %v983_v43, %v2368_v55  ;;  %v885_v29 = vmul.f32 0.044715, %v2393_v45  ;;  %v618_v44 = vadd.f32 %v2302_v28, %v1604_v25  ;;  %v484_v25 = vpop.f32.mrf.mxu0  ;;  %v696_v43 = vld [vmem:[%s1928_s6 + $0x1c0] sm:$0xff] }
 0x16b   : > { %v1709_v39 = vpop.eup %1708  ;;  %v482_v46 = vadd.f32 %v2302_v28, %v481_v31  ;;  %v1015_v58 = vmul.f32 %v951_v56, %v2378_v40  ;;  %v917_v47 = vmul.f32 %v853_v38, %v2391_v26  ;;  %v858_v5 = vmul.f32 0.044715, %v2399_v2 }
 0x16c   : > { %v1711_v62 = vpop.eup %1710  ;;  %v1267_v35 = vadd.f32 1.0, %v1709_v39  ;;  %1720 = vtanh.f32 %v1140_v36  ;;  %v1111_v49 = vmul.f32 0.7978846, %v1047_v41  ;;  %v949_v51 = vmul.f32 %v885_v29, %v2393_v45  ;;  %v699_v36 = vld [vmem:[%s1928_s6 + $0x1d8] sm:$0xff] }
 0x16d   : > { %v1713_v1 = vpop.eup %1712  ;;  %v1233_v42 = vadd.f32 1.0, %v1711_v62  ;;  %v1079_v57 = vadd.f32 %v1015_v58, %v2378_v40  ;;  %v981_v60 = vmul.f32 %v917_v47, %v2391_v26  ;;  %v922_v13 = vmul.f32 %v858_v5, %v2399_v2 }
 0x16e   : > { %v1331_v30 = vmul.f32 %v1267_v35, %v819_v27  ;;  %v1265_v53 = vadd.f32 1.0, %v1713_v1  ;;  %1722 = vtanh.f32 %v1111_v49  ;;  %v1013_v16 = vmul.f32 %v949_v51, %v2393_v45  ;;  %v1605_v27 = vpop.f32.mrf.mxu1 }
 0x16f   : > { %v1297_v63 = vmul.f32 %v1233_v42, %v785_v12  ;;  %v1715_v0 = vpop.eup %1714  ;;  %v1143_v54 = vmul.f32 0.7978846, %v1079_v57  ;;  %v1045_v4 = vadd.f32 %v981_v60, %v2391_v26  ;;  %v2420_v37 = vadd.f32 %v698_v52, %v618_v44  ;;  %v1576_v42 = vpop.f32.mrf.mxu0 }
 0x170   : > { %1395 = vst [vmem:[%s2048_s11 + $0x198] sm:$0xff] %v1331_v30  ;;  %v1329_v9 = vmul.f32 %v1265_v53, %v817_v32  ;;  %v1717_v14 = vpop.eup %1716  ;;  %v1238_v17 = vadd.f32 1.0, %v1715_v0  ;;  %v1077_v50 = vadd.f32 %v1013_v16, %v2393_v45  ;;  %v986_v15 = vmul.f32 %v922_v13, %v2399_v2  ;;  %v612_v1 = vpop.f32.mrf.mxu1 }
 0x171   : > { %1361 = vst [vmem:[%s2048_s11 + $0x88] sm:$0xff] %v1297_v63  ;;  %v2425_v33 = vadd.f32 %v664_v61, %v482_v46  ;;  %v822_v7 = vmul.f32 0.5, %v2328_v10  ;;  %v1270_v34 = vadd.f32 1.0, %v1717_v14  ;;  %1724 = vtanh.f32 %v1143_v54  ;;  %v665_v46 = vld [vmem:[%s1928_s6 + $0xc8] sm:$0xff] }
 0x172   : > { %1393 = vst [vmem:[%s2048_s11 + $0x188] sm:$0xff] %v1329_v9  ;;  %v1109_v59 = vmul.f32 0.7978846, %v1045_v4  ;;  %v1302_v3 = vmul.f32 %v1238_v17, %v790_v11  ;;  %v1141_v19 = vmul.f32 0.7978846, %v1077_v50  ;;  %v1050_v22 = vadd.f32 %v986_v15, %v2399_v2  ;;  %v667_v11 = vld [vmem:[%s1928_s6 + $0xd8] sm:$0xff] }
 0x173   : > { %v890_v20 = vmul.f32 0.044715, %v2420_v37  ;;  %v1334_v24 = vmul.f32 %v1270_v34, %v822_v7  ;;  %v788_v21 = vmul.f32 0.5, %v2343_v18  ;;  %v856_v10 = vmul.f32 0.044715, %v2425_v33  ;;  %v697_v54 = vld [vmem:[%s1928_s6 + $0x1c8] sm:$0xff] }
 0x174   : > { %v1719_v23 = vpop.eup %1718  ;;  %1726 = vtanh.f32 %v1109_v59  ;;  %1366 = vst [vmem:[%s2048_s11 + $0xb0] sm:$0xff] %v1302_v3  ;;  %v1114_v12 = vmul.f32 0.7978846, %v1050_v22  ;;  %v610_v18 = vadd.f32 %v2302_v28, %v609_v8  ;;  %v493_v38 = vadd.f32 %v2302_v28, %v1573_v6  ;;  %v670_v4 = vld [vmem:[%s1928_s6 + $0xf0] sm:$0xff] }
 0x175   : > { %v1236_v31 = vadd.f32 1.0, %v1719_v23  ;;  %1728 = vtanh.f32 %v1141_v19  ;;  %v954_v32 = vmul.f32 %v890_v20, %v2420_v37  ;;  %1398 = vst [vmem:[%s2048_s11 + $0x1b0] sm:$0xff] %v1334_v24  ;;  %v920_v56 = vmul.f32 %v856_v10, %v2425_v33 }
 0x176   : > { %v621_v39 = vadd.f32 %v2302_v28, %v1605_v27  ;;  %1730 = vtanh.f32 %v1114_v12  ;;  %v485_v44 = vadd.f32 %v2302_v28, %v484_v25  ;;  %v2447_v35 = vadd.f32 %v696_v43, %v610_v18  ;;  %v497_v18 = vpop.f32.mrf.mxu0 }
 0x177   : > { %v1300_v41 = vmul.f32 %v1236_v31, %v788_v21  ;;  %v1018_v29 = vmul.f32 %v954_v32, %v2420_v37  ;;  %v984_v62 = vmul.f32 %v920_v56, %v2425_v33  ;;  %v2449_v58 = vadd.f32 %v667_v11, %v493_v38 }
 0x178   : > { %v2451_v47 = vadd.f32 %v699_v36, %v621_v39  ;;  %v820_v51 = vmul.f32 0.5, %v2361_v48  ;;  %v791_v5 = vmul.f32 0.5, %v2368_v55  ;;  %v823_v52 = vmul.f32 0.5, %v2378_v40 }
 0x179   : > { %v1721_v49 = vpop.eup %1720  ;;  %1364 = vst [vmem:[%s2048_s11 + $0xa0] sm:$0xff] %v1300_v41  ;;  %v1082_v30 = vadd.f32 %v1018_v29, %v2420_v37  ;;  %v1048_v57 = vadd.f32 %v984_v62, %v2425_v33  ;;  %v888_v60 = vmul.f32 0.044715, %v2447_v35  ;;  %v2460_v61 = vadd.f32 %v665_v46, %v485_v44 }
 0x17a   : > { %v1268_v53 = vadd.f32 1.0, %v1721_v49  ;;  %v859_v16 = vmul.f32 0.044715, %v2449_v58  ;;  %v613_v48 = vadd.f32 %v2302_v28, %v612_v1  ;;  %v506_v55 = vadd.f32 %v2302_v28, %v1576_v42 }
 0x17b   : > { %v1146_v63 = vmul.f32 0.7978846, %v1082_v30  ;;  %v1723_v13 = vpop.eup %1722  ;;  %v1112_v8 = vmul.f32 0.7978846, %v1048_v57  ;;  %v952_v0 = vmul.f32 %v888_v60, %v2447_v35  ;;  %v891_v9 = vmul.f32 0.044715, %v2451_v47  ;;  %v1577_v60 = vpop.f32.mrf.mxu0 }
 0x17c   : > { %v1332_v40 = vmul.f32 %v1268_v53, %v820_v51  ;;  %v1239_v6 = vadd.f32 1.0, %v1723_v13  ;;  %v789_v14 = vmul.f32 0.5, %v2391_v26  ;;  %v923_v17 = vmul.f32 %v859_v16, %v2449_v58  ;;  %v1608_v26 = vpop.f32.mrf.mxu1  ;;  %v702_v51 = vld [vmem:[%s1928_s6 + $0x1f0] sm:$0xff]  ;;  %v668_v53 = vld [vmem:[%s1928_s6 + $0xe0] sm:$0xff] }
 0x17d   : > { %1732 = vtanh.f32 %v1146_v63  ;;  %v1016_v50 = vmul.f32 %v952_v0, %v2447_v35  ;;  %v955_v15 = vmul.f32 %v891_v9, %v2451_v47  ;;  %v857_v7 = vmul.f32 0.044715, %v2460_v61  ;;  %v700_v57 = vld [vmem:[%s1928_s6 + $0x1e0] sm:$0xff] }
 0x17e   : > { %1396 = vst [vmem:[%s2048_s11 + $0x1a0] sm:$0xff] %v1332_v40  ;;  %1734 = vtanh.f32 %v1112_v8  ;;  %v1725_v34 = vpop.eup %1724  ;;  %v1303_v59 = vmul.f32 %v1239_v6, %v791_v5  ;;  %v987_v3 = vmul.f32 %v923_v17, %v2449_v58  ;;  %v2476_v19 = vadd.f32 %v697_v54, %v613_v48 }
 0x17f   : > { %v2478_v22 = vadd.f32 %v670_v4, %v506_v55  ;;  %v1271_v20 = vadd.f32 1.0, %v1725_v34  ;;  %v1080_v27 = vadd.f32 %v1016_v50, %v2447_v35  ;;  %v1019_v23 = vmul.f32 %v955_v15, %v2451_v47  ;;  %v671_v15 = vld [vmem:[%s1928_s6 + $0xf8] sm:$0xff] }
 0x180   : > { %v921_v24 = vmul.f32 %v857_v7, %v2460_v61  ;;  %1367 = vst [vmem:[%s2048_s11 + $0xb8] sm:$0xff] %v1303_v59  ;;  %v821_v10 = vmul.f32 0.5, %v2393_v45  ;;  %v794_v25 = vmul.f32 0.5, %v2399_v2  ;;  %v1051_v31 = vadd.f32 %v987_v3, %v2449_v58  ;;  %v625_v2 = vpop.f32.mrf.mxu1 }
 0x181   : > { %v1727_v21 = vpop.eup %1726  ;;  %v889_v12 = vmul.f32 0.044715, %v2476_v19  ;;  %v1335_v43 = vmul.f32 %v1271_v20, %v823_v52  ;;  %v1144_v36 = vmul.f32 0.7978846, %v1080_v27  ;;  %v1083_v56 = vadd.f32 %v1019_v23, %v2451_v47  ;;  %v703_v27 = vld [vmem:[%s1928_s6 + $0x1f8] sm:$0xff] }
 0x182   : > { %v1729_v32 = vpop.eup %1728  ;;  %v1237_v11 = vadd.f32 1.0, %v1727_v21  ;;  %v1115_v39 = vmul.f32 0.7978846, %v1051_v31  ;;  %v985_v45 = vmul.f32 %v921_v24, %v2460_v61  ;;  %v862_v62 = vmul.f32 0.044715, %v2478_v22  ;;  %v1609_v13 = vpop.f32.mrf.mxu1 }
 0x183   : > { %v1269_v38 = vadd.f32 1.0, %v1729_v32  ;;  %v953_v41 = vmul.f32 %v889_v12, %v2476_v19  ;;  %v1731_v29 = vpop.eup %1730  ;;  %1399 = vst [vmem:[%s2048_s11 + $0x1b8] sm:$0xff] %v1335_v43  ;;  %1736 = vtanh.f32 %v1144_v36  ;;  %v1147_v46 = vmul.f32 0.7978846, %v1083_v56 }
 0x184   : > { %v1301_v44 = vmul.f32 %v1237_v11, %v789_v14  ;;  %v1242_v42 = vadd.f32 1.0, %v1731_v29  ;;  %1738 = vtanh.f32 %v1115_v39  ;;  %v1049_v49 = vadd.f32 %v985_v45, %v2460_v61  ;;  %v628_v11 = vpop.f32.mrf.mxu1  ;;  %v669_v39 = vld [vmem:[%s1928_s6 + $0xe8] sm:$0xff] }
 0x185   : > { %v1333_v1 = vmul.f32 %v1269_v38, %v821_v10  ;;  %1740 = vtanh.f32 %v1147_v46  ;;  %v1017_v5 = vmul.f32 %v953_v41, %v2476_v19  ;;  %v926_v52 = vmul.f32 %v862_v62, %v2478_v22 }
 0x186   : > { %1365 = vst [vmem:[%s2048_s11 + $0xa8] sm:$0xff] %v1301_v44  ;;  %v634_v30 = vadd.f32 %v2302_v28, %v1608_v26  ;;  %v1306_v63 = vmul.f32 %v1242_v42, %v794_v25  ;;  %v1113_v16 = vmul.f32 0.7978846, %v1049_v49  ;;  %v498_v48 = vadd.f32 %v2302_v28, %v497_v18 }
 0x187   : > { %1397 = vst [vmem:[%s2048_s11 + $0x1a8] sm:$0xff] %v1333_v1  ;;  %v626_v55 = vadd.f32 %v2302_v28, %v625_v2  ;;  %v826_v40 = vmul.f32 0.5, %v2420_v37  ;;  %v1081_v8 = vadd.f32 %v1017_v5, %v2476_v19  ;;  %v990_v0 = vmul.f32 %v926_v52, %v2478_v22 }
 0x188   : > { %v2507_v9 = vadd.f32 %v702_v51, %v634_v30  ;;  %1370 = vst [vmem:[%s2048_s11 + $0xd0] sm:$0xff] %v1306_v63  ;;  %1742 = vtanh.f32 %v1113_v16  ;;  %v2510_v54 = vadd.f32 %v668_v53, %v498_v48  ;;  %v509_v6 = vadd.f32 %v2302_v28, %v1577_v60  ;;  %v701_v48 = vld [vmem:[%s1928_s6 + $0x1e8] sm:$0xff] }
 0x189   : > { %v2512_v4 = vadd.f32 %v700_v57, %v626_v55  ;;  %v1145_v17 = vmul.f32 0.7978846, %v1081_v8  ;;  %v1054_v50 = vadd.f32 %v990_v0, %v2478_v22  ;;  %v637_v7 = vadd.f32 %v2302_v28, %v1609_v13 }
 0x18a   : > { %v1733_v14 = vpop.eup %1732  ;;  %v894_v37 = vmul.f32 0.044715, %v2507_v9  ;;  %v792_v3 = vmul.f32 0.5, %v2425_v33  ;;  %v824_v26 = vmul.f32 0.5, %v2447_v35  ;;  %v860_v20 = vmul.f32 0.044715, %v2510_v54  ;;  %v500_v33 = vpop.f32.mrf.mxu0 }
 0x18b   : > { %v1735_v34 = vpop.eup %1734  ;;  %v1274_v59 = vadd.f32 1.0, %v1733_v14  ;;  %1744 = vtanh.f32 %v1145_v17  ;;  %v1118_v24 = vmul.f32 0.7978846, %v1054_v50  ;;  %v892_v31 = vmul.f32 0.044715, %v2512_v4 }
 0x18c   : > { %v1240_v23 = vadd.f32 1.0, %v1735_v34  ;;  %v958_v21 = vmul.f32 %v894_v37, %v2507_v9  ;;  %v924_v25 = vmul.f32 %v860_v20, %v2510_v54  ;;  %v2526_v12 = vadd.f32 %v671_v15, %v509_v6 }
 0x18d   : > { %v1338_v10 = vmul.f32 %v1274_v59, %v826_v40  ;;  %1746 = vtanh.f32 %v1118_v24  ;;  %v2529_v43 = vadd.f32 %v703_v27, %v637_v7  ;;  %v795_v36 = vmul.f32 0.5, %v2449_v58 }
 0x18e   : > { %v1304_v35 = vmul.f32 %v1240_v23, %v792_v3  ;;  %v1022_v32 = vmul.f32 %v958_v21, %v2507_v9  ;;  %v988_v56 = vmul.f32 %v924_v25, %v2510_v54  ;;  %v956_v18 = vmul.f32 %v892_v31, %v2512_v4 }
 0x18f   : > { %1402 = vst [vmem:[%s2048_s11 + $0x1d0] sm:$0xff] %v1338_v10  ;;  %v863_v38 = vmul.f32 0.044715, %v2526_v12  ;;  %v827_v45 = vmul.f32 0.5, %v2451_v47  ;;  %v895_v2 = vmul.f32 0.044715, %v2529_v43  ;;  %v501_v29 = vadd.f32 %v2302_v28, %v500_v33 }
 0x190   : > { %1368 = vst [vmem:[%s2048_s11 + $0xc0] sm:$0xff] %v1304_v35  ;;  %v1086_v41 = vadd.f32 %v1022_v32, %v2507_v9  ;;  %v1737_v44 = vpop.eup %1736  ;;  %v1052_v46 = vadd.f32 %v988_v56, %v2510_v54  ;;  %v1020_v58 = vmul.f32 %v956_v18, %v2512_v4  ;;  %v629_v1 = vadd.f32 %v2302_v28, %v628_v11 }
 0x191   : > { %v927_v62 = vmul.f32 %v863_v38, %v2526_v12  ;;  %v1739_v42 = vpop.eup %1738  ;;  %v1272_v49 = vadd.f32 1.0, %v1737_v44  ;;  %v959_v47 = vmul.f32 %v895_v2, %v2529_v43  ;;  %v2547_v5 = vadd.f32 %v669_v39, %v501_v29 }
 0x192   : > { %v1150_v51 = vmul.f32 0.7978846, %v1086_v41  ;;  %v1741_v52 = vpop.eup %1740  ;;  %v1243_v30 = vadd.f32 1.0, %v1739_v42  ;;  %v1116_v53 = vmul.f32 0.7978846, %v1052_v46  ;;  %v1084_v57 = vadd.f32 %v1020_v58, %v2512_v4 }
 0x193   : > { %v991_v60 = vmul.f32 %v927_v62, %v2526_v12  ;;  %v1336_v63 = vmul.f32 %v1272_v49, %v824_v26  ;;  %v1275_v16 = vadd.f32 1.0, %v1741_v52  ;;  %v1023_v28 = vmul.f32 %v959_v47, %v2529_v43 }
 0x194   : > { %1748 = vtanh.f32 %v1150_v51  ;;  %v1307_v55 = vmul.f32 %v1243_v30, %v795_v36  ;;  %v1148_v13 = vmul.f32 0.7978846, %v1084_v57  ;;  %v793_v6 = vmul.f32 0.5, %v2460_v61 }
 0x195   : > { %1750 = vtanh.f32 %v1116_v53  ;;  %v1055_v40 = vadd.f32 %v991_v60, %v2526_v12  ;;  %v1743_v8 = vpop.eup %1742  ;;  %1400 = vst [vmem:[%s2048_s11 + $0x1c0] sm:$0xff] %v1336_v63  ;;  %v1339_v0 = vmul.f32 %v1275_v16, %v827_v45  ;;  %v1087_v14 = vadd.f32 %v1023_v28, %v2529_v43 }
 0x196   : > { %v861_v17 = vmul.f32 0.044715, %v2547_v5  ;;  %1371 = vst [vmem:[%s2048_s11 + $0xd8] sm:$0xff] %v1307_v55  ;;  %v1241_v50 = vadd.f32 1.0, %v1743_v8  ;;  %1752 = vtanh.f32 %v1148_v13  ;;  %v765_v15 = vadd.f32 %v701_v48, %v629_v1 }
 0x197   : > { %v1119_v37 = vmul.f32 0.7978846, %v1055_v40  ;;  %1403 = vst [vmem:[%s2048_s11 + $0x1d8] sm:$0xff] %v1339_v0  ;;  %v1151_v7 = vmul.f32 0.7978846, %v1087_v14  ;;  %v825_v61 = vmul.f32 0.5, %v2476_v19 }
 0x198   : > { %v925_v34 = vmul.f32 %v861_v17, %v2547_v5  ;;  %v1745_v59 = vpop.eup %1744  ;;  %v1305_v3 = vmul.f32 %v1241_v50, %v793_v6  ;;  %v893_v26 = vmul.f32 0.044715, %v765_v15  ;;  %v798_v10 = vmul.f32 0.5, %v2478_v22 }
 0x199   : > { %1754 = vtanh.f32 %v1119_v37  ;;  %v1273_v20 = vadd.f32 1.0, %v1745_v59  ;;  %v830_v18 = vmul.f32 0.5, %v2507_v9  ;;  %v796_v22 = vmul.f32 0.5, %v2510_v54 }
 0x19a   : > { %1756 = vtanh.f32 %v1151_v7  ;;  %v989_v27 = vmul.f32 %v925_v34, %v2547_v5  ;;  %v1747_v23 = vpop.eup %1746  ;;  %1369 = vst [vmem:[%s2048_s11 + $0xc8] sm:$0xff] %v1305_v3  ;;  %v957_v24 = vmul.f32 %v893_v26, %v765_v15  ;;  %v828_v29 = vmul.f32 0.5, %v2512_v4 }
 0x19b   : > { %v1337_v21 = vmul.f32 %v1273_v20, %v825_v61  ;;  %v1246_v25 = vadd.f32 1.0, %v1747_v23  ;;  %v799_v9 = vmul.f32 0.5, %v2526_v12  ;;  %v831_v1 = vmul.f32 0.5, %v2529_v43 }
 0x19c   : > { %v1053_v31 = vadd.f32 %v989_v27, %v2547_v5  ;;  %v1021_v33 = vmul.f32 %v957_v24, %v765_v15  ;;  %v797_v47 = vmul.f32 0.5, %v2547_v5  ;;  %v829_v57 = vmul.f32 0.5, %v765_v15 }
 0x19d   : > { %1401 = vst [vmem:[%s2048_s11 + $0x1c8] sm:$0xff] %v1337_v21  ;;  %v1310_v35 = vmul.f32 %v1246_v25, %v798_v10 }
 0x19e   : > { %v1117_v32 = vmul.f32 0.7978846, %v1053_v31  ;;  %v1085_v11 = vadd.f32 %v1021_v33, %v765_v15 }
 0x19f   : > { %1374 = vst [vmem:[%s2048_s11 + $0xf0] sm:$0xff] %v1310_v35 }
 0x1a0   : > { %1758 = vtanh.f32 %v1117_v32  ;;  %v1149_v36 = vmul.f32 0.7978846, %v1085_v11 }
 0x1a1   : > { %v1749_v19 = vpop.eup %1748 }
 0x1a2   : > { %v1751_v56 = vpop.eup %1750  ;;  %v1278_v38 = vadd.f32 1.0, %v1749_v19  ;;  %1760 = vtanh.f32 %v1149_v36 }
 0x1a3   : > { %v1244_v39 = vadd.f32 1.0, %v1751_v56  ;;  %v1753_v45 = vpop.eup %1752 }
 0x1a4   : > { %v1342_v41 = vmul.f32 %v1278_v38, %v830_v18  ;;  %v1276_v44 = vadd.f32 1.0, %v1753_v45 }
 0x1a5   : > { %v1308_v2 = vmul.f32 %v1244_v39, %v796_v22 }
 0x1a6   : > { %v1755_v46 = vpop.eup %1754  ;;  %1406 = vst [vmem:[%s2048_s11 + $0x1f0] sm:$0xff] %v1342_v41  ;;  %v1340_v62 = vmul.f32 %v1276_v44, %v828_v29 }
 0x1a7   : > { %v1757_v58 = vpop.eup %1756  ;;  %1372 = vst [vmem:[%s2048_s11 + $0xe0] sm:$0xff] %v1308_v2  ;;  %v1247_v54 = vadd.f32 1.0, %v1755_v46 }
 0x1a8   : > { %v1279_v42 = vadd.f32 1.0, %v1757_v58  ;;  %1404 = vst [vmem:[%s2048_s11 + $0x1e0] sm:$0xff] %v1340_v62 }
 0x1a9   : > { %v1311_v49 = vmul.f32 %v1247_v54, %v799_v9 }
 0x1aa   : > { %v1343_v51 = vmul.f32 %v1279_v42, %v831_v1 }
 0x1ab   : > { %1375 = vst [vmem:[%s2048_s11 + $0xf8] sm:$0xff] %v1311_v49 }
 0x1ac   : > { %1407 = vst [vmem:[%s2048_s11 + $0x1f8] sm:$0xff] %v1343_v51 }
 0x1ad   : > { %v1759_v4 = vpop.eup %1758 }
 0x1ae   : > { %v1245_v52 = vadd.f32 1.0, %v1759_v4 }
 0x1af   : > { %v1761_v30 = vpop.eup %1760 }
 0x1b0   : > { %v1309_v53 = vmul.f32 %v1245_v52, %v797_v47  ;;  %v1277_v60 = vadd.f32 1.0, %v1761_v30 }
 0x1b2   : > { %1373 = vst [vmem:[%s2048_s11 + $0xe8] sm:$0xff] %v1309_v53  ;;  %v1341_v12 = vmul.f32 %v1277_v60, %v829_v57 }
 0x1b4   : > { %1405 = vst [vmem:[%s2048_s11 + $0x1e8] sm:$0xff] %v1341_v12 }
 0x1b5 PF: > { %s14_s15 = sadd.s32 1, %s1769_s15  }
 0x1b6   : > { %p11_p4 = scmp.ge.s32.totalorder %s14_s15, 4  }
 0x1b8   :  { %13 = sbr.rel (!%p11_p4) target bundleno = 1 (0x1), region = 69 }

// kernel: fno3d_forward.14
= control target key start
LH: loop header
LB: loop body
LE: loop exit
PB: predicated region body
PF: predicated region fallthrough
CT: control target
= control target key end

     0   :  { %s1091_s15 = smov 0   ;;  %s1431_s0 = inlined_call_operand.vmem [shape: f32[1024,128], index: 0, kind: input, shape index: {}]   ;;  %s1432_s1 = inlined_call_operand.vmem [shape: f32[128,128], index: 1, kind: input, shape index: {}]   ;;  %s1433_s2 = inlined_call_operand.vmem [shape: f32[1,128], index: 2, kind: input, shape index: {}]   ;;  %s1434_s3 = inlined_call_operand.vmem [shape: f32[1024,128], index: 3, kind: input, shape index: {}]   ;;  %s1435_s4 = inlined_call_operand.vmem [shape: f32[1024,128], index: 4, kind: output, shape index: {}]  }
   0x1 LB: > { %s900_s16 = sadd.s32 4294967295, %s1064_s15   ;;  %p904_p0 = scmp.ge.s32.totalorder %s1064_s15, 1  ;;  %s1064_s15 = sphi %s1091_s15, %s14_s15  }
   0x2   : > { %p174_p1 = scmp.lt.s32.totalorder %s1064_s15, 3 }
   0x4   : > { %p175_p2 = pnand %p904_p0, %p174_p1 }
   0x5   : > { %s905_s23 = sshll.u32 (!%p175_p2), %s900_s16, 6 }
   0x6   : > { %178 = sbr.rel (%p175_p2) target bundleno = 306 (0x132), region = 36  ;;  %p206_p3 = scmp.lt.s32.totalorder (!%p175_p2), %s905_s23, 127 }
   0xb   : > { %v334_v0 = vld [vmem:[%s1432_s1 + $0x70] sm:$0xff]  ;;  %v335_v1 = vld [vmem:[%s1432_s1 + $0x78] sm:$0xff]  ;;  %v332_v2 = vld [vmem:[%s1432_s1 + $0x60] sm:$0xff]  ;;  %s1437_s23 = smov (!%p206_p3, %s905_s23), 127 }
   0xc   : > { %v343_v3 = vpack.c.bf16 %v335_v1, %v334_v0  ;;  %v333_v4 = vld [vmem:[%s1432_s1 + $0x68] sm:$0xff]  ;;  %v330_v6 = vld [vmem:[%s1432_s1 + $0x50] sm:$0xff]  ;;  %v331_v7 = vld [vmem:[%s1432_s1 + $0x58] sm:$0xff]  ;;  %s1117_s30 = sshll.u32 %s1437_s23, 3 }
   0xd   : > { %v342_v5 = vpack.c.bf16 %v333_v4, %v332_v2  ;;  %v341_v8 = vpack.c.bf16 %v331_v7, %v330_v6  ;;  %v328_v9 = vld [vmem:[%s1432_s1 + $0x40] sm:$0xff]  ;;  %v329_v10 = vld [vmem:[%s1432_s1 + $0x48] sm:$0xff]  ;;  %s1129_s11 = scalar_lea.vmem %s1431_s0, %s1117_s30  ;;  %v326_v18 = vld [vmem:[%s1432_s1 + $0x30] sm:$0xff]  ;;  %s1223_s6 = scalar_lea.vmem %s1434_s3, %s1117_s30 }
   0xe   : > { %954 = vmatprep.subr.bf16.mxu0 %v343_v3  ;;  %1034 = vmatprep.subr.bf16.mxu1 %v343_v3  ;;  %v224_v11 = vld [vmem:[%s1129_s11] sm:$0xff]  ;;  %v225_v12 = vld [vmem:[%s1129_s11 + $0x8] sm:$0xff]  ;;  %v340_v16 = vpack.c.bf16 %v329_v10, %v328_v9  ;;  %v327_v19 = vld [vmem:[%s1432_s1 + $0x38] sm:$0xff] }
   0xf   : > { %955 = vmatpush3.bf16.msra.mxu0 %v343_v3  ;;  %1042 = vmatpush3.bf16.msra.mxu1 %v343_v3  ;;  %v256_v13 = vld [vmem:[%s1129_s11 + $0x100] sm:$0xff]  ;;  %v288_v14 = vpack.c.bf16 %v225_v12, %v224_v11  ;;  %v257_v15 = vld [vmem:[%s1129_s11 + $0x108] sm:$0xff]  ;;  %v339_v20 = vpack.c.bf16 %v327_v19, %v326_v18  ;;  %v322_v24 = vld [vmem:[%s1432_s1 + $0x10] sm:$0xff] }
  0x10   : > { %956 = vmatprep.subr.bf16.mxu0 %v342_v5  ;;  %1035 = vmatprep.subr.bf16.mxu1 %v342_v5  ;;  %v304_v17 = vpack.c.bf16 %v257_v15, %v256_v13  ;;  %v324_v21 = vld [vmem:[%s1432_s1 + $0x20] sm:$0xff]  ;;  %v325_v22 = vld [vmem:[%s1432_s1 + $0x28] sm:$0xff]  ;;  %v323_v25 = vld [vmem:[%s1432_s1 + $0x18] sm:$0xff] }
  0x11   : > { %970 = vmatprep.mubr.bf16.mxu0 %v288_v14  ;;  %v338_v23 = vpack.c.bf16 %v325_v22, %v324_v21  ;;  %v337_v26 = vpack.c.bf16 %v323_v25, %v322_v24  ;;  %v320_v27 = vld [vmem:[%s1432_s1] sm:$0xff]  ;;  %v321_v28 = vld [vmem:[%s1432_s1 + $0x8] sm:$0xff]  ;;  %v226_v30 = vld [vmem:[%s1129_s11 + $0x10] sm:$0xff] }
  0x12   : > { %1002 = vmatprep.mubr.bf16.mxu1 %v304_v17  ;;  %v336_v29 = vpack.c.bf16 %v321_v28, %v320_v27  ;;  %v227_v31 = vld [vmem:[%s1129_s11 + $0x18] sm:$0xff]  ;;  %v258_v32 = vld [vmem:[%s1129_s11 + $0x110] sm:$0xff]  ;;  %v228_v34 = vld [vmem:[%s1129_s11 + $0x20] sm:$0xff] }
  0x13   : > { %957 = vmatpush3.bf16.msra.mxu0 %v342_v5  ;;  %1043 = vmatpush3.bf16.msra.mxu1 %v342_v5  ;;  %v259_v33 = vld [vmem:[%s1129_s11 + $0x118] sm:$0xff]  ;;  %v229_v35 = vld [vmem:[%s1129_s11 + $0x28] sm:$0xff]  ;;  %v260_v36 = vld [vmem:[%s1129_s11 + $0x120] sm:$0xff]  ;;  %v289_v38 = vpack.c.bf16 %v227_v31, %v226_v30 }
  0x14   : > { %958 = vmatprep.subr.bf16.mxu0 %v341_v8  ;;  %1036 = vmatprep.subr.bf16.mxu1 %v341_v8  ;;  %v261_v37 = vld [vmem:[%s1129_s11 + $0x128] sm:$0xff]  ;;  %v305_v39 = vpack.c.bf16 %v259_v33, %v258_v32  ;;  %v290_v40 = vpack.c.bf16 %v229_v35, %v228_v34  ;;  %v230_v42 = vld [vmem:[%s1129_s11 + $0x30] sm:$0xff]  ;;  %v231_v43 = vld [vmem:[%s1129_s11 + $0x38] sm:$0xff] }
  0x15   : > { %v306_v41 = vpack.c.bf16 %v261_v37, %v260_v36  ;;  %v262_v44 = vld [vmem:[%s1129_s11 + $0x130] sm:$0xff]  ;;  %v263_v45 = vld [vmem:[%s1129_s11 + $0x138] sm:$0xff]  ;;  %v232_v46 = vld [vmem:[%s1129_s11 + $0x40] sm:$0xff]  ;;  %v291_v50 = vpack.c.bf16 %v231_v43, %v230_v42 }
  0x16   : > { %v233_v47 = vld [vmem:[%s1129_s11 + $0x48] sm:$0xff]  ;;  %v264_v48 = vld [vmem:[%s1129_s11 + $0x140] sm:$0xff]  ;;  %v307_v51 = vpack.c.bf16 %v263_v45, %v262_v44  ;;  %v234_v54 = vld [vmem:[%s1129_s11 + $0x50] sm:$0xff] }
  0x17   : > { %959 = vmatpush3.bf16.msra.mxu0 %v341_v8  ;;  %1044 = vmatpush3.bf16.msra.mxu1 %v341_v8  ;;  %v265_v49 = vld [vmem:[%s1129_s11 + $0x148] sm:$0xff]  ;;  %v292_v52 = vpack.c.bf16 %v233_v47, %v232_v46  ;;  %v235_v55 = vld [vmem:[%s1129_s11 + $0x58] sm:$0xff]  ;;  %v266_v56 = vld [vmem:[%s1129_s11 + $0x150] sm:$0xff] }
  0x18   : > { %960 = vmatprep.subr.bf16.mxu0 %v340_v16  ;;  %1037 = vmatprep.subr.bf16.mxu1 %v340_v16  ;;  %v308_v53 = vpack.c.bf16 %v265_v49, %v264_v48  ;;  %v267_v57 = vld [vmem:[%s1129_s11 + $0x158] sm:$0xff]  ;;  %v236_v58 = vld [vmem:[%s1129_s11 + $0x60] sm:$0xff]  ;;  %v237_v59 = vld [vmem:[%s1129_s11 + $0x68] sm:$0xff]  ;;  %v293_v62 = vpack.c.bf16 %v235_v55, %v234_v54 }
  0x19   : > { %v268_v60 = vld [vmem:[%s1129_s11 + $0x160] sm:$0xff]  ;;  %v269_v61 = vld [vmem:[%s1129_s11 + $0x168] sm:$0xff]  ;;  %v309_v63 = vpack.c.bf16 %v267_v57, %v266_v56  ;;  %v294_v0 = vpack.c.bf16 %v237_v59, %v236_v58  ;;  %v238_v2 = vld [vmem:[%s1129_s11 + $0x70] sm:$0xff] }
  0x1a   : > { %v310_v1 = vpack.c.bf16 %v269_v61, %v268_v60  ;;  %v239_v3 = vld [vmem:[%s1129_s11 + $0x78] sm:$0xff]  ;;  %v270_v4 = vld [vmem:[%s1129_s11 + $0x170] sm:$0xff]  ;;  %v240_v6 = vld [vmem:[%s1129_s11 + $0x80] sm:$0xff] }
  0x1b   : > { %961 = vmatpush3.bf16.msra.mxu0 %v340_v16  ;;  %1045 = vmatpush3.bf16.msra.mxu1 %v340_v16  ;;  %v271_v5 = vld [vmem:[%s1129_s11 + $0x178] sm:$0xff]  ;;  %v241_v7 = vld [vmem:[%s1129_s11 + $0x88] sm:$0xff]  ;;  %v272_v8 = vld [vmem:[%s1129_s11 + $0x180] sm:$0xff]  ;;  %v295_v10 = vpack.c.bf16 %v239_v3, %v238_v2 }
  0x1c   : > { %962 = vmatprep.subr.bf16.mxu0 %v339_v20  ;;  %1038 = vmatprep.subr.bf16.mxu1 %v339_v20  ;;  %v273_v9 = vld [vmem:[%s1129_s11 + $0x188] sm:$0xff]  ;;  %v311_v11 = vpack.c.bf16 %v271_v5, %v270_v4  ;;  %v296_v12 = vpack.c.bf16 %v241_v7, %v240_v6  ;;  %v242_v14 = vld [vmem:[%s1129_s11 + $0x90] sm:$0xff]  ;;  %v243_v15 = vld [vmem:[%s1129_s11 + $0x98] sm:$0xff] }
  0x1d   : > { %v312_v13 = vpack.c.bf16 %v273_v9, %v272_v8  ;;  %v274_v16 = vld [vmem:[%s1129_s11 + $0x190] sm:$0xff]  ;;  %v275_v17 = vld [vmem:[%s1129_s11 + $0x198] sm:$0xff]  ;;  %v244_v18 = vld [vmem:[%s1129_s11 + $0xa0] sm:$0xff]  ;;  %v297_v22 = vpack.c.bf16 %v243_v15, %v242_v14 }
  0x1e   : > { %v245_v19 = vld [vmem:[%s1129_s11 + $0xa8] sm:$0xff]  ;;  %v247_v27 = vld [vmem:[%s1129_s11 + $0xb8] sm:$0xff]  ;;  %v278_v28 = vld [vmem:[%s1129_s11 + $0x1b0] sm:$0xff] }
  0x1f   : > { %963 = vmatpush3.bf16.msra.mxu0 %v339_v20  ;;  %1046 = vmatpush3.bf16.msra.mxu1 %v339_v20  ;;  %v276_v20 = vld [vmem:[%s1129_s11 + $0x1a0] sm:$0xff]  ;;  %v277_v21 = vld [vmem:[%s1129_s11 + $0x1a8] sm:$0xff]  ;;  %v298_v24 = vpack.c.bf16 %v245_v19, %v244_v18  ;;  %v642_v58 = vld [vmem:[%s1223_s6 + $0x10] sm:$0xff] }
  0x20   : > { %964 = vmatprep.subr.bf16.mxu0 %v338_v23  ;;  %1039 = vmatprep.subr.bf16.mxu1 %v338_v23  ;;  %v314_v25 = vpack.c.bf16 %v277_v21, %v276_v20  ;;  %v248_v30 = vld [vmem:[%s1129_s11 + $0xc0] sm:$0xff]  ;;  %v249_v31 = vld [vmem:[%s1129_s11 + $0xc8] sm:$0xff]  ;;  %v674_v60 = vld [vmem:[%s1223_s6 + $0x110] sm:$0xff] }
  0x21   : > { %v280_v32 = vld [vmem:[%s1129_s11 + $0x1c0] sm:$0xff]  ;;  %v281_v33 = vld [vmem:[%s1129_s11 + $0x1c8] sm:$0xff]  ;;  %v300_v36 = vpack.c.bf16 %v249_v31, %v248_v30  ;;  %v643_v8 = vld [vmem:[%s1223_s6 + $0x18] sm:$0xff] }
  0x22   : > { %v316_v37 = vpack.c.bf16 %v281_v33, %v280_v32  ;;  %v252_v42 = vld [vmem:[%s1129_s11 + $0xe0] sm:$0xff]  ;;  %v253_v43 = vld [vmem:[%s1129_s11 + $0xe8] sm:$0xff] }
  0x23   : > { %965 = vmatpush3.bf16.msra.mxu0 %v338_v23  ;;  %1047 = vmatpush3.bf16.msra.mxu1 %v338_v23  ;;  %v313_v23 = vpack.c.bf16 %v275_v17, %v274_v16  ;;  %v284_v44 = vld [vmem:[%s1129_s11 + $0x1e0] sm:$0xff]  ;;  %v285_v45 = vld [vmem:[%s1129_s11 + $0x1e8] sm:$0xff]  ;;  %v302_v48 = vpack.c.bf16 %v253_v43, %v252_v42  ;;  %v679_v42 = vld [vmem:[%s1223_s6 + $0x138] sm:$0xff] }
  0x24   : > { %966 = vmatprep.subr.bf16.mxu0 %v337_v26  ;;  %1040 = vmatprep.subr.bf16.mxu1 %v337_v26  ;;  %v318_v49 = vpack.c.bf16 %v285_v45, %v284_v44  ;;  %v1228_v56 = vld [vmem:[%s1433_s2] ss:$0 sm:$0xff]  ;;  %v641_v16 = vld [vmem:[%s1223_s6 + $0x8] sm:$0xff] }
  0x25   : > { %v672_v2 = vld [vmem:[%s1223_s6 + $0x100] sm:$0xff]  ;;  %v673_v18 = vld [vmem:[%s1223_s6 + $0x108] sm:$0xff] }
  0x26   : > { %v644_v32 = vld [vmem:[%s1223_s6 + $0x20] sm:$0xff] }
  0x27   : > { %967 = vmatpush3.bf16.msra.mxu0 %v337_v26  ;;  %1048 = vmatpush3.bf16.msra.mxu1 %v337_v26  ;;  %v246_v26 = vld [vmem:[%s1129_s11 + $0xb0] sm:$0xff] }
  0x28   : > { %968 = vmatprep.subr.bf16.mxu0 %v336_v29  ;;  %1041 = vmatprep.subr.bf16.mxu1 %v336_v29  ;;  %v299_v34 = vpack.c.bf16 %v247_v27, %v246_v26  ;;  %v678_v26 = vld [vmem:[%s1223_s6 + $0x130] sm:$0xff] }
  0x2b   : > { %969 = vmatpush3.bf16.msra.mxu0 %v336_v29  ;;  %1049 = vmatpush3.bf16.msra.mxu1 %v336_v29  ;;  %v279_v29 = vld [vmem:[%s1129_s11 + $0x1b8] sm:$0xff] }
  0x2c   : > { %v315_v35 = vpack.c.bf16 %v279_v29, %v278_v28 }
  0x2e   : > { %971 = vmatmul.mubr.bf16.vlgmr.msra.gmra.mxu0 %v289_v38  ;;  %1003 = vmatmul.mubr.bf16.vlgmr.msra.gmra.mxu1 %v305_v39  ;;  %v250_v38 = vld [vmem:[%s1129_s11 + $0xd0] sm:$0xff]  ;;  %v251_v39 = vld [vmem:[%s1129_s11 + $0xd8] sm:$0xff] }
  0x2f   : > { %974 = vmatprep.mubr.bf16.mxu0 %v290_v40  ;;  %1006 = vmatprep.mubr.bf16.mxu1 %v306_v41  ;;  %v282_v40 = vld [vmem:[%s1129_s11 + $0x1d0] sm:$0xff]  ;;  %v283_v41 = vld [vmem:[%s1129_s11 + $0x1d8] sm:$0xff]  ;;  %v301_v46 = vpack.c.bf16 %v251_v39, %v250_v38 }
  0x30   : > { %v317_v47 = vpack.c.bf16 %v283_v41, %v282_v40  ;;  %v647_v40 = vld [vmem:[%s1223_s6 + $0x38] sm:$0xff] }
  0x36   : > { %975 = vmatmul.mubr.bf16.gmra.mxu0 %v291_v50  ;;  %1007 = vmatmul.mubr.bf16.gmra.mxu1 %v307_v51  ;;  %v254_v50 = vld [vmem:[%s1129_s11 + $0xf0] sm:$0xff]  ;;  %v255_v51 = vld [vmem:[%s1129_s11 + $0xf8] sm:$0xff] }
  0x37   : > { %978 = vmatprep.mubr.bf16.mxu0 %v292_v52  ;;  %1010 = vmatprep.mubr.bf16.mxu1 %v308_v53  ;;  %v286_v52 = vld [vmem:[%s1129_s11 + $0x1f0] sm:$0xff]  ;;  %v287_v53 = vld [vmem:[%s1129_s11 + $0x1f8] sm:$0xff]  ;;  %v303_v54 = vpack.c.bf16 %v255_v51, %v254_v50  ;;  %s1238_s11 = scalar_lea.vmem %s1435_s4, %s1117_s30  ;;  %v677_v50 = vld [vmem:[%s1223_s6 + $0x128] sm:$0xff] }
  0x38   : > { %v319_v55 = vpack.c.bf16 %v287_v53, %v286_v52 }
  0x3e   : > { %979 = vmatmul.mubr.bf16.gmra.mxu0 %v293_v62  ;;  %1011 = vmatmul.mubr.bf16.gmra.mxu1 %v309_v63 }
  0x3f   : > { %982 = vmatprep.mubr.bf16.mxu0 %v294_v0  ;;  %1014 = vmatprep.mubr.bf16.mxu1 %v310_v1  ;;  %v640_v0 = vld [vmem:[%s1223_s6] sm:$0xff] }
  0x46   : > { %983 = vmatmul.mubr.bf16.gmra.mxu0 %v295_v10  ;;  %1015 = vmatmul.mubr.bf16.gmra.mxu1 %v311_v11  ;;  %v675_v10 = vld [vmem:[%s1223_s6 + $0x118] sm:$0xff] }
  0x47   : > { %986 = vmatprep.mubr.bf16.mxu0 %v296_v12  ;;  %1018 = vmatprep.mubr.bf16.mxu1 %v312_v13 }
  0x4e   : > { %987 = vmatmul.mubr.bf16.gmra.mxu0 %v297_v22  ;;  %1019 = vmatmul.mubr.bf16.gmra.mxu1 %v313_v23 }
  0x4f   : > { %990 = vmatprep.mubr.bf16.mxu0 %v298_v24  ;;  %1022 = vmatprep.mubr.bf16.mxu1 %v314_v25  ;;  %v646_v24 = vld [vmem:[%s1223_s6 + $0x30] sm:$0xff] }
  0x56   : > { %991 = vmatmul.mubr.bf16.gmra.mxu0 %v299_v34  ;;  %1023 = vmatmul.mubr.bf16.gmra.mxu1 %v315_v35  ;;  %v676_v34 = vld [vmem:[%s1223_s6 + $0x120] sm:$0xff] }
  0x57   : > { %994 = vmatprep.mubr.bf16.mxu0 %v300_v36  ;;  %1026 = vmatprep.mubr.bf16.mxu1 %v316_v37 }
  0x5e   : > { %995 = vmatmul.mubr.bf16.gmra.mxu0 %v301_v46  ;;  %1027 = vmatmul.mubr.bf16.gmra.mxu1 %v317_v47 }
  0x5f   : > { %998 = vmatprep.mubr.bf16.mxu0 %v302_v48  ;;  %1030 = vmatprep.mubr.bf16.mxu1 %v318_v49  ;;  %v645_v48 = vld [vmem:[%s1223_s6 + $0x28] sm:$0xff] }
  0x66   : > { %999 = vmatmul.mubr.bf16.gmra.mxu0 %v303_v54  ;;  %1031 = vmatmul.mubr.bf16.gmra.mxu1 %v319_v55 }
  0xee   : > { %v972_v57 = vpop.f32.mrf.mxu0  ;;  %v1004_v59 = vpop.f32.mrf.mxu1 }
  0xef   : > { %v394_v61 = vadd.f32 %v972_v57, %v1228_v56  ;;  %v522_v62 = vadd.f32 %v1004_v59, %v1228_v56  ;;  %v650_v57 = vld [vmem:[%s1223_s6 + $0x50] sm:$0xff] }
  0xf0   : > { %v385_v63 = vpop.f32.mrf.mxu0  ;;  %v513_v1 = vpop.f32.mrf.mxu1  ;;  %v682_v59 = vld [vmem:[%s1223_s6 + $0x150] sm:$0xff] }
  0xf1   : > { %v706_v3 = vadd.f32 %v642_v58, %v394_v61  ;;  %v738_v4 = vadd.f32 %v674_v60, %v522_v62  ;;  %v386_v5 = vadd.f32 %v1228_v56, %v385_v63  ;;  %v514_v6 = vadd.f32 %v1228_v56, %v513_v1  ;;  %v648_v1 = vld [vmem:[%s1223_s6 + $0x40] sm:$0xff] }
  0xf2   : > { %v973_v7 = vpop.f32.mrf.mxu0  ;;  %v1005_v9 = vpop.f32.mrf.mxu1 }
  0xf3   : > { %770 = vst [vmem:[%s1238_s11 + $0x10] sm:$0xff] %v706_v3  ;;  %802 = vst [vmem:[%s1238_s11 + $0x110] sm:$0xff] %v738_v4  ;;  %v704_v11 = vadd.f32 %v640_v0, %v386_v5  ;;  %v736_v12 = vadd.f32 %v672_v2, %v514_v6  ;;  %v397_v13 = vadd.f32 %v973_v7, %v1228_v56  ;;  %v680_v3 = vld [vmem:[%s1223_s6 + $0x140] sm:$0xff] }
  0xf4   : > { %v525_v14 = vadd.f32 %v1005_v9, %v1228_v56  ;;  %v388_v15 = vpop.f32.mrf.mxu0  ;;  %v516_v17 = vpop.f32.mrf.mxu1  ;;  %v651_v9 = vld [vmem:[%s1223_s6 + $0x58] sm:$0xff] }
  0xf5   : > { %768 = vst [vmem:[%s1238_s11] sm:$0xff] %v704_v11  ;;  %800 = vst [vmem:[%s1238_s11 + $0x100] sm:$0xff] %v736_v12  ;;  %v707_v19 = vadd.f32 %v643_v8, %v397_v13  ;;  %v389_v21 = vadd.f32 %v1228_v56, %v388_v15  ;;  %v517_v22 = vadd.f32 %v1228_v56, %v516_v17  ;;  %v683_v11 = vld [vmem:[%s1223_s6 + $0x158] sm:$0xff]  ;;  %v649_v17 = vld [vmem:[%s1223_s6 + $0x48] sm:$0xff] }
  0xf6   : > { %v739_v20 = vadd.f32 %v675_v10, %v525_v14  ;;  %v976_v23 = vpop.f32.mrf.mxu0  ;;  %v1008_v25 = vpop.f32.mrf.mxu1 }
  0xf7   : > { %771 = vst [vmem:[%s1238_s11 + $0x18] sm:$0xff] %v707_v19  ;;  %v705_v27 = vadd.f32 %v641_v16, %v389_v21  ;;  %v737_v28 = vadd.f32 %v673_v18, %v517_v22  ;;  %v410_v29 = vadd.f32 %v976_v23, %v1228_v56  ;;  %v538_v30 = vadd.f32 %v1008_v25, %v1228_v56  ;;  %v681_v19 = vld [vmem:[%s1223_s6 + $0x148] sm:$0xff]  ;;  %v654_v25 = vld [vmem:[%s1223_s6 + $0x70] sm:$0xff] }
  0xf8   : > { %803 = vst [vmem:[%s1238_s11 + $0x118] sm:$0xff] %v739_v20  ;;  %v401_v31 = vpop.f32.mrf.mxu0  ;;  %v529_v33 = vpop.f32.mrf.mxu1 }
  0xf9   : > { %769 = vst [vmem:[%s1238_s11 + $0x8] sm:$0xff] %v705_v27  ;;  %801 = vst [vmem:[%s1238_s11 + $0x108] sm:$0xff] %v737_v28  ;;  %v710_v35 = vadd.f32 %v646_v24, %v410_v29  ;;  %v742_v36 = vadd.f32 %v678_v26, %v538_v30  ;;  %v402_v37 = vadd.f32 %v1228_v56, %v401_v31  ;;  %v686_v27 = vld [vmem:[%s1223_s6 + $0x170] sm:$0xff] }
  0xfa   : > { %v530_v38 = vadd.f32 %v1228_v56, %v529_v33  ;;  %v977_v39 = vpop.f32.mrf.mxu0  ;;  %v1009_v41 = vpop.f32.mrf.mxu1  ;;  %v652_v33 = vld [vmem:[%s1223_s6 + $0x60] sm:$0xff] }
  0xfb   : > { %774 = vst [vmem:[%s1238_s11 + $0x30] sm:$0xff] %v710_v35  ;;  %806 = vst [vmem:[%s1238_s11 + $0x130] sm:$0xff] %v742_v36  ;;  %v708_v43 = vadd.f32 %v644_v32, %v402_v37  ;;  %v413_v45 = vadd.f32 %v977_v39, %v1228_v56  ;;  %v541_v46 = vadd.f32 %v1009_v41, %v1228_v56  ;;  %v684_v35 = vld [vmem:[%s1223_s6 + $0x160] sm:$0xff]  ;;  %v655_v41 = vld [vmem:[%s1223_s6 + $0x78] sm:$0xff] }
  0xfc   : > { %v740_v44 = vadd.f32 %v676_v34, %v530_v38  ;;  %v404_v47 = vpop.f32.mrf.mxu0  ;;  %v532_v49 = vpop.f32.mrf.mxu1 }
  0xfd   : > { %772 = vst [vmem:[%s1238_s11 + $0x20] sm:$0xff] %v708_v43  ;;  %v711_v51 = vadd.f32 %v647_v40, %v413_v45  ;;  %v743_v52 = vadd.f32 %v679_v42, %v541_v46  ;;  %v405_v53 = vadd.f32 %v1228_v56, %v404_v47  ;;  %v533_v54 = vadd.f32 %v1228_v56, %v532_v49  ;;  %v687_v43 = vld [vmem:[%s1223_s6 + $0x178] sm:$0xff]  ;;  %v653_v49 = vld [vmem:[%s1223_s6 + $0x68] sm:$0xff] }
  0xfe   : > { %804 = vst [vmem:[%s1238_s11 + $0x120] sm:$0xff] %v740_v44  ;;  %v980_v55 = vpop.f32.mrf.mxu0  ;;  %v1012_v58 = vpop.f32.mrf.mxu1 }
  0xff   : > { %775 = vst [vmem:[%s1238_s11 + $0x38] sm:$0xff] %v711_v51  ;;  %807 = vst [vmem:[%s1238_s11 + $0x138] sm:$0xff] %v743_v52  ;;  %v709_v60 = vadd.f32 %v645_v48, %v405_v53  ;;  %v741_v61 = vadd.f32 %v677_v50, %v533_v54  ;;  %v426_v62 = vadd.f32 %v980_v55, %v1228_v56  ;;  %v685_v51 = vld [vmem:[%s1223_s6 + $0x168] sm:$0xff] }
 0x100   : > { %v554_v63 = vadd.f32 %v1012_v58, %v1228_v56  ;;  %v417_v0 = vpop.f32.mrf.mxu0  ;;  %v545_v2 = vpop.f32.mrf.mxu1  ;;  %v658_v58 = vld [vmem:[%s1223_s6 + $0x90] sm:$0xff] }
 0x101   : > { %773 = vst [vmem:[%s1238_s11 + $0x28] sm:$0xff] %v709_v60  ;;  %805 = vst [vmem:[%s1238_s11 + $0x128] sm:$0xff] %v741_v61  ;;  %v714_v4 = vadd.f32 %v650_v57, %v426_v62  ;;  %v418_v6 = vadd.f32 %v1228_v56, %v417_v0  ;;  %v546_v7 = vadd.f32 %v1228_v56, %v545_v2  ;;  %v690_v60 = vld [vmem:[%s1223_s6 + $0x190] sm:$0xff]  ;;  %v656_v2 = vld [vmem:[%s1223_s6 + $0x80] sm:$0xff] }
 0x102   : > { %v746_v5 = vadd.f32 %v682_v59, %v554_v63  ;;  %v981_v8 = vpop.f32.mrf.mxu0  ;;  %v1013_v10 = vpop.f32.mrf.mxu1 }
 0x103   : > { %778 = vst [vmem:[%s1238_s11 + $0x50] sm:$0xff] %v714_v4  ;;  %v712_v12 = vadd.f32 %v648_v1, %v418_v6  ;;  %v744_v13 = vadd.f32 %v680_v3, %v546_v7  ;;  %v429_v14 = vadd.f32 %v981_v8, %v1228_v56  ;;  %v557_v15 = vadd.f32 %v1013_v10, %v1228_v56  ;;  %v688_v4 = vld [vmem:[%s1223_s6 + $0x180] sm:$0xff]  ;;  %v659_v10 = vld [vmem:[%s1223_s6 + $0x98] sm:$0xff] }
 0x104   : > { %810 = vst [vmem:[%s1238_s11 + $0x150] sm:$0xff] %v746_v5  ;;  %v420_v16 = vpop.f32.mrf.mxu0  ;;  %v548_v18 = vpop.f32.mrf.mxu1 }
 0x105   : > { %776 = vst [vmem:[%s1238_s11 + $0x40] sm:$0xff] %v712_v12  ;;  %808 = vst [vmem:[%s1238_s11 + $0x140] sm:$0xff] %v744_v13  ;;  %v715_v20 = vadd.f32 %v651_v9, %v429_v14  ;;  %v747_v21 = vadd.f32 %v683_v11, %v557_v15  ;;  %v421_v22 = vadd.f32 %v1228_v56, %v420_v16  ;;  %v691_v12 = vld [vmem:[%s1223_s6 + $0x198] sm:$0xff] }
 0x106   : > { %v549_v23 = vadd.f32 %v1228_v56, %v548_v18  ;;  %v984_v24 = vpop.f32.mrf.mxu0  ;;  %v1016_v26 = vpop.f32.mrf.mxu1  ;;  %v657_v18 = vld [vmem:[%s1223_s6 + $0x88] sm:$0xff] }
 0x107   : > { %779 = vst [vmem:[%s1238_s11 + $0x58] sm:$0xff] %v715_v20  ;;  %811 = vst [vmem:[%s1238_s11 + $0x158] sm:$0xff] %v747_v21  ;;  %v713_v28 = vadd.f32 %v649_v17, %v421_v22  ;;  %v442_v30 = vadd.f32 %v984_v24, %v1228_v56  ;;  %v570_v31 = vadd.f32 %v1016_v26, %v1228_v56  ;;  %v689_v20 = vld [vmem:[%s1223_s6 + $0x188] sm:$0xff]  ;;  %v662_v26 = vld [vmem:[%s1223_s6 + $0xb0] sm:$0xff] }
 0x108   : > { %v745_v29 = vadd.f32 %v681_v19, %v549_v23  ;;  %v433_v32 = vpop.f32.mrf.mxu0  ;;  %v561_v34 = vpop.f32.mrf.mxu1 }
 0x109   : > { %777 = vst [vmem:[%s1238_s11 + $0x48] sm:$0xff] %v713_v28  ;;  %v718_v36 = vadd.f32 %v654_v25, %v442_v30  ;;  %v750_v37 = vadd.f32 %v686_v27, %v570_v31  ;;  %v434_v38 = vadd.f32 %v1228_v56, %v433_v32  ;;  %v562_v39 = vadd.f32 %v1228_v56, %v561_v34  ;;  %v694_v28 = vld [vmem:[%s1223_s6 + $0x1b0] sm:$0xff]  ;;  %v660_v34 = vld [vmem:[%s1223_s6 + $0xa0] sm:$0xff] }
 0x10a   : > { %809 = vst [vmem:[%s1238_s11 + $0x148] sm:$0xff] %v745_v29  ;;  %v985_v40 = vpop.f32.mrf.mxu0  ;;  %v1017_v42 = vpop.f32.mrf.mxu1 }
 0x10b   : > { %782 = vst [vmem:[%s1238_s11 + $0x70] sm:$0xff] %v718_v36  ;;  %814 = vst [vmem:[%s1238_s11 + $0x170] sm:$0xff] %v750_v37  ;;  %v716_v44 = vadd.f32 %v652_v33, %v434_v38  ;;  %v748_v45 = vadd.f32 %v684_v35, %v562_v39  ;;  %v445_v46 = vadd.f32 %v985_v40, %v1228_v56  ;;  %v692_v36 = vld [vmem:[%s1223_s6 + $0x1a0] sm:$0xff] }
 0x10c   : > { %v573_v47 = vadd.f32 %v1017_v42, %v1228_v56  ;;  %v436_v48 = vpop.f32.mrf.mxu0  ;;  %v564_v50 = vpop.f32.mrf.mxu1  ;;  %v663_v42 = vld [vmem:[%s1223_s6 + $0xb8] sm:$0xff] }
 0x10d   : > { %780 = vst [vmem:[%s1238_s11 + $0x60] sm:$0xff] %v716_v44  ;;  %812 = vst [vmem:[%s1238_s11 + $0x160] sm:$0xff] %v748_v45  ;;  %v719_v52 = vadd.f32 %v655_v41, %v445_v46  ;;  %v437_v54 = vadd.f32 %v1228_v56, %v436_v48  ;;  %v565_v55 = vadd.f32 %v1228_v56, %v564_v50  ;;  %v695_v44 = vld [vmem:[%s1223_s6 + $0x1b8] sm:$0xff]  ;;  %v661_v50 = vld [vmem:[%s1223_s6 + $0xa8] sm:$0xff] }
 0x10e   : > { %v751_v53 = vadd.f32 %v687_v43, %v573_v47  ;;  %v988_v57 = vpop.f32.mrf.mxu0  ;;  %v1020_v59 = vpop.f32.mrf.mxu1 }
 0x10f   : > { %783 = vst [vmem:[%s1238_s11 + $0x78] sm:$0xff] %v719_v52  ;;  %v717_v61 = vadd.f32 %v653_v49, %v437_v54  ;;  %v749_v62 = vadd.f32 %v685_v51, %v565_v55  ;;  %v458_v63 = vadd.f32 %v988_v57, %v1228_v56  ;;  %v586_v0 = vadd.f32 %v1020_v59, %v1228_v56  ;;  %v693_v52 = vld [vmem:[%s1223_s6 + $0x1a8] sm:$0xff]  ;;  %v666_v59 = vld [vmem:[%s1223_s6 + $0xd0] sm:$0xff] }
 0x110   : > { %815 = vst [vmem:[%s1238_s11 + $0x178] sm:$0xff] %v751_v53  ;;  %v449_v1 = vpop.f32.mrf.mxu0  ;;  %v577_v3 = vpop.f32.mrf.mxu1 }
 0x111   : > { %781 = vst [vmem:[%s1238_s11 + $0x68] sm:$0xff] %v717_v61  ;;  %813 = vst [vmem:[%s1238_s11 + $0x168] sm:$0xff] %v749_v62  ;;  %v722_v5 = vadd.f32 %v658_v58, %v458_v63  ;;  %v754_v6 = vadd.f32 %v690_v60, %v586_v0  ;;  %v450_v7 = vadd.f32 %v1228_v56, %v449_v1  ;;  %v698_v61 = vld [vmem:[%s1223_s6 + $0x1d0] sm:$0xff] }
 0x112   : > { %v578_v8 = vadd.f32 %v1228_v56, %v577_v3  ;;  %v989_v9 = vpop.f32.mrf.mxu0  ;;  %v1021_v11 = vpop.f32.mrf.mxu1  ;;  %v664_v3 = vld [vmem:[%s1223_s6 + $0xc0] sm:$0xff] }
 0x113   : > { %786 = vst [vmem:[%s1238_s11 + $0x90] sm:$0xff] %v722_v5  ;;  %818 = vst [vmem:[%s1238_s11 + $0x190] sm:$0xff] %v754_v6  ;;  %v720_v13 = vadd.f32 %v656_v2, %v450_v7  ;;  %v461_v15 = vadd.f32 %v989_v9, %v1228_v56  ;;  %v589_v16 = vadd.f32 %v1021_v11, %v1228_v56  ;;  %v696_v5 = vld [vmem:[%s1223_s6 + $0x1c0] sm:$0xff]  ;;  %v667_v11 = vld [vmem:[%s1223_s6 + $0xd8] sm:$0xff] }
 0x114   : > { %v752_v14 = vadd.f32 %v688_v4, %v578_v8  ;;  %v452_v17 = vpop.f32.mrf.mxu0  ;;  %v580_v19 = vpop.f32.mrf.mxu1 }
 0x115   : > { %784 = vst [vmem:[%s1238_s11 + $0x80] sm:$0xff] %v720_v13  ;;  %v723_v21 = vadd.f32 %v659_v10, %v461_v15  ;;  %v755_v22 = vadd.f32 %v691_v12, %v589_v16  ;;  %v453_v23 = vadd.f32 %v1228_v56, %v452_v17  ;;  %v581_v24 = vadd.f32 %v1228_v56, %v580_v19  ;;  %v699_v13 = vld [vmem:[%s1223_s6 + $0x1d8] sm:$0xff]  ;;  %v665_v19 = vld [vmem:[%s1223_s6 + $0xc8] sm:$0xff] }
 0x116   : > { %816 = vst [vmem:[%s1238_s11 + $0x180] sm:$0xff] %v752_v14  ;;  %v992_v25 = vpop.f32.mrf.mxu0  ;;  %v1024_v27 = vpop.f32.mrf.mxu1 }
 0x117   : > { %787 = vst [vmem:[%s1238_s11 + $0x98] sm:$0xff] %v723_v21  ;;  %819 = vst [vmem:[%s1238_s11 + $0x198] sm:$0xff] %v755_v22  ;;  %v721_v29 = vadd.f32 %v657_v18, %v453_v23  ;;  %v753_v30 = vadd.f32 %v689_v20, %v581_v24  ;;  %v474_v31 = vadd.f32 %v992_v25, %v1228_v56  ;;  %v697_v21 = vld [vmem:[%s1223_s6 + $0x1c8] sm:$0xff] }
 0x118   : > { %v602_v32 = vadd.f32 %v1024_v27, %v1228_v56  ;;  %v465_v33 = vpop.f32.mrf.mxu0  ;;  %v593_v35 = vpop.f32.mrf.mxu1  ;;  %v670_v27 = vld [vmem:[%s1223_s6 + $0xf0] sm:$0xff] }
 0x119   : > { %785 = vst [vmem:[%s1238_s11 + $0x88] sm:$0xff] %v721_v29  ;;  %817 = vst [vmem:[%s1238_s11 + $0x188] sm:$0xff] %v753_v30  ;;  %v726_v37 = vadd.f32 %v662_v26, %v474_v31  ;;  %v466_v39 = vadd.f32 %v1228_v56, %v465_v33  ;;  %v594_v40 = vadd.f32 %v1228_v56, %v593_v35  ;;  %v702_v29 = vld [vmem:[%s1223_s6 + $0x1f0] sm:$0xff]  ;;  %v668_v35 = vld [vmem:[%s1223_s6 + $0xe0] sm:$0xff] }
 0x11a   : > { %v758_v38 = vadd.f32 %v694_v28, %v602_v32  ;;  %v993_v41 = vpop.f32.mrf.mxu0  ;;  %v1025_v43 = vpop.f32.mrf.mxu1 }
 0x11b   : > { %790 = vst [vmem:[%s1238_s11 + $0xb0] sm:$0xff] %v726_v37  ;;  %v724_v45 = vadd.f32 %v660_v34, %v466_v39  ;;  %v756_v46 = vadd.f32 %v692_v36, %v594_v40  ;;  %v477_v47 = vadd.f32 %v993_v41, %v1228_v56  ;;  %v605_v48 = vadd.f32 %v1025_v43, %v1228_v56  ;;  %v700_v37 = vld [vmem:[%s1223_s6 + $0x1e0] sm:$0xff]  ;;  %v671_v43 = vld [vmem:[%s1223_s6 + $0xf8] sm:$0xff] }
 0x11c   : > { %822 = vst [vmem:[%s1238_s11 + $0x1b0] sm:$0xff] %v758_v38  ;;  %v468_v49 = vpop.f32.mrf.mxu0  ;;  %v596_v51 = vpop.f32.mrf.mxu1 }
 0x11d   : > { %788 = vst [vmem:[%s1238_s11 + $0xa0] sm:$0xff] %v724_v45  ;;  %820 = vst [vmem:[%s1238_s11 + $0x1a0] sm:$0xff] %v756_v46  ;;  %v727_v53 = vadd.f32 %v663_v42, %v477_v47  ;;  %v759_v54 = vadd.f32 %v695_v44, %v605_v48  ;;  %v469_v55 = vadd.f32 %v1228_v56, %v468_v49  ;;  %v703_v45 = vld [vmem:[%s1223_s6 + $0x1f8] sm:$0xff] }
 0x11e   : > { %v597_v57 = vadd.f32 %v1228_v56, %v596_v51  ;;  %v996_v58 = vpop.f32.mrf.mxu0  ;;  %v1028_v60 = vpop.f32.mrf.mxu1  ;;  %v669_v51 = vld [vmem:[%s1223_s6 + $0xe8] sm:$0xff] }
 0x11f   : > { %791 = vst [vmem:[%s1238_s11 + $0xb8] sm:$0xff] %v727_v53  ;;  %823 = vst [vmem:[%s1238_s11 + $0x1b8] sm:$0xff] %v759_v54  ;;  %v725_v62 = vadd.f32 %v661_v50, %v469_v55  ;;  %v490_v0 = vadd.f32 %v996_v58, %v1228_v56  ;;  %v618_v1 = vadd.f32 %v1028_v60, %v1228_v56  ;;  %v701_v53 = vld [vmem:[%s1223_s6 + $0x1e8] sm:$0xff] }
 0x120   : > { %v757_v63 = vadd.f32 %v693_v52, %v597_v57  ;;  %v481_v2 = vpop.f32.mrf.mxu0  ;;  %v609_v4 = vpop.f32.mrf.mxu1 }
 0x121   : > { %789 = vst [vmem:[%s1238_s11 + $0xa8] sm:$0xff] %v725_v62  ;;  %v730_v6 = vadd.f32 %v666_v59, %v490_v0  ;;  %v762_v7 = vadd.f32 %v698_v61, %v618_v1  ;;  %v482_v8 = vadd.f32 %v1228_v56, %v481_v2  ;;  %v610_v9 = vadd.f32 %v1228_v56, %v609_v4 }
 0x122   : > { %821 = vst [vmem:[%s1238_s11 + $0x1a8] sm:$0xff] %v757_v63  ;;  %v997_v10 = vpop.f32.mrf.mxu0  ;;  %v1029_v12 = vpop.f32.mrf.mxu1 }
 0x123   : > { %794 = vst [vmem:[%s1238_s11 + $0xd0] sm:$0xff] %v730_v6  ;;  %826 = vst [vmem:[%s1238_s11 + $0x1d0] sm:$0xff] %v762_v7  ;;  %v728_v14 = vadd.f32 %v664_v3, %v482_v8  ;;  %v760_v15 = vadd.f32 %v696_v5, %v610_v9  ;;  %v493_v16 = vadd.f32 %v997_v10, %v1228_v56 }
 0x124   : > { %v621_v17 = vadd.f32 %v1029_v12, %v1228_v56  ;;  %v484_v18 = vpop.f32.mrf.mxu0  ;;  %v612_v20 = vpop.f32.mrf.mxu1 }
 0x125   : > { %792 = vst [vmem:[%s1238_s11 + $0xc0] sm:$0xff] %v728_v14  ;;  %824 = vst [vmem:[%s1238_s11 + $0x1c0] sm:$0xff] %v760_v15  ;;  %v731_v22 = vadd.f32 %v667_v11, %v493_v16  ;;  %v485_v24 = vadd.f32 %v1228_v56, %v484_v18  ;;  %v613_v25 = vadd.f32 %v1228_v56, %v612_v20 }
 0x126   : > { %v763_v23 = vadd.f32 %v699_v13, %v621_v17  ;;  %v1000_v26 = vpop.f32.mrf.mxu0  ;;  %v1032_v28 = vpop.f32.mrf.mxu1 }
 0x127   : > { %795 = vst [vmem:[%s1238_s11 + $0xd8] sm:$0xff] %v731_v22  ;;  %v729_v30 = vadd.f32 %v665_v19, %v485_v24  ;;  %v761_v31 = vadd.f32 %v697_v21, %v613_v25  ;;  %v506_v32 = vadd.f32 %v1000_v26, %v1228_v56  ;;  %v634_v33 = vadd.f32 %v1032_v28, %v1228_v56 }
 0x128   : > { %827 = vst [vmem:[%s1238_s11 + $0x1d8] sm:$0xff] %v763_v23  ;;  %v497_v34 = vpop.f32.mrf.mxu0  ;;  %v625_v36 = vpop.f32.mrf.mxu1 }
 0x129   : > { %793 = vst [vmem:[%s1238_s11 + $0xc8] sm:$0xff] %v729_v30  ;;  %825 = vst [vmem:[%s1238_s11 + $0x1c8] sm:$0xff] %v761_v31  ;;  %v734_v38 = vadd.f32 %v670_v27, %v506_v32  ;;  %v766_v39 = vadd.f32 %v702_v29, %v634_v33  ;;  %v498_v40 = vadd.f32 %v1228_v56, %v497_v34 }
 0x12a   : > { %v626_v41 = vadd.f32 %v1228_v56, %v625_v36  ;;  %v1001_v42 = vpop.f32.mrf.mxu0  ;;  %v1033_v44 = vpop.f32.mrf.mxu1 }
 0x12b   : > { %798 = vst [vmem:[%s1238_s11 + $0xf0] sm:$0xff] %v734_v38  ;;  %830 = vst [vmem:[%s1238_s11 + $0x1f0] sm:$0xff] %v766_v39  ;;  %v732_v46 = vadd.f32 %v668_v35, %v498_v40  ;;  %v509_v48 = vadd.f32 %v1001_v42, %v1228_v56  ;;  %v637_v49 = vadd.f32 %v1033_v44, %v1228_v56 }
 0x12c   : > { %v764_v47 = vadd.f32 %v700_v37, %v626_v41  ;;  %v500_v50 = vpop.f32.mrf.mxu0  ;;  %v628_v52 = vpop.f32.mrf.mxu1 }
 0x12d   : > { %796 = vst [vmem:[%s1238_s11 + $0xe0] sm:$0xff] %v732_v46  ;;  %v735_v54 = vadd.f32 %v671_v43, %v509_v48  ;;  %v767_v55 = vadd.f32 %v703_v45, %v637_v49  ;;  %v501_v57 = vadd.f32 %v1228_v56, %v500_v50  ;;  %v629_v58 = vadd.f32 %v1228_v56, %v628_v52 }
 0x12e   : > { %828 = vst [vmem:[%s1238_s11 + $0x1e0] sm:$0xff] %v764_v47 }
 0x12f   : > { %799 = vst [vmem:[%s1238_s11 + $0xf8] sm:$0xff] %v735_v54  ;;  %831 = vst [vmem:[%s1238_s11 + $0x1f8] sm:$0xff] %v767_v55  ;;  %v733_v59 = vadd.f32 %v669_v51, %v501_v57  ;;  %v765_v60 = vadd.f32 %v701_v53, %v629_v58 }
 0x131   : > { %797 = vst [vmem:[%s1238_s11 + $0xe8] sm:$0xff] %v733_v59  ;;  %829 = vst [vmem:[%s1238_s11 + $0x1e8] sm:$0xff] %v765_v60 }
 0x132 PF: > { %s14_s15 = sadd.s32 1, %s1064_s15  }
 0x133   : > { %p11_p4 = scmp.ge.s32.totalorder %s14_s15, 4  }
 0x135   :  { %13 = sbr.rel (!%p11_p4) target bundleno = 1 (0x1), region = 69 }

// kernel: fno3d_forward.15
= control target key start
LH: loop header
LB: loop body
LE: loop exit
PB: predicated region body
PF: predicated region fallthrough
CT: control target
= control target key end

     0   :  { %s2121_s18 = smov 0   ;;  %s3135_s0 = inlined_call_operand.vmem [shape: f32[1024,128], index: 0, kind: input, shape index: {}]   ;;  %s3136_s1 = inlined_call_operand.vmem [shape: f32[128,128], index: 1, kind: input, shape index: {}]   ;;  %s3137_s2 = inlined_call_operand.vmem [shape: f32[1,128], index: 2, kind: input, shape index: {}]   ;;  %s3138_s3 = inlined_call_operand.vmem [shape: f32[128,128], index: 3, kind: input, shape index: {}]   ;;  %s3139_s4 = inlined_call_operand.vmem [shape: f32[1,128], index: 4, kind: input, shape index: {}]   ;;  %s3140_s5 = inlined_call_operand.vmem [shape: f32[1024,128], index: 5, kind: output, shape index: {}]  }
   0x1 LB: > { %s1693_s19 = sadd.s32 4294967295, %s2089_s18   ;;  %p1697_p0 = scmp.ge.s32.totalorder %s2089_s18, 1  ;;  %s2089_s18 = sphi %s2121_s18, %s15_s18  }
   0x2   : > { %p188_p1 = scmp.lt.s32.totalorder %s2089_s18, 3 }
   0x4   : > { %p189_p2 = pnand %p1697_p0, %p188_p1 }
   0x5   : > { %s1698_s26 = sshll.u32 (!%p189_p2), %s1693_s19, 6 }
   0x6   : > { %192 = sbr.rel (%p189_p2) target bundleno = 635 (0x27b), region = 40  ;;  %p217_p3 = scmp.lt.s32.totalorder (!%p189_p2), %s1698_s26, 127 }
   0xb   : > { %v339_v0 = vld [vmem:[%s3136_s1 + $0x70] sm:$0xff]  ;;  %v340_v1 = vld [vmem:[%s3136_s1 + $0x78] sm:$0xff]  ;;  %v337_v2 = vld [vmem:[%s3136_s1 + $0x60] sm:$0xff]  ;;  %s3142_s26 = smov (!%p217_p3, %s1698_s26), 127 }
   0xc   : > { %v348_v3 = vpack.c.bf16 %v340_v1, %v339_v0  ;;  %v338_v4 = vld [vmem:[%s3136_s1 + $0x68] sm:$0xff]  ;;  %v335_v6 = vld [vmem:[%s3136_s1 + $0x50] sm:$0xff]  ;;  %v336_v7 = vld [vmem:[%s3136_s1 + $0x58] sm:$0xff]  ;;  %s1699_s8 = sshll.u32 %s3142_s26, 3 }
   0xd   : > { %v347_v5 = vpack.c.bf16 %v338_v4, %v337_v2  ;;  %v346_v8 = vpack.c.bf16 %v336_v7, %v335_v6  ;;  %v333_v9 = vld [vmem:[%s3136_s1 + $0x40] sm:$0xff]  ;;  %v334_v10 = vld [vmem:[%s3136_s1 + $0x48] sm:$0xff]  ;;  %s2161_s15 = scalar_lea.vmem %s3135_s0, %s1699_s8  ;;  %v331_v15 = vld [vmem:[%s3136_s1 + $0x30] sm:$0xff]  ;;  %s3002_s6 = scalar_lea.vmem %s3140_s5, %s1699_s8 }
   0xe   : > { %1786 = vmatprep.subr.bf16.mxu0 %v348_v3  ;;  %v229_v11 = vld [vmem:[%s2161_s15] sm:$0xff]  ;;  %v230_v12 = vld [vmem:[%s2161_s15 + $0x8] sm:$0xff]  ;;  %v345_v14 = vpack.c.bf16 %v334_v10, %v333_v9  ;;  %v332_v16 = vld [vmem:[%s3136_s1 + $0x38] sm:$0xff] }
   0xf   : > { %1787 = vmatpush3.bf16.msra.mxu0 %v348_v3  ;;  %v293_v13 = vpack.c.bf16 %v230_v12, %v229_v11  ;;  %v344_v17 = vpack.c.bf16 %v332_v16, %v331_v15  ;;  %v329_v18 = vld [vmem:[%s3136_s1 + $0x20] sm:$0xff]  ;;  %v330_v19 = vld [vmem:[%s3136_s1 + $0x28] sm:$0xff]  ;;  %v327_v21 = vld [vmem:[%s3136_s1 + $0x10] sm:$0xff] }
  0x10   : > { %1788 = vmatprep.subr.bf16.mxu0 %v347_v5  ;;  %v343_v20 = vpack.c.bf16 %v330_v19, %v329_v18  ;;  %v328_v22 = vld [vmem:[%s3136_s1 + $0x18] sm:$0xff]  ;;  %v325_v24 = vld [vmem:[%s3136_s1] sm:$0xff]  ;;  %v326_v25 = vld [vmem:[%s3136_s1 + $0x8] sm:$0xff] }
  0x11   : > { %1802 = vmatprep.mubr.bf16.mxu0 %v293_v13  ;;  %v342_v23 = vpack.c.bf16 %v328_v22, %v327_v21  ;;  %v341_v26 = vpack.c.bf16 %v326_v25, %v325_v24  ;;  %v231_v27 = vld [vmem:[%s2161_s15 + $0x10] sm:$0xff]  ;;  %v232_v28 = vld [vmem:[%s2161_s15 + $0x18] sm:$0xff]  ;;  %v233_v29 = vld [vmem:[%s2161_s15 + $0x20] sm:$0xff] }
  0x12   : > { %v234_v30 = vld [vmem:[%s2161_s15 + $0x28] sm:$0xff]  ;;  %v294_v31 = vpack.c.bf16 %v232_v28, %v231_v27  ;;  %v235_v33 = vld [vmem:[%s2161_s15 + $0x30] sm:$0xff]  ;;  %v236_v34 = vld [vmem:[%s2161_s15 + $0x38] sm:$0xff] }
  0x13   : > { %1789 = vmatpush3.bf16.msra.mxu0 %v347_v5  ;;  %v295_v32 = vpack.c.bf16 %v234_v30, %v233_v29  ;;  %v237_v35 = vld [vmem:[%s2161_s15 + $0x40] sm:$0xff]  ;;  %v238_v36 = vld [vmem:[%s2161_s15 + $0x48] sm:$0xff]  ;;  %v296_v37 = vpack.c.bf16 %v236_v34, %v235_v33  ;;  %v239_v39 = vld [vmem:[%s2161_s15 + $0x50] sm:$0xff] }
  0x14   : > { %1790 = vmatprep.subr.bf16.mxu0 %v346_v8  ;;  %v297_v38 = vpack.c.bf16 %v238_v36, %v237_v35  ;;  %v240_v40 = vld [vmem:[%s2161_s15 + $0x58] sm:$0xff]  ;;  %v241_v41 = vld [vmem:[%s2161_s15 + $0x60] sm:$0xff]  ;;  %v242_v42 = vld [vmem:[%s2161_s15 + $0x68] sm:$0xff] }
  0x15   : > { %v298_v43 = vpack.c.bf16 %v240_v40, %v239_v39  ;;  %v299_v44 = vpack.c.bf16 %v242_v42, %v241_v41  ;;  %v243_v45 = vld [vmem:[%s2161_s15 + $0x70] sm:$0xff]  ;;  %v244_v46 = vld [vmem:[%s2161_s15 + $0x78] sm:$0xff]  ;;  %v245_v47 = vld [vmem:[%s2161_s15 + $0x80] sm:$0xff] }
  0x16   : > { %v246_v48 = vld [vmem:[%s2161_s15 + $0x88] sm:$0xff]  ;;  %v300_v49 = vpack.c.bf16 %v244_v46, %v243_v45  ;;  %v247_v51 = vld [vmem:[%s2161_s15 + $0x90] sm:$0xff]  ;;  %v248_v52 = vld [vmem:[%s2161_s15 + $0x98] sm:$0xff] }
  0x17   : > { %1791 = vmatpush3.bf16.msra.mxu0 %v346_v8  ;;  %v301_v50 = vpack.c.bf16 %v246_v48, %v245_v47  ;;  %v249_v53 = vld [vmem:[%s2161_s15 + $0xa0] sm:$0xff]  ;;  %v250_v54 = vld [vmem:[%s2161_s15 + $0xa8] sm:$0xff]  ;;  %v302_v55 = vpack.c.bf16 %v248_v52, %v247_v51  ;;  %v251_v57 = vld [vmem:[%s2161_s15 + $0xb0] sm:$0xff] }
  0x18   : > { %1792 = vmatprep.subr.bf16.mxu0 %v345_v14  ;;  %v303_v56 = vpack.c.bf16 %v250_v54, %v249_v53  ;;  %v252_v58 = vld [vmem:[%s2161_s15 + $0xb8] sm:$0xff]  ;;  %v253_v59 = vld [vmem:[%s2161_s15 + $0xc0] sm:$0xff]  ;;  %v254_v60 = vld [vmem:[%s2161_s15 + $0xc8] sm:$0xff] }
  0x19   : > { %v304_v61 = vpack.c.bf16 %v252_v58, %v251_v57  ;;  %v305_v62 = vpack.c.bf16 %v254_v60, %v253_v59  ;;  %v255_v63 = vld [vmem:[%s2161_s15 + $0xd0] sm:$0xff]  ;;  %v256_v0 = vld [vmem:[%s2161_s15 + $0xd8] sm:$0xff]  ;;  %v257_v1 = vld [vmem:[%s2161_s15 + $0xe0] sm:$0xff] }
  0x1a   : > { %v258_v2 = vld [vmem:[%s2161_s15 + $0xe8] sm:$0xff]  ;;  %v306_v3 = vpack.c.bf16 %v256_v0, %v255_v63  ;;  %v259_v5 = vld [vmem:[%s2161_s15 + $0xf0] sm:$0xff]  ;;  %v260_v6 = vld [vmem:[%s2161_s15 + $0xf8] sm:$0xff] }
  0x1b   : > { %1793 = vmatpush3.bf16.msra.mxu0 %v345_v14  ;;  %v307_v4 = vpack.c.bf16 %v258_v2, %v257_v1  ;;  %v261_v7 = vld [vmem:[%s2161_s15 + $0x100] sm:$0xff]  ;;  %v262_v8 = vld [vmem:[%s2161_s15 + $0x108] sm:$0xff]  ;;  %v308_v9 = vpack.c.bf16 %v260_v6, %v259_v5  ;;  %v263_v11 = vld [vmem:[%s2161_s15 + $0x110] sm:$0xff] }
  0x1c   : > { %1794 = vmatprep.subr.bf16.mxu0 %v344_v17  ;;  %v309_v10 = vpack.c.bf16 %v262_v8, %v261_v7  ;;  %v264_v12 = vld [vmem:[%s2161_s15 + $0x118] sm:$0xff]  ;;  %v265_v13 = vld [vmem:[%s2161_s15 + $0x120] sm:$0xff]  ;;  %v266_v14 = vld [vmem:[%s2161_s15 + $0x128] sm:$0xff] }
  0x1d   : > { %v310_v15 = vpack.c.bf16 %v264_v12, %v263_v11  ;;  %v311_v16 = vpack.c.bf16 %v266_v14, %v265_v13  ;;  %v268_v18 = vld [vmem:[%s2161_s15 + $0x138] sm:$0xff]  ;;  %v269_v19 = vld [vmem:[%s2161_s15 + $0x140] sm:$0xff]  ;;  %v1266_v29 = vld [vmem:[%s3138_s3 + $0x68] sm:$0xff] }
  0x1e   : > { %v1268_v24 = vld [vmem:[%s3138_s3 + $0x78] sm:$0xff]  ;;  %v1265_v28 = vld [vmem:[%s3138_s3 + $0x60] sm:$0xff]  ;;  %v1263_v35 = vld [vmem:[%s3138_s3 + $0x50] sm:$0xff] }
  0x1f   : > { %1795 = vmatpush3.bf16.msra.mxu0 %v344_v17  ;;  %v267_v17 = vld [vmem:[%s2161_s15 + $0x130] sm:$0xff]  ;;  %v272_v27 = vld [vmem:[%s2161_s15 + $0x158] sm:$0xff]  ;;  %v273_v30 = vld [vmem:[%s2161_s15 + $0x160] sm:$0xff] }
  0x20   : > { %1796 = vmatprep.subr.bf16.mxu0 %v343_v20  ;;  %v312_v21 = vpack.c.bf16 %v268_v18, %v267_v17  ;;  %v1264_v36 = vld [vmem:[%s3138_s3 + $0x58] sm:$0xff]  ;;  %v1261_v40 = vld [vmem:[%s3138_s3 + $0x40] sm:$0xff]  ;;  %v1262_v41 = vld [vmem:[%s3138_s3 + $0x48] sm:$0xff] }
  0x21   : > { %v276_v39 = vld [vmem:[%s2161_s15 + $0x178] sm:$0xff]  ;;  %v277_v42 = vld [vmem:[%s2161_s15 + $0x180] sm:$0xff]  ;;  %v1259_v47 = vld [vmem:[%s3138_s3 + $0x30] sm:$0xff] }
  0x22   : > { %v1260_v48 = vld [vmem:[%s3138_s3 + $0x38] sm:$0xff]  ;;  %v1257_v52 = vld [vmem:[%s3138_s3 + $0x20] sm:$0xff]  ;;  %v1258_v53 = vld [vmem:[%s3138_s3 + $0x28] sm:$0xff] }
  0x23   : > { %1797 = vmatpush3.bf16.msra.mxu0 %v343_v20  ;;  %v270_v20 = vld [vmem:[%s2161_s15 + $0x148] sm:$0xff]  ;;  %v280_v51 = vld [vmem:[%s2161_s15 + $0x198] sm:$0xff]  ;;  %v281_v54 = vld [vmem:[%s2161_s15 + $0x1a0] sm:$0xff] }
  0x24   : > { %1798 = vmatprep.subr.bf16.mxu0 %v342_v23  ;;  %v313_v22 = vpack.c.bf16 %v270_v20, %v269_v19  ;;  %v1255_v59 = vld [vmem:[%s3138_s3 + $0x10] sm:$0xff]  ;;  %v1256_v60 = vld [vmem:[%s3138_s3 + $0x18] sm:$0xff]  ;;  %v1253_v0 = vld [vmem:[%s3138_s3] sm:$0xff] }
  0x25   : > { %v284_v63 = vld [vmem:[%s2161_s15 + $0x1b8] sm:$0xff]  ;;  %v1254_v1 = vld [vmem:[%s3138_s3 + $0x8] sm:$0xff]  ;;  %v285_v2 = vld [vmem:[%s2161_s15 + $0x1c0] sm:$0xff] }
  0x26   : > { %v287_v7 = vld [vmem:[%s2161_s15 + $0x1d0] sm:$0xff]  ;;  %v288_v8 = vld [vmem:[%s2161_s15 + $0x1d8] sm:$0xff] }
  0x27   : > { %1799 = vmatpush3.bf16.msra.mxu0 %v342_v23  ;;  %v1267_v23 = vld [vmem:[%s3138_s3 + $0x70] sm:$0xff]  ;;  %v322_v11 = vpack.c.bf16 %v288_v8, %v287_v7  ;;  %v292_v14 = vld [vmem:[%s2161_s15 + $0x1f8] sm:$0xff] }
  0x28   : > { %1800 = vmatprep.subr.bf16.mxu0 %v341_v26  ;;  %v1276_v25 = vpack.c.bf16 %v1268_v24, %v1267_v23  ;;  %v291_v13 = vld [vmem:[%s2161_s15 + $0x1f0] sm:$0xff] }
  0x2a   : > { %1866 = vmatprep.subr.bf16.mxu1 %v1276_v25 }
  0x2b   : > { %1801 = vmatpush3.bf16.msra.mxu0 %v341_v26  ;;  %v271_v26 = vld [vmem:[%s2161_s15 + $0x150] sm:$0xff]  ;;  %1867 = vmatpush3.bf16.msra.mxu1 %v1276_v25 }
  0x2c   : > { %v314_v33 = vpack.c.bf16 %v272_v27, %v271_v26 }
  0x2e   : > { %1803 = vmatmul.mubr.bf16.vlgmr.msra.gmra.mxu0 %v294_v31  ;;  %v274_v31 = vld [vmem:[%s2161_s15 + $0x168] sm:$0xff] }
  0x2f   : > { %1806 = vmatprep.mubr.bf16.mxu0 %v295_v32  ;;  %v1275_v32 = vpack.c.bf16 %v1266_v29, %v1265_v28  ;;  %v315_v34 = vpack.c.bf16 %v274_v31, %v273_v30 }
  0x31   : > { %1868 = vmatprep.subr.bf16.mxu1 %v1275_v32 }
  0x32   : > { %1869 = vmatpush3.bf16.msra.mxu1 %v1275_v32 }
  0x36   : > { %1807 = vmatmul.mubr.bf16.gmra.mxu0 %v296_v37  ;;  %v1274_v37 = vpack.c.bf16 %v1264_v36, %v1263_v35 }
  0x37   : > { %1810 = vmatprep.mubr.bf16.mxu0 %v297_v38  ;;  %v275_v38 = vld [vmem:[%s2161_s15 + $0x170] sm:$0xff] }
  0x38   : > { %1870 = vmatprep.subr.bf16.mxu1 %v1274_v37  ;;  %v316_v45 = vpack.c.bf16 %v276_v39, %v275_v38 }
  0x39   : > { %1871 = vmatpush3.bf16.msra.mxu1 %v1274_v37 }
  0x3e   : > { %1811 = vmatmul.mubr.bf16.gmra.mxu0 %v298_v43  ;;  %v278_v43 = vld [vmem:[%s2161_s15 + $0x188] sm:$0xff] }
  0x3f   : > { %1814 = vmatprep.mubr.bf16.mxu0 %v299_v44  ;;  %v1273_v44 = vpack.c.bf16 %v1262_v41, %v1261_v40  ;;  %v317_v46 = vpack.c.bf16 %v278_v43, %v277_v42 }
  0x41   : > { %1872 = vmatprep.subr.bf16.mxu1 %v1273_v44 }
  0x42   : > { %1873 = vmatpush3.bf16.msra.mxu1 %v1273_v44 }
  0x46   : > { %1815 = vmatmul.mubr.bf16.gmra.mxu0 %v300_v49  ;;  %v1272_v49 = vpack.c.bf16 %v1260_v48, %v1259_v47 }
  0x47   : > { %1818 = vmatprep.mubr.bf16.mxu0 %v301_v50  ;;  %v279_v50 = vld [vmem:[%s2161_s15 + $0x190] sm:$0xff] }
  0x48   : > { %1874 = vmatprep.subr.bf16.mxu1 %v1272_v49  ;;  %v318_v57 = vpack.c.bf16 %v280_v51, %v279_v50 }
  0x49   : > { %1875 = vmatpush3.bf16.msra.mxu1 %v1272_v49 }
  0x4e   : > { %1819 = vmatmul.mubr.bf16.gmra.mxu0 %v302_v55  ;;  %v282_v55 = vld [vmem:[%s2161_s15 + $0x1a8] sm:$0xff] }
  0x4f   : > { %1822 = vmatprep.mubr.bf16.mxu0 %v303_v56  ;;  %v1271_v56 = vpack.c.bf16 %v1258_v53, %v1257_v52  ;;  %v319_v58 = vpack.c.bf16 %v282_v55, %v281_v54 }
  0x51   : > { %1876 = vmatprep.subr.bf16.mxu1 %v1271_v56 }
  0x52   : > { %1877 = vmatpush3.bf16.msra.mxu1 %v1271_v56 }
  0x56   : > { %1823 = vmatmul.mubr.bf16.gmra.mxu0 %v304_v61  ;;  %v1270_v61 = vpack.c.bf16 %v1256_v60, %v1255_v59 }
  0x57   : > { %1826 = vmatprep.mubr.bf16.mxu0 %v305_v62  ;;  %v283_v62 = vld [vmem:[%s2161_s15 + $0x1b0] sm:$0xff] }
  0x58   : > { %1878 = vmatprep.subr.bf16.mxu1 %v1270_v61  ;;  %v320_v5 = vpack.c.bf16 %v284_v63, %v283_v62 }
  0x59   : > { %1879 = vmatpush3.bf16.msra.mxu1 %v1270_v61 }
  0x5e   : > { %1827 = vmatmul.mubr.bf16.gmra.mxu0 %v306_v3  ;;  %v286_v3 = vld [vmem:[%s2161_s15 + $0x1c8] sm:$0xff] }
  0x5f   : > { %1830 = vmatprep.mubr.bf16.mxu0 %v307_v4  ;;  %v1269_v4 = vpack.c.bf16 %v1254_v1, %v1253_v0  ;;  %v321_v6 = vpack.c.bf16 %v286_v3, %v285_v2 }
  0x61   : > { %1880 = vmatprep.subr.bf16.mxu1 %v1269_v4 }
  0x62   : > { %1881 = vmatpush3.bf16.msra.mxu1 %v1269_v4 }
  0x66   : > { %1831 = vmatmul.mubr.bf16.gmra.mxu0 %v308_v9  ;;  %v289_v9 = vld [vmem:[%s2161_s15 + $0x1e0] sm:$0xff] }
  0x67   : > { %1834 = vmatprep.mubr.bf16.mxu0 %v309_v10  ;;  %v290_v10 = vld [vmem:[%s2161_s15 + $0x1e8] sm:$0xff] }
  0x68   : > { %v323_v12 = vpack.c.bf16 %v290_v10, %v289_v9 }
  0x6e   : > { %1835 = vmatmul.mubr.bf16.gmra.mxu0 %v310_v15  ;;  %v324_v15 = vpack.c.bf16 %v292_v14, %v291_v13 }
  0x6f   : > { %1838 = vmatprep.mubr.bf16.mxu0 %v311_v16  ;;  %v2302_v16 = vld [vmem:[%s3137_s2] ss:$0 sm:$0xff] }
  0x76   : > { %1839 = vmatmul.mubr.bf16.gmra.mxu0 %v312_v21 }
  0x77   : > { %1842 = vmatprep.mubr.bf16.mxu0 %v313_v22 }
  0x7e   : > { %1843 = vmatmul.mubr.bf16.gmra.mxu0 %v314_v33 }
  0x7f   : > { %1846 = vmatprep.mubr.bf16.mxu0 %v315_v34 }
  0x86   : > { %1847 = vmatmul.mubr.bf16.gmra.mxu0 %v316_v45 }
  0x87   : > { %1850 = vmatprep.mubr.bf16.mxu0 %v317_v46 }
  0x8e   : > { %1851 = vmatmul.mubr.bf16.gmra.mxu0 %v318_v57 }
  0x8f   : > { %1854 = vmatprep.mubr.bf16.mxu0 %v319_v58 }
  0x96   : > { %1855 = vmatmul.mubr.bf16.gmra.mxu0 %v320_v5 }
  0x97   : > { %1858 = vmatprep.mubr.bf16.mxu0 %v321_v6 }
  0x9e   : > { %1859 = vmatmul.mubr.bf16.gmra.mxu0 %v322_v11 }
  0x9f   : > { %1862 = vmatprep.mubr.bf16.mxu0 %v323_v12 }
  0xa6   : > { %1863 = vmatmul.mubr.bf16.gmra.mxu0 %v324_v15 }
  0xee   : > { %v1804_v17 = vpop.f32.mrf.mxu0 }
  0xef   : > { %v2305_v18 = vadd.f32 %v1804_v17, %v2302_v16 }
  0xf0   : > { %v390_v19 = vpop.f32.mrf.mxu0 }
  0xf1   : > { %v711_v20 = vmul.f32 0.044715, %v2305_v18  ;;  %v2309_v21 = vadd.f32 %v2302_v16, %v390_v19 }
  0xf2   : > { %v1805_v22 = vpop.f32.mrf.mxu0 }
  0xf3   : > { %v775_v23 = vmul.f32 %v711_v20, %v2305_v18  ;;  %v709_v24 = vmul.f32 0.044715, %v2309_v21  ;;  %v2314_v25 = vadd.f32 %v1805_v22, %v2302_v16 }
  0xf4   : > { %v393_v26 = vpop.f32.mrf.mxu0 }
  0xf5   : > { %v839_v27 = vmul.f32 %v775_v23, %v2305_v18  ;;  %v712_v28 = vmul.f32 0.044715, %v2314_v25  ;;  %v2319_v29 = vadd.f32 %v2302_v16, %v393_v26  ;;  %v773_v30 = vmul.f32 %v709_v24, %v2309_v21 }
  0xf6   : > { %v1808_v31 = vpop.f32.mrf.mxu0 }
  0xf7   : > { %v776_v32 = vmul.f32 %v712_v28, %v2314_v25  ;;  %v710_v33 = vmul.f32 0.044715, %v2319_v29  ;;  %v2325_v34 = vadd.f32 %v1808_v31, %v2302_v16  ;;  %v837_v36 = vmul.f32 %v773_v30, %v2309_v21 }
  0xf8   : > { %v406_v35 = vpop.f32.mrf.mxu0  ;;  %v903_v37 = vadd.f32 %v839_v27, %v2305_v18 }
  0xf9   : > { %v840_v38 = vmul.f32 %v776_v32, %v2314_v25  ;;  %v715_v39 = vmul.f32 0.044715, %v2325_v34  ;;  %v2332_v40 = vadd.f32 %v2302_v16, %v406_v35  ;;  %v774_v41 = vmul.f32 %v710_v33, %v2319_v29 }
  0xfa   : > { %v1809_v42 = vpop.f32.mrf.mxu0  ;;  %v901_v43 = vadd.f32 %v837_v36, %v2309_v21  ;;  %v967_v44 = vmul.f32 0.7978846, %v903_v37 }
  0xfb   : > { %v779_v45 = vmul.f32 %v715_v39, %v2325_v34  ;;  %v713_v46 = vmul.f32 0.044715, %v2332_v40  ;;  %v2339_v47 = vadd.f32 %v1809_v42, %v2302_v16  ;;  %v838_v48 = vmul.f32 %v774_v41, %v2319_v29 }
  0xfc   : > { %v409_v49 = vpop.f32.mrf.mxu0  ;;  %v965_v50 = vmul.f32 0.7978846, %v901_v43  ;;  %v904_v51 = vadd.f32 %v840_v38, %v2314_v25  ;;  %1954 = vtanh.f32 %v967_v44  ;;  %v647_v39 = vmul.f32 0.5, %v2305_v18 }
  0xfd   : > { %v843_v52 = vmul.f32 %v779_v45, %v2325_v34  ;;  %v777_v53 = vmul.f32 %v713_v46, %v2332_v40  ;;  %v716_v54 = vmul.f32 0.044715, %v2339_v47  ;;  %v2347_v55 = vadd.f32 %v2302_v16, %v409_v49 }
  0xfe   : > { %v1812_v56 = vpop.f32.mrf.mxu0  ;;  %v902_v57 = vadd.f32 %v838_v48, %v2319_v29  ;;  %1956 = vtanh.f32 %v965_v50  ;;  %v968_v58 = vmul.f32 0.7978846, %v904_v51  ;;  %v645_v45 = vmul.f32 0.5, %v2309_v21 }
  0xff   : > { %v841_v59 = vmul.f32 %v777_v53, %v2332_v40  ;;  %v780_v60 = vmul.f32 %v716_v54, %v2339_v47  ;;  %v714_v61 = vmul.f32 0.044715, %v2347_v55  ;;  %v2354_v62 = vadd.f32 %v1812_v56, %v2302_v16 }
 0x100   : > { %v422_v63 = vpop.f32.mrf.mxu0  ;;  %v966_v0 = vmul.f32 0.7978846, %v902_v57  ;;  %1958 = vtanh.f32 %v968_v58  ;;  %v907_v1 = vadd.f32 %v843_v52, %v2325_v34  ;;  %v648_v46 = vmul.f32 0.5, %v2314_v25 }
 0x101   : > { %v844_v2 = vmul.f32 %v780_v60, %v2339_v47  ;;  %v778_v3 = vmul.f32 %v714_v61, %v2347_v55  ;;  %v719_v4 = vmul.f32 0.044715, %v2354_v62  ;;  %v2361_v5 = vadd.f32 %v2302_v16, %v422_v63 }
 0x102   : > { %v1813_v6 = vpop.f32.mrf.mxu0  ;;  %1960 = vtanh.f32 %v966_v0  ;;  %v905_v7 = vadd.f32 %v841_v59, %v2332_v40  ;;  %v971_v11 = vmul.f32 0.7978846, %v907_v1  ;;  %v646_v50 = vmul.f32 0.5, %v2319_v29 }
 0x103   : > { %v842_v8 = vmul.f32 %v778_v3, %v2347_v55  ;;  %v717_v9 = vmul.f32 0.044715, %v2361_v5  ;;  %v2367_v10 = vadd.f32 %v1813_v6, %v2302_v16  ;;  %v783_v12 = vmul.f32 %v719_v4, %v2354_v62 }
 0x104   : > { %v425_v13 = vpop.f32.mrf.mxu0  ;;  %v969_v14 = vmul.f32 0.7978846, %v905_v7  ;;  %v908_v15 = vadd.f32 %v844_v2, %v2339_v47  ;;  %v2404_v21 = vmul.f32 0.5, %v2325_v34  ;;  %v649_v0 = vmul.f32 0.5, %v2332_v40 }
 0x105   : > { %v781_v17 = vmul.f32 %v717_v9, %v2361_v5  ;;  %v720_v19 = vmul.f32 0.044715, %v2367_v10  ;;  %v2374_v20 = vadd.f32 %v2302_v16, %v425_v13  ;;  %v906_v23 = vadd.f32 %v842_v8, %v2347_v55 }
 0x106   : > { %v1816_v22 = vpop.f32.mrf.mxu0  ;;  %1962 = vtanh.f32 %v969_v14  ;;  %v972_v24 = vmul.f32 0.7978846, %v908_v15  ;;  %v847_v30 = vmul.f32 %v783_v12, %v2354_v62 }
 0x107   : > { %v845_v26 = vmul.f32 %v781_v17, %v2361_v5  ;;  %v784_v27 = vmul.f32 %v720_v19, %v2367_v10  ;;  %v718_v28 = vmul.f32 0.044715, %v2374_v20  ;;  %1964 = vtanh.f32 %v971_v11 }
 0x108   : > { %v438_v31 = vpop.f32.mrf.mxu0  ;;  %v970_v32 = vmul.f32 0.7978846, %v906_v23  ;;  %1966 = vtanh.f32 %v972_v24  ;;  %v2390_v44 = vadd.f32 %v1816_v22, %v2302_v16  ;;  %v911_v18 = vadd.f32 %v847_v30, %v2354_v62 }
 0x109   : > { %v1955_v33 = vpop.eup %1954  ;;  %v782_v35 = vmul.f32 %v718_v28, %v2374_v20  ;;  %v2383_v36 = vadd.f32 %v2302_v16, %v438_v31  ;;  %v848_v37 = vmul.f32 %v784_v27, %v2367_v10  ;;  %v909_v41 = vadd.f32 %v845_v26, %v2361_v5 }
 0x10a   : > { %v1817_v38 = vpop.f32.mrf.mxu0  ;;  %1968 = vtanh.f32 %v970_v32  ;;  %v723_v60 = vmul.f32 0.044715, %v2390_v44  ;;  %v1095_v63 = vadd.f32 1.0, %v1955_v33  ;;  %v975_v4 = vmul.f32 0.7978846, %v911_v18 }
 0x10b   : > { %v1957_v42 = vpop.eup %1956  ;;  %v846_v43 = vmul.f32 %v782_v35, %v2374_v20  ;;  %v721_v48 = vmul.f32 0.044715, %v2383_v36  ;;  %v973_v51 = vmul.f32 0.7978846, %v909_v41  ;;  %v2398_v53 = vadd.f32 %v1817_v38, %v2302_v16 }
 0x10c   : > { %v441_v49 = vpop.f32.mrf.mxu0  ;;  %v1093_v56 = vadd.f32 1.0, %v1957_v42  ;;  %v912_v29 = vadd.f32 %v848_v37, %v2367_v10  ;;  %v1159_v17 = vmul.f32 %v1095_v63, %v647_v39  ;;  %v650_v19 = vmul.f32 0.5, %v2347_v55 }
 0x10d   : > { %v1959_v52 = vpop.eup %1958  ;;  %v2401_v54 = vadd.f32 %v2302_v16, %v441_v49  ;;  %v910_v58 = vadd.f32 %v846_v43, %v2374_v20  ;;  %1970 = vtanh.f32 %v973_v51  ;;  %v785_v1 = vmul.f32 %v721_v48, %v2383_v36 }
 0x10e   : > { %v1820_v25 = vpop.f32.mrf.mxu0  ;;  %v1096_v57 = vadd.f32 1.0, %v1959_v52  ;;  %v724_v6 = vmul.f32 0.044715, %v2398_v53  ;;  %v1157_v8 = vmul.f32 %v1093_v56, %v645_v45  ;;  %v976_v14 = vmul.f32 0.7978846, %v912_v29 }
 0x10f   : > { %v1961_v59 = vpop.eup %1960  ;;  %v722_v61 = vmul.f32 0.044715, %v2401_v54  ;;  %v974_v3 = vmul.f32 0.7978846, %v910_v58  ;;  %v2414_v7 = vadd.f32 %v1820_v25, %v2302_v16  ;;  %v652_v22 = vmul.f32 0.5, %v2339_v47 }
 0x110   : > { %v454_v2 = vpop.f32.mrf.mxu0  ;;  %v1094_v34 = vadd.f32 1.0, %v1961_v59  ;;  %v1160_v9 = vmul.f32 %v1096_v57, %v648_v46  ;;  %v849_v24 = vmul.f32 %v785_v1, %v2383_v36  ;;  %v2424_v28 = vmul.f32 0.5, %v2354_v62 }
 0x111   : > { %v786_v11 = vmul.f32 %v722_v61, %v2401_v54  ;;  %1972 = vtanh.f32 %v974_v3  ;;  %v2418_v15 = vadd.f32 %v2302_v16, %v454_v2  ;;  %v787_v31 = vmul.f32 %v723_v60, %v2390_v44 }
 0x112   : > { %v1821_v12 = vpop.f32.mrf.mxu0  ;;  %v1158_v13 = vmul.f32 %v1094_v34, %v646_v50  ;;  %1974 = vtanh.f32 %v975_v4  ;;  %v788_v32 = vmul.f32 %v724_v6, %v2398_v53  ;;  %v727_v33 = vmul.f32 0.044715, %v2414_v7 }
 0x113   : > { %v1963_v40 = vpop.eup %1962  ;;  %v1222_v35 = vpack.c.bf16 %v1160_v9, %v1159_v17  ;;  %v850_v55 = vmul.f32 %v786_v11, %v2401_v54  ;;  %1976 = vtanh.f32 %v976_v14  ;;  %v725_v62 = vmul.f32 0.044715, %v2418_v15 }
 0x114   : > { %v1965_v23 = vpop.eup %1964  ;;  %v457_v26 = vpop.f32.mrf.mxu0  ;;  %v1221_v27 = vpack.c.bf16 %v1158_v13, %v1157_v8  ;;  %v1097_v37 = vadd.f32 1.0, %v1963_v40  ;;  %v2432_v41 = vadd.f32 %v1821_v12, %v2302_v16  ;;  %v653_v49 = vmul.f32 0.5, %v2361_v5 }
 0x115   : > { %v1967_v30 = vpop.eup %1966  ;;  %v2435_v42 = vadd.f32 %v2302_v16, %v457_v26  ;;  %v1099_v43 = vadd.f32 1.0, %v1965_v23  ;;  %v913_v50 = vadd.f32 %v849_v24, %v2383_v36  ;;  %v851_v51 = vmul.f32 %v787_v31, %v2390_v44 }
 0x116   : > { %1882 = vmatprep.mubr.bf16.mxu1 %v1221_v27  ;;  %v1824_v47 = vpop.f32.mrf.mxu0  ;;  %v1100_v38 = vadd.f32 1.0, %v1967_v30  ;;  %v852_v18 = vmul.f32 %v788_v32, %v2398_v53  ;;  %v791_v52 = vmul.f32 %v727_v33, %v2414_v7  ;;  %v1161_v57 = vmul.f32 %v1097_v37, %v649_v0 }
 0x117   : > { %v1969_v39 = vpop.eup %1968  ;;  %1883 = vmatmul.mubr.bf16.vlgmr.msra.gmra.mxu1 %v1222_v35  ;;  %v2438_v45 = vadd.f32 %v1824_v47, %v2302_v16  ;;  %v914_v29 = vadd.f32 %v850_v55, %v2401_v54  ;;  %v977_v59 = vmul.f32 0.7978846, %v913_v50  ;;  %v789_v61 = vmul.f32 %v725_v62, %v2418_v15 }
 0x118   : > { %v470_v46 = vpop.f32.mrf.mxu0  ;;  %v1098_v48 = vadd.f32 1.0, %v1969_v39  ;;  %v1164_v56 = vmul.f32 %v1100_v38, %v652_v22  ;;  %v728_v5 = vmul.f32 0.044715, %v2432_v41  ;;  %v726_v63 = vmul.f32 0.044715, %v2435_v42 }
 0x119   : > { %v1163_v1 = vmul.f32 %v1099_v43, %v2404_v21  ;;  %v731_v2 = vmul.f32 0.044715, %v2438_v45  ;;  %v978_v4 = vmul.f32 0.7978846, %v914_v29  ;;  %1978 = vtanh.f32 %v977_v59 }
 0x11a   : > { %v1825_v25 = vpop.f32.mrf.mxu0  ;;  %v1162_v58 = vmul.f32 %v1098_v48, %v650_v19  ;;  %v1971_v60 = vpop.eup %1970  ;;  %v2452_v0 = vadd.f32 %v2302_v16, %v470_v46  ;;  %v656_v9 = vmul.f32 0.5, %v2367_v10  ;;  %v2456_v11 = vmul.f32 %v791_v52, %v2414_v7 }
 0x11b   : > { %v1224_v6 = vpack.c.bf16 %v1164_v56, %v1163_v1  ;;  %v1101_v8 = vadd.f32 1.0, %v1971_v60  ;;  %v654_v21 = vmul.f32 0.5, %v2374_v20  ;;  %v2460_v13 = vmul.f32 0.5, %v2383_v36 }
 0x11c   : > { %v473_v34 = vpop.f32.mrf.mxu0  ;;  %v1223_v3 = vpack.c.bf16 %v1162_v58, %v1161_v57  ;;  %1980 = vtanh.f32 %v978_v4  ;;  %v853_v40 = vmul.f32 %v789_v61, %v2418_v15  ;;  %v792_v17 = vmul.f32 %v728_v5, %v2432_v41 }
 0x11d   : > { %v790_v19 = vmul.f32 %v726_v63, %v2435_v42  ;;  %v2466_v10 = vadd.f32 %v1825_v25, %v2302_v16  ;;  %v795_v22 = vmul.f32 %v731_v2, %v2438_v45  ;;  %v915_v20 = vadd.f32 %v851_v51, %v2390_v44 }
 0x11e   : > { %1886 = vmatprep.mubr.bf16.mxu1 %v1223_v3  ;;  %v1828_v12 = vpop.f32.mrf.mxu0  ;;  %v1973_v14 = vpop.eup %1972  ;;  %v916_v36 = vadd.f32 %v852_v18, %v2398_v53  ;;  %v729_v27 = vmul.f32 0.044715, %v2452_v0  ;;  %v2473_v30 = vadd.f32 %v2302_v16, %v473_v34  ;;  %v1165_v32 = vmul.f32 %v1101_v8, %v653_v49 }
 0x11f   : > { %1887 = vmatmul.mubr.bf16.gmra.mxu1 %v1224_v6  ;;  %v1102_v24 = vadd.f32 1.0, %v1973_v14  ;;  %v1975_v26 = vpop.eup %1974  ;;  %v2476_v31 = vadd.f32 %v1828_v12, %v2302_v16  ;;  %v979_v47 = vmul.f32 0.7978846, %v915_v20  ;;  %v856_v39 = vmul.f32 %v792_v17, %v2432_v41 }
 0x120   : > { %v486_v23 = vpop.f32.mrf.mxu0  ;;  %v1103_v55 = vadd.f32 1.0, %v1975_v26  ;;  %v980_v37 = vmul.f32 0.7978846, %v916_v36  ;;  %v1977_v38 = vpop.eup %1976  ;;  %v732_v62 = vmul.f32 0.044715, %v2466_v10  ;;  %v658_v46 = vmul.f32 0.5, %v2401_v54 }
 0x121   : > { %v1166_v35 = vmul.f32 %v1102_v24, %v654_v21  ;;  %v2481_v43 = vadd.f32 %v2302_v16, %v486_v23  ;;  %v854_v48 = vmul.f32 %v790_v19, %v2435_v42  ;;  %v1104_v49 = vadd.f32 1.0, %v1977_v38 }
 0x122   : > { %v1829_v33 = vpop.f32.mrf.mxu0  ;;  %1982 = vtanh.f32 %v979_v47  ;;  %v2486_v18 = vmul.f32 %v795_v22, %v2438_v45  ;;  %v793_v52 = vmul.f32 %v729_v27, %v2452_v0  ;;  %v730_v56 = vmul.f32 0.044715, %v2473_v30 }
 0x123   : > { %v1225_v51 = vpack.c.bf16 %v1166_v35, %v1165_v32  ;;  %v735_v25 = vmul.f32 0.044715, %v2476_v31  ;;  %v1167_v58 = vmul.f32 %v1103_v55, %v2424_v28  ;;  %v1168_v54 = vmul.f32 %v1104_v49, %v656_v9 }
 0x124   : > { %v489_v50 = vpop.f32.mrf.mxu0  ;;  %1984 = vtanh.f32 %v980_v37  ;;  %v917_v29 = vadd.f32 %v853_v40, %v2418_v15  ;;  %v796_v59 = vmul.f32 %v732_v62, %v2466_v10  ;;  %v733_v60 = vmul.f32 0.044715, %v2481_v43 }
 0x125   : > { %1890 = vmatprep.mubr.bf16.mxu1 %v1225_v51  ;;  %v2496_v61 = vadd.f32 %v1829_v33, %v2302_v16  ;;  %v2499_v5 = vmul.f32 0.5, %v2390_v44  ;;  %v2502_v63 = vadd.f32 %v2302_v16, %v489_v50  ;;  %v1226_v1 = vpack.c.bf16 %v1168_v54, %v1167_v58 }
 0x126   : > { %v1832_v57 = vpop.f32.mrf.mxu0  ;;  %v918_v28 = vadd.f32 %v854_v48, %v2435_v42  ;;  %v981_v34 = vmul.f32 0.7978846, %v917_v29  ;;  %v1979_v3 = vpop.eup %1978  ;;  %v794_v4 = vmul.f32 %v730_v56, %v2473_v30  ;;  %v799_v6 = vmul.f32 %v735_v25, %v2476_v31 }
 0x127   : > { %v2508_v8 = vadd.f32 %v1832_v57, %v2302_v16  ;;  %v660_v9 = vmul.f32 0.5, %v2398_v53  ;;  %v857_v44 = vmul.f32 %v793_v52, %v2452_v0  ;;  %1891 = vmatmul.mubr.bf16.gmra.mxu1 %v1226_v1  ;;  %v1105_v21 = vadd.f32 1.0, %v1979_v3 }
 0x128   : > { %v502_v2 = vpop.f32.mrf.mxu0  ;;  %v982_v14 = vmul.f32 0.7978846, %v918_v28  ;;  %1986 = vtanh.f32 %v981_v34  ;;  %v2513_v17 = vmul.f32 %v796_v59, %v2466_v10  ;;  %v797_v19 = vmul.f32 %v733_v60, %v2481_v43 }
 0x129   : > { %v1981_v40 = vpop.eup %1980  ;;  %v736_v22 = vmul.f32 0.044715, %v2496_v61  ;;  %v2518_v23 = vmul.f32 0.5, %v2418_v15  ;;  %v734_v53 = vmul.f32 0.044715, %v2502_v63  ;;  %v919_v36 = vadd.f32 %v2456_v11, %v2414_v7 }
 0x12a   : > { %v1833_v12 = vpop.f32.mrf.mxu0  ;;  %v1106_v20 = vadd.f32 1.0, %v1981_v40  ;;  %1988 = vtanh.f32 %v982_v14  ;;  %v858_v26 = vmul.f32 %v794_v4, %v2473_v30  ;;  %v2525_v27 = vmul.f32 %v799_v6, %v2476_v31 }
 0x12b   : > { %v739_v32 = vmul.f32 0.044715, %v2508_v8  ;;  %v2529_v33 = vadd.f32 %v2302_v16, %v502_v2  ;;  %v1169_v15 = vmul.f32 %v1105_v21, %v2460_v13  ;;  %v920_v47 = vadd.f32 %v856_v39, %v2432_v41 }
 0x12c   : > { %v505_v24 = vpop.f32.mrf.mxu0  ;;  %v1170_v35 = vmul.f32 %v1106_v20, %v658_v46  ;;  %v983_v37 = vmul.f32 0.7978846, %v919_v36  ;;  %v2534_v38 = vmul.f32 %v797_v19, %v2481_v43  ;;  %v800_v11 = vmul.f32 %v736_v22, %v2496_v61 }
 0x12d   : > { %v2538_v62 = vadd.f32 %v1833_v12, %v2302_v16  ;;  %v662_v48 = vmul.f32 0.5, %v2435_v42  ;;  %v798_v50 = vmul.f32 %v734_v53, %v2502_v63  ;;  %v984_v13 = vmul.f32 0.7978846, %v920_v47 }
 0x12e   : > { %v1836_v55 = vpop.f32.mrf.mxu0  ;;  %v1227_v51 = vpack.c.bf16 %v1170_v35, %v1169_v15  ;;  %1990 = vtanh.f32 %v983_v37  ;;  %v803_v39 = vmul.f32 %v739_v32, %v2508_v8  ;;  %v737_v52 = vmul.f32 0.044715, %v2529_v33 }
 0x12f   : > { %v1983_v46 = vpop.eup %1982  ;;  %v2545_v56 = vadd.f32 %v2302_v16, %v505_v24  ;;  %v2548_v25 = vadd.f32 %v1836_v55, %v2302_v16  ;;  %1992 = vtanh.f32 %v984_v13  ;;  %v921_v58 = vadd.f32 %v857_v44, %v2452_v0 }
 0x130   : > { %v518_v49 = vpop.f32.mrf.mxu0  ;;  %1894 = vmatprep.mubr.bf16.mxu1 %v1227_v51  ;;  %v1107_v57 = vadd.f32 1.0, %v1983_v46  ;;  %v922_v54 = vadd.f32 %v858_v26, %v2473_v30  ;;  %v2553_v59 = vmul.f32 %v800_v11, %v2496_v61  ;;  %v740_v60 = vmul.f32 0.044715, %v2538_v62 }
 0x131   : > { %v1985_v29 = vpop.eup %1984  ;;  %v2557_v1 = vmul.f32 0.5, %v2414_v7  ;;  %v2560_v2 = vmul.f32 0.5, %v2432_v41  ;;  %v2563_v28 = vmul.f32 %v798_v50, %v2502_v63  ;;  %v985_v4 = vmul.f32 0.7978846, %v921_v58 }
 0x132   : > { %v1837_v42 = vpop.f32.mrf.mxu0  ;;  %v1108_v34 = vadd.f32 1.0, %v1985_v29  ;;  %v986_v6 = vmul.f32 0.7978846, %v922_v54  ;;  %v2566_v44 = vmul.f32 %v803_v39, %v2508_v8  ;;  %v801_v12 = vmul.f32 %v737_v52, %v2529_v33 }
 0x133   : > { %v738_v21 = vmul.f32 0.044715, %v2545_v56  ;;  %v2571_v7 = vadd.f32 %v2302_v16, %v518_v49  ;;  %v743_v41 = vmul.f32 0.044715, %v2548_v25  ;;  %v1171_v14 = vmul.f32 %v1107_v57, %v2499_v5 }
 0x134   : > { %v521_v3 = vpop.f32.mrf.mxu0  ;;  %v1172_v40 = vmul.f32 %v1108_v34, %v660_v9  ;;  %1994 = vtanh.f32 %v985_v4  ;;  %v804_v53 = vmul.f32 %v740_v60, %v2538_v62  ;;  %v2577_v24 = vadd.f32 %v1837_v42, %v2302_v16 }
 0x135   : > { %v1987_v22 = vpop.eup %1986  ;;  %v2580_v20 = vadd.f32 %v2302_v16, %v521_v3  ;;  %v2583_v36 = vmul.f32 0.5, %v2452_v0  ;;  %1996 = vtanh.f32 %v986_v6  ;;  %v923_v5 = vadd.f32 %v2486_v18, %v2438_v45 }
 0x136   : > { %v1840_v19 = vpop.f32.mrf.mxu0  ;;  %v1228_v26 = vpack.c.bf16 %v1172_v40, %v1171_v14  ;;  %v1109_v32 = vadd.f32 1.0, %v1987_v22  ;;  %v2588_v35 = vmul.f32 %v801_v12, %v2529_v33  ;;  %v802_v55 = vmul.f32 %v738_v21, %v2545_v56 }
 0x137   : > { %v1989_v9 = vpop.eup %1988  ;;  %v741_v47 = vmul.f32 0.044715, %v2571_v7  ;;  %v2593_v37 = vadd.f32 %v1840_v19, %v2302_v16  ;;  %v807_v0 = vmul.f32 %v743_v41, %v2548_v25  ;;  %v924_v51 = vadd.f32 %v2513_v17, %v2466_v10 }
 0x138   : > { %v534_v15 = vpop.f32.mrf.mxu0  ;;  %1895 = vmatmul.mubr.bf16.gmra.mxu1 %v1228_v26  ;;  %v1110_v11 = vadd.f32 1.0, %v1989_v9  ;;  %v987_v18 = vmul.f32 0.7978846, %v923_v5  ;;  %v2599_v49 = vmul.f32 %v804_v53, %v2538_v62  ;;  %v744_v13 = vmul.f32 0.044715, %v2577_v24 }
 0x139   : > { %v742_v46 = vmul.f32 0.044715, %v2580_v20  ;;  %v666_v39 = vmul.f32 0.5, %v2473_v30  ;;  %v1173_v52 = vmul.f32 %v1109_v32, %v2518_v23  ;;  %v988_v58 = vmul.f32 0.7978846, %v924_v51 }
 0x13a   : > { %v1841_v50 = vpop.f32.mrf.mxu0  ;;  %v1174_v57 = vmul.f32 %v1110_v11, %v662_v48  ;;  %1998 = vtanh.f32 %v987_v18  ;;  %v2606_v29 = vmul.f32 %v802_v55, %v2545_v56  ;;  %v805_v17 = vmul.f32 %v741_v47, %v2571_v7 }
 0x13b   : > { %v1991_v54 = vpop.eup %1990  ;;  %v747_v60 = vmul.f32 0.044715, %v2593_v37  ;;  %v2611_v34 = vadd.f32 %v2302_v16, %v534_v15  ;;  %v2614_v3 = vmul.f32 %v807_v0, %v2548_v25  ;;  %2000 = vtanh.f32 %v988_v58 }
 0x13c   : > { %v537_v42 = vpop.f32.mrf.mxu0  ;;  %v1229_v30 = vpack.c.bf16 %v1174_v57, %v1173_v52  ;;  %v1111_v23 = vadd.f32 1.0, %v1991_v54  ;;  %v1993_v4 = vpop.eup %1992  ;;  %v808_v6 = vmul.f32 %v744_v13, %v2577_v24  ;;  %v2618_v12 = vadd.f32 %v1841_v50, %v2302_v16 }
 0x13d   : > { %v2621_v21 = vmul.f32 0.5, %v2438_v45  ;;  %v2624_v41 = vmul.f32 0.5, %v2466_v10  ;;  %v806_v14 = vmul.f32 %v742_v46, %v2580_v20  ;;  %v1112_v40 = vadd.f32 1.0, %v1993_v4 }
 0x13e   : > { %v1844_v48 = vpop.f32.mrf.mxu0  ;;  %1898 = vmatprep.mubr.bf16.mxu1 %v1229_v30  ;;  %v925_v22 = vadd.f32 %v2534_v38, %v2481_v43  ;;  %v926_v53 = vadd.f32 %v2563_v28, %v2502_v63  ;;  %v2632_v26 = vmul.f32 %v805_v17, %v2571_v7  ;;  %v811_v45 = vmul.f32 %v747_v60, %v2593_v37 }
 0x13f   : > { %v745_v32 = vmul.f32 0.044715, %v2611_v34  ;;  %v2637_v10 = vadd.f32 %v2302_v16, %v537_v42  ;;  %v1175_v15 = vmul.f32 %v1111_v23, %v2557_v1  ;;  %v1176_v5 = vmul.f32 %v1112_v40, %v2560_v2 }
 0x140   : > { %v550_v19 = vpop.f32.mrf.mxu0  ;;  %v989_v55 = vmul.f32 0.7978846, %v925_v22  ;;  %v990_v38 = vmul.f32 0.7978846, %v926_v53  ;;  %v2642_v28 = vmul.f32 %v808_v6, %v2577_v24  ;;  %v748_v0 = vmul.f32 0.044715, %v2618_v12 }
 0x141   : > { %v1995_v47 = vpop.eup %1994  ;;  %v2646_v11 = vadd.f32 %v1844_v48, %v2302_v16  ;;  %v2649_v50 = vadd.f32 %v2302_v16, %v550_v19  ;;  %v2652_v51 = vmul.f32 %v806_v14, %v2580_v20  ;;  %v1230_v1 = vpack.c.bf16 %v1176_v5, %v1175_v15 }
 0x142   : > { %v1845_v9 = vpop.f32.mrf.mxu0  ;;  %v1113_v2 = vadd.f32 1.0, %v1995_v47  ;;  %2002 = vtanh.f32 %v989_v55  ;;  %v1997_v13 = vpop.eup %1996  ;;  %v809_v46 = vmul.f32 %v745_v32, %v2611_v34  ;;  %v746_v52 = vmul.f32 0.044715, %v2637_v10 }
 0x143   : > { %v2657_v57 = vadd.f32 %v1845_v9, %v2302_v16  ;;  %v2660_v42 = vmul.f32 0.5, %v2481_v43  ;;  %v2663_v58 = vmul.f32 %v811_v45, %v2593_v37  ;;  %1899 = vmatmul.mubr.bf16.gmra.mxu1 %v1230_v1  ;;  %v1114_v54 = vadd.f32 1.0, %v1997_v13 }
 0x144   : > { %v553_v18 = vpop.f32.mrf.mxu0  ;;  %2004 = vtanh.f32 %v990_v38  ;;  %v927_v60 = vadd.f32 %v2525_v27, %v2476_v31  ;;  %v812_v30 = vmul.f32 %v748_v0, %v2618_v12  ;;  %v751_v23 = vmul.f32 0.044715, %v2646_v11 }
 0x145   : > { %v749_v48 = vmul.f32 0.044715, %v2649_v50  ;;  %v2671_v4 = vadd.f32 %v2302_v16, %v553_v18  ;;  %v1177_v43 = vmul.f32 %v1113_v2, %v2583_v36  ;;  %v1178_v6 = vmul.f32 %v1114_v54, %v666_v39 }
 0x146   : > { %v1848_v17 = vpop.f32.mrf.mxu0  ;;  %v928_v14 = vadd.f32 %v2553_v59, %v2496_v61  ;;  %v991_v40 = vmul.f32 0.7978846, %v927_v60  ;;  %v2677_v27 = vmul.f32 %v809_v46, %v2611_v34  ;;  %v810_v53 = vmul.f32 %v746_v52, %v2637_v10 }
 0x147   : > { %v1999_v22 = vpop.eup %1998  ;;  %v752_v45 = vmul.f32 0.044715, %v2657_v57  ;;  %v670_v32 = vmul.f32 0.5, %v2502_v63  ;;  %v1231_v15 = vpack.c.bf16 %v1178_v6, %v1177_v43  ;;  %v2683_v59 = vmul.f32 %v812_v30, %v2618_v12 }
 0x148   : > { %v566_v19 = vpop.f32.mrf.mxu0  ;;  %v1115_v5 = vadd.f32 1.0, %v1999_v22  ;;  %v992_v9 = vmul.f32 0.7978846, %v928_v14  ;;  %2006 = vtanh.f32 %v991_v40  ;;  %v2001_v39 = vpop.eup %2000  ;;  %v815_v55 = vmul.f32 %v751_v23, %v2646_v11 }
 0x149   : > { %v813_v38 = vmul.f32 %v749_v48, %v2649_v50  ;;  %v750_v47 = vmul.f32 0.044715, %v2671_v4  ;;  %1902 = vmatprep.mubr.bf16.mxu1 %v1231_v15  ;;  %v1116_v0 = vadd.f32 1.0, %v2001_v39  ;;  %v2689_v1 = vadd.f32 %v1848_v17, %v2302_v16 }
 0x14a   : > { %v1849_v36 = vpop.f32.mrf.mxu0  ;;  %v2692_v63 = vmul.f32 0.5, %v2476_v31  ;;  %2008 = vtanh.f32 %v992_v9  ;;  %v2695_v18 = vmul.f32 %v810_v53, %v2637_v10  ;;  %v816_v13 = vmul.f32 %v752_v45, %v2657_v57 }
 0x14b   : > { %v2699_v46 = vmul.f32 0.5, %v2496_v61  ;;  %v2702_v52 = vadd.f32 %v2302_v16, %v566_v19  ;;  %v1179_v54 = vmul.f32 %v1115_v5, %v2621_v21  ;;  %v1180_v17 = vmul.f32 %v1116_v0, %v2624_v41 }
 0x14c   : > { %v569_v2 = vpop.f32.mrf.mxu0  ;;  %v929_v31 = vadd.f32 %v2588_v35, %v2529_v33  ;;  %v930_v60 = vadd.f32 %v2606_v29, %v2545_v56  ;;  %v2711_v23 = vmul.f32 %v815_v55, %v2646_v11  ;;  %v2714_v61 = vmul.f32 %v813_v38, %v2649_v50 }
 0x14d   : > { %v814_v48 = vmul.f32 %v750_v47, %v2671_v4  ;;  %v2718_v43 = vmul.f32 0.5, %v2529_v33  ;;  %v1232_v21 = vpack.c.bf16 %v1180_v17, %v1179_v54  ;;  %v755_v41 = vmul.f32 0.044715, %v2689_v1 }
 0x14e   : > { %v1852_v30 = vpop.f32.mrf.mxu0  ;;  %v993_v6 = vmul.f32 0.7978846, %v929_v31  ;;  %v994_v35 = vmul.f32 0.7978846, %v930_v60  ;;  %v2722_v29 = vmul.f32 %v816_v13, %v2657_v57  ;;  %v753_v19 = vmul.f32 0.044715, %v2702_v52 }
 0x14f   : > { %v2003_v40 = vpop.eup %2002  ;;  %v2726_v22 = vadd.f32 %v1849_v36, %v2302_v16  ;;  %v931_v53 = vadd.f32 %v2566_v44, %v2508_v8  ;;  %1903 = vmatmul.mubr.bf16.gmra.mxu1 %v1232_v21  ;;  %v2731_v45 = vadd.f32 %v2302_v16, %v569_v2  ;;  %v932_v15 = vadd.f32 %v2599_v49, %v2538_v62 }
 0x150   : > { %v582_v14 = vpop.f32.mrf.mxu0  ;;  %v1117_v33 = vadd.f32 1.0, %v2003_v40  ;;  %2010 = vtanh.f32 %v993_v6  ;;  %v2736_v39 = vadd.f32 %v1852_v30, %v2302_v16  ;;  %v2742_v44 = vmul.f32 %v814_v48, %v2671_v4 }
 0x151   : > { %v2005_v9 = vpop.eup %2004  ;;  %2012 = vtanh.f32 %v994_v35  ;;  %v995_v36 = vmul.f32 0.7978846, %v931_v53  ;;  %v2739_v55 = vadd.f32 %v2302_v16, %v582_v14  ;;  %v819_v47 = vmul.f32 %v755_v41, %v2689_v1 }
 0x152   : > { %v1853_v5 = vpop.f32.mrf.mxu0  ;;  %v1118_v38 = vadd.f32 1.0, %v2005_v9  ;;  %v996_v0 = vmul.f32 0.7978846, %v932_v15  ;;  %v817_v49 = vmul.f32 %v753_v19, %v2702_v52  ;;  %v756_v13 = vmul.f32 0.044715, %v2726_v22 }
 0x153   : > { %v2748_v54 = vmul.f32 0.5, %v2545_v56  ;;  %2014 = vtanh.f32 %v995_v36  ;;  %v1181_v17 = vmul.f32 %v1117_v33, %v2660_v42  ;;  %v2752_v60 = vadd.f32 %v1853_v5, %v2302_v16 }
 0x154   : > { %v585_v2 = vpop.f32.mrf.mxu0  ;;  %v1182_v31 = vmul.f32 %v1118_v38, %v670_v32  ;;  %2016 = vtanh.f32 %v996_v0  ;;  %v754_v21 = vmul.f32 0.044715, %v2731_v45  ;;  %v759_v41 = vmul.f32 0.044715, %v2736_v39 }
 0x155   : > { %v2007_v48 = vpop.eup %2006  ;;  %v757_v6 = vmul.f32 0.044715, %v2739_v55  ;;  %v933_v56 = vadd.f32 %v2632_v26, %v2571_v7  ;;  %v2760_v14 = vmul.f32 %v819_v47, %v2689_v1  ;;  %v934_v32 = vadd.f32 %v2652_v51, %v2580_v20 }
 0x156   : > { %v1856_v30 = vpop.f32.mrf.mxu0  ;;  %v1233_v35 = vpack.c.bf16 %v1182_v31, %v1181_v17  ;;  %v1119_v42 = vadd.f32 1.0, %v2007_v48  ;;  %v2765_v53 = vmul.f32 %v817_v49, %v2702_v52  ;;  %v2768_v33 = vmul.f32 0.5, %v2508_v8 }
 0x157   : > { %v2009_v19 = vpop.eup %2008  ;;  %v2771_v15 = vadd.f32 %v2302_v16, %v585_v2  ;;  %v997_v26 = vmul.f32 0.7978846, %v933_v56  ;;  %v820_v9 = vmul.f32 %v756_v13, %v2726_v22  ;;  %v760_v36 = vmul.f32 0.044715, %v2752_v60 }
 0x158   : > { %v598_v40 = vpop.f32.mrf.mxu0  ;;  %1906 = vmatprep.mubr.bf16.mxu1 %v1233_v35  ;;  %v1120_v5 = vadd.f32 1.0, %v2009_v19  ;;  %v998_v38 = vmul.f32 0.7978846, %v934_v32  ;;  %v818_v47 = vmul.f32 %v754_v21, %v2731_v45  ;;  %v823_v0 = vmul.f32 %v759_v41, %v2736_v39 }
 0x159   : > { %v821_v49 = vmul.f32 %v757_v6, %v2739_v55  ;;  %2018 = vtanh.f32 %v997_v26  ;;  %v1183_v8 = vmul.f32 %v1119_v42, %v2692_v63  ;;  %v935_v17 = vadd.f32 %v2614_v3, %v2548_v25 }
 0x15a   : > { %v1857_v51 = vpop.f32.mrf.mxu0  ;;  %v1184_v2 = vmul.f32 %v1120_v5, %v2699_v46  ;;  %2020 = vtanh.f32 %v998_v38  ;;  %v676_v31 = vmul.f32 0.5, %v2538_v62  ;;  %v758_v48 = vmul.f32 0.044715, %v2771_v15 }
 0x15b   : > { %v2785_v21 = vadd.f32 %v1856_v30, %v2302_v16  ;;  %v936_v41 = vadd.f32 %v2642_v28, %v2577_v24  ;;  %v2790_v63 = vmul.f32 %v820_v9, %v2726_v22  ;;  %v824_v46 = vmul.f32 %v760_v36, %v2752_v60 }
 0x15c   : > { %v601_v13 = vpop.f32.mrf.mxu0  ;;  %v1234_v6 = vpack.c.bf16 %v1184_v2, %v1183_v8  ;;  %v999_v56 = vmul.f32 0.7978846, %v935_v17  ;;  %v2794_v42 = vmul.f32 %v818_v47, %v2731_v45  ;;  %v2797_v62 = vmul.f32 %v823_v0, %v2736_v39 }
 0x15d   : > { %v2011_v3 = vpop.eup %2010  ;;  %v677_v16 = vmul.f32 0.5, %v2571_v7  ;;  %v1000_v30 = vmul.f32 0.7978846, %v936_v41  ;;  %v2801_v19 = vmul.f32 %v821_v49, %v2739_v55  ;;  %v678_v26 = vmul.f32 0.5, %v2580_v20  ;;  %v2821_v41 = vld [vmem:[%s3137_s2] ss:$0 sm:$0xff] }
 0x15e   : > { %v1860_v35 = vpop.f32.mrf.mxu0  ;;  %v2013_v32 = vpop.eup %2012  ;;  %1907 = vmatmul.mubr.bf16.gmra.mxu1 %v1234_v6  ;;  %v1121_v28 = vadd.f32 1.0, %v2011_v3  ;;  %2022 = vtanh.f32 %v999_v56  ;;  %v822_v36 = vmul.f32 %v758_v48, %v2771_v15  ;;  %v763_v38 = vmul.f32 0.044715, %v2785_v21 }
 0x15f   : > { %v1122_v9 = vadd.f32 1.0, %v2013_v32  ;;  %2024 = vtanh.f32 %v1000_v30  ;;  %v2807_v7 = vmul.f32 %v824_v46, %v2752_v60  ;;  %v2810_v0 = vmul.f32 0.5, %v2548_v25 }
 0x160   : > { %v614_v5 = vpop.f32.mrf.mxu0  ;;  %v2015_v47 = vpop.eup %2014  ;;  %v937_v49 = vadd.f32 %v2677_v27, %v2611_v34  ;;  %v938_v20 = vadd.f32 %v2695_v18, %v2637_v10  ;;  %v1185_v2 = vmul.f32 %v1121_v28, %v2718_v43  ;;  %v2824_v25 = vadd.f32 %v2821_v41, %v598_v40 }
 0x161   : > { %v2017_v8 = vpop.eup %2016  ;;  %v1186_v17 = vmul.f32 %v1122_v9, %v2748_v54  ;;  %v1123_v48 = vadd.f32 1.0, %v2015_v47  ;;  %v2827_v27 = vadd.f32 %v2821_v41, %v1857_v51  ;;  %v2830_v43 = vmul.f32 %v822_v36, %v2771_v15 }
 0x162   : > { %v1861_v6 = vpop.f32.mrf.mxu0  ;;  %v1124_v46 = vadd.f32 1.0, %v2017_v8  ;;  %v1001_v18 = vmul.f32 0.7978846, %v937_v49  ;;  %v1002_v56 = vmul.f32 0.7978846, %v938_v20  ;;  %v827_v54 = vmul.f32 %v763_v38, %v2785_v21 }
 0x163   : > { %v1235_v3 = vpack.c.bf16 %v1186_v17, %v1185_v2  ;;  %v680_v30 = vmul.f32 0.5, %v2577_v24  ;;  %v1187_v32 = vmul.f32 %v1123_v48, %v2768_v33  ;;  %v939_v40 = vadd.f32 %v2663_v58, %v2593_v37 }
 0x164   : > { %v1188_v28 = vmul.f32 %v1124_v46, %v676_v31  ;;  %2026 = vtanh.f32 %v1001_v18  ;;  %v761_v51 = vmul.f32 0.044715, %v2824_v25  ;;  %v2839_v9 = vadd.f32 %v2821_v41, %v601_v13  ;;  %v617_v38 = vpop.f32.mrf.mxu0 }
 0x165   : > { %1910 = vmatprep.mubr.bf16.mxu1 %v1235_v3  ;;  %2028 = vtanh.f32 %v1002_v56  ;;  %v940_v36 = vadd.f32 %v2683_v59, %v2618_v12  ;;  %v764_v33 = vmul.f32 0.044715, %v2827_v27  ;;  %v2845_v31 = vadd.f32 %v2821_v41, %v1860_v35 }
 0x166   : > { %v2019_v47 = vpop.eup %2018  ;;  %v1236_v24 = vpack.c.bf16 %v1188_v28, %v1187_v32  ;;  %v1003_v49 = vmul.f32 0.7978846, %v939_v40  ;;  %v2848_v8 = vmul.f32 0.5, %v2611_v34  ;;  %v2851_v2 = vadd.f32 %v2821_v41, %v614_v5 }
 0x167   : > { %v2021_v58 = vpop.eup %2020  ;;  %v1125_v20 = vadd.f32 1.0, %v2019_v47  ;;  %v1004_v13 = vmul.f32 0.7978846, %v940_v36  ;;  %v2854_v17 = vadd.f32 %v2821_v41, %v1861_v6  ;;  %v2857_v48 = vadd.f32 %v2821_v41, %v617_v38 }
 0x168   : > { %1911 = vmatmul.mubr.bf16.gmra.mxu1 %v1236_v24  ;;  %v1126_v59 = vadd.f32 1.0, %v2021_v58  ;;  %2030 = vtanh.f32 %v1003_v49  ;;  %v2860_v35 = vmul.f32 %v827_v54, %v2785_v21  ;;  %v825_v46 = vmul.f32 %v761_v51, %v2824_v25  ;;  %v1864_v51 = vpop.f32.mrf.mxu0 }
 0x169   : > { %v762_v34 = vmul.f32 0.044715, %v2839_v9  ;;  %2032 = vtanh.f32 %v1004_v13  ;;  %v1189_v18 = vmul.f32 %v1125_v20, %v677_v16  ;;  %v828_v56 = vmul.f32 %v764_v33, %v2827_v27 }
 0x16a   : > { %v1190_v5 = vmul.f32 %v1126_v59, %v678_v26  ;;  %v767_v3 = vmul.f32 0.044715, %v2845_v31  ;;  %v682_v6 = vmul.f32 0.5, %v2637_v10  ;;  %v765_v28 = vmul.f32 0.044715, %v2851_v2 }
 0x16b   : > { %v2023_v32 = vpop.eup %2022  ;;  %v941_v54 = vadd.f32 %v2714_v61, %v2649_v50  ;;  %v942_v40 = vadd.f32 %v2742_v44, %v2671_v4  ;;  %v768_v26 = vmul.f32 0.044715, %v2854_v17  ;;  %v766_v47 = vmul.f32 0.044715, %v2857_v48 }
 0x16c   : > { %v2025_v36 = vpop.eup %2024  ;;  %v1237_v38 = vpack.c.bf16 %v1190_v5, %v1189_v18  ;;  %v1127_v16 = vadd.f32 1.0, %v2023_v32  ;;  %v826_v33 = vmul.f32 %v762_v34, %v2839_v9  ;;  %v2876_v58 = vmul.f32 %v825_v46, %v2824_v25  ;;  %v630_v18 = vpop.f32.mrf.mxu0 }
 0x16d   : > { %v1128_v24 = vadd.f32 1.0, %v2025_v36  ;;  %v1005_v10 = vmul.f32 0.7978846, %v941_v54  ;;  %v1006_v49 = vmul.f32 0.7978846, %v942_v40  ;;  %v2879_v61 = vmul.f32 %v828_v56, %v2827_v27 }
 0x16e   : > { %1914 = vmatprep.mubr.bf16.mxu1 %v1237_v38  ;;  %v831_v44 = vmul.f32 %v767_v3, %v2845_v31  ;;  %v943_v20 = vadd.f32 %v2711_v23, %v2646_v11  ;;  %v1191_v13 = vmul.f32 %v1127_v16, %v2810_v0  ;;  %v944_v34 = vadd.f32 %v2722_v29, %v2657_v57 }
 0x16f   : > { %v1192_v59 = vmul.f32 %v1128_v24, %v680_v30  ;;  %2034 = vtanh.f32 %v1005_v10  ;;  %v829_v5 = vmul.f32 %v765_v28, %v2851_v2  ;;  %v832_v46 = vmul.f32 %v768_v26, %v2854_v17  ;;  %v1865_v26 = vpop.f32.mrf.mxu0 }
 0x170   : > { %2036 = vtanh.f32 %v1006_v49  ;;  %v1007_v56 = vmul.f32 0.7978846, %v943_v20  ;;  %v2890_v3 = vmul.f32 %v826_v33, %v2839_v9  ;;  %v830_v23 = vmul.f32 %v766_v47, %v2857_v48 }
 0x171   : > { %v2027_v32 = vpop.eup %2026  ;;  %v1238_v54 = vpack.c.bf16 %v1192_v59, %v1191_v13  ;;  %v1008_v0 = vmul.f32 0.7978846, %v944_v34  ;;  %v683_v36 = vmul.f32 0.5, %v2593_v37  ;;  %v684_v29 = vmul.f32 0.5, %v2618_v12 }
 0x172   : > { %v2029_v30 = vpop.eup %2028  ;;  %v1129_v40 = vadd.f32 1.0, %v2027_v32  ;;  %2038 = vtanh.f32 %v1007_v56  ;;  %v2896_v38 = vmul.f32 %v831_v44, %v2845_v31  ;;  %v685_v16 = vmul.f32 0.5, %v2649_v50 }
 0x173   : > { %1915 = vmatmul.mubr.bf16.gmra.mxu1 %v1238_v54  ;;  %v1130_v28 = vadd.f32 1.0, %v2029_v30  ;;  %2040 = vtanh.f32 %v1008_v0  ;;  %v2900_v24 = vmul.f32 %v829_v5, %v2851_v2  ;;  %v2903_v47 = vmul.f32 %v832_v46, %v2854_v17 }
 0x174   : > { %v686_v37 = vmul.f32 0.5, %v2671_v4  ;;  %v2907_v12 = vadd.f32 %v2821_v41, %v1864_v51  ;;  %v1193_v10 = vmul.f32 %v1129_v40, %v2848_v8  ;;  %v2911_v44 = vmul.f32 %v830_v23, %v2857_v48 }
 0x175   : > { %v2031_v33 = vpop.eup %2030  ;;  %v1194_v49 = vmul.f32 %v1130_v28, %v682_v6  ;;  %v945_v50 = vadd.f32 %v2765_v53, %v2702_v52  ;;  %v687_v59 = vmul.f32 0.5, %v2646_v11  ;;  %v2917_v34 = vadd.f32 %v2821_v41, %v630_v18  ;;  %v633_v6 = vpop.f32.mrf.mxu0 }
 0x176   : > { %v2033_v20 = vpop.eup %2032  ;;  %v1131_v13 = vadd.f32 1.0, %v2031_v33  ;;  %v946_v4 = vadd.f32 %v2794_v42, %v2731_v45  ;;  %v688_v8 = vmul.f32 0.5, %v2657_v57  ;;  %v771_v32 = vmul.f32 0.044715, %v2907_v12 }
 0x177   : > { %v1239_v51 = vpack.c.bf16 %v1194_v49, %v1193_v10  ;;  %v1132_v5 = vadd.f32 1.0, %v2033_v20  ;;  %v1009_v46 = vmul.f32 0.7978846, %v945_v50  ;;  %v2924_v53 = vadd.f32 %v2821_v41, %v1865_v26 }
 0x178   : > { %v1195_v56 = vmul.f32 %v1131_v13, %v683_v36  ;;  %v1010_v54 = vmul.f32 0.7978846, %v946_v4  ;;  %v947_v18 = vadd.f32 %v2760_v14, %v2689_v1  ;;  %v948_v42 = vadd.f32 %v2790_v63, %v2726_v22 }
 0x179   : > { %1918 = vmatprep.mubr.bf16.mxu1 %v1239_v51  ;;  %v1196_v11 = vmul.f32 %v1132_v5, %v684_v29  ;;  %2042 = vtanh.f32 %v1009_v46  ;;  %v769_v57 = vmul.f32 0.044715, %v2917_v34  ;;  %v2932_v23 = vadd.f32 %v2821_v41, %v633_v6 }
 0x17a   : > { %2044 = vtanh.f32 %v1010_v54  ;;  %v949_v0 = vadd.f32 %v2801_v19, %v2739_v55  ;;  %v1011_v40 = vmul.f32 0.7978846, %v947_v18  ;;  %v1012_v36 = vmul.f32 0.7978846, %v948_v42 }
 0x17b   : > { %v1240_v30 = vpack.c.bf16 %v1196_v11, %v1195_v56  ;;  %v950_v29 = vadd.f32 %v2830_v43, %v2771_v15  ;;  %v835_v14 = vmul.f32 %v771_v32, %v2907_v12  ;;  %v772_v63 = vmul.f32 0.044715, %v2924_v53 }
 0x17c   : > { %v2035_v28 = vpop.eup %2034  ;;  %v1013_v26 = vmul.f32 0.7978846, %v949_v0  ;;  %v951_v41 = vadd.f32 %v2797_v62, %v2736_v39  ;;  %2046 = vtanh.f32 %v1011_v40  ;;  %v952_v49 = vadd.f32 %v2807_v7, %v2752_v60 }
 0x17d   : > { %v2037_v33 = vpop.eup %2036  ;;  %1919 = vmatmul.mubr.bf16.gmra.mxu1 %v1240_v30  ;;  %v1133_v10 = vadd.f32 1.0, %v2035_v28  ;;  %v1014_v19 = vmul.f32 0.7978846, %v950_v29  ;;  %v770_v43 = vmul.f32 0.044715, %v2932_v23  ;;  %2048 = vtanh.f32 %v1012_v36 }
 0x17e   : > { %v1134_v50 = vadd.f32 1.0, %v2037_v33  ;;  %v1015_v20 = vmul.f32 0.7978846, %v951_v41  ;;  %v833_v51 = vmul.f32 %v769_v57, %v2917_v34  ;;  %2050 = vtanh.f32 %v1013_v26 }
 0x17f   : > { %v2039_v13 = vpop.eup %2038  ;;  %v1197_v4 = vmul.f32 %v1133_v10, %v685_v16  ;;  %v1016_v5 = vmul.f32 0.7978846, %v952_v49  ;;  %2052 = vtanh.f32 %v1014_v19  ;;  %v953_v56 = vadd.f32 %v2876_v58, %v2824_v25 }
 0x180   : > { %v2041_v62 = vpop.eup %2040  ;;  %v1198_v6 = vmul.f32 %v1134_v50, %v686_v37  ;;  %v1135_v46 = vadd.f32 1.0, %v2039_v13  ;;  %v836_v7 = vmul.f32 %v772_v63, %v2924_v53  ;;  %2054 = vtanh.f32 %v1015_v20 }
 0x181   : > { %v1136_v32 = vadd.f32 1.0, %v2041_v62  ;;  %v954_v54 = vadd.f32 %v2890_v3, %v2839_v9  ;;  %v834_v16 = vmul.f32 %v770_v43, %v2932_v23  ;;  %2056 = vtanh.f32 %v1016_v5 }
 0x182   : > { %v1241_v11 = vpack.c.bf16 %v1198_v6, %v1197_v4  ;;  %v1017_v18 = vmul.f32 0.7978846, %v953_v56  ;;  %v1199_v42 = vmul.f32 %v1135_v46, %v687_v59  ;;  %v955_v0 = vadd.f32 %v2860_v35, %v2785_v21 }
 0x183   : > { %v1200_v57 = vmul.f32 %v1136_v32, %v688_v8  ;;  %v1018_v37 = vmul.f32 0.7978846, %v954_v54  ;;  %v689_v58 = vmul.f32 0.5, %v2702_v52  ;;  %v690_v30 = vmul.f32 0.5, %v2731_v45 }
 0x184   : > { %1922 = vmatprep.mubr.bf16.mxu1 %v1241_v11  ;;  %2058 = vtanh.f32 %v1017_v18  ;;  %v956_v3 = vadd.f32 %v2879_v61, %v2827_v27  ;;  %v1019_v36 = vmul.f32 0.7978846, %v955_v0  ;;  %v957_v59 = vadd.f32 %v2900_v24, %v2851_v2 }
 0x185   : > { %v1242_v40 = vpack.c.bf16 %v1200_v57, %v1199_v42  ;;  %2060 = vtanh.f32 %v1018_v37  ;;  %v897_v29 = vmul.f32 %v833_v51, %v2917_v34  ;;  %v898_v35 = vmul.f32 %v834_v16, %v2932_v23 }
 0x186   : > { %v2043_v8 = vpop.eup %2042  ;;  %v1020_v28 = vmul.f32 0.7978846, %v956_v3  ;;  %v958_v52 = vadd.f32 %v2911_v44, %v2857_v48  ;;  %2062 = vtanh.f32 %v1019_v36  ;;  %v1021_v61 = vmul.f32 0.7978846, %v957_v59 }
 0x187   : > { %v2045_v45 = vpop.eup %2044  ;;  %1923 = vmatmul.mubr.bf16.gmra.mxu1 %v1242_v40  ;;  %v1137_v63 = vadd.f32 1.0, %v2043_v8  ;;  %v959_v26 = vadd.f32 %v2896_v38, %v2845_v31  ;;  %v960_v33 = vadd.f32 %v2903_v47, %v2854_v17  ;;  %v899_v10 = vmul.f32 %v835_v14, %v2907_v12 }
 0x188   : > { %v1138_v41 = vadd.f32 1.0, %v2045_v45  ;;  %2064 = vtanh.f32 %v1020_v28  ;;  %v1022_v24 = vmul.f32 0.7978846, %v958_v52  ;;  %v900_v19 = vmul.f32 %v836_v7, %v2924_v53 }
 0x189   : > { %v691_v44 = vmul.f32 0.5, %v2689_v1  ;;  %2066 = vtanh.f32 %v1021_v61  ;;  %v2047_v49 = vpop.eup %2046  ;;  %v1201_v50 = vmul.f32 %v1137_v63, %v689_v58  ;;  %v1023_v20 = vmul.f32 0.7978846, %v959_v26 }
 0x18a   : > { %v1202_v43 = vmul.f32 %v1138_v41, %v690_v30  ;;  %2068 = vtanh.f32 %v1022_v24  ;;  %v2049_v13 = vpop.eup %2048  ;;  %v1139_v38 = vadd.f32 1.0, %v2047_v49  ;;  %v1024_v4 = vmul.f32 0.7978846, %v960_v33 }
 0x18b   : > { %v961_v51 = vadd.f32 %v897_v29, %v2917_v34  ;;  %v962_v5 = vadd.f32 %v898_v35, %v2932_v23  ;;  %v2051_v47 = vpop.eup %2050  ;;  %v692_v14 = vmul.f32 0.5, %v2726_v22  ;;  %v1140_v6 = vadd.f32 1.0, %v2049_v13 }
 0x18c   : > { %v1243_v62 = vpack.c.bf16 %v1202_v43, %v1201_v50  ;;  %v693_v1 = vmul.f32 0.5, %v2739_v55  ;;  %v2053_v46 = vpop.eup %2052  ;;  %v694_v56 = vmul.f32 0.5, %v2771_v15  ;;  %v1141_v32 = vadd.f32 1.0, %v2051_v47 }
 0x18d   : > { %v1025_v7 = vmul.f32 0.7978846, %v961_v51  ;;  %v1026_v54 = vmul.f32 0.7978846, %v962_v5  ;;  %v2055_v11 = vpop.eup %2054  ;;  %v1203_v16 = vmul.f32 %v1139_v38, %v691_v44  ;;  %v1204_v18 = vmul.f32 %v1140_v6, %v692_v14 }
 0x18e   : > { %1926 = vmatprep.mubr.bf16.mxu1 %v1243_v62  ;;  %v1142_v42 = vadd.f32 1.0, %v2053_v46  ;;  %2070 = vtanh.f32 %v1023_v20  ;;  %v2057_v57 = vpop.eup %2056  ;;  %v1205_v37 = vmul.f32 %v1141_v32, %v693_v1  ;;  %v964_v22 = vadd.f32 %v900_v19, %v2924_v53 }
 0x18f   : > { %2072 = vtanh.f32 %v1024_v4  ;;  %v1244_v0 = vpack.c.bf16 %v1204_v18, %v1203_v16  ;;  %v1144_v55 = vadd.f32 1.0, %v2057_v57  ;;  %v696_v15 = vmul.f32 0.5, %v2752_v60 }
 0x190   : > { %v1206_v58 = vmul.f32 %v1142_v42, %v694_v56  ;;  %2074 = vtanh.f32 %v1026_v54  ;;  %v1143_v36 = vadd.f32 1.0, %v2055_v11  ;;  %v963_v8 = vadd.f32 %v899_v10, %v2907_v12 }
 0x191   : > { %v2059_v30 = vpop.eup %2058  ;;  %2076 = vtanh.f32 %v1025_v7  ;;  %1927 = vmatmul.mubr.bf16.gmra.mxu1 %v1244_v0  ;;  %v697_v29 = vmul.f32 0.5, %v2824_v25  ;;  %v698_v35 = vmul.f32 0.5, %v2839_v9  ;;  %v695_v45 = vmul.f32 0.5, %v2736_v39 }
 0x192   : > { %v2061_v3 = vpop.eup %2060  ;;  %v1245_v40 = vpack.c.bf16 %v1206_v58, %v1205_v37  ;;  %v1145_v59 = vadd.f32 1.0, %v2059_v30  ;;  %v1208_v63 = vmul.f32 %v1144_v55, %v696_v15  ;;  %v1028_v61 = vmul.f32 0.7978846, %v964_v22 }
 0x193   : > { %v1146_v28 = vadd.f32 1.0, %v2061_v3  ;;  %v2063_v52 = vpop.eup %2062  ;;  %v1207_v33 = vmul.f32 %v1143_v36, %v695_v45  ;;  %v1027_v19 = vmul.f32 0.7978846, %v963_v8  ;;  %v702_v9 = vmul.f32 0.5, %v2857_v48 }
 0x194   : > { %1930 = vmatprep.mubr.bf16.mxu1 %v1245_v40  ;;  %v1209_v26 = vmul.f32 %v1145_v59, %v697_v29  ;;  %2078 = vtanh.f32 %v1028_v61  ;;  %v700_v39 = vmul.f32 0.5, %v2827_v27  ;;  %v1147_v20 = vadd.f32 1.0, %v2063_v52 }
 0x195   : > { %v2065_v60 = vpop.eup %2064  ;;  %v1210_v41 = vmul.f32 %v1146_v28, %v698_v35  ;;  %v1246_v10 = vpack.c.bf16 %v1208_v63, %v1207_v33  ;;  %2080 = vtanh.f32 %v1027_v19  ;;  %v701_v38 = vmul.f32 0.5, %v2851_v2 }
 0x196   : > { %v2067_v24 = vpop.eup %2066  ;;  %v1148_v50 = vadd.f32 1.0, %v2065_v60  ;;  %v699_v5 = vmul.f32 0.5, %v2785_v21  ;;  %v706_v27 = vmul.f32 0.5, %v2932_v23  ;;  %v704_v54 = vmul.f32 0.5, %v2854_v17 }
 0x197   : > { %v2069_v44 = vpop.eup %2068  ;;  %v1247_v49 = vpack.c.bf16 %v1210_v41, %v1209_v26  ;;  %v1149_v43 = vadd.f32 1.0, %v2067_v24  ;;  %v705_v11 = vmul.f32 0.5, %v2917_v34  ;;  %v703_v16 = vmul.f32 0.5, %v2845_v31  ;;  %v2995_v31 = vld [vmem:[%s3139_s4] ss:$0 sm:$0xff] }
 0x198   : > { %v1150_v25 = vadd.f32 1.0, %v2069_v44  ;;  %v1212_v47 = vmul.f32 %v1148_v50, %v700_v39  ;;  %v1211_v1 = vmul.f32 %v1147_v20, %v699_v5  ;;  %v708_v55 = vmul.f32 0.5, %v2924_v53 }
 0x199   : > { %1931 = vmatmul.mubr.bf16.gmra.mxu1 %v1246_v10  ;;  %v1213_v14 = vmul.f32 %v1149_v43, %v701_v38  ;;  %v707_v30 = vmul.f32 0.5, %v2907_v12 }
 0x19a   : > { %1934 = vmatprep.mubr.bf16.mxu1 %v1247_v49  ;;  %v1214_v4 = vmul.f32 %v1150_v25, %v702_v9  ;;  %v1248_v56 = vpack.c.bf16 %v1212_v47, %v1211_v1 }
 0x19b   : > { %v2071_v13 = vpop.eup %2070 }
 0x19c   : > { %v2073_v51 = vpop.eup %2072  ;;  %v1249_v48 = vpack.c.bf16 %v1214_v4, %v1213_v14  ;;  %v1151_v2 = vadd.f32 1.0, %v2071_v13 }
 0x19d   : > { %v2075_v62 = vpop.eup %2074  ;;  %v1152_v32 = vadd.f32 1.0, %v2073_v51 }
 0x19e   : > { %v2077_v6 = vpop.eup %2076  ;;  %v1154_v46 = vadd.f32 1.0, %v2075_v62  ;;  %v1215_v37 = vmul.f32 %v1151_v2, %v703_v16 }
 0x19f   : > { %v1153_v7 = vadd.f32 1.0, %v2077_v6  ;;  %v1216_v18 = vmul.f32 %v1152_v32, %v704_v54 }
 0x1a0   : > { %v1218_v21 = vmul.f32 %v1154_v46, %v706_v27 }
 0x1a1   : > { %1935 = vmatmul.mubr.bf16.gmra.mxu1 %v1248_v56  ;;  %v2079_v42 = vpop.eup %2078  ;;  %v1217_v57 = vmul.f32 %v1153_v7, %v705_v11  ;;  %v1250_v58 = vpack.c.bf16 %v1216_v18, %v1215_v37 }
 0x1a2   : > { %1938 = vmatprep.mubr.bf16.mxu1 %v1249_v48  ;;  %v2081_v22 = vpop.eup %2080  ;;  %v1156_v23 = vadd.f32 1.0, %v2079_v42 }
 0x1a3   : > { %v1251_v0 = vpack.c.bf16 %v1218_v21, %v1217_v57  ;;  %v1155_v17 = vadd.f32 1.0, %v2081_v22 }
 0x1a4   : > { %v1220_v34 = vmul.f32 %v1156_v23, %v708_v55 }
 0x1a5   : > { %v1219_v15 = vmul.f32 %v1155_v17, %v707_v30 }
 0x1a7   : > { %v1252_v3 = vpack.c.bf16 %v1220_v34, %v1219_v15 }
 0x1a9   : > { %1939 = vmatmul.mubr.bf16.gmra.mxu1 %v1250_v58 }
 0x1aa   : > { %1942 = vmatprep.mubr.bf16.mxu1 %v1251_v0 }
 0x1b1   : > { %1943 = vmatmul.mubr.bf16.gmra.mxu1 %v1252_v3 }
 0x1d7   : > { %v1884_v12 = vpop.f32.mrf.mxu1 }
 0x1d8   : > { %v1327_v53 = vadd.f32 %v1884_v12, %v2995_v31 }
 0x1d9   : > { %v1318_v40 = vpop.f32.mrf.mxu1 }
 0x1da   : > { %1575 = vst [vmem:[%s3002_s6 + $0x10] sm:$0xff] %v1327_v53  ;;  %v1319_v36 = vadd.f32 %v2995_v31, %v1318_v40 }
 0x1db   : > { %v1885_v59 = vpop.f32.mrf.mxu1 }
 0x1dc   : > { %1573 = vst [vmem:[%s3002_s6] sm:$0xff] %v1319_v36  ;;  %v1330_v8 = vadd.f32 %v1885_v59, %v2995_v31 }
 0x1dd   : > { %v1321_v29 = vpop.f32.mrf.mxu1 }
 0x1de   : > { %1576 = vst [vmem:[%s3002_s6 + $0x18] sm:$0xff] %v1330_v8  ;;  %v1322_v35 = vadd.f32 %v2995_v31, %v1321_v29 }
 0x1df   : > { %v1888_v28 = vpop.f32.mrf.mxu1 }
 0x1e0   : > { %1574 = vst [vmem:[%s3002_s6 + $0x8] sm:$0xff] %v1322_v35  ;;  %v1343_v52 = vadd.f32 %v1888_v28, %v2995_v31 }
 0x1e1   : > { %v1334_v45 = vpop.f32.mrf.mxu1 }
 0x1e2   : > { %1579 = vst [vmem:[%s3002_s6 + $0x30] sm:$0xff] %v1343_v52  ;;  %v1335_v63 = vadd.f32 %v2995_v31, %v1334_v45 }
 0x1e3   : > { %v1889_v61 = vpop.f32.mrf.mxu1 }
 0x1e4   : > { %1577 = vst [vmem:[%s3002_s6 + $0x20] sm:$0xff] %v1335_v63  ;;  %v1346_v60 = vadd.f32 %v1889_v61, %v2995_v31 }
 0x1e5   : > { %v1337_v26 = vpop.f32.mrf.mxu1 }
 0x1e6   : > { %1580 = vst [vmem:[%s3002_s6 + $0x38] sm:$0xff] %v1346_v60  ;;  %v1338_v41 = vadd.f32 %v2995_v31, %v1337_v26 }
 0x1e7   : > { %v1892_v24 = vpop.f32.mrf.mxu1 }
 0x1e8   : > { %1578 = vst [vmem:[%s3002_s6 + $0x28] sm:$0xff] %v1338_v41  ;;  %v1359_v33 = vadd.f32 %v1892_v24, %v2995_v31 }
 0x1e9   : > { %v1350_v19 = vpop.f32.mrf.mxu1 }
 0x1ea   : > { %1583 = vst [vmem:[%s3002_s6 + $0x50] sm:$0xff] %v1359_v33  ;;  %v1351_v44 = vadd.f32 %v2995_v31, %v1350_v19 }
 0x1eb   : > { %v1893_v49 = vpop.f32.mrf.mxu1 }
 0x1ec   : > { %1581 = vst [vmem:[%s3002_s6 + $0x40] sm:$0xff] %v1351_v44  ;;  %v1362_v10 = vadd.f32 %v1893_v49, %v2995_v31 }
 0x1ed   : > { %v1353_v50 = vpop.f32.mrf.mxu1 }
 0x1ee   : > { %1584 = vst [vmem:[%s3002_s6 + $0x58] sm:$0xff] %v1362_v10  ;;  %v1354_v25 = vadd.f32 %v2995_v31, %v1353_v50 }
 0x1f0   : > { %1582 = vst [vmem:[%s3002_s6 + $0x48] sm:$0xff] %v1354_v25 }
 0x1f8   : > { %v1896_v9 = vpop.f32.mrf.mxu1 }
 0x1f9   : > { %v1375_v43 = vadd.f32 %v1896_v9, %v2995_v31 }
 0x1fa   : > { %v1366_v39 = vpop.f32.mrf.mxu1 }
 0x1fb   : > { %1587 = vst [vmem:[%s3002_s6 + $0x70] sm:$0xff] %v1375_v43  ;;  %v1367_v20 = vadd.f32 %v2995_v31, %v1366_v39 }
 0x1fc   : > { %v1897_v13 = vpop.f32.mrf.mxu1 }
 0x1fd   : > { %1585 = vst [vmem:[%s3002_s6 + $0x60] sm:$0xff] %v1367_v20  ;;  %v1378_v38 = vadd.f32 %v1897_v13, %v2995_v31 }
 0x1fe   : > { %v1369_v4 = vpop.f32.mrf.mxu1 }
 0x1ff   : > { %1588 = vst [vmem:[%s3002_s6 + $0x78] sm:$0xff] %v1378_v38  ;;  %v1370_v51 = vadd.f32 %v2995_v31, %v1369_v4 }
 0x201   : > { %1586 = vst [vmem:[%s3002_s6 + $0x68] sm:$0xff] %v1370_v51 }
 0x203   : > { %v1900_v5 = vpop.f32.mrf.mxu1 }
 0x204   : > { %v1391_v47 = vadd.f32 %v1900_v5, %v2995_v31 }
 0x205   : > { %v1382_v62 = vpop.f32.mrf.mxu1 }
 0x206   : > { %1591 = vst [vmem:[%s3002_s6 + $0x90] sm:$0xff] %v1391_v47  ;;  %v1383_v14 = vadd.f32 %v2995_v31, %v1382_v62 }
 0x207   : > { %v1901_v6 = vpop.f32.mrf.mxu1 }
 0x208   : > { %1589 = vst [vmem:[%s3002_s6 + $0x80] sm:$0xff] %v1383_v14  ;;  %v1394_v1 = vadd.f32 %v1901_v6, %v2995_v31 }
 0x209   : > { %v1385_v48 = vpop.f32.mrf.mxu1 }
 0x20a   : > { %1592 = vst [vmem:[%s3002_s6 + $0x98] sm:$0xff] %v1394_v1  ;;  %v1386_v46 = vadd.f32 %v2995_v31, %v1385_v48 }
 0x20c   : > { %1590 = vst [vmem:[%s3002_s6 + $0x88] sm:$0xff] %v1386_v46 }
 0x20f   : > { %v1904_v56 = vpop.f32.mrf.mxu1 }
 0x210   : > { %v1407_v32 = vadd.f32 %v1904_v56, %v2995_v31 }
 0x211   : > { %v1398_v27 = vpop.f32.mrf.mxu1 }
 0x212   : > { %1595 = vst [vmem:[%s3002_s6 + $0xb0] sm:$0xff] %v1407_v32  ;;  %v1399_v7 = vadd.f32 %v2995_v31, %v1398_v27 }
 0x213   : > { %v1905_v54 = vpop.f32.mrf.mxu1 }
 0x214   : > { %1593 = vst [vmem:[%s3002_s6 + $0xa0] sm:$0xff] %v1399_v7  ;;  %v1410_v2 = vadd.f32 %v1905_v54, %v2995_v31 }
 0x215   : > { %v1401_v11 = vpop.f32.mrf.mxu1 }
 0x216   : > { %1596 = vst [vmem:[%s3002_s6 + $0xb8] sm:$0xff] %v1410_v2  ;;  %v1402_v21 = vadd.f32 %v2995_v31, %v1401_v11 }
 0x218   : > { %1594 = vst [vmem:[%s3002_s6 + $0xa8] sm:$0xff] %v1402_v21 }
 0x21e   : > { %v1908_v16 = vpop.f32.mrf.mxu1 }
 0x21f   : > { %v1423_v18 = vadd.f32 %v1908_v16, %v2995_v31 }
 0x220   : > { %v1414_v42 = vpop.f32.mrf.mxu1 }
 0x221   : > { %1599 = vst [vmem:[%s3002_s6 + $0xd0] sm:$0xff] %v1423_v18  ;;  %v1415_v57 = vadd.f32 %v2995_v31, %v1414_v42 }
 0x222   : > { %v1909_v37 = vpop.f32.mrf.mxu1 }
 0x223   : > { %1597 = vst [vmem:[%s3002_s6 + $0xc0] sm:$0xff] %v1415_v57  ;;  %v1426_v22 = vadd.f32 %v1909_v37, %v2995_v31 }
 0x224   : > { %v1417_v0 = vpop.f32.mrf.mxu1 }
 0x225   : > { %1600 = vst [vmem:[%s3002_s6 + $0xd8] sm:$0xff] %v1426_v22  ;;  %v1418_v58 = vadd.f32 %v2995_v31, %v1417_v0 }
 0x227   : > { %1598 = vst [vmem:[%s3002_s6 + $0xc8] sm:$0xff] %v1418_v58 }
 0x228   : > { %v1912_v23 = vpop.f32.mrf.mxu1 }
 0x229   : > { %v1439_v55 = vadd.f32 %v1912_v23, %v2995_v31 }
 0x22a   : > { %v1430_v17 = vpop.f32.mrf.mxu1 }
 0x22b   : > { %1603 = vst [vmem:[%s3002_s6 + $0xf0] sm:$0xff] %v1439_v55  ;;  %v1431_v30 = vadd.f32 %v2995_v31, %v1430_v17 }
 0x22c   : > { %v1913_v34 = vpop.f32.mrf.mxu1 }
 0x22d   : > { %1601 = vst [vmem:[%s3002_s6 + $0xe0] sm:$0xff] %v1431_v30  ;;  %v1442_v15 = vadd.f32 %v1913_v34, %v2995_v31 }
 0x22e   : > { %v1433_v3 = vpop.f32.mrf.mxu1 }
 0x22f   : > { %1604 = vst [vmem:[%s3002_s6 + $0xf8] sm:$0xff] %v1442_v15  ;;  %v1434_v12 = vadd.f32 %v2995_v31, %v1433_v3 }
 0x231   : > { %1602 = vst [vmem:[%s3002_s6 + $0xe8] sm:$0xff] %v1434_v12 }
 0x233   : > { %v1916_v53 = vpop.f32.mrf.mxu1 }
 0x234   : > { %v1455_v40 = vadd.f32 %v1916_v53, %v2995_v31 }
 0x235   : > { %v1446_v36 = vpop.f32.mrf.mxu1 }
 0x236   : > { %1607 = vst [vmem:[%s3002_s6 + $0x110] sm:$0xff] %v1455_v40  ;;  %v1447_v59 = vadd.f32 %v2995_v31, %v1446_v36 }
 0x237   : > { %v1917_v8 = vpop.f32.mrf.mxu1 }
 0x238   : > { %1605 = vst [vmem:[%s3002_s6 + $0x100] sm:$0xff] %v1447_v59  ;;  %v1458_v29 = vadd.f32 %v1917_v8, %v2995_v31 }
 0x239   : > { %v1449_v35 = vpop.f32.mrf.mxu1 }
 0x23a   : > { %1608 = vst [vmem:[%s3002_s6 + $0x118] sm:$0xff] %v1458_v29  ;;  %v1450_v28 = vadd.f32 %v2995_v31, %v1449_v35 }
 0x23c   : > { %1606 = vst [vmem:[%s3002_s6 + $0x108] sm:$0xff] %v1450_v28 }
 0x23d   : > { %v1920_v52 = vpop.f32.mrf.mxu1 }
 0x23e   : > { %v1471_v45 = vadd.f32 %v1920_v52, %v2995_v31 }
 0x23f   : > { %v1462_v63 = vpop.f32.mrf.mxu1 }
 0x240   : > { %1611 = vst [vmem:[%s3002_s6 + $0x130] sm:$0xff] %v1471_v45  ;;  %v1463_v61 = vadd.f32 %v2995_v31, %v1462_v63 }
 0x241   : > { %v1921_v60 = vpop.f32.mrf.mxu1 }
 0x242   : > { %1609 = vst [vmem:[%s3002_s6 + $0x120] sm:$0xff] %v1463_v61  ;;  %v1474_v26 = vadd.f32 %v1921_v60, %v2995_v31 }
 0x243   : > { %v1465_v41 = vpop.f32.mrf.mxu1 }
 0x244   : > { %1612 = vst [vmem:[%s3002_s6 + $0x138] sm:$0xff] %v1474_v26  ;;  %v1466_v24 = vadd.f32 %v2995_v31, %v1465_v41 }
 0x246   : > { %1610 = vst [vmem:[%s3002_s6 + $0x128] sm:$0xff] %v1466_v24 }
 0x247   : > { %v1924_v33 = vpop.f32.mrf.mxu1 }
 0x248   : > { %v1487_v19 = vadd.f32 %v1924_v33, %v2995_v31 }
 0x249   : > { %v1478_v44 = vpop.f32.mrf.mxu1 }
 0x24a   : > { %1615 = vst [vmem:[%s3002_s6 + $0x150] sm:$0xff] %v1487_v19  ;;  %v1479_v49 = vadd.f32 %v2995_v31, %v1478_v44 }
 0x24b   : > { %v1925_v10 = vpop.f32.mrf.mxu1 }
 0x24c   : > { %1613 = vst [vmem:[%s3002_s6 + $0x140] sm:$0xff] %v1479_v49  ;;  %v1490_v50 = vadd.f32 %v1925_v10, %v2995_v31 }
 0x24d   : > { %v1481_v25 = vpop.f32.mrf.mxu1 }
 0x24e   : > { %1616 = vst [vmem:[%s3002_s6 + $0x158] sm:$0xff] %v1490_v50  ;;  %v1482_v9 = vadd.f32 %v2995_v31, %v1481_v25 }
 0x250   : > { %1614 = vst [vmem:[%s3002_s6 + $0x148] sm:$0xff] %v1482_v9 }
 0x251   : > { %v1928_v43 = vpop.f32.mrf.mxu1 }
 0x252   : > { %v1503_v39 = vadd.f32 %v1928_v43, %v2995_v31 }
 0x253   : > { %v1494_v20 = vpop.f32.mrf.mxu1 }
 0x254   : > { %1619 = vst [vmem:[%s3002_s6 + $0x170] sm:$0xff] %v1503_v39  ;;  %v1495_v13 = vadd.f32 %v2995_v31, %v1494_v20 }
 0x255   : > { %v1929_v38 = vpop.f32.mrf.mxu1 }
 0x256   : > { %1617 = vst [vmem:[%s3002_s6 + $0x160] sm:$0xff] %v1495_v13  ;;  %v1506_v4 = vadd.f32 %v1929_v38, %v2995_v31 }
 0x257   : > { %v1497_v51 = vpop.f32.mrf.mxu1 }
 0x258   : > { %1620 = vst [vmem:[%s3002_s6 + $0x178] sm:$0xff] %v1506_v4  ;;  %v1498_v5 = vadd.f32 %v2995_v31, %v1497_v51 }
 0x259   : > { %v1932_v47 = vpop.f32.mrf.mxu1 }
 0x25a   : > { %1618 = vst [vmem:[%s3002_s6 + $0x168] sm:$0xff] %v1498_v5  ;;  %v1519_v62 = vadd.f32 %v1932_v47, %v2995_v31 }
 0x25b   : > { %v1510_v14 = vpop.f32.mrf.mxu1 }
 0x25c   : > { %1623 = vst [vmem:[%s3002_s6 + $0x190] sm:$0xff] %v1519_v62  ;;  %v1511_v6 = vadd.f32 %v2995_v31, %v1510_v14 }
 0x25d   : > { %v1933_v1 = vpop.f32.mrf.mxu1 }
 0x25e   : > { %1621 = vst [vmem:[%s3002_s6 + $0x180] sm:$0xff] %v1511_v6  ;;  %v1522_v48 = vadd.f32 %v1933_v1, %v2995_v31 }
 0x25f   : > { %v1513_v46 = vpop.f32.mrf.mxu1 }
 0x260   : > { %1624 = vst [vmem:[%s3002_s6 + $0x198] sm:$0xff] %v1522_v48  ;;  %v1514_v56 = vadd.f32 %v2995_v31, %v1513_v46 }
 0x261   : > { %v1936_v32 = vpop.f32.mrf.mxu1 }
 0x262   : > { %1622 = vst [vmem:[%s3002_s6 + $0x188] sm:$0xff] %v1514_v56  ;;  %v1535_v27 = vadd.f32 %v1936_v32, %v2995_v31 }
 0x263   : > { %v1526_v7 = vpop.f32.mrf.mxu1 }
 0x264   : > { %1627 = vst [vmem:[%s3002_s6 + $0x1b0] sm:$0xff] %v1535_v27  ;;  %v1527_v54 = vadd.f32 %v2995_v31, %v1526_v7 }
 0x265   : > { %v1937_v2 = vpop.f32.mrf.mxu1 }
 0x266   : > { %1625 = vst [vmem:[%s3002_s6 + $0x1a0] sm:$0xff] %v1527_v54  ;;  %v1538_v11 = vadd.f32 %v1937_v2, %v2995_v31 }
 0x267   : > { %v1529_v21 = vpop.f32.mrf.mxu1 }
 0x268   : > { %1628 = vst [vmem:[%s3002_s6 + $0x1b8] sm:$0xff] %v1538_v11  ;;  %v1530_v16 = vadd.f32 %v2995_v31, %v1529_v21 }
 0x269   : > { %v1940_v18 = vpop.f32.mrf.mxu1 }
 0x26a   : > { %1626 = vst [vmem:[%s3002_s6 + $0x1a8] sm:$0xff] %v1530_v16  ;;  %v1551_v42 = vadd.f32 %v1940_v18, %v2995_v31 }
 0x26b   : > { %v1542_v57 = vpop.f32.mrf.mxu1 }
 0x26c   : > { %1631 = vst [vmem:[%s3002_s6 + $0x1d0] sm:$0xff] %v1551_v42  ;;  %v1543_v37 = vadd.f32 %v2995_v31, %v1542_v57 }
 0x26d   : > { %v1941_v22 = vpop.f32.mrf.mxu1 }
 0x26e   : > { %1629 = vst [vmem:[%s3002_s6 + $0x1c0] sm:$0xff] %v1543_v37  ;;  %v1554_v0 = vadd.f32 %v1941_v22, %v2995_v31 }
 0x26f   : > { %v1545_v58 = vpop.f32.mrf.mxu1 }
 0x270   : > { %1632 = vst [vmem:[%s3002_s6 + $0x1d8] sm:$0xff] %v1554_v0  ;;  %v1546_v23 = vadd.f32 %v2995_v31, %v1545_v58 }
 0x271   : > { %v1944_v55 = vpop.f32.mrf.mxu1 }
 0x272   : > { %1630 = vst [vmem:[%s3002_s6 + $0x1c8] sm:$0xff] %v1546_v23  ;;  %v1567_v17 = vadd.f32 %v1944_v55, %v2995_v31 }
 0x273   : > { %v1558_v30 = vpop.f32.mrf.mxu1 }
 0x274   : > { %1635 = vst [vmem:[%s3002_s6 + $0x1f0] sm:$0xff] %v1567_v17  ;;  %v1559_v34 = vadd.f32 %v2995_v31, %v1558_v30 }
 0x275   : > { %v1945_v15 = vpop.f32.mrf.mxu1 }
 0x276   : > { %1633 = vst [vmem:[%s3002_s6 + $0x1e0] sm:$0xff] %v1559_v34  ;;  %v1570_v3 = vadd.f32 %v1945_v15, %v2995_v31 }
 0x277   : > { %v1561_v12 = vpop.f32.mrf.mxu1 }
 0x278   : > { %1636 = vst [vmem:[%s3002_s6 + $0x1f8] sm:$0xff] %v1570_v3  ;;  %v1562_v53 = vadd.f32 %v2995_v31, %v1561_v12 }
 0x27a   : > { %1634 = vst [vmem:[%s3002_s6 + $0x1e8] sm:$0xff] %v1562_v53 }
 0x27b PF: > { %s15_s18 = sadd.s32 1, %s2089_s18  }
 0x27c   : > { %p12_p4 = scmp.ge.s32.totalorder %s15_s18, 4  }
 0x27e   :  { %14 = sbr.rel (!%p12_p4) target bundleno = 1 (0x1), region = 70 }

</bundles_post_ra>
